<compile_context>
chip_gen: v5e
topology: v5e:2x2
jax: 0.10.0
libtpu: 0.0.40
codegen_flags: <defaults>
</compile_context>

<pallas_src>
import jax
import jax.numpy as jnp
from jax.experimental import pallas as pl
from jax.experimental.pallas import tpu as pltpu


def _round_up(x, m):
    return (x + m - 1) // m * m


# ------------------------------- kernel ------------------------------------


def gru_kernel(x_ref, wx_ref, wzrh_ref, whh_ref, b_ref, h_out_ref, xp_ref):
    TB, T, F = x_ref.shape
    Hp = h_out_ref.shape[1]

    wx = wx_ref[...]          # (F, 3Hp)  bf16, fused [zx | rx | hx] input weights
    wzrh = wzrh_ref[...]      # (Hp, 2Hp) bf16, fused [zh | rh] hidden weights
    whh = whh_ref[...]        # (Hp, Hp)  bf16
    b = b_ref[...]            # (1, 3Hp)  f32, pre-summed bias pairs

    # ---- Hoisted input projection into explicit VMEM scratch (time-major). ----
    # T independent (TB, F) @ (F, 3Hp) dots (M = TB is large), all outside the
    # serial recurrence chain; results are stored time-major so each recurrence
    # step reads a contiguous (TB, Hp) slab per gate.  T (= n_jets_per_event)
    # is small and static, so a static Python loop is fine here.
    for tt in range(T):
        xt = x_ref[:, tt, :].astype(jnp.bfloat16)                  # (TB, F)
        xp_ref[tt] = jnp.dot(xt, wx, preferred_element_type=jnp.float32) + b

    def step(t, h):
        tr = T - 1 - t                                             # reverse time
        zr = jnp.dot(h.astype(jnp.bfloat16), wzrh,
                     preferred_element_type=jnp.float32)           # (TB, 2Hp)
        zt = jax.nn.sigmoid(zr[:, :Hp] + xp_ref[tr, :, 0:Hp])
        rt = jax.nn.sigmoid(zr[:, Hp:] + xp_ref[tr, :, Hp:2 * Hp])
        hc = jnp.dot((rt * h).astype(jnp.bfloat16), whh,
                     preferred_element_type=jnp.float32)
        ht = jnp.maximum(hc + xp_ref[tr, :, 2 * Hp:3 * Hp], 0.0)   # relu candidate
        return h + zt * (ht - h)                                   # (1-z)*h + z*ht

    h = jnp.zeros((TB, Hp), dtype=jnp.float32)
    if T <= 16:
        # Small static T: fully unrolled serial recurrence.
        for t in range(T):
            h = step(t, h)
    else:
        # Larger T: bound live ranges / code size with a loop over the scratch.
        h = jax.lax.fori_loop(0, T, step, h, unroll=T <= 64)

    h_out_ref[...] = h


# ------------------------------ wrapper -------------------------------------


def _vmem_estimate(block_b, T, F, Hp, x_itemsize):
    """Rough per-block VMEM footprint (padded tiles, double-buffered pipelining)."""
    sub = max(8, 32 // x_itemsize)                               # sublane packing
    x_tile = 2 * block_b * _round_up(T, sub) * _round_up(F, 128) * x_itemsize
    xp = T * block_b * 3 * Hp * 4                                # scratch (single)
    w = 2 * (_round_up(F, 16) * 3 * Hp + Hp * 2 * Hp + Hp * Hp) * 2   # bf16 slabs
    bias = 2 * 8 * 3 * Hp * 4
    out = 2 * block_b * Hp * 4
    return x_tile + xp + w + bias + out


def _pick_block_b(B, T, F, Hp, x_itemsize, budget):
    """Largest MXU M (block_b) that fits the VMEM budget while keeping >=2 grid
    steps (x-tile DMA/compute overlap; both TensorCores on v7x)."""
    best_single = None
    for cand in (512, 256, 128, 64, 32, 16, 8):
        if cand > B or B % cand != 0:
            continue
        if _vmem_estimate(cand, T, F, Hp, x_itemsize) > budget:
            continue
        if B // cand >= 2:
            return cand
        if best_single is None:
            best_single = cand
    return best_single if best_single is not None else B


def gru_forward(x, params, *, block_b=None, vmem_budget_bytes=40 << 20):
    """x: (B, T, F) float32 or bfloat16 (the pre-built h_jets sequence).
    params hold transposed weights (in, out) and (1, H) biases."""
    B, T, F = x.shape
    H = params["wzh"].shape[1]
    Hp = _round_up(H, 128)           # lane-dense hidden dim

    def pad_to(a, rows, cols):
        return jnp.pad(a, ((0, rows - a.shape[0]), (0, cols - a.shape[1])))

    # Fused + zero-padded weight slabs, cast once to bf16 (native MXU dtype).
    wx = jnp.concatenate([pad_to(params["wzx"], F, Hp),
                          pad_to(params["wrx"], F, Hp),
                          pad_to(params["whx"], F, Hp)], axis=1).astype(jnp.bfloat16)
    wzrh = jnp.concatenate([pad_to(params["wzh"], Hp, Hp),
                            pad_to(params["wrh"], Hp, Hp)], axis=1).astype(jnp.bfloat16)
    whh = pad_to(params["whh"], Hp, Hp).astype(jnp.bfloat16)
    # Pre-summed bias pairs, folded once into the hoisted input projection.
    b = jnp.concatenate([pad_to(params["bzh"] + params["bzx"], 1, Hp),
                         pad_to(params["brh"] + params["brx"], 1, Hp),
                         pad_to(params["bhh"] + params["bhx"], 1, Hp)],
                        axis=1).astype(jnp.float32)

    itemsize = jnp.dtype(x.dtype).itemsize
    if block_b is None:
        block_b = _pick_block_b(B, T, F, Hp, itemsize, vmem_budget_bytes)
    assert B % block_b == 0, "B must be divisible by block_b"
    assert block_b == B or block_b % 8 == 0, "block_b must be a multiple of 8 (or == B)"

    # Explicit VMEM limit derived from the footprint (v7x-safe: <= 56 MiB).
    vmem_limit = int(min(max(2 * _vmem_estimate(block_b, T, F, Hp, itemsize),
                             32 << 20), 56 << 20))

    out = pl.pallas_call(
        gru_kernel,
        out_shape=jax.ShapeDtypeStruct((B, Hp), jnp.float32),
        grid=(B // block_b,),
        in_specs=[
            # x streamed straight from its (B, T, F) layout: no wrapper-side
            # transpose pass over HBM; tiles auto-pipeline across the grid.
            pl.BlockSpec((block_b, T, F), lambda i: (i, 0, 0)),
            pl.BlockSpec((F, 3 * Hp), lambda i: (0, 0)),      # replicated weights
            pl.BlockSpec((Hp, 2 * Hp), lambda i: (0, 0)),
            pl.BlockSpec((Hp, Hp), lambda i: (0, 0)),
            pl.BlockSpec((1, 3 * Hp), lambda i: (0, 0)),
        ],
        out_specs=pl.BlockSpec((block_b, Hp), lambda i: (i, 0)),
        scratch_shapes=[pltpu.VMEM((T, block_b, 3 * Hp), jnp.float32)],
        compiler_params=pltpu.CompilerParams(
            dimension_semantics=("parallel",),
            vmem_limit_bytes=vmem_limit),
    )(x, wx, wzrh, whh, b)

    return out[:, :H]


# ----------------------- deterministic parameter init -----------------------


def xavier_uniform(key, out_dim, in_dim, gain):
    a = gain * jnp.sqrt(6.0 / (in_dim + out_dim))
    return jax.random.uniform(key, (out_dim, in_dim), jnp.float32, -a, a)


def orthogonal(key, out_dim, in_dim, gain):
    w = jax.random.normal(key, (out_dim, in_dim), jnp.float32)
    q, r = jnp.linalg.qr(w)
    s = jnp.sign(jnp.diag(r))
    s = jnp.where(s == 0, 1.0, s)      # avoid zeroing a column on exact-zero diag
    q = q * s[None, :]
    return gain * q


def linear_bias(key, out_dim, in_dim):
    bound = 1.0 / jnp.sqrt(in_dim)
    return jax.random.uniform(key, (out_dim,), jnp.float32, -bound, bound)


def make_params(key, n_features_rnn, n_hidden_rnn):
    gain = jnp.sqrt(2.0)  # calculate_gain('relu')
    ks = jax.random.split(key, 12)
    F, H = n_features_rnn, n_hidden_rnn

    def pack(w, b):  # transpose to (in, out), bias to (1, out)
        return w.T, b.reshape(1, -1)

    wzh, bzh = pack(orthogonal(ks[0], H, H, gain), linear_bias(ks[1], H, H))
    wzx, bzx = pack(xavier_uniform(ks[2], H, F, gain), linear_bias(ks[3], H, F))
    wrh, brh = pack(orthogonal(ks[4], H, H, gain), linear_bias(ks[5], H, H))
    wrx, brx = pack(xavier_uniform(ks[6], H, F, gain), linear_bias(ks[7], H, F))
    whh, bhh = pack(orthogonal(ks[8], H, H, gain), linear_bias(ks[9], H, H))
    whx, bhx = pack(xavier_uniform(ks[10], H, F, gain), linear_bias(ks[11], H, F))

    return dict(wzh=wzh, bzh=bzh, wzx=wzx, bzx=bzx,
                wrh=wrh, brh=brh, wrx=wrx, brx=brx,
                whh=whh, bhh=bhh, whx=whx, bhx=bhx)


def gru_reference(x, p, matmul_dtype=jnp.float32):
    """Plain-JAX reference mirroring the PyTorch forward loop."""
    B, T, F = x.shape
    H = p["wzh"].shape[1]

    def mm(a, w):
        return jnp.dot(a.astype(matmul_dtype), w.astype(matmul_dtype),
                       preferred_element_type=jnp.float32)

    h = jnp.zeros((B, H), jnp.float32)
    for t in range(T):
        xt = x[:, T - 1 - t, :]
        zt = jax.nn.sigmoid(mm(h, p["wzh"]) + p["bzh"] + mm(xt, p["wzx"]) + p["bzx"])
        rt = jax.nn.sigmoid(mm(h, p["wrh"]) + p["brh"] + mm(xt, p["wrx"]) + p["brx"])
        ht = jnp.maximum(mm(rt * h, p["whh"]) + p["bhh"] + mm(xt, p["whx"]) + p["bhx"],
                         0.0)
        h = (1.0 - zt) * h + zt * ht
    return h


if __name__ == "__main__":
    # Shapes consistent with the module:
    #   len(X) = batch of events B, n_jets_per_event = T,
    #   n_features_rnn = F (per-jet feature dim fed to the GRU), n_hidden_rnn = H.
    B, T, F, H = 256, 4, 32, 32

    key = jax.random.PRNGKey(0)
    k_x, k_p = jax.random.split(key)
    x = jax.random.normal(k_x, (B, T, F), jnp.float32)   # stands in for h_jets
    params = make_params(k_p, F, H)

    out = gru_forward(x, params)          # auto block_b=128 -> grid of 2 batch tiles
    out = jax.block_until_ready(out)

    ref_bf16 = gru_reference(x, params, matmul_dtype=jnp.bfloat16)
    ref_f32 = gru_reference(x, params, matmul_dtype=jnp.float32)

    assert out.shape == (B, H)
    # Tight check against a reference using the same bf16 matmul path.
    assert jnp.allclose(out, ref_bf16, atol=1e-2, rtol=1e-2), "mismatch vs bf16 reference"
    # Loose sanity check against the pure-f32 original semantics.
    assert jnp.allclose(out, ref_f32, atol=1e-1, rtol=1e-1), "mismatch vs f32 reference"

    print("KERNEL_OK")
</pallas_src>

<mosaic_0001>
module attributes {stable_mosaic.version = 11 : i64} {
  func.func @gru_kernel(%arg0: i32, %arg1: memref<128x4x32xf32, #tpu.memory_space<vmem>>, %arg2: memref<32x384xbf16, #tpu.memory_space<vmem>>, %arg3: memref<128x256xbf16, #tpu.memory_space<vmem>>, %arg4: memref<128x128xbf16, #tpu.memory_space<vmem>>, %arg5: memref<1x384xf32, #tpu.memory_space<vmem>>, %arg6: memref<128x128xf32, #tpu.memory_space<vmem>>, %arg7: memref<4x128x384xf32, #tpu.memory_space<vmem>>) attributes {dimension_semantics = [#tpu.dimension_semantics<parallel>], iteration_bounds = array<i64: 2>, scalar_prefetch = 0 : i64, scratch_operands = 1 : i64, tpu.core_type = #tpu.core_type<tc>, window_params = [{transform_indices = @transform_0, window_bounds = array<i64: 128, 4, 32>}, {pipeline_mode = #tpu.pipeline_mode<synchronous>, transform_indices = @transform_1, window_bounds = array<i64: 32, 384>}, {pipeline_mode = #tpu.pipeline_mode<synchronous>, transform_indices = @transform_2, window_bounds = array<i64: 128, 256>}, {pipeline_mode = #tpu.pipeline_mode<synchronous>, transform_indices = @transform_3, window_bounds = array<i64: 128, 128>}, {pipeline_mode = #tpu.pipeline_mode<synchronous>, transform_indices = @transform_4, window_bounds = array<i64: 1, 384>}, {transform_indices = @transform_5, window_bounds = array<i64: 128, 128>}]} {
    %c0 = arith.constant 0 : index
    %c0_0 = arith.constant 0 : index
    %0 = vector.load %arg2[%c0, %c0_0] : memref<32x384xbf16, #tpu.memory_space<vmem>>, vector<32x384xbf16>
    %c0_1 = arith.constant 0 : index
    %c0_2 = arith.constant 0 : index
    %1 = vector.load %arg3[%c0_1, %c0_2] : memref<128x256xbf16, #tpu.memory_space<vmem>>, vector<128x256xbf16>
    %c0_3 = arith.constant 0 : index
    %c0_4 = arith.constant 0 : index
    %2 = vector.load %arg4[%c0_3, %c0_4] : memref<128x128xbf16, #tpu.memory_space<vmem>>, vector<128x128xbf16>
    %c0_5 = arith.constant 0 : index
    %c0_6 = arith.constant 0 : index
    %3 = vector.load %arg5[%c0_5, %c0_6] : memref<1x384xf32, #tpu.memory_space<vmem>>, vector<1x384xf32>
    %c0_7 = arith.constant 0 : index
    %c0_8 = arith.constant 0 : index
    %c0_9 = arith.constant 0 : index
    %4 = vector.load %arg1[%c0_7, %c0_8, %c0_9] : memref<128x4x32xf32, #tpu.memory_space<vmem>>, vector<128x1x32xf32>
    %5 = vector.shape_cast %4 : vector<128x1x32xf32> to vector<128x32xf32>
    %6 = arith.truncf %5 : vector<128x32xf32> to vector<128x32xbf16>
    %cst = arith.constant dense<0.000000e+00> : vector<128x384xf32>
    %7 = tpu.matmul %6, %0, %cst {dimension_numbers = #tpu.dot_dimension_numbers<[1], [0], [0], [1], [0, 0, 1, 1], [], []>} : vector<128x32xbf16>, vector<32x384xbf16>, vector<128x384xf32> -> vector<128x384xf32>
    %8 = vector.broadcast %3 : vector<1x384xf32> to vector<128x384xf32>
    %9 = arith.addf %7, %8 : vector<128x384xf32>
    %c0_10 = arith.constant 0 : index
    %c0_11 = arith.constant 0 : index
    %c0_12 = arith.constant 0 : index
    %10 = vector.load %arg7[%c0_10, %c0_11, %c0_12] : memref<4x128x384xf32, #tpu.memory_space<vmem>>, vector<1x128x384xf32>
    %11 = vector.shape_cast %10 : vector<1x128x384xf32> to vector<128x384xf32>
    %12 = vector.shape_cast %9 : vector<128x384xf32> to vector<1x128x384xf32>
    tpu.vector_store %arg7[%c0_10, %c0_11, %c0_12], %12 {strides = array<i32>} : memref<4x128x384xf32, #tpu.memory_space<vmem>>, vector<1x128x384xf32>,
    %c0_13 = arith.constant 0 : index
    %c1 = arith.constant 1 : index
    %c0_14 = arith.constant 0 : index
    %13 = vector.load %arg1[%c0_13, %c1, %c0_14] : memref<128x4x32xf32, #tpu.memory_space<vmem>>, vector<128x1x32xf32>
    %14 = vector.shape_cast %13 : vector<128x1x32xf32> to vector<128x32xf32>
    %15 = arith.truncf %14 : vector<128x32xf32> to vector<128x32xbf16>
    %cst_15 = arith.constant dense<0.000000e+00> : vector<128x384xf32>
    %16 = tpu.matmul %15, %0, %cst_15 {dimension_numbers = #tpu.dot_dimension_numbers<[1], [0], [0], [1], [0, 0, 1, 1], [], []>} : vector<128x32xbf16>, vector<32x384xbf16>, vector<128x384xf32> -> vector<128x384xf32>
    %17 = vector.broadcast %3 : vector<1x384xf32> to vector<128x384xf32>
    %18 = arith.addf %16, %17 : vector<128x384xf32>
    %c1_16 = arith.constant 1 : index
    %c0_17 = arith.constant 0 : index
    %c0_18 = arith.constant 0 : index
    %19 = vector.load %arg7[%c1_16, %c0_17, %c0_18] : memref<4x128x384xf32, #tpu.memory_space<vmem>>, vector<1x128x384xf32>
    %20 = vector.shape_cast %19 : vector<1x128x384xf32> to vector<128x384xf32>
    %21 = vector.shape_cast %18 : vector<128x384xf32> to vector<1x128x384xf32>
    tpu.vector_store %arg7[%c1_16, %c0_17, %c0_18], %21 {strides = array<i32>} : memref<4x128x384xf32, #tpu.memory_space<vmem>>, vector<1x128x384xf32>,
    %c0_19 = arith.constant 0 : index
    %c2 = arith.constant 2 : index
    %c0_20 = arith.constant 0 : index
    %22 = vector.load %arg1[%c0_19, %c2, %c0_20] : memref<128x4x32xf32, #tpu.memory_space<vmem>>, vector<128x1x32xf32>
    %23 = vector.shape_cast %22 : vector<128x1x32xf32> to vector<128x32xf32>
    %24 = arith.truncf %23 : vector<128x32xf32> to vector<128x32xbf16>
    %cst_21 = arith.constant dense<0.000000e+00> : vector<128x384xf32>
    %25 = tpu.matmul %24, %0, %cst_21 {dimension_numbers = #tpu.dot_dimension_numbers<[1], [0], [0], [1], [0, 0, 1, 1], [], []>} : vector<128x32xbf16>, vector<32x384xbf16>, vector<128x384xf32> -> vector<128x384xf32>
    %26 = vector.broadcast %3 : vector<1x384xf32> to vector<128x384xf32>
    %27 = arith.addf %25, %26 : vector<128x384xf32>
    %c2_22 = arith.constant 2 : index
    %c0_23 = arith.constant 0 : index
    %c0_24 = arith.constant 0 : index
    %28 = vector.load %arg7[%c2_22, %c0_23, %c0_24] : memref<4x128x384xf32, #tpu.memory_space<vmem>>, vector<1x128x384xf32>
    %29 = vector.shape_cast %28 : vector<1x128x384xf32> to vector<128x384xf32>
    %30 = vector.shape_cast %27 : vector<128x384xf32> to vector<1x128x384xf32>
    tpu.vector_store %arg7[%c2_22, %c0_23, %c0_24], %30 {strides = array<i32>} : memref<4x128x384xf32, #tpu.memory_space<vmem>>, vector<1x128x384xf32>,
    %c0_25 = arith.constant 0 : index
    %c3 = arith.constant 3 : index
    %c0_26 = arith.constant 0 : index
    %31 = vector.load %arg1[%c0_25, %c3, %c0_26] : memref<128x4x32xf32, #tpu.memory_space<vmem>>, vector<128x1x32xf32>
    %32 = vector.shape_cast %31 : vector<128x1x32xf32> to vector<128x32xf32>
    %33 = arith.truncf %32 : vector<128x32xf32> to vector<128x32xbf16>
    %cst_27 = arith.constant dense<0.000000e+00> : vector<128x384xf32>
    %34 = tpu.matmul %33, %0, %cst_27 {dimension_numbers = #tpu.dot_dimension_numbers<[1], [0], [0], [1], [0, 0, 1, 1], [], []>} : vector<128x32xbf16>, vector<32x384xbf16>, vector<128x384xf32> -> vector<128x384xf32>
    %35 = vector.broadcast %3 : vector<1x384xf32> to vector<128x384xf32>
    %36 = arith.addf %34, %35 : vector<128x384xf32>
    %c3_28 = arith.constant 3 : index
    %c0_29 = arith.constant 0 : index
    %c0_30 = arith.constant 0 : index
    %37 = vector.load %arg7[%c3_28, %c0_29, %c0_30] : memref<4x128x384xf32, #tpu.memory_space<vmem>>, vector<1x128x384xf32>
    %38 = vector.shape_cast %37 : vector<1x128x384xf32> to vector<128x384xf32>
    %39 = vector.shape_cast %36 : vector<128x384xf32> to vector<1x128x384xf32>
    tpu.vector_store %arg7[%c3_28, %c0_29, %c0_30], %39 {strides = array<i32>} : memref<4x128x384xf32, #tpu.memory_space<vmem>>, vector<1x128x384xf32>,
    %cst_31 = arith.constant 0.000000e+00 : f32
    %40 = vector.broadcast %cst_31 : f32 to vector<128x128xf32>
    %41 = arith.truncf %40 : vector<128x128xf32> to vector<128x128xbf16>
    %cst_32 = arith.constant dense<0.000000e+00> : vector<128x256xf32>
    %42 = tpu.matmul %41, %1, %cst_32 {dimension_numbers = #tpu.dot_dimension_numbers<[1], [0], [0], [1], [0, 0, 1, 1], [], []>} : vector<128x128xbf16>, vector<128x256xbf16>, vector<128x256xf32> -> vector<128x256xf32>
    %43 = vector.extract_strided_slice %42 {offsets = [0, 0], sizes = [128, 128], strides = [1, 1]} : vector<128x256xf32> to vector<128x128xf32>
    %c3_33 = arith.constant 3 : index
    %c0_34 = arith.constant 0 : index
    %c0_35 = arith.constant 0 : index
    %44 = vector.load %arg7[%c3_33, %c0_34, %c0_35] : memref<4x128x384xf32, #tpu.memory_space<vmem>>, vector<1x128x128xf32>
    %45 = vector.shape_cast %44 : vector<1x128x128xf32> to vector<128x128xf32>
    %46 = arith.addf %43, %45 : vector<128x128xf32>
    %47 = arith.negf %46 : vector<128x128xf32>
    %48 = math.exp %47 : vector<128x128xf32>
    %cst_36 = arith.constant 1.000000e+00 : f32
    %49 = vector.broadcast %cst_36 : f32 to vector<128x128xf32>
    %50 = arith.addf %49, %48 : vector<128x128xf32>
    %51 = arith.divf %49, %50 : vector<128x128xf32>
    %52 = vector.extract_strided_slice %42 {offsets = [0, 128], sizes = [128, 128], strides = [1, 1]} : vector<128x256xf32> to vector<128x128xf32>
    %c3_37 = arith.constant 3 : index
    %c0_38 = arith.constant 0 : index
    %c128 = arith.constant 128 : index
    %53 = vector.load %arg7[%c3_37, %c0_38, %c128] : memref<4x128x384xf32, #tpu.memory_space<vmem>>, vector<1x128x128xf32>
    %54 = vector.shape_cast %53 : vector<1x128x128xf32> to vector<128x128xf32>
    %55 = arith.addf %52, %54 : vector<128x128xf32>
    %56 = arith.negf %55 : vector<128x128xf32>
    %57 = math.exp %56 : vector<128x128xf32>
    %cst_39 = arith.constant 1.000000e+00 : f32
    %58 = vector.broadcast %cst_39 : f32 to vector<128x128xf32>
    %59 = arith.addf %58, %57 : vector<128x128xf32>
    %60 = arith.divf %58, %59 : vector<128x128xf32>
    %61 = arith.mulf %60, %40 : vector<128x128xf32>
    %62 = arith.truncf %61 : vector<128x128xf32> to vector<128x128xbf16>
    %cst_40 = arith.constant dense<0.000000e+00> : vector<128x128xf32>
    %63 = tpu.matmul %62, %2, %cst_40 {dimension_numbers = #tpu.dot_dimension_numbers<[1], [0], [0], [1], [0, 0, 1, 1], [], []>} : vector<128x128xbf16>, vector<128x128xbf16>, vector<128x128xf32> -> vector<128x128xf32>
    %c3_41 = arith.constant 3 : index
    %c0_42 = arith.constant 0 : index
    %c256 = arith.constant 256 : index
    %64 = vector.load %arg7[%c3_41, %c0_42, %c256] : memref<4x128x384xf32, #tpu.memory_space<vmem>>, vector<1x128x128xf32>
    %65 = vector.shape_cast %64 : vector<1x128x128xf32> to vector<128x128xf32>
    %66 = arith.addf %63, %65 : vector<128x128xf32>
    %cst_43 = arith.constant 0.000000e+00 : f32
    %67 = vector.broadcast %cst_43 : f32 to vector<128x128xf32>
    %68 = arith.maximumf %66, %67 : vector<128x128xf32>
    %69 = arith.subf %68, %40 : vector<128x128xf32>
    %70 = arith.mulf %51, %69 : vector<128x128xf32>
    %71 = arith.addf %40, %70 : vector<128x128xf32>
    %72 = arith.truncf %71 : vector<128x128xf32> to vector<128x128xbf16>
    %cst_44 = arith.constant dense<0.000000e+00> : vector<128x256xf32>
    %73 = tpu.matmul %72, %1, %cst_44 {dimension_numbers = #tpu.dot_dimension_numbers<[1], [0], [0], [1], [0, 0, 1, 1], [], []>} : vector<128x128xbf16>, vector<128x256xbf16>, vector<128x256xf32> -> vector<128x256xf32>
    %74 = vector.extract_strided_slice %73 {offsets = [0, 0], sizes = [128, 128], strides = [1, 1]} : vector<128x256xf32> to vector<128x128xf32>
    %c2_45 = arith.constant 2 : index
    %c0_46 = arith.constant 0 : index
    %c0_47 = arith.constant 0 : index
    %75 = vector.load %arg7[%c2_45, %c0_46, %c0_47] : memref<4x128x384xf32, #tpu.memory_space<vmem>>, vector<1x128x128xf32>
    %76 = vector.shape_cast %75 : vector<1x128x128xf32> to vector<128x128xf32>
    %77 = arith.addf %74, %76 : vector<128x128xf32>
    %78 = arith.negf %77 : vector<128x128xf32>
    %79 = math.exp %78 : vector<128x128xf32>
    %cst_48 = arith.constant 1.000000e+00 : f32
    %80 = vector.broadcast %cst_48 : f32 to vector<128x128xf32>
    %81 = arith.addf %80, %79 : vector<128x128xf32>
    %82 = arith.divf %80, %81 : vector<128x128xf32>
    %83 = vector.extract_strided_slice %73 {offsets = [0, 128], sizes = [128, 128], strides = [1, 1]} : vector<128x256xf32> to vector<128x128xf32>
    %c2_49 = arith.constant 2 : index
    %c0_50 = arith.constant 0 : index
    %c128_51 = arith.constant 128 : index
    %84 = vector.load %arg7[%c2_49, %c0_50, %c128_51] : memref<4x128x384xf32, #tpu.memory_space<vmem>>, vector<1x128x128xf32>
    %85 = vector.shape_cast %84 : vector<1x128x128xf32> to vector<128x128xf32>
    %86 = arith.addf %83, %85 : vector<128x128xf32>
    %87 = arith.negf %86 : vector<128x128xf32>
    %88 = math.exp %87 : vector<128x128xf32>
    %cst_52 = arith.constant 1.000000e+00 : f32
    %89 = vector.broadcast %cst_52 : f32 to vector<128x128xf32>
    %90 = arith.addf %89, %88 : vector<128x128xf32>
    %91 = arith.divf %89, %90 : vector<128x128xf32>
    %92 = arith.mulf %91, %71 : vector<128x128xf32>
    %93 = arith.truncf %92 : vector<128x128xf32> to vector<128x128xbf16>
    %cst_53 = arith.constant dense<0.000000e+00> : vector<128x128xf32>
    %94 = tpu.matmul %93, %2, %cst_53 {dimension_numbers = #tpu.dot_dimension_numbers<[1], [0], [0], [1], [0, 0, 1, 1], [], []>} : vector<128x128xbf16>, vector<128x128xbf16>, vector<128x128xf32> -> vector<128x128xf32>
    %c2_54 = arith.constant 2 : index
    %c0_55 = arith.constant 0 : index
    %c256_56 = arith.constant 256 : index
    %95 = vector.load %arg7[%c2_54, %c0_55, %c256_56] : memref<4x128x384xf32, #tpu.memory_space<vmem>>, vector<1x128x128xf32>
    %96 = vector.shape_cast %95 : vector<1x128x128xf32> to vector<128x128xf32>
    %97 = arith.addf %94, %96 : vector<128x128xf32>
    %cst_57 = arith.constant 0.000000e+00 : f32
    %98 = vector.broadcast %cst_57 : f32 to vector<128x128xf32>
    %99 = arith.maximumf %97, %98 : vector<128x128xf32>
    %100 = arith.subf %99, %71 : vector<128x128xf32>
    %101 = arith.mulf %82, %100 : vector<128x128xf32>
    %102 = arith.addf %71, %101 : vector<128x128xf32>
    %103 = arith.truncf %102 : vector<128x128xf32> to vector<128x128xbf16>
    %cst_58 = arith.constant dense<0.000000e+00> : vector<128x256xf32>
    %104 = tpu.matmul %103, %1, %cst_58 {dimension_numbers = #tpu.dot_dimension_numbers<[1], [0], [0], [1], [0, 0, 1, 1], [], []>} : vector<128x128xbf16>, vector<128x256xbf16>, vector<128x256xf32> -> vector<128x256xf32>
    %105 = vector.extract_strided_slice %104 {offsets = [0, 0], sizes = [128, 128], strides = [1, 1]} : vector<128x256xf32> to vector<128x128xf32>
    %c1_59 = arith.constant 1 : index
    %c0_60 = arith.constant 0 : index
    %c0_61 = arith.constant 0 : index
    %106 = vector.load %arg7[%c1_59, %c0_60, %c0_61] : memref<4x128x384xf32, #tpu.memory_space<vmem>>, vector<1x128x128xf32>
    %107 = vector.shape_cast %106 : vector<1x128x128xf32> to vector<128x128xf32>
    %108 = arith.addf %105, %107 : vector<128x128xf32>
    %109 = arith.negf %108 : vector<128x128xf32>
    %110 = math.exp %109 : vector<128x128xf32>
    %cst_62 = arith.constant 1.000000e+00 : f32
    %111 = vector.broadcast %cst_62 : f32 to vector<128x128xf32>
    %112 = arith.addf %111, %110 : vector<128x128xf32>
    %113 = arith.divf %111, %112 : vector<128x128xf32>
    %114 = vector.extract_strided_slice %104 {offsets = [0, 128], sizes = [128, 128], strides = [1, 1]} : vector<128x256xf32> to vector<128x128xf32>
    %c1_63 = arith.constant 1 : index
    %c0_64 = arith.constant 0 : index
    %c128_65 = arith.constant 128 : index
    %115 = vector.load %arg7[%c1_63, %c0_64, %c128_65] : memref<4x128x384xf32, #tpu.memory_space<vmem>>, vector<1x128x128xf32>
    %116 = vector.shape_cast %115 : vector<1x128x128xf32> to vector<128x128xf32>
    %117 = arith.addf %114, %116 : vector<128x128xf32>
    %118 = arith.negf %117 : vector<128x128xf32>
    %119 = math.exp %118 : vector<128x128xf32>
    %cst_66 = arith.constant 1.000000e+00 : f32
    %120 = vector.broadcast %cst_66 : f32 to vector<128x128xf32>
    %121 = arith.addf %120, %119 : vector<128x128xf32>
    %122 = arith.divf %120, %121 : vector<128x128xf32>
    %123 = arith.mulf %122, %102 : vector<128x128xf32>
    %124 = arith.truncf %123 : vector<128x128xf32> to vector<128x128xbf16>
    %cst_67 = arith.constant dense<0.000000e+00> : vector<128x128xf32>
    %125 = tpu.matmul %124, %2, %cst_67 {dimension_numbers = #tpu.dot_dimension_numbers<[1], [0], [0], [1], [0, 0, 1, 1], [], []>} : vector<128x128xbf16>, vector<128x128xbf16>, vector<128x128xf32> -> vector<128x128xf32>
    %c1_68 = arith.constant 1 : index
    %c0_69 = arith.constant 0 : index
    %c256_70 = arith.constant 256 : index
    %126 = vector.load %arg7[%c1_68, %c0_69, %c256_70] : memref<4x128x384xf32, #tpu.memory_space<vmem>>, vector<1x128x128xf32>
    %127 = vector.shape_cast %126 : vector<1x128x128xf32> to vector<128x128xf32>
    %128 = arith.addf %125, %127 : vector<128x128xf32>
    %cst_71 = arith.constant 0.000000e+00 : f32
    %129 = vector.broadcast %cst_71 : f32 to vector<128x128xf32>
    %130 = arith.maximumf %128, %129 : vector<128x128xf32>
    %131 = arith.subf %130, %102 : vector<128x128xf32>
    %132 = arith.mulf %113, %131 : vector<128x128xf32>
    %133 = arith.addf %102, %132 : vector<128x128xf32>
    %134 = arith.truncf %133 : vector<128x128xf32> to vector<128x128xbf16>
    %cst_72 = arith.constant dense<0.000000e+00> : vector<128x256xf32>
    %135 = tpu.matmul %134, %1, %cst_72 {dimension_numbers = #tpu.dot_dimension_numbers<[1], [0], [0], [1], [0, 0, 1, 1], [], []>} : vector<128x128xbf16>, vector<128x256xbf16>, vector<128x256xf32> -> vector<128x256xf32>
    %136 = vector.extract_strided_slice %135 {offsets = [0, 0], sizes = [128, 128], strides = [1, 1]} : vector<128x256xf32> to vector<128x128xf32>
    %c0_73 = arith.constant 0 : index
    %c0_74 = arith.constant 0 : index
    %c0_75 = arith.constant 0 : index
    %137 = vector.load %arg7[%c0_73, %c0_74, %c0_75] : memref<4x128x384xf32, #tpu.memory_space<vmem>>, vector<1x128x128xf32>
    %138 = vector.shape_cast %137 : vector<1x128x128xf32> to vector<128x128xf32>
    %139 = arith.addf %136, %138 : vector<128x128xf32>
    %140 = arith.negf %139 : vector<128x128xf32>
    %141 = math.exp %140 : vector<128x128xf32>
    %cst_76 = arith.constant 1.000000e+00 : f32
    %142 = vector.broadcast %cst_76 : f32 to vector<128x128xf32>
    %143 = arith.addf %142, %141 : vector<128x128xf32>
    %144 = arith.divf %142, %143 : vector<128x128xf32>
    %145 = vector.extract_strided_slice %135 {offsets = [0, 128], sizes = [128, 128], strides = [1, 1]} : vector<128x256xf32> to vector<128x128xf32>
    %c0_77 = arith.constant 0 : index
    %c0_78 = arith.constant 0 : index
    %c128_79 = arith.constant 128 : index
    %146 = vector.load %arg7[%c0_77, %c0_78, %c128_79] : memref<4x128x384xf32, #tpu.memory_space<vmem>>, vector<1x128x128xf32>
    %147 = vector.shape_cast %146 : vector<1x128x128xf32> to vector<128x128xf32>
    %148 = arith.addf %145, %147 : vector<128x128xf32>
    %149 = arith.negf %148 : vector<128x128xf32>
    %150 = math.exp %149 : vector<128x128xf32>
    %cst_80 = arith.constant 1.000000e+00 : f32
    %151 = vector.broadcast %cst_80 : f32 to vector<128x128xf32>
    %152 = arith.addf %151, %150 : vector<128x128xf32>
    %153 = arith.divf %151, %152 : vector<128x128xf32>
    %154 = arith.mulf %153, %133 : vector<128x128xf32>
    %155 = arith.truncf %154 : vector<128x128xf32> to vector<128x128xbf16>
    %cst_81 = arith.constant dense<0.000000e+00> : vector<128x128xf32>
    %156 = tpu.matmul %155, %2, %cst_81 {dimension_numbers = #tpu.dot_dimension_numbers<[1], [0], [0], [1], [0, 0, 1, 1], [], []>} : vector<128x128xbf16>, vector<128x128xbf16>, vector<128x128xf32> -> vector<128x128xf32>
    %c0_82 = arith.constant 0 : index
    %c0_83 = arith.constant 0 : index
    %c256_84 = arith.constant 256 : index
    %157 = vector.load %arg7[%c0_82, %c0_83, %c256_84] : memref<4x128x384xf32, #tpu.memory_space<vmem>>, vector<1x128x128xf32>
    %158 = vector.shape_cast %157 : vector<1x128x128xf32> to vector<128x128xf32>
    %159 = arith.addf %156, %158 : vector<128x128xf32>
    %cst_85 = arith.constant 0.000000e+00 : f32
    %160 = vector.broadcast %cst_85 : f32 to vector<128x128xf32>
    %161 = arith.maximumf %159, %160 : vector<128x128xf32>
    %162 = arith.subf %161, %133 : vector<128x128xf32>
    %163 = arith.mulf %144, %162 : vector<128x128xf32>
    %164 = arith.addf %133, %163 : vector<128x128xf32>
    %c0_86 = arith.constant 0 : index
    %c0_87 = arith.constant 0 : index
    %165 = vector.load %arg6[%c0_86, %c0_87] : memref<128x128xf32, #tpu.memory_space<vmem>>, vector<128x128xf32>
    tpu.vector_store %arg6[%c0_86, %c0_87], %164 {strides = array<i32>} : memref<128x128xf32, #tpu.memory_space<vmem>>, vector<128x128xf32>,
    return
  }
  func.func @transform_0(%arg0: i32) -> (i32, i32, i32) {
    %c0_i32 = arith.constant 0 : i32
    %c0_i32_0 = arith.constant 0 : i32
    %c0_i32_1 = arith.constant 0 : i32
    return %arg0, %c0_i32, %c0_i32_0 : i32, i32, i32
  }
  func.func @transform_1(%arg0: i32) -> (i32, i32) {
    %c0_i32 = arith.constant 0 : i32
    %c0_i32_0 = arith.constant 0 : i32
    %c0_i32_1 = arith.constant 0 : i32
    return %c0_i32, %c0_i32_0 : i32, i32
  }
  func.func @transform_2(%arg0: i32) -> (i32, i32) {
    %c0_i32 = arith.constant 0 : i32
    %c0_i32_0 = arith.constant 0 : i32
    %c0_i32_1 = arith.constant 0 : i32
    return %c0_i32, %c0_i32_0 : i32, i32
  }
  func.func @transform_3(%arg0: i32) -> (i32, i32) {
    %c0_i32 = arith.constant 0 : i32
    %c0_i32_0 = arith.constant 0 : i32
    %c0_i32_1 = arith.constant 0 : i32
    return %c0_i32, %c0_i32_0 : i32, i32
  }
  func.func @transform_4(%arg0: i32) -> (i32, i32) {
    %c0_i32 = arith.constant 0 : i32
    %c0_i32_0 = arith.constant 0 : i32
    %c0_i32_1 = arith.constant 0 : i32
    return %c0_i32, %c0_i32_0 : i32, i32
  }
  func.func @transform_5(%arg0: i32) -> (i32, i32) {
    %c0_i32 = arith.constant 0 : i32
    %c0_i32_0 = arith.constant 0 : i32
    return %arg0, %c0_i32 : i32, i32
  }
}

</mosaic_0001>

<bundles_post_ra>
// kernel: tpu_custom_call.1
= control target key start
LH: loop header
LB: loop body
LE: loop exit
PB: predicated region body
PF: predicated region fallthrough
CT: control target
= control target key end

     0   :  { %10 = vsyncpa [#allocation4], 0  ;;  %s13305_s0 = inlined_call_operand.vmem [shape: f32[256,4,32], index: 0, kind: input, shape index: {}]   ;;  %s13306_s1 = inlined_call_operand.vmem [shape: bf16[32,384], index: 1, kind: input, shape index: {}]   ;;  %s13307_s2 = inlined_call_operand.vmem [shape: bf16[128,256], index: 2, kind: input, shape index: {}]   ;;  %s13308_s3 = inlined_call_operand.vmem [shape: bf16[128,128], index: 3, kind: input, shape index: {}]   ;;  %s13309_s4 = inlined_call_operand.vmem [shape: f32[1,384], index: 4, kind: input, shape index: {}]   ;;  %s13310_s5 = inlined_call_operand.hbm [shape: f32[256,128], index: 5, kind: output, shape index: {}]  }
   0x1   :  { %12 = vsyncpa [#allocation4 + $0x1], 0  ;;  %s9139_s18 = smov 0   ;;  %s9141_s19 = smov 0  }
   0x2   :  { %s9143_s20 = smov 0   ;;  %s9145_s21 = smov 0  }
   0x3 LB: > { %s8091_s22 = sadd.s32 4294967295, %s9104_s21   ;;  %s8092_s23 = sadd.s32 4294967294, %s9104_s21   ;;  %s9104_s21 = sphi %s9145_s21, %s13658_s21   ;;  %s9100_s20 = sphi %s9143_s20, %s13657_s20   ;;  %s9096_s19 = sphi %s9141_s19, %s13656_s19   ;;  %s9092_s18 = sphi %s9139_s18, %s13655_s18  }
   0x4   : > { %s9162_s24 = sadd.s32 1, %s9104_s21   ;;  %s135_s25 = sadd.s32 1, %s9100_s20 }
   0x5   : > { %s132_s26 = ssub.s32 %s9104_s21, %s9162_s24  ;;  %p145_p0 = scmp.ne.s32.totalorder %s9100_s20, %s9096_s19 }
   0x6   : > { %p133_p1 = scmp.eq.s32.totalorder %s132_s26, 0  ;;  %p146_p2 = scmp.eq.s32.totalorder %s8091_s22, 1 }
   0x7   : > { %p151_p3 = scmp.ne.s32.totalorder %s9096_s19, %s9092_s18  ;;  %p152_p4 = scmp.eq.s32.totalorder %s8092_s23, 1 }
   0x8   : > { %s9172_s27 = scalar_select %p133_p1, %s9100_s20, %s135_s25  }
   0x9   : > { %p9174_p5 = por %p146_p2, %p145_p0  ;;  %p9178_p6 = por %p152_p4, %p151_p3 }
   0xa   : > { %p8095_p7 = scmp.ge.s32.totalorder %s9104_s21, 1  ;;  %p191_p8 = scmp.lt.s32.totalorder %s9104_s21, 3 }
   0xc   : > { %p192_p9 = pnand %p8095_p7, %p191_p8 }
   0xe   : > { %195 = sbr.rel (%p192_p9) target bundleno = 1934 (0x78e), region = 40 }
  0x13   : > { %v8113_v0 = vld [vmem:[%s13306_s1 + $0x18] sm:$0xf]  ;;  %v8452_v1 = vld [vmem:[%s13306_s1 + $0x20] sm:$0xf0]  ;;  %v8451_v2 = vld [vmem:[%s13306_s1 + $0x1c] sm:$0xf] }
  0x14   : > { %v9193_v3 = vor.u32 %v8452_v1, %v8113_v0  ;;  %v8115_v4 = vld [vmem:[%s13306_s1 + $0x24] sm:$0xf0]  ;;  %v8101_v5 = vld [vmem:[%s13306_s1] sm:$0xf]  ;;  %v8449_v6 = vld [vmem:[%s13306_s1 + $0x8] sm:$0xf0] }
  0x15   : > { %v9204_v7 = vor.u32 %v8451_v2, %v8115_v4  ;;  %v8448_v8 = vld [vmem:[%s13306_s1 + $0x4] sm:$0xf]  ;;  %v8103_v9 = vld [vmem:[%s13306_s1 + $0xc] sm:$0xf0]  ;;  %s9212_s30 = sshll.u32 %s8091_s22, 7  ;;  %v9215_v10 = vor.u32 %v8449_v6, %v8101_v5  ;;  %vm788_vm0 = vcmask 1041409  }
  0x16   : > { %1089 = vmatpush.bf16.msra.mxu0 %v9193_v3  ;;  %p220_p10 = scmp.lt.s32.totalorder %s9212_s30, 255  ;;  %v8121_v11 = vld [vmem:[%s13306_s1 + $0x20] sm:$0xf]  ;;  %2052 = vmatpush.bf16.msra.mxu3 %v9193_v3  ;;  %v9223_v12 = vor.u32 %v8448_v8, %v8103_v9  ;;  %v8453_v13 = vld [vmem:[%s13306_s1 + $0x28] sm:$0xf0]  ;;  %vm791_vm1 = vcmask 1042434   ;;  %s8026_s14 = scalar_lea.hbm %s13310_s5, %s9212_s30 }
  0x17   : > { %1138 = vmatpush.bf16.msra.mxu1 %v9204_v7  ;;  %v9229_v14 = vor.u32 %v8453_v13, %v8121_v11  ;;  %vm794_vm2 = vcmask 1043459   ;;  %vm797_vm3 = vcmask 1044484   ;;  %vm800_vm4 = vcmask 1045509   ;;  %s216_s22 = sand.u32 1, %s9096_s19   ;;  %s8029_s16 = sshll.u32 %s8026_s14, 4  ;;  %s8030_s16 = int_to_ptr.hbm [resolvable:$true] %s8029_s16 }
  0x18   : > { %s221_s9 = scalar_select %p220_p10, %s9212_s30, 255  ;;  %vm803_vm5 = vcmask 1046534   ;;  %vm806_vm6 = vcmask 1047559   ;;  %vm1058_vm7 = vcmask 261120  }
  0x19   : > { %1187 = vmatpush.bf16.msra.mxu2 %v9229_v14  ;;  %s9056_s30 = sshra.s32 %s8030_s16, 4  ;;  %s9062_s26 = scalar_lea.hbm %s13310_s5, 256  ;;  %s9057_s30 = int_to_ptr.hbm [resolvable:$true] %s9056_s30 }
  0x1a   : > { %1090 = vmatpush.bf16.msra.mxu0 %v9215_v10  ;;  %s8098_s10 = sshll.u32 %s221_s9, 2  ;;  %2053 = vmatpush.bf16.msra.mxu3 %v9215_v10  ;;  %s8096_s9 = sshll.u32 %s216_s22, 7 }
  0x1b   : > { %1139 = vmatpush.bf16.msra.mxu1 %v9223_v12  ;;  %s9237_s13 = scalar_lea.vmem %s13305_s0, %s8098_s10  ;;  %s12986_s10 = scalar_lea.vmem [#allocation3], %s8096_s9 }
  0x1c   : > { %v268_v15 = vld [vmem:[%s9237_s13] sm:$0x1]  ;;  %v269_v16 = vld [vmem:[%s9237_s13 + $0x4] sm:$0x1]  ;;  %v270_v17 = vld [vmem:[%s9237_s13 + $0x8] sm:$0x1]  ;;  %p9063_p0 = scmp.lt.s32.totalorder %s9057_s30, %s13310_s5 }
  0x1d   : > { %v271_v18 = vld [vmem:[%s9237_s13 + $0xc] sm:$0x1]  ;;  %v272_v19 = vld [vmem:[%s9237_s13 + $0x10] sm:$0x1]  ;;  %v273_v20 = vld [vmem:[%s9237_s13 + $0x14] sm:$0x1]  ;;  %v396_v21 = vpack.c.bf16 %v268_v15, %v268_v15  ;;  %v397_v22 = vpack.c.bf16 %v269_v16, %v269_v16  ;;  %v398_v23 = vpack.c.bf16 %v270_v17, %v270_v17 }
  0x1e   : > { %2101 = vmatpush.bf16.msrb.mxu0 %v9204_v7  ;;  %3065 = vmatpush.bf16.msrb.mxu3 %v9204_v7  ;;  %v274_v24 = vld [vmem:[%s9237_s13 + $0x18] sm:$0x1]  ;;  %v275_v25 = vld [vmem:[%s9237_s13 + $0x1c] sm:$0x1]  ;;  %v276_v26 = vld [vmem:[%s9237_s13 + $0x20] sm:$0x1]  ;;  %v399_v27 = vpack.c.bf16 %v271_v18, %v271_v18  ;;  %v400_v28 = vpack.c.bf16 %v272_v19, %v272_v19  ;;  %v401_v29 = vpack.c.bf16 %v273_v20, %v273_v20 }
  0x1f   : > { %2150 = vmatpush.bf16.msrb.mxu1 %v9229_v14  ;;  %v277_v30 = vld [vmem:[%s9237_s13 + $0x24] sm:$0x1]  ;;  %v278_v31 = vld [vmem:[%s9237_s13 + $0x28] sm:$0x1]  ;;  %v279_v32 = vld [vmem:[%s9237_s13 + $0x2c] sm:$0x1]  ;;  %v402_v33 = vpack.c.bf16 %v274_v24, %v274_v24  ;;  %v403_v34 = vpack.c.bf16 %v275_v25, %v275_v25  ;;  %v404_v35 = vpack.c.bf16 %v276_v26, %v276_v26  ;;  %v659_v36 = vunpack.c.l.b16 %v396_v21 }
  0x20   : > { %v280_v37 = vld [vmem:[%s9237_s13 + $0x30] sm:$0x1]  ;;  %v281_v38 = vld [vmem:[%s9237_s13 + $0x34] sm:$0x1]  ;;  %v282_v39 = vld [vmem:[%s9237_s13 + $0x38] sm:$0x1]  ;;  %v405_v40 = vpack.c.bf16 %v277_v30, %v277_v30  ;;  %v406_v41 = vpack.c.bf16 %v278_v31, %v278_v31  ;;  %v407_v42 = vpack.c.bf16 %v279_v32, %v279_v32  ;;  %v660_v43 = vunpack.c.l.b16 %v397_v22 }
  0x21   : > { %v283_v44 = vld [vmem:[%s9237_s13 + $0x3c] sm:$0x1]  ;;  %v408_v45 = vpack.c.bf16 %v280_v37, %v280_v37  ;;  %v409_v46 = vpack.c.bf16 %v281_v38, %v281_v38  ;;  %v410_v47 = vpack.c.bf16 %v282_v39, %v282_v39  ;;  %v661_v48 = vunpack.c.l.b16 %v398_v23  ;;  %v284_v1 = vld [vmem:[%s9237_s13 + $0x40] sm:$0x1]  ;;  %v285_v8 = vld [vmem:[%s9237_s13 + $0x44] sm:$0x1] }
  0x22   : > { %2102 = vmatpush.bf16.msrb.mxu0 %v9223_v12  ;;  %3066 = vmatpush.bf16.msrb.mxu3 %v9223_v12  ;;  %v411_v49 = vpack.c.bf16 %v283_v44, %v283_v44  ;;  %v662_v50 = vunpack.c.l.b16 %v399_v27  ;;  %v663_v51 = vunpack.c.l.b16 %v400_v28  ;;  %v664_v52 = vunpack.c.l.b16 %v401_v29  ;;  %v286_v16 = vld [vmem:[%s9237_s13 + $0x48] sm:$0x1]  ;;  %v287_v21 = vld [vmem:[%s9237_s13 + $0x4c] sm:$0x1]  ;;  %v288_v26 = vld [vmem:[%s9237_s13 + $0x50] sm:$0x1] }
  0x23   : > { %v665_v53 = vunpack.c.l.b16 %v402_v33  ;;  %v666_v54 = vunpack.c.l.b16 %v403_v34  ;;  %v667_v55 = vunpack.c.l.b16 %v404_v35  ;;  %v668_v56 = vunpack.c.l.b16 %v405_v40  ;;  %v289_v27 = vld [vmem:[%s9237_s13 + $0x54] sm:$0x1]  ;;  %v290_v30 = vld [vmem:[%s9237_s13 + $0x58] sm:$0x1]  ;;  %v291_v31 = vld [vmem:[%s9237_s13 + $0x5c] sm:$0x1] }
  0x24   : > { %v669_v57 = vunpack.c.l.b16 %v406_v41  ;;  %v670_v58 = vunpack.c.l.b16 %v407_v42  ;;  %v671_v59 = vunpack.c.l.b16 %v408_v45  ;;  %v672_v60 = vunpack.c.l.b16 %v409_v46  ;;  %v293_v37 = vld [vmem:[%s9237_s13 + $0x64] sm:$0x1]  ;;  %v294_v38 = vld [vmem:[%s9237_s13 + $0x68] sm:$0x1]  ;;  %v296_v44 = vld [vmem:[%s9237_s13 + $0x70] sm:$0x1] }
  0x25   : > { %v673_v61 = vunpack.c.l.b16 %v410_v47  ;;  %v674_v62 = vunpack.c.l.b16 %v411_v49  ;;  %v787_v63 = vrot.slane %v660_v43, 7  ;;  %v790_v0 = vrot.slane %v661_v48, 6  ;;  %v295_v43 = vld [vmem:[%s9237_s13 + $0x6c] sm:$0x1]  ;;  %v297_v45 = vld [vmem:[%s9237_s13 + $0x74] sm:$0x1] }
  0x26   : > { %v793_v2 = vrot.slane %v662_v50, 5  ;;  %v796_v4 = vrot.slane %v663_v51, 4  ;;  %v799_v5 = vrot.slane %v664_v52, 3  ;;  %v802_v6 = vrot.slane %v665_v53, 2  ;;  %v298_v50 = vld [vmem:[%s9237_s13 + $0x78] sm:$0x1] }
  0x27   : > { %v789_v9 = vsel %vm788_vm0, %v787_v63, %v659_v36  ;;  %v805_v11 = vrot.slane %v666_v54, 1  ;;  %v808_v13 = vrot.slane %v668_v56, 7  ;;  %v810_v15 = vrot.slane %v669_v57, 6  ;;  %v292_v36 = vld [vmem:[%s9237_s13 + $0x60] sm:$0x1]  ;;  %s8027_s15 = sshll.u32 %s12986_s10, 4  ;;  %s8028_s15 = int_to_ptr.vmem [resolvable:$true] %s8027_s15 }
  0x28   : > { %v792_v17 = vsel %vm791_vm1, %v790_v0, %v789_v9  ;;  %v812_v18 = vrot.slane %v670_v58, 5  ;;  %v814_v19 = vrot.slane %v671_v59, 4  ;;  %v816_v20 = vrot.slane %v672_v60, 3  ;;  %v299_v51 = vld [vmem:[%s9237_s13 + $0x7c] sm:$0x1]  ;;  %s9058_s17 = scalar_lea.hbm %s9057_s30, 128 }
  0x29   : > { %v795_v22 = vsel %vm794_vm2, %v793_v2, %v792_v17  ;;  %v809_v23 = vsel %vm788_vm0, %v808_v13, %v667_v55  ;;  %v818_v24 = vrot.slane %v673_v61, 2  ;;  %v820_v25 = vrot.slane %v674_v62, 1  ;;  %p9059_p11 = scmp.ne.s32.totalorder %s9057_s30, %s9058_s17  ;;  %p9064_p1 = scmp.lt.s32.totalorder %s9062_s26, %s9058_s17 }
  0x2a   : > { %v798_v28 = vsel %vm797_vm3, %v796_v4, %v795_v22  ;;  %v811_v29 = vsel %vm791_vm1, %v810_v15, %v809_v23  ;;  %v412_v32 = vpack.c.bf16 %v284_v1, %v284_v1  ;;  %v413_v33 = vpack.c.bf16 %v285_v8, %v285_v8 }
  0x2b   : > { %v801_v34 = vsel %vm800_vm4, %v799_v5, %v798_v28  ;;  %v813_v35 = vsel %vm794_vm2, %v812_v18, %v811_v29  ;;  %v414_v39 = vpack.c.bf16 %v286_v16, %v286_v16  ;;  %v415_v40 = vpack.c.bf16 %v287_v21, %v287_v21  ;;  %p9060_p12 = pnand %p9059_p11, %p9174_p5  ;;  %p9065_p2 = por %p9064_p1, %p9063_p0 }
  0x2c   : > { %v804_v41 = vsel %vm803_vm5, %v802_v6, %v801_v34  ;;  %v815_v42 = vsel %vm797_vm3, %v814_v19, %v813_v35  ;;  %v416_v46 = vpack.c.bf16 %v288_v26, %v288_v26  ;;  %v417_v47 = vpack.c.bf16 %v289_v27, %v289_v27  ;;  %v300_v27 = vld [vmem:[%s9237_s13 + $0x80] sm:$0x1] }
  0x2d   : > { %v807_v48 = vsel %vm806_vm6, %v805_v11, %v804_v41  ;;  %v817_v49 = vsel %vm800_vm4, %v816_v20, %v815_v42  ;;  %v418_v52 = vpack.c.bf16 %v290_v30, %v290_v30  ;;  %v419_v53 = vpack.c.bf16 %v291_v31, %v291_v31  ;;  %v303_v42 = vld [vmem:[%s9237_s13 + $0x8c] sm:$0x1]  ;;  %p9061_p13 = pneg %p9060_p12 }
  0x2e   : > { %v819_v54 = vsel %vm803_vm5, %v818_v24, %v817_v49  ;;  %v420_v55 = vpack.c.bf16 %v292_v36, %v292_v36  ;;  %v421_v56 = vpack.c.bf16 %v293_v37, %v293_v37  ;;  %v422_v57 = vpack.c.bf16 %v294_v38, %v294_v38  ;;  %v302_v37 = vld [vmem:[%s9237_s13 + $0x88] sm:$0x1] }
  0x2f   : > { %v821_v58 = vsel %vm806_vm6, %v820_v25, %v819_v54  ;;  %v423_v59 = vpack.c.bf16 %v295_v43, %v295_v43  ;;  %v424_v60 = vpack.c.bf16 %v296_v44, %v296_v44  ;;  %v425_v61 = vpack.c.bf16 %v297_v45, %v297_v45  ;;  %v304_v43 = vld [vmem:[%s9237_s13 + $0x90] sm:$0x1]  ;;  %v309_v54 = vld [vmem:[%s9237_s13 + $0xa4] sm:$0x1]  ;;  %p9066_p3 = pnand %p9065_p2, %p9061_p13 }
  0x30   : > { %v9291_v62 = vpack.c.b16 %v821_v58, %v807_v48  ;;  %v426_v63 = vpack.c.bf16 %v298_v50, %v298_v50  ;;  %v427_v0 = vpack.c.bf16 %v299_v51, %v299_v51  ;;  %v675_v1 = vunpack.c.l.b16 %v412_v32  ;;  %v301_v32 = vld [vmem:[%s9237_s13 + $0x84] sm:$0x1]  ;;  %v306_v48 = vld [vmem:[%s9237_s13 + $0x98] sm:$0x1] }
  0x31   : > { %v676_v2 = vunpack.c.l.b16 %v413_v33  ;;  %v677_v4 = vunpack.c.l.b16 %v414_v39  ;;  %v678_v5 = vunpack.c.l.b16 %v415_v40  ;;  %v679_v6 = vunpack.c.l.b16 %v416_v46 }
  0x32   : > { %8123 = vmatmul.msk.bf16.vlgmr.msra.gmra.mxu0 %vm1058_vm7, %v9291_v62  ;;  %8131 = vmatmul.msk.bf16.vlgmr.msra.gmra.mxu1 %vm1058_vm7, %v9291_v62  ;;  %v680_v8 = vunpack.c.l.b16 %v417_v47  ;;  %v681_v9 = vunpack.c.l.b16 %v418_v52  ;;  %v682_v11 = vunpack.c.l.b16 %v419_v53  ;;  %v683_v13 = vunpack.c.l.b16 %v420_v55  ;;  %v305_v47 = vld [vmem:[%s9237_s13 + $0x94] sm:$0x1]  ;;  %v307_v52 = vld [vmem:[%s9237_s13 + $0x9c] sm:$0x1]  ;;  %v308_v53 = vld [vmem:[%s9237_s13 + $0xa0] sm:$0x1] }
  0x33   : > { %v684_v15 = vunpack.c.l.b16 %v421_v56  ;;  %v685_v16 = vunpack.c.l.b16 %v422_v57  ;;  %v686_v17 = vunpack.c.l.b16 %v423_v59  ;;  %v687_v18 = vunpack.c.l.b16 %v424_v60  ;;  %3114 = vmatpush.bf16.msra.mxu0 %v9229_v14  ;;  %v310_v59 = vld [vmem:[%s9237_s13 + $0xa8] sm:$0x1]  ;;  %v311_v60 = vld [vmem:[%s9237_s13 + $0xac] sm:$0x1] }
  0x34   : > { %v688_v19 = vunpack.c.l.b16 %v425_v61  ;;  %v689_v20 = vunpack.c.l.b16 %v426_v63  ;;  %v690_v21 = vunpack.c.l.b16 %v427_v0  ;;  %v822_v22 = vrot.slane %v676_v2, 7  ;;  %v312_v61 = vld [vmem:[%s9237_s13 + $0xb0] sm:$0x1] }
  0x35   : > { %v824_v23 = vrot.slane %v677_v4, 6  ;;  %v826_v24 = vrot.slane %v678_v5, 5  ;;  %v828_v25 = vrot.slane %v679_v6, 4  ;;  %v830_v26 = vrot.slane %v680_v8, 3  ;;  %v313_v4 = vld [vmem:[%s9237_s13 + $0xb4] sm:$0x1] }
  0x36   : > { %v823_v28 = vsel %vm788_vm0, %v822_v22, %v675_v1  ;;  %v832_v29 = vrot.slane %v681_v9, 2  ;;  %v834_v30 = vrot.slane %v682_v11, 1  ;;  %v836_v31 = vrot.slane %v684_v15, 7  ;;  %v314_v5 = vld [vmem:[%s9237_s13 + $0xb8] sm:$0x1] }
  0x37   : > { %v825_v33 = vsel %vm791_vm1, %v824_v23, %v823_v28  ;;  %v838_v34 = vrot.slane %v685_v16, 6  ;;  %v840_v35 = vrot.slane %v686_v17, 5  ;;  %v842_v36 = vrot.slane %v687_v18, 4  ;;  %v315_v6 = vld [vmem:[%s9237_s13 + $0xbc] sm:$0x1] }
  0x38   : > { %v827_v38 = vsel %vm794_vm2, %v826_v24, %v825_v33  ;;  %v837_v39 = vsel %vm788_vm0, %v836_v31, %v683_v13  ;;  %v844_v40 = vrot.slane %v688_v19, 3  ;;  %v846_v41 = vrot.slane %v689_v20, 2 }
  0x39   : > { %v829_v44 = vsel %vm797_vm3, %v828_v25, %v827_v38  ;;  %v839_v45 = vsel %vm791_vm1, %v838_v34, %v837_v39  ;;  %v848_v46 = vrot.slane %v690_v21, 1  ;;  %v428_v49 = vpack.c.bf16 %v300_v27, %v300_v27 }
  0x3a   : > { %v831_v50 = vsel %vm800_vm4, %v830_v26, %v829_v44  ;;  %v841_v51 = vsel %vm794_vm2, %v840_v35, %v839_v45  ;;  %v429_v55 = vpack.c.bf16 %v301_v32, %v301_v32  ;;  %v430_v56 = vpack.c.bf16 %v302_v37, %v302_v37  ;;  %v316_v45 = vld [vmem:[%s9237_s13 + $0xc0] sm:$0x1] }
  0x3b   : > { %v833_v57 = vsel %vm803_vm5, %v832_v29, %v831_v50  ;;  %v843_v58 = vsel %vm797_vm3, %v842_v36, %v841_v51  ;;  %v431_v63 = vpack.c.bf16 %v303_v42, %v303_v42  ;;  %v432_v0 = vpack.c.bf16 %v304_v43, %v304_v43  ;;  %v317_v50 = vld [vmem:[%s9237_s13 + $0xc4] sm:$0x1] }
  0x3c   : > { %v835_v1 = vsel %vm806_vm6, %v834_v30, %v833_v57  ;;  %v845_v2 = vsel %vm800_vm4, %v844_v40, %v843_v58  ;;  %v433_v8 = vpack.c.bf16 %v305_v47, %v305_v47  ;;  %v434_v9 = vpack.c.bf16 %v306_v48, %v306_v48 }
  0x3d   : > { %v847_v11 = vsel %vm803_vm5, %v846_v41, %v845_v2  ;;  %v435_v13 = vpack.c.bf16 %v307_v52, %v307_v52  ;;  %v436_v15 = vpack.c.bf16 %v308_v53, %v308_v53  ;;  %v437_v16 = vpack.c.bf16 %v309_v54, %v309_v54  ;;  %v321_v2 = vld [vmem:[%s9237_s13 + $0xd4] sm:$0x1] }
  0x3e   : > { %v849_v17 = vsel %vm806_vm6, %v848_v46, %v847_v11  ;;  %v438_v18 = vpack.c.bf16 %v310_v59, %v310_v59  ;;  %v439_v19 = vpack.c.bf16 %v311_v60, %v311_v60  ;;  %v440_v20 = vpack.c.bf16 %v312_v61, %v312_v61  ;;  %v319_v60 = vld [vmem:[%s9237_s13 + $0xcc] sm:$0x1]  ;;  %v320_v61 = vld [vmem:[%s9237_s13 + $0xd0] sm:$0x1]  ;;  %v324_v11 = vld [vmem:[%s9237_s13 + $0xe0] sm:$0x1] }
  0x3f   : > { %v9328_v21 = vpack.c.b16 %v849_v17, %v835_v1  ;;  %v441_v22 = vpack.c.bf16 %v313_v4, %v313_v4  ;;  %v442_v23 = vpack.c.bf16 %v314_v5, %v314_v5  ;;  %v443_v24 = vpack.c.bf16 %v315_v6, %v315_v6  ;;  %v322_v4 = vld [vmem:[%s9237_s13 + $0xd8] sm:$0x1] }
  0x40   : > { %v691_v25 = vunpack.c.l.b16 %v428_v49  ;;  %v692_v26 = vunpack.c.l.b16 %v429_v55  ;;  %v693_v27 = vunpack.c.l.b16 %v430_v56  ;;  %v694_v28 = vunpack.c.l.b16 %v431_v63  ;;  %v318_v55 = vld [vmem:[%s9237_s13 + $0xc8] sm:$0x1] }
  0x41   : > { %v695_v29 = vunpack.c.l.b16 %v432_v0  ;;  %v696_v30 = vunpack.c.l.b16 %v433_v8  ;;  %v697_v31 = vunpack.c.l.b16 %v434_v9  ;;  %v698_v32 = vunpack.c.l.b16 %v435_v13  ;;  %v323_v9 = vld [vmem:[%s9237_s13 + $0xdc] sm:$0x1] }
  0x42   : > { %8124 = vmatmul.msk.bf16.gmra.mxu0 %vm1058_vm7, %v9328_v21  ;;  %8132 = vmatmul.msk.bf16.gmra.mxu1 %vm1058_vm7, %v9328_v21  ;;  %v699_v33 = vunpack.c.l.b16 %v436_v15  ;;  %v700_v34 = vunpack.c.l.b16 %v437_v16  ;;  %v701_v35 = vunpack.c.l.b16 %v438_v18  ;;  %v702_v36 = vunpack.c.l.b16 %v439_v19  ;;  %v325_v18 = vld [vmem:[%s9237_s13 + $0xe4] sm:$0x1]  ;;  %v326_v19 = vld [vmem:[%s9237_s13 + $0xe8] sm:$0x1] }
  0x43   : > { %v703_v37 = vunpack.c.l.b16 %v440_v20  ;;  %v704_v38 = vunpack.c.l.b16 %v441_v22  ;;  %v705_v39 = vunpack.c.l.b16 %v442_v23  ;;  %v706_v40 = vunpack.c.l.b16 %v443_v24  ;;  %v327_v20 = vld [vmem:[%s9237_s13 + $0xec] sm:$0x1] }
  0x44   : > { %v850_v41 = vrot.slane %v692_v26, 7  ;;  %v852_v42 = vrot.slane %v693_v27, 6  ;;  %v854_v43 = vrot.slane %v694_v28, 5  ;;  %v856_v44 = vrot.slane %v695_v29, 4  ;;  %v328_v26 = vld [vmem:[%s9237_s13 + $0xf0] sm:$0x1] }
  0x45   : > { %v858_v46 = vrot.slane %v696_v30, 3  ;;  %v860_v47 = vrot.slane %v697_v31, 2  ;;  %v862_v48 = vrot.slane %v698_v32, 1  ;;  %v864_v49 = vrot.slane %v700_v34, 7  ;;  %v329_v27 = vld [vmem:[%s9237_s13 + $0xf4] sm:$0x1] }
  0x46   : > { %v851_v51 = vsel %vm788_vm0, %v850_v41, %v691_v25  ;;  %v866_v52 = vrot.slane %v701_v35, 6  ;;  %v868_v53 = vrot.slane %v702_v36, 5  ;;  %v870_v54 = vrot.slane %v703_v37, 4  ;;  %v330_v28 = vld [vmem:[%s9237_s13 + $0xf8] sm:$0x1] }
  0x47   : > { %v853_v56 = vsel %vm791_vm1, %v852_v42, %v851_v51  ;;  %v865_v57 = vsel %vm788_vm0, %v864_v49, %v699_v33  ;;  %v872_v58 = vrot.slane %v704_v38, 3  ;;  %v874_v59 = vrot.slane %v705_v39, 2  ;;  %v331_v33 = vld [vmem:[%s9237_s13 + $0xfc] sm:$0x1] }
  0x48   : > { %v855_v63 = vsel %vm794_vm2, %v854_v43, %v853_v56  ;;  %v867_v0 = vsel %vm791_vm1, %v866_v52, %v865_v57  ;;  %v876_v1 = vrot.slane %v706_v40, 1  ;;  %v444_v5 = vpack.c.bf16 %v316_v45, %v316_v45 }
  0x49   : > { %v857_v6 = vsel %vm797_vm3, %v856_v44, %v855_v63  ;;  %v869_v8 = vsel %vm794_vm2, %v868_v53, %v867_v0  ;;  %v445_v13 = vpack.c.bf16 %v317_v50, %v317_v50  ;;  %v446_v15 = vpack.c.bf16 %v318_v55, %v318_v55 }
  0x4a   : > { %v859_v16 = vsel %vm800_vm4, %v858_v46, %v857_v6  ;;  %v871_v17 = vsel %vm797_vm3, %v870_v54, %v869_v8  ;;  %v447_v22 = vpack.c.bf16 %v319_v60, %v319_v60  ;;  %v448_v23 = vpack.c.bf16 %v320_v61, %v320_v61  ;;  %v333_v6 = vld [vmem:[%s9237_s13 + $0x104] sm:$0x1] }
  0x4b   : > { %v861_v24 = vsel %vm803_vm5, %v860_v47, %v859_v16  ;;  %v873_v25 = vsel %vm800_vm4, %v872_v58, %v871_v17  ;;  %v449_v29 = vpack.c.bf16 %v321_v2, %v321_v2  ;;  %v450_v30 = vpack.c.bf16 %v322_v4, %v322_v4 }
  0x4c   : > { %v863_v31 = vsel %vm806_vm6, %v862_v48, %v861_v24  ;;  %v875_v32 = vsel %vm803_vm5, %v874_v59, %v873_v25  ;;  %v451_v34 = vpack.c.bf16 %v323_v9, %v323_v9  ;;  %v452_v35 = vpack.c.bf16 %v324_v11, %v324_v11 }
  0x4d   : > { %v877_v36 = vsel %vm806_vm6, %v876_v1, %v875_v32  ;;  %v453_v37 = vpack.c.bf16 %v325_v18, %v325_v18  ;;  %v454_v38 = vpack.c.bf16 %v326_v19, %v326_v19  ;;  %v455_v39 = vpack.c.bf16 %v327_v20, %v327_v20  ;;  %v9371_v1 = vld [vmem:[%s9237_s13 + $0x100] sm:$0x1]  ;;  %v335_v20 = vld [vmem:[%s9237_s13 + $0x10c] sm:$0x1] }
  0x4e   : > { %v9364_v40 = vpack.c.b16 %v877_v36, %v863_v31  ;;  %v456_v41 = vpack.c.bf16 %v328_v26, %v328_v26  ;;  %v457_v42 = vpack.c.bf16 %v329_v27, %v329_v27  ;;  %v458_v43 = vpack.c.bf16 %v330_v28, %v330_v28  ;;  %v336_v26 = vld [vmem:[%s9237_s13 + $0x110] sm:$0x1]  ;;  %v337_v27 = vld [vmem:[%s9237_s13 + $0x114] sm:$0x1]  ;;  %v339_v31 = vld [vmem:[%s9237_s13 + $0x11c] sm:$0x1] }
  0x4f   : > { %v459_v44 = vpack.c.bf16 %v331_v33, %v331_v33  ;;  %v707_v45 = vunpack.c.l.b16 %v444_v5  ;;  %v708_v46 = vunpack.c.l.b16 %v445_v13  ;;  %v709_v47 = vunpack.c.l.b16 %v446_v15  ;;  %v334_v15 = vld [vmem:[%s9237_s13 + $0x108] sm:$0x1]  ;;  %v340_v36 = vld [vmem:[%s9237_s13 + $0x120] sm:$0x1] }
  0x50   : > { %v710_v48 = vunpack.c.l.b16 %v447_v22  ;;  %v711_v49 = vunpack.c.l.b16 %v448_v23  ;;  %v712_v50 = vunpack.c.l.b16 %v449_v29  ;;  %v713_v51 = vunpack.c.l.b16 %v450_v30  ;;  %v338_v30 = vld [vmem:[%s9237_s13 + $0x118] sm:$0x1] }
  0x51   : > { %v714_v52 = vunpack.c.l.b16 %v451_v34  ;;  %v715_v53 = vunpack.c.l.b16 %v452_v35  ;;  %v716_v54 = vunpack.c.l.b16 %v453_v37  ;;  %v717_v55 = vunpack.c.l.b16 %v454_v38  ;;  %v341_v37 = vld [vmem:[%s9237_s13 + $0x124] sm:$0x1]  ;;  %v342_v38 = vld [vmem:[%s9237_s13 + $0x128] sm:$0x1] }
  0x52   : > { %8125 = vmatmul.msk.bf16.gmra.mxu0 %vm1058_vm7, %v9364_v40  ;;  %8133 = vmatmul.msk.bf16.gmra.mxu1 %vm1058_vm7, %v9364_v40  ;;  %v718_v56 = vunpack.c.l.b16 %v455_v39  ;;  %v719_v57 = vunpack.c.l.b16 %v456_v41  ;;  %v720_v58 = vunpack.c.l.b16 %v457_v42  ;;  %v721_v59 = vunpack.c.l.b16 %v458_v43 }
  0x53   : > { %v722_v60 = vunpack.c.l.b16 %v459_v44  ;;  %v878_v61 = vrot.slane %v708_v46, 7  ;;  %v880_v63 = vrot.slane %v709_v47, 6  ;;  %v882_v0 = vrot.slane %v710_v48, 5  ;;  %v343_v44 = vld [vmem:[%s9237_s13 + $0x12c] sm:$0x1] }
  0x54   : > { %v884_v2 = vrot.slane %v711_v49, 4  ;;  %v886_v4 = vrot.slane %v712_v50, 3  ;;  %v888_v5 = vrot.slane %v713_v51, 2  ;;  %v892_v9 = vrot.slane %v716_v54, 7  ;;  %v345_v46 = vld [vmem:[%s9237_s13 + $0x134] sm:$0x1] }
  0x55   : > { %v879_v8 = vsel %vm788_vm0, %v878_v61, %v707_v45  ;;  %v894_v11 = vrot.slane %v717_v55, 6  ;;  %v896_v13 = vrot.slane %v718_v56, 5  ;;  %v890_v17 = vrot.slane %v714_v52, 1  ;;  %v344_v45 = vld [vmem:[%s9237_s13 + $0x130] sm:$0x1] }
  0x56   : > { %v881_v16 = vsel %vm791_vm1, %v880_v63, %v879_v8  ;;  %v898_v18 = vrot.slane %v719_v57, 4  ;;  %v900_v19 = vrot.slane %v720_v58, 3  ;;  %v893_v23 = vsel %vm788_vm0, %v892_v9, %v715_v53  ;;  %v346_v51 = vld [vmem:[%s9237_s13 + $0x138] sm:$0x1]  ;;  %v347_v52 = vld [vmem:[%s9237_s13 + $0x13c] sm:$0x1] }
  0x57   : > { %v883_v22 = vsel %vm794_vm2, %v882_v0, %v881_v16  ;;  %v902_v24 = vrot.slane %v721_v59, 2  ;;  %v904_v25 = vrot.slane %v722_v60, 1  ;;  %v895_v29 = vsel %vm791_vm1, %v894_v11, %v893_v23 }
  0x58   : > { %v885_v28 = vsel %vm797_vm3, %v884_v2, %v883_v22  ;;  %v460_v32 = vpack.c.bf16 %v9371_v1, %v9371_v1  ;;  %v461_v33 = vpack.c.bf16 %v333_v6, %v333_v6  ;;  %v897_v35 = vsel %vm794_vm2, %v896_v13, %v895_v29 }
  0x59   : > { %v887_v34 = vsel %vm800_vm4, %v886_v4, %v885_v28  ;;  %v462_v39 = vpack.c.bf16 %v334_v15, %v334_v15  ;;  %v463_v41 = vpack.c.bf16 %v335_v20, %v335_v20  ;;  %v899_v43 = vsel %vm797_vm3, %v898_v18, %v897_v35 }
  0x5a   : > { %v889_v42 = vsel %vm803_vm5, %v888_v5, %v887_v34  ;;  %v464_v47 = vpack.c.bf16 %v336_v26, %v336_v26  ;;  %v465_v48 = vpack.c.bf16 %v337_v27, %v337_v27  ;;  %v901_v50 = vsel %vm800_vm4, %v900_v19, %v899_v43  ;;  %v8109_v26 = vld [vmem:[%s13306_s1 + $0x8] sm:$0xf] }
  0x5b   : > { %v891_v49 = vsel %vm806_vm6, %v890_v17, %v889_v42  ;;  %v466_v53 = vpack.c.bf16 %v338_v30, %v338_v30  ;;  %v467_v54 = vpack.c.bf16 %v339_v31, %v339_v31  ;;  %v903_v55 = vsel %vm803_vm5, %v902_v24, %v901_v50  ;;  %v8450_v31 = vld [vmem:[%s13306_s1 + $0x10] sm:$0xf0]  ;;  %v349_v42 = vld [vmem:[%s9237_s13 + $0x144] sm:$0x1] }
  0x5c   : > { %v468_v56 = vpack.c.bf16 %v340_v36, %v340_v36  ;;  %v469_v57 = vpack.c.bf16 %v341_v37, %v341_v37  ;;  %v470_v58 = vpack.c.bf16 %v342_v38, %v342_v38  ;;  %v905_v59 = vsel %vm806_vm6, %v904_v25, %v903_v55  ;;  %v348_v36 = vld [vmem:[%s9237_s13 + $0x140] sm:$0x1] }
  0x5d   : > { %v471_v60 = vpack.c.bf16 %v343_v44, %v343_v44  ;;  %v472_v61 = vpack.c.bf16 %v344_v45, %v344_v45  ;;  %v473_v63 = vpack.c.bf16 %v345_v46, %v345_v46  ;;  %v9404_v0 = vpack.c.b16 %v905_v59, %v891_v49  ;;  %v356_v59 = vld [vmem:[%s9237_s13 + $0x160] sm:$0x1] }
  0x5e   : > { %v474_v1 = vpack.c.bf16 %v346_v51, %v346_v51  ;;  %v475_v2 = vpack.c.bf16 %v347_v52, %v347_v52  ;;  %v724_v4 = vunpack.c.l.b16 %v461_v33  ;;  %v725_v5 = vunpack.c.l.b16 %v462_v39 }
  0x5f   : > { %v726_v6 = vunpack.c.l.b16 %v463_v41  ;;  %v727_v8 = vunpack.c.l.b16 %v464_v47  ;;  %v728_v9 = vunpack.c.l.b16 %v465_v48  ;;  %v723_v11 = vunpack.c.l.b16 %v460_v32  ;;  %v350_v47 = vld [vmem:[%s9237_s13 + $0x148] sm:$0x1]  ;;  %v351_v48 = vld [vmem:[%s9237_s13 + $0x14c] sm:$0x1] }
  0x60   : > { %v729_v13 = vunpack.c.l.b16 %v466_v53  ;;  %v730_v15 = vunpack.c.l.b16 %v467_v54  ;;  %v732_v16 = vunpack.c.l.b16 %v469_v57  ;;  %v731_v17 = vunpack.c.l.b16 %v468_v56  ;;  %v352_v53 = vld [vmem:[%s9237_s13 + $0x150] sm:$0x1]  ;;  %v353_v54 = vld [vmem:[%s9237_s13 + $0x154] sm:$0x1]  ;;  %v354_v57 = vld [vmem:[%s9237_s13 + $0x158] sm:$0x1] }
  0x61   : > { %v733_v18 = vunpack.c.l.b16 %v470_v58  ;;  %v734_v19 = vunpack.c.l.b16 %v471_v60  ;;  %v735_v20 = vunpack.c.l.b16 %v472_v61  ;;  %v736_v22 = vunpack.c.l.b16 %v473_v63  ;;  %v355_v58 = vld [vmem:[%s9237_s13 + $0x15c] sm:$0x1] }
  0x62   : > { %8126 = vmatmul.msk.bf16.gmra.mxu0 %vm1058_vm7, %v9404_v0  ;;  %8134 = vmatmul.msk.bf16.gmra.mxu1 %vm1058_vm7, %v9404_v0  ;;  %v737_v23 = vunpack.c.l.b16 %v474_v1  ;;  %v906_v24 = vrot.slane %v724_v4, 7  ;;  %v908_v25 = vrot.slane %v725_v5, 6  ;;  %v738_v27 = vunpack.c.l.b16 %v475_v2  ;;  %v357_v2 = vld [vmem:[%s9237_s13 + $0x164] sm:$0x1]  ;;  %v358_v4 = vld [vmem:[%s9237_s13 + $0x168] sm:$0x1] }
  0x63   : > { %v910_v28 = vrot.slane %v726_v6, 5  ;;  %v912_v29 = vrot.slane %v727_v8, 4  ;;  %v914_v30 = vrot.slane %v728_v9, 3  ;;  %v916_v33 = vrot.slane %v729_v13, 2  ;;  %v359_v5 = vld [vmem:[%s9237_s13 + $0x16c] sm:$0x1] }
  0x64   : > { %v907_v32 = vsel %vm788_vm0, %v906_v24, %v723_v11  ;;  %v920_v34 = vrot.slane %v732_v16, 7  ;;  %v922_v35 = vrot.slane %v733_v18, 6  ;;  %v918_v38 = vrot.slane %v730_v15, 1  ;;  %v360_v13 = vld [vmem:[%s9237_s13 + $0x170] sm:$0x1] }
  0x65   : > { %v909_v37 = vsel %vm791_vm1, %v908_v25, %v907_v32  ;;  %v924_v39 = vrot.slane %v734_v19, 5  ;;  %v926_v41 = vrot.slane %v735_v20, 4  ;;  %v928_v45 = vrot.slane %v736_v22, 3  ;;  %v361_v15 = vld [vmem:[%s9237_s13 + $0x174] sm:$0x1] }
  0x66   : > { %v911_v43 = vsel %vm794_vm2, %v910_v28, %v909_v37  ;;  %v921_v44 = vsel %vm788_vm0, %v920_v34, %v731_v17  ;;  %v930_v46 = vrot.slane %v737_v23, 2  ;;  %v932_v51 = vrot.slane %v738_v27, 1  ;;  %v362_v16 = vld [vmem:[%s9237_s13 + $0x178] sm:$0x1]  ;;  %v363_v20 = vld [vmem:[%s9237_s13 + $0x17c] sm:$0x1] }
  0x67   : > { %v913_v49 = vsel %vm797_vm3, %v912_v29, %v911_v43  ;;  %v923_v50 = vsel %vm791_vm1, %v922_v35, %v921_v44  ;;  %v9426_v52 = vor.u32 %v8450_v31, %v8109_v26  ;;  %v476_v60 = vpack.c.bf16 %v348_v36, %v348_v36 }
  0x68   : > { %v915_v55 = vsel %vm800_vm4, %v914_v30, %v913_v49  ;;  %v925_v56 = vsel %vm794_vm2, %v924_v39, %v923_v50  ;;  %v477_v61 = vpack.c.bf16 %v349_v42, %v349_v42  ;;  %v478_v6 = vpack.c.bf16 %v350_v47, %v350_v47 }
  0x69   : > { %v917_v63 = vsel %vm803_vm5, %v916_v33, %v915_v55  ;;  %v927_v1 = vsel %vm797_vm3, %v926_v41, %v925_v56  ;;  %2151 = vmatpush.bf16.msrb.mxu1 %v9426_v52  ;;  %v479_v8 = vpack.c.bf16 %v351_v48, %v351_v48  ;;  %v480_v17 = vpack.c.bf16 %v352_v53, %v352_v53  ;;  %v364_v55 = vld [vmem:[%s9237_s13 + $0x180] sm:$0x1] }
  0x6a   : > { %v919_v9 = vsel %vm806_vm6, %v918_v38, %v917_v63  ;;  %v929_v11 = vsel %vm800_vm4, %v928_v45, %v927_v1  ;;  %v481_v18 = vpack.c.bf16 %v353_v54, %v353_v54  ;;  %1188 = vmatpush.bf16.msra.mxu2 %v9426_v52  ;;  %v482_v22 = vpack.c.bf16 %v354_v57, %v354_v57 }
  0x6b   : > { %v931_v19 = vsel %vm803_vm5, %v930_v46, %v929_v11  ;;  %v483_v23 = vpack.c.bf16 %v355_v58, %v355_v58  ;;  %v484_v24 = vpack.c.bf16 %v356_v59, %v356_v59  ;;  %v485_v26 = vpack.c.bf16 %v357_v2, %v357_v2  ;;  %3115 = vmatpush.bf16.msra.mxu0 %v9426_v52 }
  0x6c   : > { %v933_v25 = vsel %vm806_vm6, %v932_v51, %v931_v19  ;;  %v486_v27 = vpack.c.bf16 %v358_v4, %v358_v4  ;;  %v487_v28 = vpack.c.bf16 %v359_v5, %v359_v5  ;;  %v488_v30 = vpack.c.bf16 %v360_v13, %v360_v13  ;;  %v366_v4 = vld [vmem:[%s9237_s13 + $0x188] sm:$0x1]  ;;  %v367_v5 = vld [vmem:[%s9237_s13 + $0x18c] sm:$0x1]  ;;  %v368_v13 = vld [vmem:[%s9237_s13 + $0x190] sm:$0x1] }
  0x6d   : > { %3980 = vmatpush.bf16.msra.mxu1 %v9193_v3  ;;  %v9452_v29 = vpack.c.b16 %v933_v25, %v919_v9  ;;  %v489_v31 = vpack.c.bf16 %v361_v15, %v361_v15  ;;  %v490_v32 = vpack.c.bf16 %v362_v16, %v362_v16  ;;  %8139 = vmatmul.msk.bf16.vlgmr.msra.gmra.mxu2 %vm1058_vm7, %v9291_v62  ;;  %v740_v34 = vunpack.c.l.b16 %v477_v61  ;;  %v373_v25 = vld [vmem:[%s9237_s13 + $0x1a4] sm:$0x1] }
  0x6e   : > { %3016 = vmatpush.bf16.msrb.mxu2 %v9193_v3  ;;  %v491_v33 = vpack.c.bf16 %v363_v20, %v363_v20  ;;  %v741_v35 = vunpack.c.l.b16 %v478_v6  ;;  %v742_v36 = vunpack.c.l.b16 %v479_v8  ;;  %v739_v37 = vunpack.c.l.b16 %v476_v60  ;;  %v365_v60 = vld [vmem:[%s9237_s13 + $0x184] sm:$0x1] }
  0x6f   : > { %v743_v38 = vunpack.c.l.b16 %v480_v17  ;;  %v744_v39 = vunpack.c.l.b16 %v481_v18  ;;  %v745_v41 = vunpack.c.l.b16 %v482_v22  ;;  %v746_v3 = vunpack.c.l.b16 %v483_v23  ;;  %v370_v17 = vld [vmem:[%s9237_s13 + $0x198] sm:$0x1]  ;;  %v371_v18 = vld [vmem:[%s9237_s13 + $0x19c] sm:$0x1] }
  0x70   : > { %v748_v42 = vunpack.c.l.b16 %v485_v26  ;;  %v749_v43 = vunpack.c.l.b16 %v486_v27  ;;  %v750_v44 = vunpack.c.l.b16 %v487_v28  ;;  %v747_v62 = vunpack.c.l.b16 %v484_v24  ;;  %v372_v24 = vld [vmem:[%s9237_s13 + $0x1a0] sm:$0x1]  ;;  %v374_v26 = vld [vmem:[%s9237_s13 + $0x1a8] sm:$0x1] }
  0x71   : > { %3981 = vmatpush.bf16.msra.mxu1 %v9215_v10  ;;  %v751_v45 = vunpack.c.l.b16 %v488_v30  ;;  %v752_v46 = vunpack.c.l.b16 %v489_v31  ;;  %v753_v47 = vunpack.c.l.b16 %v490_v32  ;;  %v754_v48 = vunpack.c.l.b16 %v491_v33  ;;  %v375_v32 = vld [vmem:[%s9237_s13 + $0x1ac] sm:$0x1]  ;;  %v376_v33 = vld [vmem:[%s9237_s13 + $0x1b0] sm:$0x1] }
  0x72   : > { %3017 = vmatpush.bf16.msrb.mxu2 %v9215_v10  ;;  %8127 = vmatmul.msk.bf16.gmra.mxu0 %vm1058_vm7, %v9452_v29  ;;  %v934_v49 = vrot.slane %v740_v34, 7  ;;  %v936_v50 = vrot.slane %v741_v35, 6  ;;  %v938_v51 = vrot.slane %v742_v36, 5  ;;  %v940_v10 = vrot.slane %v743_v38, 4  ;;  %v377_v34 = vld [vmem:[%s9237_s13 + $0x1b4] sm:$0x1] }
  0x73   : > { %8135 = vmatmul.msk.bf16.gmra.mxu1 %vm1058_vm7, %v9452_v29  ;;  %v942_v53 = vrot.slane %v744_v39, 3  ;;  %v948_v54 = vrot.slane %v748_v42, 7  ;;  %v950_v57 = vrot.slane %v749_v43, 6  ;;  %v952_v58 = vrot.slane %v750_v44, 5  ;;  %v378_v39 = vld [vmem:[%s9237_s13 + $0x1b8] sm:$0x1] }
  0x74   : > { %v935_v56 = vsel %vm788_vm0, %v934_v49, %v739_v37  ;;  %v954_v59 = vrot.slane %v751_v45, 4  ;;  %v946_v63 = vrot.slane %v746_v3, 1  ;;  %v956_v2 = vrot.slane %v752_v46, 3 }
  0x75   : > { %v937_v61 = vsel %vm791_vm1, %v936_v50, %v935_v56  ;;  %v949_v1 = vsel %vm788_vm0, %v948_v54, %v747_v62  ;;  %v958_v9 = vrot.slane %v753_v47, 2  ;;  %v960_v11 = vrot.slane %v754_v48, 1 }
  0x76   : > { %4029 = vmatpush.bf16.msra.mxu2 %v9204_v7  ;;  %v944_v7 = vrot.slane %v745_v41, 2  ;;  %v939_v6 = vsel %vm794_vm2, %v938_v51, %v937_v61  ;;  %v951_v8 = vsel %vm791_vm1, %v950_v57, %v949_v1  ;;  %v492_v19 = vpack.c.bf16 %v364_v55, %v364_v55  ;;  %v379_v41 = vld [vmem:[%s9237_s13 + $0x1bc] sm:$0x1] }
  0x77   : > { %v941_v15 = vsel %vm797_vm3, %v940_v10, %v939_v6  ;;  %v953_v16 = vsel %vm794_vm2, %v952_v58, %v951_v8  ;;  %v493_v20 = vpack.c.bf16 %v365_v60, %v365_v60  ;;  %v494_v27 = vpack.c.bf16 %v366_v4, %v366_v4 }
  0x78   : > { %v943_v22 = vsel %vm800_vm4, %v942_v53, %v941_v15  ;;  %v955_v23 = vsel %vm797_vm3, %v954_v59, %v953_v16  ;;  %v495_v28 = vpack.c.bf16 %v367_v5, %v367_v5  ;;  %v496_v35 = vpack.c.bf16 %v368_v13, %v368_v13  ;;  %v380_v13 = vld [vmem:[%s9237_s13 + $0x1c0] sm:$0x1] }
  0x79   : > { %v945_v30 = vsel %vm803_vm5, %v944_v7, %v943_v22  ;;  %v957_v31 = vsel %vm800_vm4, %v956_v2, %v955_v23  ;;  %v498_v3 = vpack.c.bf16 %v370_v17, %v370_v17  ;;  %v499_v42 = vpack.c.bf16 %v371_v18, %v371_v18  ;;  %v381_v18 = vld [vmem:[%s9237_s13 + $0x1c4] sm:$0x1] }
  0x7a   : > { %4030 = vmatpush.bf16.msra.mxu2 %v9223_v12  ;;  %v369_v12 = vld [vmem:[%s9237_s13 + $0x194] sm:$0x1]  ;;  %v947_v37 = vsel %vm806_vm6, %v946_v63, %v945_v30  ;;  %v959_v38 = vsel %vm803_vm5, %v958_v9, %v957_v31  ;;  %v500_v44 = vpack.c.bf16 %v372_v24, %v372_v24  ;;  %v501_v62 = vpack.c.bf16 %v373_v25, %v373_v25  ;;  %v382_v24 = vld [vmem:[%s9237_s13 + $0x1c8] sm:$0x1]  ;;  %v383_v30 = vld [vmem:[%s9237_s13 + $0x1cc] sm:$0x1] }
  0x7b   : > { %v497_v36 = vpack.c.bf16 %v369_v12, %v369_v12  ;;  %v961_v43 = vsel %vm806_vm6, %v960_v11, %v959_v38  ;;  %v502_v45 = vpack.c.bf16 %v374_v26, %v374_v26  ;;  %v503_v47 = vpack.c.bf16 %v375_v32, %v375_v32  ;;  %v384_v31 = vld [vmem:[%s9237_s13 + $0x1d0] sm:$0x1] }
  0x7c   : > { %v9495_v46 = vpack.c.b16 %v961_v43, %v947_v37  ;;  %v504_v48 = vpack.c.bf16 %v376_v33, %v376_v33  ;;  %v505_v49 = vpack.c.bf16 %v377_v34, %v377_v34  ;;  %v506_v50 = vpack.c.bf16 %v378_v39, %v378_v39 }
  0x7d   : > { %v507_v51 = vpack.c.bf16 %v379_v41, %v379_v41  ;;  %v756_v10 = vunpack.c.l.b16 %v493_v20  ;;  %v757_v53 = vunpack.c.l.b16 %v494_v27  ;;  %8140 = vmatmul.msk.bf16.gmra.mxu2 %vm1058_vm7, %v9328_v21  ;;  %v755_v7 = vunpack.c.l.b16 %v492_v19  ;;  %v387_v41 = vld [vmem:[%s9237_s13 + $0x1dc] sm:$0x1] }
  0x7e   : > { %v758_v54 = vunpack.c.l.b16 %v495_v28  ;;  %v759_v55 = vunpack.c.l.b16 %v496_v35  ;;  %v760_v56 = vunpack.c.l.b16 %v497_v36  ;;  %v761_v57 = vunpack.c.l.b16 %v498_v3  ;;  %v385_v35 = vld [vmem:[%s9237_s13 + $0x1d4] sm:$0x1]  ;;  %v386_v36 = vld [vmem:[%s9237_s13 + $0x1d8] sm:$0x1]  ;;  %v388_v3 = vld [vmem:[%s9237_s13 + $0x1e0] sm:$0x1] }
  0x7f   : > { %v762_v58 = vunpack.c.l.b16 %v499_v42  ;;  %v764_v59 = vunpack.c.l.b16 %v501_v62  ;;  %v765_v60 = vunpack.c.l.b16 %v502_v45  ;;  %v763_v61 = vunpack.c.l.b16 %v500_v44  ;;  %v389_v42 = vld [vmem:[%s9237_s13 + $0x1e4] sm:$0x1] }
  0x80   : > { %v766_v63 = vunpack.c.l.b16 %v503_v47  ;;  %v767_v1 = vunpack.c.l.b16 %v504_v48  ;;  %v768_v2 = vunpack.c.l.b16 %v505_v49  ;;  %v769_v4 = vunpack.c.l.b16 %v506_v50  ;;  %v390_v47 = vld [vmem:[%s9237_s13 + $0x1e8] sm:$0x1]  ;;  %v391_v48 = vld [vmem:[%s9237_s13 + $0x1ec] sm:$0x1]  ;;  %v392_v49 = vld [vmem:[%s9237_s13 + $0x1f0] sm:$0x1] }
  0x81   : > { %v962_v5 = vrot.slane %v756_v10, 7  ;;  %v964_v6 = vrot.slane %v757_v53, 6  ;;  %v966_v8 = vrot.slane %v758_v54, 5  ;;  %v770_v21 = vunpack.c.l.b16 %v507_v51  ;;  %v394_v54 = vld [vmem:[%s9237_s13 + $0x1f8] sm:$0x1] }
  0x82   : > { %8128 = vmatmul.msk.bf16.gmra.mxu0 %vm1058_vm7, %v9495_v46  ;;  %v968_v9 = vrot.slane %v759_v55, 4  ;;  %v970_v11 = vrot.slane %v760_v56, 3  ;;  %v976_v15 = vrot.slane %v764_v59, 7  ;;  %v978_v16 = vrot.slane %v765_v60, 6 }
  0x83   : > { %8136 = vmatmul.msk.bf16.gmra.mxu1 %vm1058_vm7, %v9495_v46  ;;  %v963_v12 = vsel %vm788_vm0, %v962_v5, %v755_v7  ;;  %v980_v17 = vrot.slane %v766_v63, 5  ;;  %v972_v20 = vrot.slane %v761_v57, 2  ;;  %v974_v22 = vrot.slane %v762_v58, 1  ;;  %v393_v7 = vld [vmem:[%s9237_s13 + $0x1f4] sm:$0x1] }
  0x84   : > { %v965_v19 = vsel %vm791_vm1, %v964_v6, %v963_v12  ;;  %v982_v23 = vrot.slane %v767_v1, 4  ;;  %v977_v26 = vsel %vm788_vm0, %v976_v15, %v763_v61  ;;  %v984_v27 = vrot.slane %v768_v2, 3  ;;  %v395_v58 = vld [vmem:[%s9237_s13 + $0x1fc] sm:$0x1] }
  0x85   : > { %v967_v25 = vsel %vm794_vm2, %v966_v8, %v965_v19  ;;  %v986_v28 = vrot.slane %v769_v4, 2  ;;  %v979_v33 = vsel %vm791_vm1, %v978_v16, %v977_v26  ;;  %v988_v34 = vrot.slane %v770_v21, 1 }
  0x86   : > { %v969_v32 = vsel %vm797_vm3, %v968_v9, %v967_v25  ;;  %v508_v37 = vpack.c.bf16 %v380_v13, %v380_v13  ;;  %v981_v39 = vsel %vm794_vm2, %v980_v17, %v979_v33  ;;  %v509_v43 = vpack.c.bf16 %v381_v18, %v381_v18 }
  0x87   : > { %v971_v38 = vsel %vm800_vm4, %v970_v11, %v969_v32  ;;  %v510_v44 = vpack.c.bf16 %v382_v24, %v382_v24  ;;  %v983_v45 = vsel %vm797_vm3, %v982_v23, %v981_v39  ;;  %v511_v50 = vpack.c.bf16 %v383_v30, %v383_v30 }
  0x88   : > { %v973_v62 = vsel %vm803_vm5, %v972_v20, %v971_v38  ;;  %v512_v51 = vpack.c.bf16 %v384_v31, %v384_v31  ;;  %v985_v53 = vsel %vm800_vm4, %v984_v27, %v983_v45  ;;  %v513_v55 = vpack.c.bf16 %v385_v35, %v385_v35  ;;  %v1280_v45 = vld [vmem:[%s9237_s13 + $0x9] sm:$0x1] }
  0x89   : > { %v975_v10 = vsel %vm806_vm6, %v974_v22, %v973_v62  ;;  %v514_v56 = vpack.c.bf16 %v386_v36, %v386_v36  ;;  %v987_v57 = vsel %vm803_vm5, %v986_v28, %v985_v53  ;;  %v515_v59 = vpack.c.bf16 %v387_v41, %v387_v41  ;;  %v1279_v41 = vld [vmem:[%s9237_s13 + $0x5] sm:$0x1]  ;;  %v1278_v62 = vld [vmem:[%s9237_s13 + $0x1] sm:$0x1] }
  0x8a   : > { %v516_v60 = vpack.c.bf16 %v388_v3, %v388_v3  ;;  %v517_v61 = vpack.c.bf16 %v389_v42, %v389_v42  ;;  %v989_v63 = vsel %vm806_vm6, %v988_v34, %v987_v57  ;;  %v518_v1 = vpack.c.bf16 %v390_v47, %v390_v47 }
  0x8b   : > { %v519_v2 = vpack.c.bf16 %v391_v48, %v391_v48  ;;  %v520_v4 = vpack.c.bf16 %v392_v49, %v392_v49  ;;  %v9533_v5 = vpack.c.b16 %v989_v63, %v975_v10  ;;  %v521_v6 = vpack.c.bf16 %v393_v7, %v393_v7 }
  0x8c   : > { %v522_v8 = vpack.c.bf16 %v394_v54, %v394_v54  ;;  %v772_v21 = vunpack.c.l.b16 %v509_v43  ;;  %v523_v9 = vpack.c.bf16 %v395_v58, %v395_v58  ;;  %v773_v11 = vunpack.c.l.b16 %v510_v44  ;;  %v1283_v54 = vld [vmem:[%s9237_s13 + $0x15] sm:$0x1]  ;;  %v1285_v58 = vld [vmem:[%s9237_s13 + $0x1d] sm:$0x1] }
  0x8d   : > { %v774_v13 = vunpack.c.l.b16 %v511_v50  ;;  %v775_v12 = vunpack.c.l.b16 %v512_v51  ;;  %8141 = vmatmul.msk.bf16.gmra.mxu2 %vm1058_vm7, %v9364_v40  ;;  %v771_v15 = vunpack.c.l.b16 %v508_v37  ;;  %v776_v16 = vunpack.c.l.b16 %v513_v55  ;;  %v1281_v50 = vld [vmem:[%s9237_s13 + $0xd] sm:$0x1]  ;;  %v1282_v51 = vld [vmem:[%s9237_s13 + $0x11] sm:$0x1]  ;;  %v1284_v55 = vld [vmem:[%s9237_s13 + $0x19] sm:$0x1] }
  0x8e   : > { %v777_v17 = vunpack.c.l.b16 %v514_v56  ;;  %v780_v18 = vunpack.c.l.b16 %v517_v61  ;;  %v778_v19 = vunpack.c.l.b16 %v515_v59  ;;  %v781_v20 = vunpack.c.l.b16 %v518_v1  ;;  %v1287_v59 = vld [vmem:[%s9237_s13 + $0x25] sm:$0x1] }
  0x8f   : > { %v782_v22 = vunpack.c.l.b16 %v519_v2  ;;  %v783_v23 = vunpack.c.l.b16 %v520_v4  ;;  %v779_v24 = vunpack.c.l.b16 %v516_v60  ;;  %v784_v25 = vunpack.c.l.b16 %v521_v6  ;;  %v1288_v60 = vld [vmem:[%s9237_s13 + $0x29] sm:$0x1]  ;;  %v1286_v4 = vld [vmem:[%s9237_s13 + $0x21] sm:$0x1]  ;;  %v1289_v6 = vld [vmem:[%s9237_s13 + $0x2d] sm:$0x1] }
  0x90   : > { %v990_v26 = vrot.slane %v772_v21, 7  ;;  %v992_v27 = vrot.slane %v773_v11, 6  ;;  %v785_v28 = vunpack.c.l.b16 %v522_v8  ;;  %v786_v30 = vunpack.c.l.b16 %v523_v9  ;;  %v1290_v8 = vld [vmem:[%s9237_s13 + $0x31] sm:$0x1] }
  0x91   : > { %v994_v31 = vrot.slane %v774_v13, 5  ;;  %v996_v32 = vrot.slane %v775_v12, 4  ;;  %v998_v33 = vrot.slane %v776_v16, 3  ;;  %v1004_v34 = vrot.slane %v780_v18, 7  ;;  %v1291_v13 = vld [vmem:[%s9237_s13 + $0x35] sm:$0x1] }
  0x92   : > { %8129 = vmatmul.msk.bf16.gmra.mxu0 %vm1058_vm7, %v9533_v5  ;;  %v991_v40 = vsel %vm788_vm0, %v990_v26, %v771_v15  ;;  %v1006_v35 = vrot.slane %v781_v20, 6  ;;  %v1000_v37 = vrot.slane %v777_v17, 2  ;;  %v1008_v38 = vrot.slane %v782_v22, 5  ;;  %v1292_v12 = vld [vmem:[%s9237_s13 + $0x39] sm:$0x1] }
  0x93   : > { %8137 = vmatmul.msk.bf16.gmra.mxu1 %vm1058_vm7, %v9533_v5  ;;  %v993_v36 = vsel %vm791_vm1, %v992_v27, %v991_v40  ;;  %v1010_v39 = vrot.slane %v783_v23, 4  ;;  %v1002_v42 = vrot.slane %v778_v19, 1  ;;  %v1005_v43 = vsel %vm788_vm0, %v1004_v34, %v779_v24  ;;  %v1293_v19 = vld [vmem:[%s9237_s13 + $0x3d] sm:$0x1] }
  0x94   : > { %v995_v3 = vsel %vm794_vm2, %v994_v31, %v993_v36  ;;  %v1012_v44 = vrot.slane %v784_v25, 3  ;;  %v1007_v48 = vsel %vm791_vm1, %v1006_v35, %v1005_v43  ;;  %v1014_v49 = vrot.slane %v785_v28, 2 }
  0x95   : > { %v997_v47 = vsel %vm797_vm3, %v996_v32, %v995_v3  ;;  %v1009_v53 = vsel %vm794_vm2, %v1008_v38, %v1007_v48  ;;  %v1016_v7 = vrot.slane %v786_v30, 1  ;;  %v1406_v61 = vpack.c.bf16 %v1278_v62, %v1278_v62 }
  0x96   : > { %v999_v10 = vsel %vm800_vm4, %v998_v33, %v997_v47  ;;  %v1011_v57 = vsel %vm797_vm3, %v1010_v39, %v1009_v53  ;;  %v1407_v63 = vpack.c.bf16 %v1279_v41, %v1279_v41  ;;  %v1408_v21 = vpack.c.bf16 %v1280_v45, %v1280_v45 }
  0x97   : > { %v1001_v56 = vsel %vm803_vm5, %v1000_v37, %v999_v10  ;;  %v1013_v2 = vsel %vm800_vm4, %v1012_v44, %v1011_v57  ;;  %v1409_v9 = vpack.c.bf16 %v1281_v50, %v1281_v50  ;;  %v1410_v15 = vpack.c.bf16 %v1282_v51, %v1282_v51  ;;  %v1294_v57 = vld [vmem:[%s9237_s13 + $0x41] sm:$0x1] }
  0x98   : > { %v1003_v1 = vsel %vm806_vm6, %v1002_v42, %v1001_v56  ;;  %v1015_v11 = vsel %vm803_vm5, %v1014_v49, %v1013_v2  ;;  %v1411_v16 = vpack.c.bf16 %v1283_v54, %v1283_v54  ;;  %v1412_v17 = vpack.c.bf16 %v1284_v55, %v1284_v55  ;;  %v1297_v2 = vld [vmem:[%s9237_s13 + $0x4d] sm:$0x1] }
  0x99   : > { %v1017_v18 = vsel %vm806_vm6, %v1016_v7, %v1015_v11  ;;  %v1413_v20 = vpack.c.bf16 %v1285_v58, %v1285_v58  ;;  %v1415_v22 = vpack.c.bf16 %v1287_v59, %v1287_v59  ;;  %v1416_v23 = vpack.c.bf16 %v1288_v60, %v1288_v60  ;;  %v1295_v58 = vld [vmem:[%s9237_s13 + $0x45] sm:$0x1]  ;;  %v1299_v11 = vld [vmem:[%s9237_s13 + $0x55] sm:$0x1] }
  0x9a   : > { %v9571_v24 = vpack.c.b16 %v1017_v18, %v1003_v1  ;;  %v1414_v25 = vpack.c.bf16 %v1286_v4, %v1286_v4  ;;  %v1417_v26 = vpack.c.bf16 %v1289_v6, %v1289_v6  ;;  %v1418_v27 = vpack.c.bf16 %v1290_v8, %v1290_v8  ;;  %v1296_v1 = vld [vmem:[%s9237_s13 + $0x49] sm:$0x1] }
  0x9b   : > { %v1419_v28 = vpack.c.bf16 %v1291_v13, %v1291_v13  ;;  %v1420_v30 = vpack.c.bf16 %v1292_v12, %v1292_v12  ;;  %v1663_v31 = vunpack.c.l.b16 %v1407_v63  ;;  %v1664_v32 = vunpack.c.l.b16 %v1408_v21 }
  0x9c   : > { %v1421_v40 = vpack.c.bf16 %v1293_v19, %v1293_v19  ;;  %v1665_v33 = vunpack.c.l.b16 %v1409_v9  ;;  %v1666_v34 = vunpack.c.l.b16 %v1410_v15  ;;  %v1667_v35 = vunpack.c.l.b16 %v1411_v16  ;;  %v1298_v9 = vld [vmem:[%s9237_s13 + $0x51] sm:$0x1]  ;;  %v1300_v15 = vld [vmem:[%s9237_s13 + $0x59] sm:$0x1]  ;;  %v1301_v16 = vld [vmem:[%s9237_s13 + $0x5d] sm:$0x1] }
  0x9d   : > { %8142 = vmatmul.msk.bf16.gmra.mxu2 %vm1058_vm7, %v9404_v0  ;;  %v1662_v36 = vunpack.c.l.b16 %v1406_v61  ;;  %v1668_v37 = vunpack.c.l.b16 %v1412_v17  ;;  %v1671_v38 = vunpack.c.l.b16 %v1415_v22  ;;  %v1672_v39 = vunpack.c.l.b16 %v1416_v23  ;;  %v1302_v17 = vld [vmem:[%s9237_s13 + $0x61] sm:$0x1]  ;;  %v1303_v23 = vld [vmem:[%s9237_s13 + $0x65] sm:$0x1] }
  0x9e   : > { %v1669_v41 = vunpack.c.l.b16 %v1413_v20  ;;  %v1670_v3 = vunpack.c.l.b16 %v1414_v25  ;;  %v1673_v42 = vunpack.c.l.b16 %v1417_v26  ;;  %v1674_v43 = vunpack.c.l.b16 %v1418_v27  ;;  %v1304_v25 = vld [vmem:[%s9237_s13 + $0x69] sm:$0x1]  ;;  %v1305_v26 = vld [vmem:[%s9237_s13 + $0x6d] sm:$0x1] }
  0x9f   : > { %v1675_v44 = vunpack.c.l.b16 %v1419_v28  ;;  %v1790_v62 = vrot.slane %v1663_v31, 7  ;;  %v1792_v45 = vrot.slane %v1664_v32, 6  ;;  %v1794_v47 = vrot.slane %v1665_v33, 5  ;;  %v1306_v32 = vld [vmem:[%s9237_s13 + $0x71] sm:$0x1] }
  0xa0   : > { %v1676_v48 = vunpack.c.l.b16 %v1420_v30  ;;  %v1677_v49 = vunpack.c.l.b16 %v1421_v40  ;;  %v1796_v50 = vrot.slane %v1666_v34, 4  ;;  %v1798_v51 = vrot.slane %v1667_v35, 3  ;;  %v1307_v40 = vld [vmem:[%s9237_s13 + $0x75] sm:$0x1] }
  0xa1   : > { %v1791_v0 = vsel %vm788_vm0, %v1790_v62, %v1662_v36  ;;  %v1804_v10 = vrot.slane %v1671_v38, 7  ;;  %v1806_v53 = vrot.slane %v1672_v39, 6  ;;  %v1808_v7 = vrot.slane %v1673_v42, 5  ;;  %v1308_v36 = vld [vmem:[%s9237_s13 + $0x79] sm:$0x1] }
  0xa2   : > { %8130 = vmatmul.msk.bf16.gmra.mxu0 %vm1058_vm7, %v9571_v24  ;;  %v1793_v54 = vsel %vm791_vm1, %v1792_v45, %v1791_v0  ;;  %v1800_v55 = vrot.slane %v1668_v37, 2  ;;  %v1810_v56 = vrot.slane %v1674_v43, 4  ;;  %v1802_v60 = vrot.slane %v1669_v41, 1 }
  0xa3   : > { %8138 = vmatmul.msk.bf16.gmra.mxu1 %vm1058_vm7, %v9571_v24  ;;  %v1795_v59 = vsel %vm794_vm2, %v1794_v47, %v1793_v54  ;;  %v1805_v61 = vsel %vm788_vm0, %v1804_v10, %v1670_v3  ;;  %v1812_v63 = vrot.slane %v1675_v44, 3  ;;  %v1814_v8 = vrot.slane %v1676_v48, 2  ;;  %v1309_v3 = vld [vmem:[%s9237_s13 + $0x7d] sm:$0x1] }
  0xa4   : > { %v1797_v4 = vsel %vm797_vm3, %v1796_v50, %v1795_v59  ;;  %v1807_v6 = vsel %vm791_vm1, %v1806_v53, %v1805_v61  ;;  %v1816_v21 = vrot.slane %v1677_v49, 1  ;;  %v1422_v18 = vpack.c.bf16 %v1294_v57, %v1294_v57 }
  0xa5   : > { %v1799_v13 = vsel %vm800_vm4, %v1798_v51, %v1797_v4  ;;  %v1809_v12 = vsel %vm794_vm2, %v1808_v7, %v1807_v6  ;;  %v1423_v19 = vpack.c.bf16 %v1295_v58, %v1295_v58  ;;  %v1424_v27 = vpack.c.bf16 %v1296_v1, %v1296_v1 }
  0xa6   : > { %v1801_v20 = vsel %vm803_vm5, %v1800_v55, %v1799_v13  ;;  %v1811_v22 = vsel %vm797_vm3, %v1810_v56, %v1809_v12  ;;  %v1425_v28 = vpack.c.bf16 %v1297_v2, %v1297_v2  ;;  %v1426_v33 = vpack.c.bf16 %v1298_v9, %v1298_v9 }
  0xa7   : > { %v1803_v30 = vsel %vm806_vm6, %v1802_v60, %v1801_v20  ;;  %v1813_v31 = vsel %vm800_vm4, %v1812_v63, %v1811_v22  ;;  %v1427_v34 = vpack.c.bf16 %v1299_v11, %v1299_v11  ;;  %v1428_v37 = vpack.c.bf16 %v1300_v15, %v1300_v15 }
  0xa8   : > { %v1815_v35 = vsel %vm803_vm5, %v1814_v8, %v1813_v31  ;;  %v1429_v38 = vpack.c.bf16 %v1301_v16, %v1301_v16  ;;  %v1430_v39 = vpack.c.bf16 %v1302_v17, %v1302_v17  ;;  %v1431_v42 = vpack.c.bf16 %v1303_v23, %v1303_v23  ;;  %v1311_v17 = vld [vmem:[%s9237_s13 + $0x85] sm:$0x1]  ;;  %v1314_v31 = vld [vmem:[%s9237_s13 + $0x91] sm:$0x1] }
  0xa9   : > { %v1817_v41 = vsel %vm806_vm6, %v1816_v21, %v1815_v35  ;;  %v1432_v43 = vpack.c.bf16 %v1304_v25, %v1304_v25  ;;  %v1433_v44 = vpack.c.bf16 %v1305_v26, %v1305_v26  ;;  %v1434_v45 = vpack.c.bf16 %v1306_v32, %v1306_v32  ;;  %v1310_v25 = vld [vmem:[%s9237_s13 + $0x81] sm:$0x1]  ;;  %v1313_v26 = vld [vmem:[%s9237_s13 + $0x8d] sm:$0x1]  ;;  %v1317_v35 = vld [vmem:[%s9237_s13 + $0x9d] sm:$0x1] }
  0xaa   : > { %v2014_v62 = vpack.c.b16 %v1817_v41, %v1803_v30  ;;  %v1435_v47 = vpack.c.bf16 %v1307_v40, %v1307_v40  ;;  %v1679_v48 = vunpack.c.l.b16 %v1423_v19  ;;  %v1436_v49 = vpack.c.bf16 %v1308_v36, %v1308_v36 }
  0xab   : > { %v1680_v50 = vunpack.c.l.b16 %v1424_v27  ;;  %v1681_v51 = vunpack.c.l.b16 %v1425_v28  ;;  %v1682_v0 = vunpack.c.l.b16 %v1426_v33  ;;  %v1437_v10 = vpack.c.bf16 %v1309_v3, %v1309_v3 }
  0xac   : > { %v1678_v53 = vunpack.c.l.b16 %v1422_v18  ;;  %v1683_v7 = vunpack.c.l.b16 %v1427_v34  ;;  %v1684_v54 = vunpack.c.l.b16 %v1428_v37  ;;  %8147 = vmatmul.msk.bf16.vlgmr.msra.gmra.mxu3 %vm1058_vm7, %v2014_v62  ;;  %v1685_v55 = vunpack.c.l.b16 %v1429_v38  ;;  %v1312_v18 = vld [vmem:[%s9237_s13 + $0x89] sm:$0x1]  ;;  %v1316_v34 = vld [vmem:[%s9237_s13 + $0x99] sm:$0x1]  ;;  %v1318_v37 = vld [vmem:[%s9237_s13 + $0xa1] sm:$0x1] }
  0xad   : > { %8143 = vmatmul.msk.bf16.gmra.mxu2 %vm1058_vm7, %v9452_v29  ;;  %v1687_v56 = vunpack.c.l.b16 %v1431_v42  ;;  %v1688_v57 = vunpack.c.l.b16 %v1432_v43  ;;  %v1689_v58 = vunpack.c.l.b16 %v1433_v44  ;;  %4078 = vmatpush.bf16.msra.mxu3 %v9229_v14  ;;  %v1686_v59 = vunpack.c.l.b16 %v1430_v39  ;;  %v1319_v38 = vld [vmem:[%s9237_s13 + $0xa5] sm:$0x1]  ;;  %v1320_v39 = vld [vmem:[%s9237_s13 + $0xa9] sm:$0x1] }
  0xae   : > { %v1690_v60 = vunpack.c.l.b16 %v1434_v45  ;;  %v1818_v61 = vrot.slane %v1679_v48, 7  ;;  %v1820_v63 = vrot.slane %v1680_v50, 6  ;;  %v1691_v1 = vunpack.c.l.b16 %v1435_v47  ;;  %v1322_v45 = vld [vmem:[%s9237_s13 + $0xb1] sm:$0x1]  ;;  %v1323_v47 = vld [vmem:[%s9237_s13 + $0xb5] sm:$0x1] }
  0xaf   : > { %v1692_v2 = vunpack.c.l.b16 %v1436_v49  ;;  %v1822_v4 = vrot.slane %v1681_v51, 5  ;;  %v1824_v6 = vrot.slane %v1682_v0, 4  ;;  %v1693_v8 = vunpack.c.l.b16 %v1437_v10  ;;  %v1324_v51 = vld [vmem:[%s9237_s13 + $0xb9] sm:$0x1] }
  0xb0   : > { %v1819_v29 = vsel %vm788_vm0, %v1818_v61, %v1678_v53  ;;  %v1826_v21 = vrot.slane %v1683_v7, 3  ;;  %v1828_v9 = vrot.slane %v1684_v54, 2  ;;  %v1832_v11 = vrot.slane %v1687_v56, 7  ;;  %v1325_v54 = vld [vmem:[%s9237_s13 + $0xbd] sm:$0x1] }
  0xb1   : > { %v1821_v14 = vsel %vm791_vm1, %v1820_v63, %v1819_v29  ;;  %v1834_v13 = vrot.slane %v1688_v57, 6  ;;  %v1836_v12 = vrot.slane %v1689_v58, 5  ;;  %v1838_v16 = vrot.slane %v1690_v60, 4  ;;  %4079 = vmatpush.bf16.msra.mxu3 %v9426_v52  ;;  %v1315_v52 = vld [vmem:[%s9237_s13 + $0x95] sm:$0x1] }
  0xb2   : > { %8155 = vmatmul.msk.bf16.vlgmr.msrb.gmra.mxu0 %vm1058_vm7, %v2014_v62  ;;  %v1823_v15 = vsel %vm794_vm2, %v1822_v4, %v1821_v14  ;;  %v1830_v20 = vrot.slane %v1685_v55, 1  ;;  %v1833_v22 = vsel %vm788_vm0, %v1832_v11, %v1686_v59  ;;  %v1840_v23 = vrot.slane %v1691_v1, 3 }
  0xb3   : > { %8163 = vmatmul.msk.bf16.vlgmr.msrb.gmra.mxu1 %vm1058_vm7, %v2014_v62  ;;  %v1825_v19 = vsel %vm797_vm3, %v1824_v6, %v1823_v15  ;;  %v1835_v28 = vsel %vm791_vm1, %v1834_v13, %v1833_v22  ;;  %v1842_v30 = vrot.slane %v1692_v2, 2  ;;  %v1844_v33 = vrot.slane %v1693_v8, 1  ;;  %v1321_v62 = vld [vmem:[%s9237_s13 + $0xad] sm:$0x1] }
  0xb4   : > { %v1827_v27 = vsel %vm800_vm4, %v1826_v21, %v1825_v19  ;;  %v1837_v40 = vsel %vm794_vm2, %v1836_v12, %v1835_v28  ;;  %v1438_v41 = vpack.c.bf16 %v1310_v25, %v1310_v25  ;;  %v1439_v3 = vpack.c.bf16 %v1311_v17, %v1311_v17 }
  0xb5   : > { %v1829_v32 = vsel %vm803_vm5, %v1828_v9, %v1827_v27  ;;  %v1839_v36 = vsel %vm797_vm3, %v1838_v16, %v1837_v40  ;;  %v1440_v42 = vpack.c.bf16 %v1312_v18, %v1312_v18  ;;  %v1441_v48 = vpack.c.bf16 %v1313_v26, %v1313_v26 }
  0xb6   : > { %v1831_v43 = vsel %vm806_vm6, %v1830_v20, %v1829_v32  ;;  %v1841_v44 = vsel %vm800_vm4, %v1840_v23, %v1839_v36  ;;  %v1442_v49 = vpack.c.bf16 %v1314_v31, %v1314_v31  ;;  %v1443_v0 = vpack.c.bf16 %v1315_v52, %v1315_v52 }
  0xb7   : > { %v1843_v50 = vsel %vm803_vm5, %v1842_v30, %v1841_v44  ;;  %v1444_v10 = vpack.c.bf16 %v1316_v34, %v1316_v34  ;;  %v1445_v53 = vpack.c.bf16 %v1317_v35, %v1317_v35  ;;  %v1446_v55 = vpack.c.bf16 %v1318_v37, %v1318_v37  ;;  %v1326_v37 = vld [vmem:[%s9237_s13 + $0xc1] sm:$0x1] }
  0xb8   : > { %v1845_v7 = vsel %vm806_vm6, %v1844_v33, %v1843_v50  ;;  %v1447_v56 = vpack.c.bf16 %v1319_v38, %v1319_v38  ;;  %v1448_v57 = vpack.c.bf16 %v1320_v39, %v1320_v39  ;;  %v1449_v59 = vpack.c.bf16 %v1321_v62, %v1321_v62  ;;  %v1327_v38 = vld [vmem:[%s9237_s13 + $0xc5] sm:$0x1]  ;;  %v1332_v50 = vld [vmem:[%s9237_s13 + $0xd9] sm:$0x1] }
  0xb9   : > { %v2015_v58 = vpack.c.b16 %v1845_v7, %v1831_v43  ;;  %v1450_v60 = vpack.c.bf16 %v1322_v45, %v1322_v45  ;;  %v1451_v61 = vpack.c.bf16 %v1323_v47, %v1323_v47  ;;  %v1452_v63 = vpack.c.bf16 %v1324_v51, %v1324_v51  ;;  %v1329_v43 = vld [vmem:[%s9237_s13 + $0xcd] sm:$0x1]  ;;  %v1330_v47 = vld [vmem:[%s9237_s13 + $0xd1] sm:$0x1]  ;;  %v1335_v51 = vld [vmem:[%s9237_s13 + $0xe5] sm:$0x1] }
  0xba   : > { %v1695_v1 = vunpack.c.l.b16 %v1439_v3  ;;  %v1696_v2 = vunpack.c.l.b16 %v1440_v42  ;;  %v1697_v4 = vunpack.c.l.b16 %v1441_v48  ;;  %v1453_v6 = vpack.c.bf16 %v1325_v54, %v1325_v54  ;;  %v1328_v42 = vld [vmem:[%s9237_s13 + $0xc9] sm:$0x1]  ;;  %v1331_v48 = vld [vmem:[%s9237_s13 + $0xd5] sm:$0x1]  ;;  %v1333_v54 = vld [vmem:[%s9237_s13 + $0xdd] sm:$0x1] }
  0xbb   : > { %v1694_v8 = vunpack.c.l.b16 %v1438_v41  ;;  %v1698_v29 = vunpack.c.l.b16 %v1442_v49  ;;  %v1699_v21 = vunpack.c.l.b16 %v1443_v0  ;;  %v1700_v9 = vunpack.c.l.b16 %v1444_v10  ;;  %v1336_v0 = vld [vmem:[%s9237_s13 + $0xe9] sm:$0x1] }
  0xbc   : > { %8148 = vmatmul.msk.bf16.gmra.mxu3 %vm1058_vm7, %v2015_v58  ;;  %v1701_v14 = vunpack.c.l.b16 %v1445_v53  ;;  %v1703_v11 = vunpack.c.l.b16 %v1447_v56  ;;  %v1704_v13 = vunpack.c.l.b16 %v1448_v57  ;;  %v1702_v12 = vunpack.c.l.b16 %v1446_v55  ;;  %v1337_v55 = vld [vmem:[%s9237_s13 + $0xed] sm:$0x1]  ;;  %v1338_v56 = vld [vmem:[%s9237_s13 + $0xf1] sm:$0x1] }
  0xbd   : > { %8144 = vmatmul.msk.bf16.gmra.mxu2 %vm1058_vm7, %v9495_v46  ;;  %v1705_v15 = vunpack.c.l.b16 %v1449_v59  ;;  %v1706_v16 = vunpack.c.l.b16 %v1450_v60  ;;  %v1846_v17 = vrot.slane %v1695_v1, 7  ;;  %v1707_v18 = vunpack.c.l.b16 %v1451_v61  ;;  %v1334_v60 = vld [vmem:[%s9237_s13 + $0xe1] sm:$0x1]  ;;  %v1339_v61 = vld [vmem:[%s9237_s13 + $0xf5] sm:$0x1] }
  0xbe   : > { %v1708_v19 = vunpack.c.l.b16 %v1452_v63  ;;  %v1848_v20 = vrot.slane %v1696_v2, 6  ;;  %v1850_v22 = vrot.slane %v1697_v4, 5  ;;  %v1709_v23 = vunpack.c.l.b16 %v1453_v6  ;;  %v1340_v6 = vld [vmem:[%s9237_s13 + $0xf9] sm:$0x1] }
  0xbf   : > { %v1847_v25 = vsel %vm788_vm0, %v1846_v17, %v1694_v8  ;;  %v1852_v26 = vrot.slane %v1698_v29, 4  ;;  %v1854_v46 = vrot.slane %v1699_v21, 3  ;;  %v1856_v28 = vrot.slane %v1700_v9, 2  ;;  %v1341_v8 = vld [vmem:[%s9237_s13 + $0xfd] sm:$0x1] }
  0xc0   : > { %v1849_v27 = vsel %vm791_vm1, %v1848_v20, %v1847_v25  ;;  %v1860_v30 = vrot.slane %v1703_v11, 7  ;;  %v1862_v31 = vrot.slane %v1704_v13, 6  ;;  %v1864_v32 = vrot.slane %v1705_v15, 5 }
  0xc1   : > { %v1851_v52 = vsel %vm794_vm2, %v1850_v22, %v1849_v27  ;;  %v1866_v40 = vrot.slane %v1706_v16, 4  ;;  %v1858_v34 = vrot.slane %v1701_v14, 1  ;;  %v1868_v36 = vrot.slane %v1707_v18, 3 }
  0xc2   : > { %8156 = vmatmul.msk.bf16.gmra.mxu0 %vm1058_vm7, %v2015_v58  ;;  %v1853_v33 = vsel %vm797_vm3, %v1852_v26, %v1851_v52  ;;  %v1861_v35 = vsel %vm788_vm0, %v1860_v30, %v1702_v12  ;;  %v1870_v3 = vrot.slane %v1708_v19, 2  ;;  %v1872_v45 = vrot.slane %v1709_v23, 1 }
  0xc3   : > { %8164 = vmatmul.msk.bf16.gmra.mxu1 %vm1058_vm7, %v2015_v58  ;;  %v1855_v39 = vsel %vm800_vm4, %v1854_v46, %v1853_v33  ;;  %v1863_v41 = vsel %vm791_vm1, %v1862_v31, %v1861_v35  ;;  %v1454_v10 = vpack.c.bf16 %v1326_v37, %v1326_v37  ;;  %v1455_v57 = vpack.c.bf16 %v1327_v38, %v1327_v38 }
  0xc4   : > { %v1857_v44 = vsel %vm803_vm5, %v1856_v28, %v1855_v39  ;;  %v1865_v62 = vsel %vm794_vm2, %v1864_v32, %v1863_v41  ;;  %v1456_v58 = vpack.c.bf16 %v1328_v42, %v1328_v42  ;;  %v1457_v63 = vpack.c.bf16 %v1329_v43, %v1329_v43 }
  0xc5   : > { %v1867_v49 = vsel %vm797_vm3, %v1866_v40, %v1865_v62  ;;  %v1859_v53 = vsel %vm806_vm6, %v1858_v34, %v1857_v44  ;;  %v1458_v1 = vpack.c.bf16 %v1330_v47, %v1330_v47  ;;  %v1459_v2 = vpack.c.bf16 %v1331_v48, %v1331_v48 }
  0xc6   : > { %v1869_v7 = vsel %vm800_vm4, %v1868_v36, %v1867_v49  ;;  %v1460_v29 = vpack.c.bf16 %v1332_v50, %v1332_v50  ;;  %v1463_v21 = vpack.c.bf16 %v1335_v51, %v1335_v51  ;;  %v1464_v9 = vpack.c.bf16 %v1336_v0, %v1336_v0  ;;  %v1342_v51 = vld [vmem:[%s9237_s13 + $0x101] sm:$0x1]  ;;  %v1343_v0 = vld [vmem:[%s9237_s13 + $0x105] sm:$0x1] }
  0xc7   : > { %v1871_v59 = vsel %vm803_vm5, %v1870_v3, %v1869_v7  ;;  %v1461_v11 = vpack.c.bf16 %v1333_v54, %v1333_v54  ;;  %v1465_v13 = vpack.c.bf16 %v1337_v55, %v1337_v55  ;;  %v1466_v12 = vpack.c.bf16 %v1338_v56, %v1338_v56  ;;  %v1344_v55 = vld [vmem:[%s9237_s13 + $0x109] sm:$0x1]  ;;  %v1345_v56 = vld [vmem:[%s9237_s13 + $0x10d] sm:$0x1] }
  0xc8   : > { %v1873_v4 = vsel %vm806_vm6, %v1872_v45, %v1871_v59  ;;  %v1462_v15 = vpack.c.bf16 %v1334_v60, %v1334_v60  ;;  %v1467_v16 = vpack.c.bf16 %v1339_v61, %v1339_v61  ;;  %v1711_v17 = vunpack.c.l.b16 %v1455_v57  ;;  %v9688_v45 = vpop.f32.mrf.mxu0  ;;  %v1346_v60 = vld [vmem:[%s9237_s13 + $0x111] sm:$0x1]  ;;  %v1347_v61 = vld [vmem:[%s9237_s13 + $0x115] sm:$0x1] }
  0xc9   : > { %v2016_v14 = vpack.c.b16 %v1873_v4, %v1859_v53  ;;  %v1712_v18 = vunpack.c.l.b16 %v1456_v58  ;;  %v1468_v19 = vpack.c.bf16 %v1340_v6, %v1340_v6  ;;  %v1469_v20 = vpack.c.bf16 %v1341_v8, %v1341_v8  ;;  %13313 = vst [vmem:[#allocation6_spill] sm:$0xff] %v9688_v45  ;;  %v1349_v4 = vld [vmem:[%s9237_s13 + $0x11d] sm:$0x1]  ;;  %v1351_v6 = vld [vmem:[%s9237_s13 + $0x125] sm:$0x1] }
  0xca   : > { %v1713_v22 = vunpack.c.l.b16 %v1457_v63  ;;  %v1714_v23 = vunpack.c.l.b16 %v1458_v1  ;;  %v1710_v25 = vunpack.c.l.b16 %v1454_v10  ;;  %v1715_v26 = vunpack.c.l.b16 %v1459_v2  ;;  %v9694_v10 = vpop.f32.mrf.mxu1  ;;  %v1348_v2 = vld [vmem:[%s9237_s13 + $0x119] sm:$0x1] }
  0xcb   : > { %v1719_v46 = vunpack.c.l.b16 %v1463_v21  ;;  %v1720_v27 = vunpack.c.l.b16 %v1464_v9  ;;  %v1716_v28 = vunpack.c.l.b16 %v1460_v29  ;;  %v1717_v30 = vunpack.c.l.b16 %v1461_v11  ;;  %13314 = vst [vmem:[#allocation7_spill] sm:$0xff] %v9694_v10  ;;  %v1352_v9 = vld [vmem:[%s9237_s13 + $0x129] sm:$0x1]  ;;  %v1354_v11 = vld [vmem:[%s9237_s13 + $0x131] sm:$0x1] }
  0xcc   : > { %8149 = vmatmul.msk.bf16.gmra.mxu3 %vm1058_vm7, %v2016_v14  ;;  %v1721_v31 = vunpack.c.l.b16 %v1465_v13  ;;  %v1722_v52 = vunpack.c.l.b16 %v1466_v12  ;;  %v1718_v32 = vunpack.c.l.b16 %v1462_v15  ;;  %v1723_v40 = vunpack.c.l.b16 %v1467_v16  ;;  %v1350_v16 = vld [vmem:[%s9237_s13 + $0x121] sm:$0x1] }
  0xcd   : > { %8145 = vmatmul.msk.bf16.gmra.mxu2 %vm1058_vm7, %v9533_v5  ;;  %v1874_v33 = vrot.slane %v1711_v17, 7  ;;  %v1876_v34 = vrot.slane %v1712_v18, 6  ;;  %v1724_v35 = vunpack.c.l.b16 %v1468_v19  ;;  %v1725_v36 = vunpack.c.l.b16 %v1469_v20  ;;  %v1355_v17 = vld [vmem:[%s9237_s13 + $0x135] sm:$0x1]  ;;  %v1356_v18 = vld [vmem:[%s9237_s13 + $0x139] sm:$0x1] }
  0xce   : > { %v1878_v37 = vrot.slane %v1713_v22, 5  ;;  %v1880_v38 = vrot.slane %v1714_v23, 4  ;;  %v1882_v39 = vrot.slane %v1715_v26, 3  ;;  %v1888_v41 = vrot.slane %v1719_v46, 7 }
  0xcf   : > { %v1875_v5 = vsel %vm788_vm0, %v1874_v33, %v1710_v25  ;;  %v1890_v3 = vrot.slane %v1720_v27, 6  ;;  %v1884_v43 = vrot.slane %v1716_v28, 2  ;;  %v1892_v44 = vrot.slane %v1721_v31, 5  ;;  %v1357_v25 = vld [vmem:[%s9237_s13 + $0x13d] sm:$0x1] }
  0xd0   : > { %v1877_v42 = vsel %vm791_vm1, %v1876_v34, %v1875_v5  ;;  %v1894_v62 = vrot.slane %v1722_v52, 4  ;;  %v1886_v48 = vrot.slane %v1717_v30, 1  ;;  %v1889_v49 = vsel %vm788_vm0, %v1888_v41, %v1718_v32  ;;  %v9723_v5 = vpop.f32.mrf.mxu0 }
  0xd1   : > { %v1879_v47 = vsel %vm794_vm2, %v1878_v37, %v1877_v42  ;;  %v1896_v50 = vrot.slane %v1723_v40, 3  ;;  %v1891_v7 = vsel %vm791_vm1, %v1890_v3, %v1889_v49  ;;  %v1898_v54 = vrot.slane %v1724_v35, 2  ;;  %13315 = vst [vmem:[#allocation8_spill] sm:$0xff] %v9723_v5 }
  0xd2   : > { %8157 = vmatmul.msk.bf16.gmra.mxu0 %vm1058_vm7, %v2016_v14  ;;  %v1881_v53 = vsel %vm797_vm3, %v1880_v38, %v1879_v47  ;;  %v1893_v58 = vsel %vm794_vm2, %v1892_v44, %v1891_v7  ;;  %v1900_v59 = vrot.slane %v1725_v36, 1  ;;  %v1470_v8 = vpack.c.bf16 %v1342_v51, %v1342_v51 }
  0xd3   : > { %8165 = vmatmul.msk.bf16.gmra.mxu1 %vm1058_vm7, %v2016_v14  ;;  %v1883_v57 = vsel %vm800_vm4, %v1882_v39, %v1881_v53  ;;  %v1895_v1 = vsel %vm797_vm3, %v1894_v62, %v1893_v58  ;;  %v1353_v14 = vld [vmem:[%s9237_s13 + $0x12d] sm:$0x1]  ;;  %v1471_v13 = vpack.c.bf16 %v1343_v0, %v1343_v0  ;;  %v1472_v12 = vpack.c.bf16 %v1344_v55, %v1344_v55 }
  0xd4   : > { %v1885_v63 = vsel %vm803_vm5, %v1884_v43, %v1883_v57  ;;  %v1897_v21 = vsel %vm800_vm4, %v1896_v50, %v1895_v1  ;;  %v1473_v19 = vpack.c.bf16 %v1345_v56, %v1345_v56  ;;  %v1474_v20 = vpack.c.bf16 %v1346_v60, %v1346_v60  ;;  %v9725_v43 = vpop.f32.mrf.mxu1 }
  0xd5   : > { %v1887_v29 = vsel %vm806_vm6, %v1886_v48, %v1885_v63  ;;  %v1899_v15 = vsel %vm803_vm5, %v1898_v54, %v1897_v21  ;;  %v1475_v22 = vpack.c.bf16 %v1347_v61, %v1347_v61  ;;  %v1476_v26 = vpack.c.bf16 %v1348_v2, %v1348_v2  ;;  %13316 = vst [vmem:[#allocation9_spill] sm:$0xff] %v9725_v43 }
  0xd6   : > { %v1901_v23 = vsel %vm806_vm6, %v1900_v59, %v1899_v15  ;;  %v1477_v46 = vpack.c.bf16 %v1349_v4, %v1349_v4  ;;  %v1479_v27 = vpack.c.bf16 %v1351_v6, %v1351_v6  ;;  %v1480_v30 = vpack.c.bf16 %v1352_v9, %v1352_v9 }
  0xd7   : > { %v2017_v28 = vpack.c.b16 %v1901_v23, %v1887_v29  ;;  %v1481_v31 = vpack.c.bf16 %v1353_v14, %v1353_v14  ;;  %v1482_v52 = vpack.c.bf16 %v1354_v11, %v1354_v11  ;;  %v1478_v32 = vpack.c.bf16 %v1350_v16, %v1350_v16  ;;  %v1358_v14 = vld [vmem:[%s9237_s13 + $0x141] sm:$0x1]  ;;  %v1360_v11 = vld [vmem:[%s9237_s13 + $0x149] sm:$0x1]  ;;  %v1361_v16 = vld [vmem:[%s9237_s13 + $0x14d] sm:$0x1] }
  0xd8   : > { %v1483_v40 = vpack.c.bf16 %v1355_v17, %v1355_v17  ;;  %v1484_v33 = vpack.c.bf16 %v1356_v18, %v1356_v18  ;;  %v1727_v34 = vunpack.c.l.b16 %v1471_v13  ;;  %v1485_v35 = vpack.c.bf16 %v1357_v25, %v1357_v25  ;;  %v1362_v17 = vld [vmem:[%s9237_s13 + $0x151] sm:$0x1]  ;;  %v1367_v23 = vld [vmem:[%s9237_s13 + $0x165] sm:$0x1]  ;;  %v9747_v25 = vpop.f32.mrf.mxu0 }
  0xd9   : > { %v1728_v36 = vunpack.c.l.b16 %v1472_v12  ;;  %v1729_v37 = vunpack.c.l.b16 %v1473_v19  ;;  %v1730_v38 = vunpack.c.l.b16 %v1474_v20  ;;  %v1726_v39 = vunpack.c.l.b16 %v1470_v8  ;;  %v1359_v8 = vld [vmem:[%s9237_s13 + $0x145] sm:$0x1]  ;;  %v1363_v20 = vld [vmem:[%s9237_s13 + $0x155] sm:$0x1]  ;;  %13317 = vst [vmem:[#allocation10_spill] sm:$0xff] %v9747_v25 }
  0xda   : > { %v1731_v41 = vunpack.c.l.b16 %v1475_v22  ;;  %v1732_v3 = vunpack.c.l.b16 %v1476_v26  ;;  %v1735_v42 = vunpack.c.l.b16 %v1479_v27  ;;  %v1733_v44 = vunpack.c.l.b16 %v1477_v46  ;;  %v1366_v22 = vld [vmem:[%s9237_s13 + $0x161] sm:$0x1]  ;;  %v1368_v27 = vld [vmem:[%s9237_s13 + $0x169] sm:$0x1] }
  0xdb   : > { %v1736_v62 = vunpack.c.l.b16 %v1480_v30  ;;  %v1737_v47 = vunpack.c.l.b16 %v1481_v31  ;;  %v1738_v48 = vunpack.c.l.b16 %v1482_v52  ;;  %v1734_v49 = vunpack.c.l.b16 %v1478_v32  ;;  %v1370_v30 = vld [vmem:[%s9237_s13 + $0x171] sm:$0x1] }
  0xdc   : > { %8150 = vmatmul.msk.bf16.gmra.mxu3 %vm1058_vm7, %v2017_v28  ;;  %v1739_v50 = vunpack.c.l.b16 %v1483_v40  ;;  %v1740_v51 = vunpack.c.l.b16 %v1484_v33  ;;  %v1902_v0 = vrot.slane %v1727_v34, 7  ;;  %v1741_v53 = vunpack.c.l.b16 %v1485_v35  ;;  %v9754_v52 = vpop.f32.mrf.mxu1  ;;  %v1364_v40 = vld [vmem:[%s9237_s13 + $0x159] sm:$0x1]  ;;  %v1365_v33 = vld [vmem:[%s9237_s13 + $0x15d] sm:$0x1] }
  0xdd   : > { %8146 = vmatmul.msk.bf16.gmra.mxu2 %vm1058_vm7, %v9571_v24  ;;  %v1904_v24 = vrot.slane %v1728_v36, 6  ;;  %v1906_v7 = vrot.slane %v1729_v37, 5  ;;  %v1908_v54 = vrot.slane %v1730_v38, 4  ;;  %v1910_v56 = vrot.slane %v1731_v41, 3  ;;  %13318 = vst [vmem:[#allocation11_spill] sm:$0xff] %v9754_v52 }
  0xde   : > { %v1903_v55 = vsel %vm788_vm0, %v1902_v0, %v1726_v39  ;;  %v1912_v57 = vrot.slane %v1732_v3, 2  ;;  %v1916_v58 = vrot.slane %v1735_v42, 7  ;;  %v1918_v60 = vrot.slane %v1736_v62, 6  ;;  %v1371_v34 = vld [vmem:[%s9237_s13 + $0x175] sm:$0x1] }
  0xdf   : > { %v1905_v59 = vsel %vm791_vm1, %v1904_v24, %v1903_v55  ;;  %v1920_v61 = vrot.slane %v1737_v47, 5  ;;  %v1922_v63 = vrot.slane %v1738_v48, 4  ;;  %v1914_v2 = vrot.slane %v1733_v44, 1  ;;  %v1372_v39 = vld [vmem:[%s9237_s13 + $0x179] sm:$0x1] }
  0xe0   : > { %v1907_v1 = vsel %vm794_vm2, %v1906_v7, %v1905_v59  ;;  %v1917_v4 = vsel %vm788_vm0, %v1916_v58, %v1734_v49  ;;  %v1924_v6 = vrot.slane %v1739_v50, 3  ;;  %v1926_v9 = vrot.slane %v1740_v51, 2  ;;  %v1373_v62 = vld [vmem:[%s9237_s13 + $0x17d] sm:$0x1] }
  0xe1   : > { %v1909_v29 = vsel %vm797_vm3, %v1908_v54, %v1907_v1  ;;  %v1919_v21 = vsel %vm791_vm1, %v1918_v60, %v1917_v4  ;;  %v1928_v15 = vrot.slane %v1741_v53, 1  ;;  %v1486_v31 = vpack.c.bf16 %v1358_v14, %v1358_v14 }
  0xe2   : > { %8158 = vmatmul.msk.bf16.gmra.mxu0 %vm1058_vm7, %v2017_v28  ;;  %v1911_v13 = vsel %vm800_vm4, %v1910_v56, %v1909_v29  ;;  %v1921_v12 = vsel %vm794_vm2, %v1920_v61, %v1919_v21  ;;  %v1487_v35 = vpack.c.bf16 %v1359_v8, %v1359_v8  ;;  %v1488_v36 = vpack.c.bf16 %v1360_v11, %v1360_v11  ;;  %v9764_v11 = vpop.f32.mrf.mxu0 }
  0xe3   : > { %8166 = vmatmul.msk.bf16.gmra.mxu1 %vm1058_vm7, %v2017_v28  ;;  %v1913_v18 = vsel %vm803_vm5, %v1912_v57, %v1911_v13  ;;  %v1923_v19 = vsel %vm797_vm3, %v1922_v63, %v1921_v12  ;;  %v1369_v28 = vld [vmem:[%s9237_s13 + $0x16d] sm:$0x1]  ;;  %v1489_v37 = vpack.c.bf16 %v1361_v16, %v1361_v16  ;;  %v1490_v41 = vpack.c.bf16 %v1362_v17, %v1362_v17 }
  0xe4   : > { %v1915_v26 = vsel %vm806_vm6, %v1914_v2, %v1913_v18  ;;  %v1925_v46 = vsel %vm800_vm4, %v1924_v6, %v1923_v19  ;;  %v1491_v3 = vpack.c.bf16 %v1363_v20, %v1363_v20  ;;  %v1495_v42 = vpack.c.bf16 %v1367_v23, %v1367_v23  ;;  %13319 = vst [vmem:[#allocation12_spill] sm:$0xff] %v9764_v11  ;;  %v9768_v17 = vpop.f32.mrf.mxu1 }
  0xe5   : > { %v1927_v32 = vsel %vm803_vm5, %v1926_v9, %v1925_v46  ;;  %v1496_v47 = vpack.c.bf16 %v1368_v27, %v1368_v27  ;;  %v1497_v48 = vpack.c.bf16 %v1369_v28, %v1369_v28  ;;  %v1498_v49 = vpack.c.bf16 %v1370_v30, %v1370_v30  ;;  %13320 = vst [vmem:[#allocation13_spill] sm:$0xff] %v9768_v17 }
  0xe6   : > { %v1929_v38 = vsel %vm806_vm6, %v1928_v15, %v1927_v32  ;;  %v1492_v50 = vpack.c.bf16 %v1364_v40, %v1364_v40  ;;  %v1493_v51 = vpack.c.bf16 %v1365_v33, %v1365_v33  ;;  %v1494_v0 = vpack.c.bf16 %v1366_v22, %v1366_v22  ;;  %v1375_v40 = vld [vmem:[%s9237_s13 + $0x185] sm:$0x1]  ;;  %v1376_v33 = vld [vmem:[%s9237_s13 + $0x189] sm:$0x1] }
  0xe7   : > { %v2018_v44 = vpack.c.b16 %v1929_v38, %v1915_v26  ;;  %v1499_v53 = vpack.c.bf16 %v1371_v34, %v1371_v34  ;;  %v1500_v24 = vpack.c.bf16 %v1372_v39, %v1372_v39  ;;  %v1743_v7 = vunpack.c.l.b16 %v1487_v35  ;;  %v1377_v38 = vld [vmem:[%s9237_s13 + $0x18d] sm:$0x1] }
  0xe8   : > { %v1744_v54 = vunpack.c.l.b16 %v1488_v36  ;;  %v1745_v55 = vunpack.c.l.b16 %v1489_v37  ;;  %v1501_v56 = vpack.c.bf16 %v1373_v62, %v1373_v62  ;;  %v1746_v57 = vunpack.c.l.b16 %v1490_v41  ;;  %v1374_v37 = vld [vmem:[%s9237_s13 + $0x181] sm:$0x1] }
  0xe9   : > { %v1747_v58 = vunpack.c.l.b16 %v1491_v3  ;;  %v1751_v59 = vunpack.c.l.b16 %v1495_v42  ;;  %v1742_v60 = vunpack.c.l.b16 %v1486_v31  ;;  %v1752_v61 = vunpack.c.l.b16 %v1496_v47  ;;  %v1378_v3 = vld [vmem:[%s9237_s13 + $0x191] sm:$0x1]  ;;  %v1379_v42 = vld [vmem:[%s9237_s13 + $0x195] sm:$0x1] }
  0xea   : > { %v1753_v63 = vunpack.c.l.b16 %v1497_v48  ;;  %v1754_v1 = vunpack.c.l.b16 %v1498_v49  ;;  %v1748_v2 = vunpack.c.l.b16 %v1492_v50  ;;  %v1749_v4 = vunpack.c.l.b16 %v1493_v51  ;;  %v1383_v48 = vld [vmem:[%s9237_s13 + $0x1a5] sm:$0x1]  ;;  %v1384_v49 = vld [vmem:[%s9237_s13 + $0x1a9] sm:$0x1]  ;;  %v1385_v50 = vld [vmem:[%s9237_s13 + $0x1ad] sm:$0x1] }
  0xeb   : > { %v1750_v6 = vunpack.c.l.b16 %v1494_v0  ;;  %v1755_v8 = vunpack.c.l.b16 %v1499_v53  ;;  %v1756_v29 = vunpack.c.l.b16 %v1500_v24  ;;  %v1930_v21 = vrot.slane %v1743_v7, 7  ;;  %v1380_v24 = vld [vmem:[%s9237_s13 + $0x199] sm:$0x1]  ;;  %v1381_v7 = vld [vmem:[%s9237_s13 + $0x19d] sm:$0x1] }
  0xec   : > { %8151 = vmatmul.msk.bf16.gmra.mxu3 %vm1058_vm7, %v2018_v44  ;;  %v1932_v9 = vrot.slane %v1744_v54, 6  ;;  %v1934_v14 = vrot.slane %v1745_v55, 5  ;;  %v1757_v13 = vunpack.c.l.b16 %v1501_v56  ;;  %v1936_v12 = vrot.slane %v1746_v57, 4  ;;  %v1386_v54 = vld [vmem:[%s9237_s13 + $0x1b1] sm:$0x1] }
  0xed   : > { %v1938_v15 = vrot.slane %v1747_v58, 3  ;;  %v1944_v16 = vrot.slane %v1751_v59, 7  ;;  %v1931_v18 = vsel %vm788_vm0, %v1930_v21, %v1742_v60  ;;  %v1946_v19 = vrot.slane %v1752_v61, 6  ;;  %v1387_v58 = vld [vmem:[%s9237_s13 + $0x1b5] sm:$0x1] }
  0xee   : > { %v1948_v20 = vrot.slane %v1753_v63, 5  ;;  %v1950_v22 = vrot.slane %v1754_v1, 4  ;;  %v1933_v23 = vsel %vm791_vm1, %v1932_v9, %v1931_v18  ;;  %v1940_v26 = vrot.slane %v1748_v2, 2  ;;  %v1388_v1 = vld [vmem:[%s9237_s13 + $0x1b9] sm:$0x1] }
  0xef   : > { %v1945_v46 = vsel %vm788_vm0, %v1944_v16, %v1750_v6  ;;  %v1952_v27 = vrot.slane %v1755_v8, 3  ;;  %v1935_v28 = vsel %vm794_vm2, %v1934_v14, %v1933_v23  ;;  %v1942_v30 = vrot.slane %v1749_v4, 1  ;;  %v1389_v2 = vld [vmem:[%s9237_s13 + $0x1bd] sm:$0x1] }
  0xf0   : > { %v1947_v31 = vsel %vm791_vm1, %v1946_v19, %v1945_v46  ;;  %v1954_v32 = vrot.slane %v1756_v29, 2  ;;  %v1937_v34 = vsel %vm797_vm3, %v1936_v12, %v1935_v28  ;;  %v1956_v36 = vrot.slane %v1757_v13, 1  ;;  %v9800_v29 = vpop.f32.mrf.mxu0  ;;  %v9802_v12 = vpop.f32.mrf.mxu1 }
  0xf1   : > { %v1949_v35 = vsel %vm794_vm2, %v1948_v20, %v1947_v31  ;;  %v1939_v39 = vsel %vm800_vm4, %v1938_v15, %v1937_v34  ;;  %v1503_v51 = vpack.c.bf16 %v1375_v40, %v1375_v40  ;;  %v1504_v55 = vpack.c.bf16 %v1376_v33, %v1376_v33  ;;  %13321 = vst [vmem:[#allocation14_spill] sm:$0xff] %v9800_v29 }
  0xf2   : > { %8159 = vmatmul.msk.bf16.gmra.mxu0 %vm1058_vm7, %v2018_v44  ;;  %v1951_v41 = vsel %vm797_vm3, %v1950_v22, %v1949_v35  ;;  %v1941_v62 = vsel %vm803_vm5, %v1940_v26, %v1939_v39  ;;  %v1505_v56 = vpack.c.bf16 %v1377_v38, %v1377_v38  ;;  %v1502_v59 = vpack.c.bf16 %v1374_v37, %v1374_v37 }
  0xf3   : > { %8167 = vmatmul.msk.bf16.gmra.mxu1 %vm1058_vm7, %v2018_v44  ;;  %v1382_v44 = vld [vmem:[%s9237_s13 + $0x1a1] sm:$0x1]  ;;  %v1953_v47 = vsel %vm800_vm4, %v1952_v27, %v1951_v41  ;;  %v1943_v0 = vsel %vm806_vm6, %v1942_v30, %v1941_v62  ;;  %v1506_v60 = vpack.c.bf16 %v1378_v3, %v1378_v3  ;;  %v1507_v61 = vpack.c.bf16 %v1379_v42, %v1379_v42 }
  0xf4   : > { %v1955_v53 = vsel %vm803_vm5, %v1954_v32, %v1953_v47  ;;  %v1511_v4 = vpack.c.bf16 %v1383_v48, %v1383_v48  ;;  %v1512_v6 = vpack.c.bf16 %v1384_v49, %v1384_v49  ;;  %v1513_v8 = vpack.c.bf16 %v1385_v50, %v1385_v50  ;;  %13322 = vst [vmem:[#allocation15_spill] sm:$0xff] %v9802_v12 }
  0xf5   : > { %v1957_v57 = vsel %vm806_vm6, %v1956_v36, %v1955_v53  ;;  %v1508_v21 = vpack.c.bf16 %v1380_v24, %v1380_v24  ;;  %v1509_v9 = vpack.c.bf16 %v1381_v7, %v1381_v7  ;;  %v1510_v14 = vpack.c.bf16 %v1382_v44, %v1382_v44  ;;  %v1390_v7 = vld [vmem:[%s9237_s13 + $0x1c1] sm:$0x1] }
  0xf6   : > { %v2019_v63 = vpack.c.b16 %v1957_v57, %v1943_v0  ;;  %v1514_v13 = vpack.c.bf16 %v1386_v54, %v1386_v54  ;;  %v1515_v15 = vpack.c.bf16 %v1387_v58, %v1387_v58  ;;  %v1759_v16 = vunpack.c.l.b16 %v1503_v51  ;;  %v1391_v54 = vld [vmem:[%s9237_s13 + $0x1c5] sm:$0x1] }
  0xf7   : > { %v1760_v18 = vunpack.c.l.b16 %v1504_v55  ;;  %v1761_v19 = vunpack.c.l.b16 %v1505_v56  ;;  %v1516_v20 = vpack.c.bf16 %v1388_v1, %v1388_v1  ;;  %v1517_v22 = vpack.c.bf16 %v1389_v2, %v1389_v2 }
  0xf8   : > { %v1762_v23 = vunpack.c.l.b16 %v1506_v60  ;;  %v1763_v26 = vunpack.c.l.b16 %v1507_v61  ;;  %v1758_v46 = vunpack.c.l.b16 %v1502_v59  ;;  %v1767_v27 = vunpack.c.l.b16 %v1511_v4  ;;  %v9813_v55 = vpop.f32.mrf.mxu0  ;;  %v1392_v59 = vld [vmem:[%s9237_s13 + $0x1c9] sm:$0x1]  ;;  %v1393_v60 = vld [vmem:[%s9237_s13 + $0x1cd] sm:$0x1]  ;;  %v9819_v61 = vpop.f32.mrf.mxu1  ;;  %v1394_v4 = vld [vmem:[%s9237_s13 + $0x1d1] sm:$0x1] }
  0xf9   : > { %v1768_v28 = vunpack.c.l.b16 %v1512_v6  ;;  %v1769_v30 = vunpack.c.l.b16 %v1513_v8  ;;  %v1764_v31 = vunpack.c.l.b16 %v1508_v21  ;;  %v1765_v32 = vunpack.c.l.b16 %v1509_v9  ;;  %13323 = vst [vmem:[#allocation16_spill] sm:$0xff] %v9813_v55  ;;  %v1395_v6 = vld [vmem:[%s9237_s13 + $0x1d5] sm:$0x1]  ;;  %v1396_v9 = vld [vmem:[%s9237_s13 + $0x1d9] sm:$0x1] }
  0xfa   : > { %v1766_v40 = vunpack.c.l.b16 %v1510_v14  ;;  %v1770_v33 = vunpack.c.l.b16 %v1514_v13  ;;  %v1771_v34 = vunpack.c.l.b16 %v1515_v15  ;;  %v1958_v35 = vrot.slane %v1759_v16, 7  ;;  %13324 = vst [vmem:[#allocation17_spill] sm:$0xff] %v9819_v61  ;;  %v1399_v14 = vld [vmem:[%s9237_s13 + $0x1e5] sm:$0x1]  ;;  %v1400_v13 = vld [vmem:[%s9237_s13 + $0x1e9] sm:$0x1] }
  0xfb   : > { %v1960_v36 = vrot.slane %v1760_v18, 6  ;;  %v1962_v37 = vrot.slane %v1761_v19, 5  ;;  %v1772_v38 = vunpack.c.l.b16 %v1516_v20  ;;  %v1773_v39 = vunpack.c.l.b16 %v1517_v22  ;;  %v1397_v19 = vld [vmem:[%s9237_s13 + $0x1dd] sm:$0x1]  ;;  %v1401_v20 = vld [vmem:[%s9237_s13 + $0x1ed] sm:$0x1] }
  0xfc   : > { %8152 = vmatmul.msk.bf16.gmra.mxu3 %vm1058_vm7, %v2019_v63  ;;  %v1964_v41 = vrot.slane %v1762_v23, 4  ;;  %v1966_v3 = vrot.slane %v1763_v26, 3  ;;  %v1959_v42 = vsel %vm788_vm0, %v1958_v35, %v1758_v46  ;;  %v1972_v44 = vrot.slane %v1767_v27, 7  ;;  %v1402_v22 = vld [vmem:[%s9237_s13 + $0x1f1] sm:$0x1] }
  0xfd   : > { %v1974_v62 = vrot.slane %v1768_v28, 6  ;;  %v1976_v47 = vrot.slane %v1769_v30, 5  ;;  %v1961_v48 = vsel %vm791_vm1, %v1960_v36, %v1959_v42  ;;  %v1968_v49 = vrot.slane %v1764_v31, 2  ;;  %v1398_v27 = vld [vmem:[%s9237_s13 + $0x1e1] sm:$0x1] }
  0xfe   : > { %v1978_v50 = vrot.slane %v1770_v33, 4  ;;  %v1963_v51 = vsel %vm794_vm2, %v1962_v37, %v1961_v48  ;;  %v1970_v0 = vrot.slane %v1765_v32, 1  ;;  %v1973_v53 = vsel %vm788_vm0, %v1972_v44, %v1766_v40  ;;  %v1403_v28 = vld [vmem:[%s9237_s13 + $0x1f5] sm:$0x1]  ;;  %v1404_v33 = vld [vmem:[%s9237_s13 + $0x1f9] sm:$0x1] }
  0xff   : > { %v1980_v24 = vrot.slane %v1771_v34, 3  ;;  %v1965_v56 = vsel %vm797_vm3, %v1964_v41, %v1963_v51  ;;  %v1975_v57 = vsel %vm791_vm1, %v1974_v62, %v1973_v53  ;;  %v1982_v58 = vrot.slane %v1772_v38, 2  ;;  %v1405_v34 = vld [vmem:[%s9237_s13 + $0x1fd] sm:$0x1] }
 0x100   : > { %v1977_v1 = vsel %vm794_vm2, %v1976_v47, %v1975_v57  ;;  %v1984_v2 = vrot.slane %v1773_v39, 1  ;;  %v1518_v15 = vpack.c.bf16 %v1390_v7, %v1390_v7  ;;  %v1519_v23 = vpack.c.bf16 %v1391_v54, %v1391_v54  ;;  %v9842_v54 = vpop.f32.mrf.mxu0 }
 0x101   : > { %v1979_v21 = vsel %vm797_vm3, %v1978_v50, %v1977_v1  ;;  %v1520_v26 = vpack.c.bf16 %v1392_v59, %v1392_v59  ;;  %v1521_v30 = vpack.c.bf16 %v1393_v60, %v1393_v60  ;;  %v1522_v31 = vpack.c.bf16 %v1394_v4, %v1394_v4  ;;  %13325 = vst [vmem:[#allocation18_spill] sm:$0xff] %v9842_v54  ;;  %v9844_v60 = vpop.f32.mrf.mxu1 }
 0x102   : > { %8160 = vmatmul.msk.bf16.gmra.mxu0 %vm1058_vm7, %v2019_v63  ;;  %v1981_v18 = vsel %vm800_vm4, %v1980_v24, %v1979_v21  ;;  %v1523_v32 = vpack.c.bf16 %v1395_v6, %v1395_v6  ;;  %v1524_v35 = vpack.c.bf16 %v1396_v9, %v1396_v9  ;;  %v1527_v36 = vpack.c.bf16 %v1399_v14, %v1399_v14 }
 0x103   : > { %8168 = vmatmul.msk.bf16.gmra.mxu1 %vm1058_vm7, %v2019_v63  ;;  %v1967_v63 = vsel %vm800_vm4, %v1966_v3, %v1965_v56  ;;  %v1983_v46 = vsel %vm803_vm5, %v1982_v58, %v1981_v18  ;;  %v1528_v37 = vpack.c.bf16 %v1400_v13, %v1400_v13  ;;  %v1525_v39 = vpack.c.bf16 %v1397_v19, %v1397_v19 }
 0x104   : > { %v1969_v8 = vsel %vm803_vm5, %v1968_v49, %v1967_v63  ;;  %v1985_v40 = vsel %vm806_vm6, %v1984_v2, %v1983_v46  ;;  %v1529_v41 = vpack.c.bf16 %v1401_v20, %v1401_v20  ;;  %v1530_v3 = vpack.c.bf16 %v1402_v22, %v1402_v22  ;;  %13326 = vst [vmem:[#allocation19_spill] sm:$0xff] %v9844_v60 }
 0x105   : > { %v1971_v16 = vsel %vm806_vm6, %v1970_v0, %v1969_v8  ;;  %v1526_v42 = vpack.c.bf16 %v1398_v27, %v1398_v27  ;;  %v1531_v44 = vpack.c.bf16 %v1403_v28, %v1403_v28  ;;  %v1775_v62 = vunpack.c.l.b16 %v1519_v23  ;;  %v2242_v28 = vld [vmem:[%s9237_s13 + $0x2] sm:$0x1] }
 0x106   : > { %v2020_v38 = vpack.c.b16 %v1985_v40, %v1971_v16  ;;  %v1776_v47 = vunpack.c.l.b16 %v1520_v26  ;;  %v1532_v48 = vpack.c.bf16 %v1404_v33, %v1404_v33  ;;  %v1533_v49 = vpack.c.bf16 %v1405_v34, %v1405_v34  ;;  %v2244_v33 = vld [vmem:[%s9237_s13 + $0xa] sm:$0x1]  ;;  %v2245_v34 = vld [vmem:[%s9237_s13 + $0xe] sm:$0x1] }
 0x107   : > { %v1777_v50 = vunpack.c.l.b16 %v1521_v30  ;;  %v1778_v51 = vunpack.c.l.b16 %v1522_v31  ;;  %v1774_v0 = vunpack.c.l.b16 %v1518_v15  ;;  %v1779_v53 = vunpack.c.l.b16 %v1523_v32  ;;  %v2243_v30 = vld [vmem:[%s9237_s13 + $0x6] sm:$0x1] }
 0x108   : > { %v1783_v24 = vunpack.c.l.b16 %v1527_v36  ;;  %v1784_v7 = vunpack.c.l.b16 %v1528_v37  ;;  %v1780_v56 = vunpack.c.l.b16 %v1524_v35  ;;  %v1781_v57 = vunpack.c.l.b16 %v1525_v39  ;;  %v2247_v39 = vld [vmem:[%s9237_s13 + $0x16] sm:$0x1] }
 0x109   : > { %v1785_v58 = vunpack.c.l.b16 %v1529_v41  ;;  %v1786_v59 = vunpack.c.l.b16 %v1530_v3  ;;  %v1782_v63 = vunpack.c.l.b16 %v1526_v42  ;;  %v1787_v1 = vunpack.c.l.b16 %v1531_v44  ;;  %v2248_v42 = vld [vmem:[%s9237_s13 + $0x1a] sm:$0x1]  ;;  %v2249_v44 = vld [vmem:[%s9237_s13 + $0x1e] sm:$0x1] }
 0x10a   : > { %v1986_v2 = vrot.slane %v1775_v62, 7  ;;  %v1988_v4 = vrot.slane %v1776_v47, 6  ;;  %v1788_v6 = vunpack.c.l.b16 %v1532_v48  ;;  %v1789_v8 = vunpack.c.l.b16 %v1533_v49  ;;  %v2251_v62 = vld [vmem:[%s9237_s13 + $0x26] sm:$0x1] }
 0x10b   : > { %v1990_v21 = vrot.slane %v1777_v50, 5  ;;  %v1992_v9 = vrot.slane %v1778_v51, 4  ;;  %v1994_v13 = vrot.slane %v1779_v53, 3  ;;  %v2000_v15 = vrot.slane %v1783_v24, 7  ;;  %v2252_v50 = vld [vmem:[%s9237_s13 + $0x2a] sm:$0x1] }
 0x10c   : > { %8153 = vmatmul.msk.bf16.gmra.mxu3 %vm1058_vm7, %v2020_v38  ;;  %v1987_v14 = vsel %vm788_vm0, %v1986_v2, %v1774_v0  ;;  %v2002_v16 = vrot.slane %v1784_v7, 6  ;;  %v1996_v19 = vrot.slane %v1780_v56, 2  ;;  %v2004_v20 = vrot.slane %v1785_v58, 5  ;;  %v2253_v51 = vld [vmem:[%s9237_s13 + $0x2e] sm:$0x1]  ;;  %v9872_v7 = vpop.f32.mrf.mxu0 }
 0x10d   : > { %v1989_v18 = vsel %vm791_vm1, %v1988_v4, %v1987_v14  ;;  %v2006_v22 = vrot.slane %v1786_v59, 4  ;;  %v1998_v26 = vrot.slane %v1781_v57, 1  ;;  %v2001_v46 = vsel %vm788_vm0, %v2000_v15, %v1782_v63  ;;  %v2254_v0 = vld [vmem:[%s9237_s13 + $0x32] sm:$0x1]  ;;  %13327 = vst [vmem:[#allocation20_spill] sm:$0xff] %v9872_v7  ;;  %v9878_v4 = vpop.f32.mrf.mxu1 }
 0x10e   : > { %v1991_v23 = vsel %vm794_vm2, %v1990_v21, %v1989_v18  ;;  %v2008_v27 = vrot.slane %v1787_v1, 3  ;;  %v2003_v32 = vsel %vm791_vm1, %v2002_v16, %v2001_v46  ;;  %v2010_v40 = vrot.slane %v1788_v6, 2  ;;  %v2250_v57 = vld [vmem:[%s9237_s13 + $0x22] sm:$0x1]  ;;  %v2255_v58 = vld [vmem:[%s9237_s13 + $0x36] sm:$0x1] }
 0x10f   : > { %v1993_v31 = vsel %vm797_vm3, %v1992_v9, %v1991_v23  ;;  %v2005_v36 = vsel %vm794_vm2, %v2004_v20, %v2003_v32  ;;  %v2012_v37 = vrot.slane %v1789_v8, 1  ;;  %v2370_v47 = vpack.c.bf16 %v2242_v28, %v2242_v28  ;;  %v2256_v59 = vld [vmem:[%s9237_s13 + $0x3a] sm:$0x1]  ;;  %13328 = vst [vmem:[#allocation21_spill] sm:$0xff] %v9878_v4  ;;  %v2257_v8 = vld [vmem:[%s9237_s13 + $0x3e] sm:$0x1] }
 0x110   : > { %v1995_v35 = vsel %vm800_vm4, %v1994_v13, %v1993_v31  ;;  %v2007_v3 = vsel %vm797_vm3, %v2006_v22, %v2005_v36  ;;  %v2371_v53 = vpack.c.bf16 %v2243_v30, %v2243_v30  ;;  %v2372_v24 = vpack.c.bf16 %v2244_v33, %v2244_v33 }
 0x111   : > { %v1997_v41 = vsel %vm803_vm5, %v1996_v19, %v1995_v35  ;;  %v2009_v49 = vsel %vm800_vm4, %v2008_v27, %v2007_v3  ;;  %v2373_v63 = vpack.c.bf16 %v2245_v34, %v2245_v34  ;;  %v2375_v2 = vpack.c.bf16 %v2247_v39, %v2247_v39 }
 0x112   : > { %8161 = vmatmul.msk.bf16.gmra.mxu0 %vm1058_vm7, %v2020_v38  ;;  %v1999_v48 = vsel %vm806_vm6, %v1998_v26, %v1997_v41  ;;  %v2011_v56 = vsel %vm803_vm5, %v2010_v40, %v2009_v49  ;;  %v2376_v21 = vpack.c.bf16 %v2248_v42, %v2248_v42  ;;  %v2377_v9 = vpack.c.bf16 %v2249_v44, %v2249_v44 }
 0x113   : > { %8169 = vmatmul.msk.bf16.gmra.mxu1 %vm1058_vm7, %v2020_v38  ;;  %v2246_v38 = vld [vmem:[%s9237_s13 + $0x12] sm:$0x1]  ;;  %v2013_v6 = vsel %vm806_vm6, %v2012_v37, %v2011_v56  ;;  %v2379_v14 = vpack.c.bf16 %v2251_v62, %v2251_v62  ;;  %v2380_v15 = vpack.c.bf16 %v2252_v50, %v2252_v50  ;;  %v2381_v16 = vpack.c.bf16 %v2253_v51, %v2253_v51 }
 0x114   : > { %v2374_v1 = vpack.c.bf16 %v2246_v38, %v2246_v38  ;;  %v2021_v13 = vpack.c.b16 %v2013_v6, %v1999_v48  ;;  %v2382_v18 = vpack.c.bf16 %v2254_v0, %v2254_v0  ;;  %v2378_v19 = vpack.c.bf16 %v2250_v57, %v2250_v57  ;;  %v9886_v51 = vpop.f32.mrf.mxu0 }
 0x115   : > { %v2383_v20 = vpack.c.bf16 %v2255_v58, %v2255_v58  ;;  %v2384_v22 = vpack.c.bf16 %v2256_v59, %v2256_v59  ;;  %v2627_v23 = vunpack.c.l.b16 %v2371_v53  ;;  %v2385_v26 = vpack.c.bf16 %v2257_v8, %v2257_v8  ;;  %13329 = vst [vmem:[#allocation22_spill] sm:$0xff] %v9886_v51  ;;  %v9889_v57 = vpop.f32.mrf.mxu1 }
 0x116   : > { %v2628_v46 = vunpack.c.l.b16 %v2372_v24  ;;  %v2629_v27 = vunpack.c.l.b16 %v2373_v63  ;;  %v2630_v28 = vunpack.c.l.b16 %v2374_v1  ;;  %v2626_v30 = vunpack.c.l.b16 %v2370_v47  ;;  %13330 = vst [vmem:[#allocation23_spill] sm:$0xff] %v9889_v57 }
 0x117   : > { %v2631_v31 = vunpack.c.l.b16 %v2375_v2  ;;  %v2632_v32 = vunpack.c.l.b16 %v2376_v21  ;;  %v2635_v40 = vunpack.c.l.b16 %v2379_v14  ;;  %v2633_v33 = vunpack.c.l.b16 %v2377_v9 }
 0x118   : > { %v2636_v34 = vunpack.c.l.b16 %v2380_v15  ;;  %v2637_v35 = vunpack.c.l.b16 %v2381_v16  ;;  %v2638_v36 = vunpack.c.l.b16 %v2382_v18  ;;  %v2634_v37 = vunpack.c.l.b16 %v2378_v19  ;;  %v2259_v15 = vld [vmem:[%s9237_s13 + $0x46] sm:$0x1]  ;;  %v2260_v19 = vld [vmem:[%s9237_s13 + $0x4a] sm:$0x1] }
 0x119   : > { %v2639_v38 = vunpack.c.l.b16 %v2383_v20  ;;  %v2640_v39 = vunpack.c.l.b16 %v2384_v22  ;;  %v2754_v41 = vrot.slane %v2627_v23, 7  ;;  %v2641_v3 = vunpack.c.l.b16 %v2385_v26  ;;  %v2261_v20 = vld [vmem:[%s9237_s13 + $0x4e] sm:$0x1]  ;;  %v2262_v22 = vld [vmem:[%s9237_s13 + $0x52] sm:$0x1] }
 0x11a   : > { %v2756_v42 = vrot.slane %v2628_v46, 6  ;;  %v2758_v44 = vrot.slane %v2629_v27, 5  ;;  %v2760_v62 = vrot.slane %v2630_v28, 4  ;;  %v2762_v48 = vrot.slane %v2631_v31, 3  ;;  %v2267_v23 = vld [vmem:[%s9237_s13 + $0x66] sm:$0x1] }
 0x11b   : > { %v2755_v47 = vsel %vm788_vm0, %v2754_v41, %v2626_v30  ;;  %v2764_v49 = vrot.slane %v2632_v32, 2  ;;  %v2768_v50 = vrot.slane %v2635_v40, 7  ;;  %v2770_v53 = vrot.slane %v2636_v34, 6  ;;  %v2263_v27 = vld [vmem:[%s9237_s13 + $0x56] sm:$0x1] }
 0x11c   : > { %8154 = vmatmul.msk.bf16.gmra.mxu3 %vm1058_vm7, %v2021_v13  ;;  %v2757_v0 = vsel %vm791_vm1, %v2756_v42, %v2755_v47  ;;  %v2772_v24 = vrot.slane %v2637_v35, 5  ;;  %v2774_v56 = vrot.slane %v2638_v36, 4  ;;  %v2766_v59 = vrot.slane %v2633_v33, 1  ;;  %v2264_v28 = vld [vmem:[%s9237_s13 + $0x5a] sm:$0x1] }
 0x11d   : > { %v2759_v58 = vsel %vm794_vm2, %v2758_v44, %v2757_v0  ;;  %v2769_v63 = vsel %vm788_vm0, %v2768_v50, %v2634_v37  ;;  %v2776_v1 = vrot.slane %v2639_v38, 3  ;;  %v2778_v8 = vrot.slane %v2640_v39, 2  ;;  %v2265_v30 = vld [vmem:[%s9237_s13 + $0x5e] sm:$0x1]  ;;  %v2268_v32 = vld [vmem:[%s9237_s13 + $0x6a] sm:$0x1] }
 0x11e   : > { %v2761_v2 = vsel %vm797_vm3, %v2760_v62, %v2759_v58  ;;  %v2771_v6 = vsel %vm791_vm1, %v2770_v53, %v2769_v63  ;;  %v2780_v14 = vrot.slane %v2641_v3, 1  ;;  %v2269_v40 = vld [vmem:[%s9237_s13 + $0x6e] sm:$0x1]  ;;  %v2270_v33 = vld [vmem:[%s9237_s13 + $0x72] sm:$0x1]  ;;  %v2387_v35 = vpack.c.bf16 %v2259_v15, %v2259_v15 }
 0x11f   : > { %v2763_v21 = vsel %vm800_vm4, %v2762_v48, %v2761_v2  ;;  %v2773_v9 = vsel %vm794_vm2, %v2772_v24, %v2771_v6  ;;  %v2266_v37 = vld [vmem:[%s9237_s13 + $0x62] sm:$0x1]  ;;  %v2271_v38 = vld [vmem:[%s9237_s13 + $0x76] sm:$0x1]  ;;  %v2272_v39 = vld [vmem:[%s9237_s13 + $0x7a] sm:$0x1]  ;;  %v2388_v41 = vpack.c.bf16 %v2260_v19, %v2260_v19  ;;  %v2389_v3 = vpack.c.bf16 %v2261_v20, %v2261_v20  ;;  %v9923_v2 = vpop.f32.mrf.mxu1 }
 0x120   : > { %v2765_v16 = vsel %vm803_vm5, %v2764_v49, %v2763_v21  ;;  %v2775_v18 = vsel %vm797_vm3, %v2774_v56, %v2773_v9  ;;  %v2390_v42 = vpack.c.bf16 %v2262_v22, %v2262_v22  ;;  %v2273_v62 = vld [vmem:[%s9237_s13 + $0x7e] sm:$0x1]  ;;  %v2391_v47 = vpack.c.bf16 %v2263_v27, %v2263_v27  ;;  %v9919_v56 = vpop.f32.mrf.mxu0  ;;  %13332 = vst [vmem:[#allocation25_spill] sm:$0xff] %v9923_v2 }
 0x121   : > { %v2767_v26 = vsel %vm806_vm6, %v2766_v59, %v2765_v16  ;;  %v2777_v46 = vsel %vm800_vm4, %v2776_v1, %v2775_v18  ;;  %v2392_v48 = vpack.c.bf16 %v2264_v28, %v2264_v28  ;;  %v2393_v49 = vpack.c.bf16 %v2265_v30, %v2265_v30  ;;  %13331 = vst [vmem:[#allocation24_spill] sm:$0xff] %v9919_v56 }
 0x122   : > { %8162 = vmatmul.msk.bf16.gmra.mxu0 %vm1058_vm7, %v2021_v13  ;;  %v2779_v31 = vsel %vm803_vm5, %v2778_v8, %v2777_v46  ;;  %v2395_v50 = vpack.c.bf16 %v2267_v23, %v2267_v23  ;;  %v2396_v0 = vpack.c.bf16 %v2268_v32, %v2268_v32  ;;  %v2397_v53 = vpack.c.bf16 %v2269_v40, %v2269_v40 }
 0x123   : > { %8170 = vmatmul.msk.bf16.gmra.mxu1 %vm1058_vm7, %v2021_v13  ;;  %v2258_v13 = vld [vmem:[%s9237_s13 + $0x42] sm:$0x1]  ;;  %v2781_v36 = vsel %vm806_vm6, %v2780_v14, %v2779_v31  ;;  %v2398_v24 = vpack.c.bf16 %v2270_v33, %v2270_v33  ;;  %v2394_v58 = vpack.c.bf16 %v2266_v37, %v2266_v37  ;;  %v2399_v59 = vpack.c.bf16 %v2271_v38, %v2271_v38 }
 0x124   : > { %v2386_v34 = vpack.c.bf16 %v2258_v13, %v2258_v13  ;;  %v2978_v44 = vpack.c.b16 %v2781_v36, %v2767_v26  ;;  %v2400_v63 = vpack.c.bf16 %v2272_v39, %v2272_v39  ;;  %v2643_v1 = vunpack.c.l.b16 %v2387_v35  ;;  %v3207_v36 = vld [vmem:[%s9237_s13 + $0x7] sm:$0x1] }
 0x125   : > { %v2401_v6 = vpack.c.bf16 %v2273_v62, %v2273_v62  ;;  %v2644_v8 = vunpack.c.l.b16 %v2388_v41  ;;  %v2645_v21 = vunpack.c.l.b16 %v2389_v3  ;;  %v2646_v9 = vunpack.c.l.b16 %v2390_v42  ;;  %v3206_v3 = vld [vmem:[%s9237_s13 + $0x3] sm:$0x1] }
 0x126   : > { %8171 = vmatmul.msk.bf16.vlgmr.msrb.gmra.mxu2 %vm1058_vm7, %v2978_v44  ;;  %v2642_v14 = vunpack.c.l.b16 %v2386_v34  ;;  %v2647_v13 = vunpack.c.l.b16 %v2391_v47  ;;  %v2648_v15 = vunpack.c.l.b16 %v2392_v48  ;;  %v2649_v16 = vunpack.c.l.b16 %v2393_v49  ;;  %v3208_v48 = vld [vmem:[%s9237_s13 + $0xb] sm:$0x1]  ;;  %v3209_v49 = vld [vmem:[%s9237_s13 + $0xf] sm:$0x1] }
 0x127   : > { %v2651_v18 = vunpack.c.l.b16 %v2395_v50  ;;  %v2652_v19 = vunpack.c.l.b16 %v2396_v0  ;;  %v2653_v20 = vunpack.c.l.b16 %v2397_v53  ;;  %v2654_v22 = vunpack.c.l.b16 %v2398_v24 }
 0x128   : > { %v2650_v23 = vunpack.c.l.b16 %v2394_v58  ;;  %v2655_v26 = vunpack.c.l.b16 %v2399_v59  ;;  %v2656_v46 = vunpack.c.l.b16 %v2400_v63  ;;  %v2782_v27 = vrot.slane %v2643_v1, 7  ;;  %v3210_v58 = vld [vmem:[%s9237_s13 + $0x13] sm:$0x1]  ;;  %v3211_v59 = vld [vmem:[%s9237_s13 + $0x17] sm:$0x1]  ;;  %v9938_v63 = vpop.f32.mrf.mxu0 }
 0x129   : > { %v2657_v28 = vunpack.c.l.b16 %v2401_v6  ;;  %v2784_v30 = vrot.slane %v2644_v8, 6  ;;  %v2786_v31 = vrot.slane %v2645_v21, 5  ;;  %v2788_v32 = vrot.slane %v2646_v9, 4  ;;  %13333 = vst [vmem:[#allocation26_spill] sm:$0xff] %v9938_v63  ;;  %v3212_v8 = vld [vmem:[%s9237_s13 + $0x1b] sm:$0x1] }
 0x12a   : > { %v2783_v40 = vsel %vm788_vm0, %v2782_v27, %v2642_v14  ;;  %v2790_v33 = vrot.slane %v2647_v13, 3  ;;  %v2792_v34 = vrot.slane %v2648_v15, 2  ;;  %v2796_v35 = vrot.slane %v2651_v18, 7  ;;  %v3213_v21 = vld [vmem:[%s9237_s13 + $0x1f] sm:$0x1]  ;;  %v9945_v15 = vpop.f32.mrf.mxu1 }
 0x12b   : > { %v2785_v37 = vsel %vm791_vm1, %v2784_v30, %v2783_v40  ;;  %v2798_v38 = vrot.slane %v2652_v19, 6  ;;  %v2800_v39 = vrot.slane %v2653_v20, 5  ;;  %v2802_v41 = vrot.slane %v2654_v22, 4  ;;  %v3214_v9 = vld [vmem:[%s9237_s13 + $0x23] sm:$0x1]  ;;  %13334 = vst [vmem:[#allocation27_spill] sm:$0xff] %v9945_v15 }
 0x12c   : > { %8179 = vmatmul.msk.bf16.vlgmr.msrb.gmra.mxu3 %vm1058_vm7, %v2978_v44  ;;  %v2787_v42 = vsel %vm794_vm2, %v2786_v31, %v2785_v37  ;;  %v2797_v62 = vsel %vm788_vm0, %v2796_v35, %v2650_v23  ;;  %v2804_v47 = vrot.slane %v2655_v26, 3  ;;  %v2806_v53 = vrot.slane %v2656_v46, 2  ;;  %v3215_v19 = vld [vmem:[%s9237_s13 + $0x27] sm:$0x1]  ;;  %v3216_v20 = vld [vmem:[%s9237_s13 + $0x2b] sm:$0x1] }
 0x12d   : > { %v2789_v50 = vsel %vm797_vm3, %v2788_v32, %v2787_v42  ;;  %v2799_v0 = vsel %vm791_vm1, %v2798_v38, %v2797_v62  ;;  %v2808_v24 = vrot.slane %v2657_v28, 1  ;;  %v3334_v14 = vpack.c.bf16 %v3206_v3, %v3206_v3  ;;  %v3217_v22 = vld [vmem:[%s9237_s13 + $0x2f] sm:$0x1]  ;;  %v3218_v28 = vld [vmem:[%s9237_s13 + $0x33] sm:$0x1] }
 0x12e   : > { %v2791_v1 = vsel %vm800_vm4, %v2790_v33, %v2789_v50  ;;  %v2801_v6 = vsel %vm794_vm2, %v2800_v39, %v2799_v0  ;;  %v3335_v13 = vpack.c.bf16 %v3207_v36, %v3207_v36  ;;  %v3336_v23 = vpack.c.bf16 %v3208_v48, %v3208_v48  ;;  %v3219_v30 = vld [vmem:[%s9237_s13 + $0x37] sm:$0x1]  ;;  %v3220_v31 = vld [vmem:[%s9237_s13 + $0x3b] sm:$0x1]  ;;  %v3221_v35 = vld [vmem:[%s9237_s13 + $0x3f] sm:$0x1] }
 0x12f   : > { %v2803_v18 = vsel %vm797_vm3, %v2802_v41, %v2801_v6  ;;  %v3337_v26 = vpack.c.bf16 %v3209_v49, %v3209_v49  ;;  %v3338_v32 = vpack.c.bf16 %v3210_v58, %v3210_v58  ;;  %v3339_v40 = vpack.c.bf16 %v3211_v59, %v3211_v59 }
 0x130   : > { %v2805_v27 = vsel %vm800_vm4, %v2804_v47, %v2803_v18  ;;  %v3341_v36 = vpack.c.bf16 %v3213_v21, %v3213_v21  ;;  %v3342_v37 = vpack.c.bf16 %v3214_v9, %v3214_v9  ;;  %v3343_v39 = vpack.c.bf16 %v3215_v19, %v3215_v19 }
 0x131   : > { %v2807_v33 = vsel %vm803_vm5, %v2806_v53, %v2805_v27  ;;  %v3344_v41 = vpack.c.bf16 %v3216_v20, %v3216_v20  ;;  %v3345_v3 = vpack.c.bf16 %v3217_v22, %v3217_v22  ;;  %v3347_v62 = vpack.c.bf16 %v3219_v30, %v3219_v30  ;;  %v9962_v20 = vpop.f32.mrf.mxu0 }
 0x132   : > { %8187 = vmatmul.msk.bf16.vlgmr.msra.gmra.mxu0 %vm1058_vm7, %v2978_v44  ;;  %v2794_v44 = vrot.slane %v2649_v16, 1  ;;  %v2793_v16 = vsel %vm803_vm5, %v2792_v34, %v2791_v1  ;;  %v3340_v34 = vpack.c.bf16 %v3212_v8, %v3212_v8  ;;  %v2809_v38 = vsel %vm806_vm6, %v2808_v24, %v2807_v33  ;;  %13335 = vst [vmem:[#allocation28_spill] sm:$0xff] %v9962_v20 }
 0x133   : > { %v3348_v47 = vpack.c.bf16 %v3220_v31, %v3220_v31  ;;  %v3349_v48 = vpack.c.bf16 %v3221_v35, %v3221_v35  ;;  %v3591_v49 = vunpack.c.l.b16 %v3335_v13  ;;  %v3592_v50 = vunpack.c.l.b16 %v3336_v23 }
 0x134   : > { %v2795_v46 = vsel %vm806_vm6, %v2794_v44, %v2793_v16  ;;  %v3346_v44 = vpack.c.bf16 %v3218_v28, %v3218_v28  ;;  %v3593_v0 = vunpack.c.l.b16 %v3337_v26  ;;  %v3590_v53 = vunpack.c.l.b16 %v3334_v14  ;;  %v8468_v14 = vld [vmem:[%s13307_s2 + $0x74] sm:$0xf] }
 0x135   : > { %v2979_v42 = vpack.c.b16 %v2809_v38, %v2795_v46  ;;  %v3594_v58 = vunpack.c.l.b16 %v3338_v32  ;;  %v3595_v59 = vunpack.c.l.b16 %v3339_v40  ;;  %v3596_v1 = vunpack.c.l.b16 %v3340_v34  ;;  %v9968_v46 = vpop.f32.mrf.mxu1  ;;  %v8279_v32 = vld [vmem:[%s13307_s2 + $0x78] sm:$0xf0] }
 0x136   : > { %v3597_v24 = vunpack.c.l.b16 %v3341_v36  ;;  %v3599_v6 = vunpack.c.l.b16 %v3343_v39  ;;  %v3600_v8 = vunpack.c.l.b16 %v3344_v41  ;;  %v3601_v21 = vunpack.c.l.b16 %v3345_v3  ;;  %13336 = vst [vmem:[#allocation29_spill] sm:$0xff] %v9968_v46 }
 0x137   : > { %8172 = vmatmul.msk.bf16.gmra.mxu2 %vm1058_vm7, %v2979_v42  ;;  %v3598_v9 = vunpack.c.l.b16 %v3342_v37  ;;  %v3602_v16 = vunpack.c.l.b16 %v3346_v44  ;;  %v3603_v18 = vunpack.c.l.b16 %v3347_v62  ;;  %v3604_v19 = vunpack.c.l.b16 %v3348_v47 }
 0x138   : > { %v3605_v13 = vunpack.c.l.b16 %v3349_v48  ;;  %v3718_v22 = vrot.slane %v3591_v49, 7  ;;  %v3720_v23 = vrot.slane %v3592_v50, 6  ;;  %v3722_v26 = vrot.slane %v3593_v0, 5  ;;  %v2274_v49 = vld [vmem:[%s9237_s13 + $0x82] sm:$0x1] }
 0x139   : > { %v3724_v27 = vrot.slane %v3594_v58, 4  ;;  %v3726_v28 = vrot.slane %v3595_v59, 3  ;;  %v3728_v30 = vrot.slane %v3596_v1, 2  ;;  %v3732_v31 = vrot.slane %v3599_v6, 7  ;;  %v2275_v50 = vld [vmem:[%s9237_s13 + $0x86] sm:$0x1] }
 0x13a   : > { %v3719_v40 = vsel %vm788_vm0, %v3718_v22, %v3590_v53  ;;  %v3734_v33 = vrot.slane %v3600_v8, 6  ;;  %v3736_v35 = vrot.slane %v3601_v21, 5  ;;  %v3738_v34 = vrot.slane %v3602_v16, 4  ;;  %v2276_v58 = vld [vmem:[%s9237_s13 + $0x8a] sm:$0x1] }
 0x13b   : > { %v3721_v36 = vsel %vm791_vm1, %v3720_v23, %v3719_v40  ;;  %v3730_v37 = vrot.slane %v3597_v24, 1  ;;  %v3733_v38 = vsel %vm788_vm0, %v3732_v31, %v3598_v9  ;;  %v3740_v39 = vrot.slane %v3603_v18, 3  ;;  %v2277_v59 = vld [vmem:[%s9237_s13 + $0x8e] sm:$0x1]  ;;  %v2278_v1 = vld [vmem:[%s9237_s13 + $0x92] sm:$0x1] }
 0x13c   : > { %8180 = vmatmul.msk.bf16.gmra.mxu3 %vm1058_vm7, %v2979_v42  ;;  %v3723_v41 = vsel %vm794_vm2, %v3722_v26, %v3721_v36  ;;  %v3735_v3 = vsel %vm791_vm1, %v3734_v33, %v3733_v38  ;;  %v9978_v44 = vor.u32 %v8468_v14, %v8279_v32  ;;  %v3744_v48 = vrot.slane %v3605_v13, 1  ;;  %v2279_v8 = vld [vmem:[%s9237_s13 + $0x96] sm:$0x1]  ;;  %v2280_v21 = vld [vmem:[%s9237_s13 + $0x9a] sm:$0x1] }
 0x13d   : > { %v3725_v62 = vsel %vm797_vm3, %v3724_v27, %v3723_v41  ;;  %v3737_v47 = vsel %vm794_vm2, %v3736_v35, %v3735_v3  ;;  %v2281_v9 = vld [vmem:[%s9237_s13 + $0x9e] sm:$0x1]  ;;  %v2284_v13 = vld [vmem:[%s9237_s13 + $0xaa] sm:$0x1]  ;;  %v2285_v22 = vld [vmem:[%s9237_s13 + $0xae] sm:$0x1]  ;;  %v2405_v31 = vpack.c.bf16 %v2277_v59, %v2277_v59  ;;  %v2402_v33 = vpack.c.bf16 %v2274_v49, %v2274_v49  ;;  %v10007_v36 = vpop.f32.mrf.mxu1 }
 0x13e   : > { %v3727_v0 = vsel %vm800_vm4, %v3726_v28, %v3725_v62  ;;  %v3739_v53 = vsel %vm797_vm3, %v3738_v34, %v3737_v47  ;;  %4299 = vmatpush.bf16.msrb.mxu1 %v9978_v44  ;;  %v2282_v26 = vld [vmem:[%s9237_s13 + $0xa2] sm:$0x1]  ;;  %v2286_v14 = vld [vmem:[%s9237_s13 + $0xb2] sm:$0x1]  ;;  %v2287_v27 = vld [vmem:[%s9237_s13 + $0xb6] sm:$0x1]  ;;  %v2403_v28 = vpack.c.bf16 %v2275_v50, %v2275_v50  ;;  %v2406_v35 = vpack.c.bf16 %v2278_v1, %v2278_v1 }
 0x13f   : > { %v3729_v24 = vsel %vm803_vm5, %v3728_v30, %v3727_v0  ;;  %v3741_v6 = vsel %vm800_vm4, %v3740_v39, %v3739_v53  ;;  %v2404_v30 = vpack.c.bf16 %v2276_v58, %v2276_v58  ;;  %v2288_v40 = vld [vmem:[%s9237_s13 + $0xba] sm:$0x1]  ;;  %v2407_v34 = vpack.c.bf16 %v2279_v8, %v2279_v8  ;;  %13337 = vst [vmem:[#allocation30_spill] sm:$0xff] %v10007_v36 }
 0x140   : > { %v3731_v16 = vsel %vm806_vm6, %v3730_v37, %v3729_v24  ;;  %v2289_v37 = vld [vmem:[%s9237_s13 + $0xbe] sm:$0x1]  ;;  %v2408_v38 = vpack.c.bf16 %v2280_v21, %v2280_v21  ;;  %v2412_v41 = vpack.c.bf16 %v2284_v13, %v2284_v13  ;;  %v2413_v3 = vpack.c.bf16 %v2285_v22, %v2285_v22 }
 0x141   : > { %v2410_v62 = vpack.c.bf16 %v2282_v26, %v2282_v26  ;;  %v2414_v47 = vpack.c.bf16 %v2286_v14, %v2286_v14  ;;  %v2416_v50 = vpack.c.bf16 %v2288_v40, %v2288_v40  ;;  %v2659_v0 = vunpack.c.l.b16 %v2403_v28  ;;  %v10012_v40 = vpop.f32.mrf.mxu0 }
 0x142   : > { %8188 = vmatmul.msk.bf16.gmra.mxu0 %vm1058_vm7, %v2979_v42  ;;  %v3742_v42 = vrot.slane %v3604_v19, 2  ;;  %v2283_v19 = vld [vmem:[%s9237_s13 + $0xa6] sm:$0x1]  ;;  %v2660_v53 = vunpack.c.l.b16 %v2404_v30  ;;  %v2661_v49 = vunpack.c.l.b16 %v2405_v31  ;;  %v2417_v58 = vpack.c.bf16 %v2289_v37, %v2289_v37  ;;  %13338 = vst [vmem:[#allocation31_spill] sm:$0xff] %v10012_v40 }
 0x143   : > { %v2411_v39 = vpack.c.bf16 %v2283_v19, %v2283_v19  ;;  %v2658_v59 = vunpack.c.l.b16 %v2402_v33  ;;  %v2662_v1 = vunpack.c.l.b16 %v2406_v35  ;;  %v2663_v24 = vunpack.c.l.b16 %v2407_v34 }
 0x144   : > { %v3743_v18 = vsel %vm803_vm5, %v3742_v42, %v3741_v6  ;;  %v2409_v42 = vpack.c.bf16 %v2281_v9, %v2281_v9  ;;  %v2664_v6 = vunpack.c.l.b16 %v2408_v38  ;;  %v2668_v21 = vunpack.c.l.b16 %v2412_v41  ;;  %v3222_v38 = vld [vmem:[%s9237_s13 + $0x43] sm:$0x1] }
 0x145   : > { %v3745_v23 = vsel %vm806_vm6, %v3744_v48, %v3743_v18  ;;  %v2415_v48 = vpack.c.bf16 %v2287_v27, %v2287_v27  ;;  %v2667_v8 = vunpack.c.l.b16 %v2411_v39  ;;  %v2666_v19 = vunpack.c.l.b16 %v2410_v62  ;;  %v3223_v62 = vld [vmem:[%s9237_s13 + $0x47] sm:$0x1] }
 0x146   : > { %v10004_v32 = vpack.c.b16 %v3745_v23, %v3731_v16  ;;  %v2669_v16 = vunpack.c.l.b16 %v2413_v3  ;;  %v2665_v18 = vunpack.c.l.b16 %v2409_v42  ;;  %v2670_v13 = vunpack.c.l.b16 %v2414_v47  ;;  %v3224_v47 = vld [vmem:[%s9237_s13 + $0x4b] sm:$0x1] }
 0x147   : > { %v2671_v9 = vunpack.c.l.b16 %v2415_v48  ;;  %v2672_v22 = vunpack.c.l.b16 %v2416_v50  ;;  %v2810_v23 = vrot.slane %v2659_v0, 7  ;;  %v2812_v26 = vrot.slane %v2660_v53, 6  ;;  %v10020_v48 = vpop.f32.mrf.mxu1 }
 0x148   : > { %8195 = vmatmul.msk.bf16.vlgmr.msra.gmra.mxu1 %vm1058_vm7, %v10004_v32  ;;  %v2814_v14 = vrot.slane %v2661_v49, 5  ;;  %v2673_v27 = vunpack.c.l.b16 %v2417_v58  ;;  %v2816_v28 = vrot.slane %v2662_v1, 4  ;;  %v2818_v30 = vrot.slane %v2663_v24, 3  ;;  %13339 = vst [vmem:[#allocation32_spill] sm:$0xff] %v10020_v48  ;;  %v3225_v58 = vld [vmem:[%s9237_s13 + $0x4f] sm:$0x1] }
 0x149   : > { %v2824_v31 = vrot.slane %v2667_v8, 7  ;;  %v2811_v33 = vsel %vm788_vm0, %v2810_v23, %v2658_v59  ;;  %v2826_v35 = vrot.slane %v2668_v21, 6  ;;  %v2828_v34 = vrot.slane %v2669_v16, 5  ;;  %v3226_v59 = vld [vmem:[%s9237_s13 + $0x53] sm:$0x1] }
 0x14a   : > { %v2830_v37 = vrot.slane %v2670_v13, 4  ;;  %v2813_v39 = vsel %vm791_vm1, %v2812_v26, %v2811_v33  ;;  %v2820_v41 = vrot.slane %v2664_v6, 2  ;;  %v2832_v42 = vrot.slane %v2671_v9, 3  ;;  %v3227_v8 = vld [vmem:[%s9237_s13 + $0x57] sm:$0x1] }
 0x14b   : > { %v2825_v3 = vsel %vm788_vm0, %v2824_v31, %v2666_v19  ;;  %v2815_v50 = vsel %vm794_vm2, %v2814_v14, %v2813_v39  ;;  %v2822_v0 = vrot.slane %v2665_v18, 1  ;;  %v2834_v49 = vrot.slane %v2672_v22, 2  ;;  %v3228_v21 = vld [vmem:[%s9237_s13 + $0x5b] sm:$0x1]  ;;  %v3229_v13 = vld [vmem:[%s9237_s13 + $0x5f] sm:$0x1] }
 0x14c   : > { %v2827_v53 = vsel %vm791_vm1, %v2826_v35, %v2825_v3  ;;  %v2817_v1 = vsel %vm797_vm3, %v2816_v28, %v2815_v50  ;;  %v2836_v6 = vrot.slane %v2673_v27, 1  ;;  %v3350_v16 = vpack.c.bf16 %v3222_v38, %v3222_v38  ;;  %v3231_v9 = vld [vmem:[%s9237_s13 + $0x67] sm:$0x1]  ;;  %v3232_v22 = vld [vmem:[%s9237_s13 + $0x6b] sm:$0x1] }
 0x14d   : > { %v2829_v24 = vsel %vm794_vm2, %v2828_v34, %v2827_v53  ;;  %v2819_v19 = vsel %vm800_vm4, %v2818_v30, %v2817_v1  ;;  %v3351_v23 = vpack.c.bf16 %v3223_v62, %v3223_v62  ;;  %v3352_v26 = vpack.c.bf16 %v3224_v47, %v3224_v47  ;;  %v3230_v27 = vld [vmem:[%s9237_s13 + $0x63] sm:$0x1]  ;;  %v3233_v31 = vld [vmem:[%s9237_s13 + $0x6f] sm:$0x1]  ;;  %v3234_v33 = vld [vmem:[%s9237_s13 + $0x73] sm:$0x1] }
 0x14e   : > { %v2831_v18 = vsel %vm797_vm3, %v2830_v37, %v2829_v24  ;;  %v2821_v14 = vsel %vm803_vm5, %v2820_v41, %v2819_v19  ;;  %v3353_v35 = vpack.c.bf16 %v3225_v58, %v3225_v58  ;;  %v3354_v34 = vpack.c.bf16 %v3226_v59, %v3226_v59  ;;  %v3235_v38 = vld [vmem:[%s9237_s13 + $0x77] sm:$0x1]  ;;  %v3236_v39 = vld [vmem:[%s9237_s13 + $0x7b] sm:$0x1]  ;;  %v3237_v47 = vld [vmem:[%s9237_s13 + $0x7f] sm:$0x1] }
 0x14f   : > { %v2833_v28 = vsel %vm800_vm4, %v2832_v42, %v2831_v18  ;;  %v2823_v30 = vsel %vm806_vm6, %v2822_v0, %v2821_v14  ;;  %v3355_v3 = vpack.c.bf16 %v3227_v8, %v3227_v8  ;;  %v3356_v50 = vpack.c.bf16 %v3228_v21, %v3228_v21  ;;  %v10046_v14 = vpop.f32.mrf.mxu0 }
 0x150   : > { %v2835_v37 = vsel %vm803_vm5, %v2834_v49, %v2833_v28  ;;  %v3357_v53 = vpack.c.bf16 %v3229_v13, %v3229_v13  ;;  %v3359_v41 = vpack.c.bf16 %v3231_v9, %v3231_v9  ;;  %v3360_v1 = vpack.c.bf16 %v3232_v22, %v3232_v22  ;;  %13340 = vst [vmem:[#allocation33_spill] sm:$0xff] %v10046_v14 }
 0x151   : > { %v2837_v62 = vsel %vm806_vm6, %v2836_v6, %v2835_v37  ;;  %v3358_v24 = vpack.c.bf16 %v3230_v27, %v3230_v27  ;;  %v3361_v19 = vpack.c.bf16 %v3233_v31, %v3233_v31  ;;  %v3362_v18 = vpack.c.bf16 %v3234_v33, %v3234_v33  ;;  %v10051_v27 = vpop.f32.mrf.mxu1 }
 0x152   : > { %v2980_v42 = vpack.c.b16 %v2837_v62, %v2823_v30  ;;  %v3363_v58 = vpack.c.bf16 %v3235_v38, %v3235_v38  ;;  %v3364_v59 = vpack.c.bf16 %v3236_v39, %v3236_v39  ;;  %v3607_v40 = vunpack.c.l.b16 %v3351_v23  ;;  %13341 = vst [vmem:[#allocation34_spill] sm:$0xff] %v10051_v27 }
 0x153   : > { %v3608_v0 = vunpack.c.l.b16 %v3352_v26  ;;  %v3365_v49 = vpack.c.bf16 %v3237_v47, %v3237_v47  ;;  %v3609_v8 = vunpack.c.l.b16 %v3353_v35  ;;  %v3610_v21 = vunpack.c.l.b16 %v3354_v34  ;;  %v10059_v47 = vpop.f32.mrf.mxu2 }
 0x154   : > { %8173 = vmatmul.msk.bf16.gmra.mxu2 %vm1058_vm7, %v2980_v42  ;;  %v3611_v6 = vunpack.c.l.b16 %v3355_v3  ;;  %8189 = vmatmul.msk.bf16.gmra.mxu0 %vm1058_vm7, %v2980_v42  ;;  %v3606_v13 = vunpack.c.l.b16 %v3350_v16  ;;  %v3612_v9 = vunpack.c.l.b16 %v3356_v50  ;;  %v3615_v22 = vunpack.c.l.b16 %v3359_v41  ;;  %v8466_v16 = vld [vmem:[%s13307_s2 + $0x64] sm:$0xf]  ;;  %v8271_v50 = vld [vmem:[%s13307_s2 + $0x68] sm:$0xf0]  ;;  %13342 = vst [vmem:[#allocation35_spill] sm:$0xff] %v10059_v47 }
 0x155   : > { %v3616_v28 = vunpack.c.l.b16 %v3360_v1  ;;  %8181 = vmatmul.msk.bf16.gmra.mxu3 %vm1058_vm7, %v2980_v42  ;;  %v3613_v23 = vunpack.c.l.b16 %v3357_v53  ;;  %v3614_v26 = vunpack.c.l.b16 %v3358_v24  ;;  %v3617_v31 = vunpack.c.l.b16 %v3361_v19  ;;  %v3269_v47 = vld [vmem:[%s9237_s13 + $0xff] sm:$0x1] }
 0x156   : > { %v3618_v33 = vunpack.c.l.b16 %v3362_v18  ;;  %v3619_v30 = vunpack.c.l.b16 %v3363_v58  ;;  %v3746_v37 = vrot.slane %v3607_v40, 7  ;;  %v3748_v38 = vrot.slane %v3608_v0, 6 }
 0x157   : > { %v3750_v35 = vrot.slane %v3609_v8, 5  ;;  %v3620_v34 = vunpack.c.l.b16 %v3364_v59  ;;  %v3621_v39 = vunpack.c.l.b16 %v3365_v49  ;;  %v3752_v3 = vrot.slane %v3610_v21, 4  ;;  %v2290_v8 = vld [vmem:[%s9237_s13 + $0xc2] sm:$0x1] }
 0x158   : > { %v3754_v62 = vrot.slane %v3611_v6, 3  ;;  %v3747_v53 = vsel %vm788_vm0, %v3746_v37, %v3606_v13  ;;  %v3760_v40 = vrot.slane %v3615_v22, 7  ;;  %v3762_v41 = vrot.slane %v3616_v28, 6  ;;  %v2292_v22 = vld [vmem:[%s9237_s13 + $0xca] sm:$0x1] }
 0x159   : > { %v3764_v1 = vrot.slane %v3617_v31, 5  ;;  %v3749_v42 = vsel %vm791_vm1, %v3748_v38, %v3747_v53  ;;  %v3756_v24 = vrot.slane %v3612_v9, 2  ;;  %v3758_v19 = vrot.slane %v3613_v23, 1  ;;  %v2291_v9 = vld [vmem:[%s9237_s13 + $0xc6] sm:$0x1] }
 0x15a   : > { %v3766_v18 = vrot.slane %v3618_v33, 4  ;;  %v3751_v58 = vsel %vm794_vm2, %v3750_v35, %v3749_v42  ;;  %v3761_v59 = vsel %vm788_vm0, %v3760_v40, %v3614_v26  ;;  %v3768_v0 = vrot.slane %v3619_v30, 3  ;;  %v2293_v31 = vld [vmem:[%s9237_s13 + $0xce] sm:$0x1]  ;;  %v2294_v33 = vld [vmem:[%s9237_s13 + $0xd2] sm:$0x1]  ;;  %v10087_v40 = vpop.f32.mrf.mxu1 }
 0x15b   : > { %v10065_v49 = vor.u32 %v8466_v16, %v8271_v50  ;;  %v3753_v21 = vsel %vm797_vm3, %v3752_v3, %v3751_v58  ;;  %v3763_v6 = vsel %vm791_vm1, %v3762_v41, %v3761_v59  ;;  %v3770_v13 = vrot.slane %v3620_v34, 2  ;;  %v2295_v38 = vld [vmem:[%s9237_s13 + $0xd6] sm:$0x1]  ;;  %v2296_v35 = vld [vmem:[%s9237_s13 + $0xda] sm:$0x1]  ;;  %13343 = vst [vmem:[#allocation36_spill] sm:$0xff] %v10087_v40  ;;  %v10098_v20 = vpop.f32.mrf.mxu2 }
 0x15c   : > { %v3755_v28 = vsel %vm800_vm4, %v3754_v62, %v3753_v21  ;;  %v3765_v23 = vsel %vm794_vm2, %v3764_v1, %v3763_v6  ;;  %v3772_v26 = vrot.slane %v3621_v39, 1  ;;  %v2297_v34 = vld [vmem:[%s9237_s13 + $0xde] sm:$0x1]  ;;  %v2298_v62 = vld [vmem:[%s9237_s13 + $0xe2] sm:$0x1]  ;;  %v2418_v53 = vpack.c.bf16 %v2290_v8, %v2290_v8  ;;  %13344 = vst [vmem:[#allocation37_spill] sm:$0xff] %v10098_v20 }
 0x15d   : > { %4300 = vmatpush.bf16.msrb.mxu1 %v10065_v49  ;;  %v3757_v30 = vsel %vm803_vm5, %v3756_v24, %v3755_v28  ;;  %v3767_v37 = vsel %vm797_vm3, %v3766_v18, %v3765_v23  ;;  %v2299_v16 = vld [vmem:[%s9237_s13 + $0xe6] sm:$0x1]  ;;  %v2300_v50 = vld [vmem:[%s9237_s13 + $0xea] sm:$0x1]  ;;  %v2301_v1 = vld [vmem:[%s9237_s13 + $0xee] sm:$0x1]  ;;  %v2419_v18 = vpack.c.bf16 %v2291_v9, %v2291_v9  ;;  %v2420_v58 = vpack.c.bf16 %v2292_v22, %v2292_v22 }
 0x15e   : > { %v3759_v3 = vsel %vm806_vm6, %v3758_v19, %v3757_v30  ;;  %v3769_v39 = vsel %vm800_vm4, %v3768_v0, %v3767_v37  ;;  %v2302_v42 = vld [vmem:[%s9237_s13 + $0xf2] sm:$0x1]  ;;  %v2303_v24 = vld [vmem:[%s9237_s13 + $0xf6] sm:$0x1]  ;;  %v2421_v59 = vpack.c.bf16 %v2293_v31, %v2293_v31  ;;  %v2304_v19 = vld [vmem:[%s9237_s13 + $0xfa] sm:$0x1]  ;;  %v2422_v28 = vpack.c.bf16 %v2294_v33, %v2294_v33 }
 0x15f   : > { %v3771_v41 = vsel %vm803_vm5, %v3770_v13, %v3769_v39  ;;  %v2305_v6 = vld [vmem:[%s9237_s13 + $0xfe] sm:$0x1]  ;;  %v2423_v0 = vpack.c.bf16 %v2295_v38, %v2295_v38  ;;  %v2424_v23 = vpack.c.bf16 %v2296_v35, %v2296_v35  ;;  %v2425_v8 = vpack.c.bf16 %v2297_v34, %v2297_v34 }
 0x160   : > { %v3773_v21 = vsel %vm806_vm6, %v3772_v26, %v3771_v41  ;;  %v2427_v37 = vpack.c.bf16 %v2299_v16, %v2299_v16  ;;  %v2428_v14 = vpack.c.bf16 %v2300_v50, %v2300_v50  ;;  %v2426_v13 = vpack.c.bf16 %v2298_v62, %v2298_v62 }
 0x161   : > { %v10096_v30 = vpack.c.b16 %v3773_v21, %v3759_v3  ;;  %v2429_v39 = vpack.c.bf16 %v2301_v1, %v2301_v1  ;;  %v2430_v63 = vpack.c.bf16 %v2302_v42, %v2302_v42  ;;  %v2431_v9 = vpack.c.bf16 %v2303_v24, %v2303_v24 }
 0x162   : > { %v2432_v22 = vpack.c.bf16 %v2304_v19, %v2304_v19  ;;  %v2433_v26 = vpack.c.bf16 %v2305_v6, %v2305_v6  ;;  %v2675_v31 = vunpack.c.l.b16 %v2419_v18  ;;  %v2676_v33 = vunpack.c.l.b16 %v2420_v58 }
 0x163   : > { %8196 = vmatmul.msk.bf16.gmra.mxu1 %vm1058_vm7, %v10096_v30  ;;  %v2674_v38 = vunpack.c.l.b16 %v2418_v53  ;;  %v2677_v35 = vunpack.c.l.b16 %v2421_v59  ;;  %v2678_v3 = vunpack.c.l.b16 %v2422_v28  ;;  %v2679_v41 = vunpack.c.l.b16 %v2423_v0  ;;  %v10103_v59 = vld [vmem:[%s9237_s13 + $0x83] sm:$0x1]  ;;  %v10105_v28 = vpop.f32.mrf.mxu1 }
 0x164   : > { %v2680_v34 = vunpack.c.l.b16 %v2424_v23  ;;  %v2681_v16 = vunpack.c.l.b16 %v2425_v8  ;;  %v2683_v50 = vunpack.c.l.b16 %v2427_v37  ;;  %v2684_v21 = vunpack.c.l.b16 %v2428_v14  ;;  %13345 = vst [vmem:[#allocation38_spill] sm:$0xff] %v10105_v28  ;;  %v3239_v8 = vld [vmem:[%s9237_s13 + $0x87] sm:$0x1]  ;;  %v10109_v37 = vpop.f32.mrf.mxu0 }
 0x165   : > { %v2682_v62 = vunpack.c.l.b16 %v2426_v13  ;;  %v2685_v1 = vunpack.c.l.b16 %v2429_v39  ;;  %v2686_v42 = vunpack.c.l.b16 %v2430_v63  ;;  %v2687_v24 = vunpack.c.l.b16 %v2431_v9  ;;  %13346 = vst [vmem:[#allocation39_spill] sm:$0xff] %v10109_v37 }
 0x166   : > { %v2688_v56 = vunpack.c.l.b16 %v2432_v22  ;;  %v2838_v51 = vrot.slane %v2675_v31, 7  ;;  %v2840_v19 = vrot.slane %v2676_v33, 6  ;;  %v2842_v6 = vrot.slane %v2677_v35, 5  ;;  %v3241_v35 = vld [vmem:[%s9237_s13 + $0x8f] sm:$0x1] }
 0x167   : > { %v2689_v18 = vunpack.c.l.b16 %v2433_v26  ;;  %v2844_v53 = vrot.slane %v2678_v3, 4  ;;  %v2846_v58 = vrot.slane %v2679_v41, 3  ;;  %v2852_v0 = vrot.slane %v2683_v50, 7  ;;  %v3240_v26 = vld [vmem:[%s9237_s13 + $0x8b] sm:$0x1]  ;;  %v10117_v41 = vpop.f32.mrf.mxu2 }
 0x168   : > { %v2839_v14 = vsel %vm788_vm0, %v2838_v51, %v2674_v38  ;;  %v2854_v23 = vrot.slane %v2684_v21, 6  ;;  %v2856_v63 = vrot.slane %v2685_v1, 5  ;;  %v2848_v39 = vrot.slane %v2680_v34, 2  ;;  %v3242_v3 = vld [vmem:[%s9237_s13 + $0x93] sm:$0x1]  ;;  %13347 = vst [vmem:[#allocation40_spill] sm:$0xff] %v10117_v41 }
 0x169   : > { %v2841_v13 = vsel %vm791_vm1, %v2840_v19, %v2839_v14  ;;  %v2850_v9 = vrot.slane %v2681_v16, 1  ;;  %v2858_v22 = vrot.slane %v2686_v42, 4  ;;  %v2853_v51 = vsel %vm788_vm0, %v2852_v0, %v2682_v62  ;;  %v3243_v21 = vld [vmem:[%s9237_s13 + $0x97] sm:$0x1]  ;;  %v3244_v1 = vld [vmem:[%s9237_s13 + $0x9b] sm:$0x1] }
 0x16a   : > { %v2843_v31 = vsel %vm794_vm2, %v2842_v6, %v2841_v13  ;;  %v2860_v33 = vrot.slane %v2687_v24, 3  ;;  %v2862_v38 = vrot.slane %v2688_v56, 2  ;;  %v2855_v34 = vsel %vm791_vm1, %v2854_v23, %v2853_v51  ;;  %v3245_v24 = vld [vmem:[%s9237_s13 + $0x9f] sm:$0x1]  ;;  %v3246_v19 = vld [vmem:[%s9237_s13 + $0xa3] sm:$0x1] }
 0x16b   : > { %v2845_v50 = vsel %vm797_vm3, %v2844_v53, %v2843_v31  ;;  %v2864_v16 = vrot.slane %v2689_v18, 1  ;;  %v3366_v62 = vpack.c.bf16 %v10103_v59, %v10103_v59  ;;  %v2857_v56 = vsel %vm794_vm2, %v2856_v63, %v2855_v34  ;;  %v3247_v6 = vld [vmem:[%s9237_s13 + $0xa7] sm:$0x1]  ;;  %v3248_v23 = vld [vmem:[%s9237_s13 + $0xab] sm:$0x1] }
 0x16c   : > { %v2847_v42 = vsel %vm800_vm4, %v2846_v58, %v2845_v50  ;;  %v3367_v53 = vpack.c.bf16 %v3239_v8, %v3239_v8  ;;  %v3368_v14 = vpack.c.bf16 %v3240_v26, %v3240_v26  ;;  %v2859_v18 = vsel %vm797_vm3, %v2858_v22, %v2857_v56  ;;  %v3249_v13 = vld [vmem:[%s9237_s13 + $0xaf] sm:$0x1]  ;;  %v3250_v31 = vld [vmem:[%s9237_s13 + $0xb3] sm:$0x1]  ;;  %v3251_v50 = vld [vmem:[%s9237_s13 + $0xb7] sm:$0x1] }
 0x16d   : > { %v2849_v0 = vsel %vm803_vm5, %v2848_v39, %v2847_v42  ;;  %v3369_v59 = vpack.c.bf16 %v3241_v35, %v3241_v35  ;;  %v3370_v51 = vpack.c.bf16 %v3242_v3, %v3242_v3  ;;  %v2861_v63 = vsel %vm800_vm4, %v2860_v33, %v2859_v18  ;;  %v3252_v34 = vld [vmem:[%s9237_s13 + $0xbb] sm:$0x1]  ;;  %v3253_v26 = vld [vmem:[%s9237_s13 + $0xbf] sm:$0x1]  ;;  %v10142_v33 = vpop.f32.mrf.mxu1 }
 0x16e   : > { %v2851_v58 = vsel %vm806_vm6, %v2850_v9, %v2849_v0  ;;  %v3371_v37 = vpack.c.bf16 %v3243_v21, %v3243_v21  ;;  %v3372_v41 = vpack.c.bf16 %v3244_v1, %v3244_v1  ;;  %v2863_v8 = vsel %vm803_vm5, %v2862_v38, %v2861_v63  ;;  %13348 = vst [vmem:[#allocation41_spill] sm:$0xff] %v10142_v33  ;;  %v10144_v38 = vpop.f32.mrf.mxu0 }
 0x16f   : > { %v3373_v7 = vpack.c.bf16 %v3245_v24, %v3245_v24  ;;  %v3374_v39 = vpack.c.bf16 %v3246_v19, %v3246_v19  ;;  %v3375_v42 = vpack.c.bf16 %v3247_v6, %v3247_v6  ;;  %v2865_v22 = vsel %vm806_vm6, %v2864_v16, %v2863_v8  ;;  %13349 = vst [vmem:[#allocation42_spill] sm:$0xff] %v10144_v38 }
 0x170   : > { %v3376_v56 = vpack.c.bf16 %v3248_v23, %v3248_v23  ;;  %v3377_v54 = vpack.c.bf16 %v3249_v13, %v3249_v13  ;;  %v3378_v35 = vpack.c.bf16 %v3250_v31, %v3250_v31  ;;  %v2981_v3 = vpack.c.b16 %v2865_v22, %v2851_v58  ;;  %v10149_v58 = vpop.f32.mrf.mxu2 }
 0x171   : > { %v3379_v20 = vpack.c.bf16 %v3251_v50, %v3251_v50  ;;  %v3380_v9 = vpack.c.bf16 %v3252_v34, %v3252_v34  ;;  %v3623_v0 = vunpack.c.l.b16 %v3367_v53  ;;  %v3381_v18 = vpack.c.bf16 %v3253_v26, %v3253_v26  ;;  %13350 = vst [vmem:[#allocation43_spill] sm:$0xff] %v10149_v58 }
 0x172   : > { %v3624_v21 = vunpack.c.l.b16 %v3368_v14  ;;  %v3625_v1 = vunpack.c.l.b16 %v3369_v59  ;;  %v3626_v55 = vunpack.c.l.b16 %v3370_v51  ;;  %8174 = vmatmul.msk.bf16.gmra.mxu2 %vm1058_vm7, %v2981_v3  ;;  %v3622_v24 = vunpack.c.l.b16 %v3366_v62  ;;  %8190 = vmatmul.msk.bf16.gmra.mxu0 %vm1058_vm7, %v2981_v3 }
 0x173   : > { %v3627_v19 = vunpack.c.l.b16 %v3371_v37  ;;  %v3628_v16 = vunpack.c.l.b16 %v3372_v41  ;;  %v3631_v6 = vunpack.c.l.b16 %v3375_v42  ;;  %v3629_v23 = vunpack.c.l.b16 %v3373_v7  ;;  %8182 = vmatmul.msk.bf16.gmra.mxu3 %vm1058_vm7, %v2981_v3  ;;  %v8464_v41 = vld [vmem:[%s13307_s2 + $0x54] sm:$0xf] }
 0x174   : > { %v3632_v13 = vunpack.c.l.b16 %v3376_v56  ;;  %v3633_v31 = vunpack.c.l.b16 %v3377_v54  ;;  %v3634_v53 = vunpack.c.l.b16 %v3378_v35  ;;  %v3630_v14 = vunpack.c.l.b16 %v3374_v39 }
 0x175   : > { %v3635_v59 = vunpack.c.l.b16 %v3379_v20  ;;  %v3774_v51 = vrot.slane %v3623_v0, 7  ;;  %v3776_v63 = vrot.slane %v3624_v21, 6  ;;  %v3636_v50 = vunpack.c.l.b16 %v3380_v9  ;;  %v8263_v20 = vld [vmem:[%s13307_s2 + $0x58] sm:$0xf0] }
 0x176   : > { %v3637_v34 = vunpack.c.l.b16 %v3381_v18  ;;  %v3778_v62 = vrot.slane %v3625_v1, 5  ;;  %v3780_v37 = vrot.slane %v3626_v55, 4  ;;  %v3782_v54 = vrot.slane %v3627_v19, 3  ;;  %v2307_v19 = vld [vmem:[%s9237_s13 + $0x106] sm:$0x1] }
 0x177   : > { %v3775_v7 = vsel %vm788_vm0, %v3774_v51, %v3622_v24  ;;  %v3788_v8 = vrot.slane %v3631_v6, 7  ;;  %v3790_v26 = vrot.slane %v3632_v13, 6  ;;  %v3784_v42 = vrot.slane %v3628_v16, 2  ;;  %v2306_v24 = vld [vmem:[%s9237_s13 + $0x102] sm:$0x1] }
 0x178   : > { %v3777_v39 = vsel %vm791_vm1, %v3776_v63, %v3775_v7  ;;  %v3792_v55 = vrot.slane %v3633_v31, 5  ;;  %v3794_v22 = vrot.slane %v3634_v53, 4  ;;  %v3786_v35 = vrot.slane %v3629_v23, 1  ;;  %v2308_v13 = vld [vmem:[%s9237_s13 + $0x10a] sm:$0x1]  ;;  %v10171_v53 = vpop.f32.mrf.mxu1 }
 0x179   : > { %v3779_v56 = vsel %vm794_vm2, %v3778_v62, %v3777_v39  ;;  %v3789_v3 = vsel %vm788_vm0, %v3788_v8, %v3630_v14  ;;  %v3796_v9 = vrot.slane %v3635_v59, 3  ;;  %v3798_v21 = vrot.slane %v3636_v50, 2  ;;  %v2309_v31 = vld [vmem:[%s9237_s13 + $0x10e] sm:$0x1]  ;;  %13351 = vst [vmem:[#allocation44_spill] sm:$0xff] %v10171_v53 }
 0x17a   : > { %v3781_v0 = vsel %vm797_vm3, %v3780_v37, %v3779_v56  ;;  %v3791_v18 = vsel %vm791_vm1, %v3790_v26, %v3789_v3  ;;  %v10163_v1 = vor.u32 %v8464_v41, %v8263_v20  ;;  %v3800_v23 = vrot.slane %v3637_v34, 1  ;;  %v2310_v51 = vld [vmem:[%s9237_s13 + $0x112] sm:$0x1]  ;;  %v2311_v63 = vld [vmem:[%s9237_s13 + $0x116] sm:$0x1] }
 0x17b   : > { %v3783_v16 = vsel %vm800_vm4, %v3782_v54, %v3781_v0  ;;  %v3793_v6 = vsel %vm794_vm2, %v3792_v55, %v3791_v18  ;;  %v2312_v50 = vld [vmem:[%s9237_s13 + $0x11a] sm:$0x1]  ;;  %v2313_v37 = vld [vmem:[%s9237_s13 + $0x11e] sm:$0x1]  ;;  %v2314_v41 = vld [vmem:[%s9237_s13 + $0x122] sm:$0x1]  ;;  %v2434_v39 = vpack.c.bf16 %v2306_v24, %v2306_v24  ;;  %v2436_v55 = vpack.c.bf16 %v2308_v13, %v2308_v13 }
 0x17c   : > { %v3785_v14 = vsel %vm803_vm5, %v3784_v42, %v3783_v16  ;;  %v3795_v59 = vsel %vm797_vm3, %v3794_v22, %v3793_v6  ;;  %4301 = vmatpush.bf16.msrb.mxu1 %v10163_v1  ;;  %v2315_v7 = vld [vmem:[%s9237_s13 + $0x126] sm:$0x1]  ;;  %v2316_v8 = vld [vmem:[%s9237_s13 + $0x12a] sm:$0x1]  ;;  %v2317_v26 = vld [vmem:[%s9237_s13 + $0x12e] sm:$0x1]  ;;  %v2435_v42 = vpack.c.bf16 %v2307_v19, %v2307_v19  ;;  %v10188_v22 = vpop.f32.mrf.mxu2  ;;  %v2437_v18 = vpack.c.bf16 %v2309_v31, %v2309_v31 }
 0x17d   : > { %v3787_v34 = vsel %vm806_vm6, %v3786_v35, %v3785_v14  ;;  %v3797_v62 = vsel %vm800_vm4, %v3796_v9, %v3795_v59  ;;  %v2318_v20 = vld [vmem:[%s9237_s13 + $0x132] sm:$0x1]  ;;  %13352 = vst [vmem:[#allocation45_spill] sm:$0xff] %v10188_v22  ;;  %v2319_v3 = vld [vmem:[%s9237_s13 + $0x136] sm:$0x1]  ;;  %v2438_v9 = vpack.c.bf16 %v2310_v51, %v2310_v51  ;;  %v2439_v16 = vpack.c.bf16 %v2311_v63, %v2311_v63 }
 0x17e   : > { %v3799_v54 = vsel %vm803_vm5, %v3798_v21, %v3797_v62  ;;  %v2320_v35 = vld [vmem:[%s9237_s13 + $0x13a] sm:$0x1]  ;;  %v2321_v0 = vld [vmem:[%s9237_s13 + $0x13e] sm:$0x1]  ;;  %v2440_v14 = vpack.c.bf16 %v2312_v50, %v2312_v50  ;;  %v2441_v21 = vpack.c.bf16 %v2313_v37, %v2313_v37  ;;  %v2443_v59 = vpack.c.bf16 %v2315_v7, %v2315_v7 }
 0x17f   : > { %v3801_v56 = vsel %vm806_vm6, %v3800_v23, %v3799_v54  ;;  %v2442_v62 = vpack.c.bf16 %v2314_v41, %v2314_v41  ;;  %v2444_v38 = vpack.c.bf16 %v2316_v8, %v2316_v8  ;;  %v2445_v24 = vpack.c.bf16 %v2317_v26, %v2317_v26 }
 0x180   : > { %v10194_v6 = vpack.c.b16 %v3801_v56, %v3787_v34  ;;  %v2446_v19 = vpack.c.bf16 %v2318_v20, %v2318_v20  ;;  %v2447_v13 = vpack.c.bf16 %v2319_v3, %v2319_v3  ;;  %v2448_v23 = vpack.c.bf16 %v2320_v35, %v2320_v35  ;;  %v10198_v20 = vpop.f32.mrf.mxu1 }
 0x181   : > { %v2449_v54 = vpack.c.bf16 %v2321_v0, %v2321_v0  ;;  %v2691_v22 = vunpack.c.l.b16 %v2435_v42  ;;  %v2692_v58 = vunpack.c.l.b16 %v2436_v55  ;;  %v2693_v31 = vunpack.c.l.b16 %v2437_v18  ;;  %13353 = vst [vmem:[#allocation46_spill] sm:$0xff] %v10198_v20 }
 0x182   : > { %8197 = vmatmul.msk.bf16.gmra.mxu1 %vm1058_vm7, %v10194_v6  ;;  %v2694_v51 = vunpack.c.l.b16 %v2438_v9  ;;  %v2695_v63 = vunpack.c.l.b16 %v2439_v16  ;;  %v2690_v34 = vunpack.c.l.b16 %v2434_v39  ;;  %v2696_v56 = vunpack.c.l.b16 %v2440_v14  ;;  %v10201_v16 = vld [vmem:[%s9237_s13 + $0xc3] sm:$0x1] }
 0x183   : > { %v2697_v50 = vunpack.c.l.b16 %v2441_v21  ;;  %v2699_v37 = vunpack.c.l.b16 %v2443_v59  ;;  %v2698_v41 = vunpack.c.l.b16 %v2442_v62  ;;  %v2700_v7 = vunpack.c.l.b16 %v2444_v38  ;;  %v3255_v62 = vld [vmem:[%s9237_s13 + $0xc7] sm:$0x1] }
 0x184   : > { %v2701_v8 = vunpack.c.l.b16 %v2445_v24  ;;  %v2702_v26 = vunpack.c.l.b16 %v2446_v19  ;;  %v2703_v3 = vunpack.c.l.b16 %v2447_v13  ;;  %v2704_v35 = vunpack.c.l.b16 %v2448_v23  ;;  %v10205_v24 = vpop.f32.mrf.mxu0 }
 0x185   : > { %v2866_v0 = vrot.slane %v2691_v22, 7  ;;  %v2868_v42 = vrot.slane %v2692_v58, 6  ;;  %v2705_v55 = vunpack.c.l.b16 %v2449_v54  ;;  %v2870_v18 = vrot.slane %v2693_v31, 5  ;;  %13354 = vst [vmem:[#allocation47_spill] sm:$0xff] %v10205_v24  ;;  %v10207_v22 = vpop.f32.mrf.mxu2  ;;  %v3256_v54 = vld [vmem:[%s9237_s13 + $0xcb] sm:$0x1] }
 0x186   : > { %v2872_v9 = vrot.slane %v2694_v51, 4  ;;  %v2874_v39 = vrot.slane %v2695_v63, 3  ;;  %v2876_v38 = vrot.slane %v2696_v56, 2  ;;  %v2880_v21 = vrot.slane %v2699_v37, 7  ;;  %13355 = vst [vmem:[#allocation48_spill] sm:$0xff] %v10207_v22 }
 0x187   : > { %v2867_v14 = vsel %vm788_vm0, %v2866_v0, %v2690_v34  ;;  %v2882_v59 = vrot.slane %v2700_v7, 6  ;;  %v2878_v19 = vrot.slane %v2697_v50, 1  ;;  %v2884_v13 = vrot.slane %v2701_v8, 5  ;;  %v3257_v56 = vld [vmem:[%s9237_s13 + $0xcf] sm:$0x1] }
 0x188   : > { %v2869_v58 = vsel %vm791_vm1, %v2868_v42, %v2867_v14  ;;  %v2886_v23 = vrot.slane %v2702_v26, 4  ;;  %v2881_v51 = vsel %vm788_vm0, %v2880_v21, %v2698_v41  ;;  %v2888_v63 = vrot.slane %v2703_v3, 3  ;;  %v3258_v37 = vld [vmem:[%s9237_s13 + $0xd3] sm:$0x1]  ;;  %v3259_v26 = vld [vmem:[%s9237_s13 + $0xd7] sm:$0x1] }
 0x189   : > { %v2871_v31 = vsel %vm794_vm2, %v2870_v18, %v2869_v58  ;;  %v2890_v34 = vrot.slane %v2704_v35, 2  ;;  %v2883_v50 = vsel %vm791_vm1, %v2882_v59, %v2881_v51  ;;  %v2892_v8 = vrot.slane %v2705_v55, 1  ;;  %v3260_v0 = vld [vmem:[%s9237_s13 + $0xdb] sm:$0x1]  ;;  %v3261_v3 = vld [vmem:[%s9237_s13 + $0xdf] sm:$0x1] }
 0x18a   : > { %v2873_v7 = vsel %vm797_vm3, %v2872_v9, %v2871_v31  ;;  %v3382_v42 = vpack.c.bf16 %v10201_v16, %v10201_v16  ;;  %v2885_v41 = vsel %vm794_vm2, %v2884_v13, %v2883_v50  ;;  %v3262_v35 = vld [vmem:[%s9237_s13 + $0xe3] sm:$0x1]  ;;  %v3263_v9 = vld [vmem:[%s9237_s13 + $0xe7] sm:$0x1]  ;;  %v3383_v14 = vpack.c.bf16 %v3255_v62, %v3255_v62  ;;  %v3264_v58 = vld [vmem:[%s9237_s13 + $0xeb] sm:$0x1] }
 0x18b   : > { %v2875_v18 = vsel %vm800_vm4, %v2874_v39, %v2873_v7  ;;  %v3384_v21 = vpack.c.bf16 %v3256_v54, %v3256_v54  ;;  %v2887_v55 = vsel %vm797_vm3, %v2886_v23, %v2885_v41  ;;  %v3265_v31 = vld [vmem:[%s9237_s13 + $0xef] sm:$0x1]  ;;  %v3266_v51 = vld [vmem:[%s9237_s13 + $0xf3] sm:$0x1]  ;;  %v3385_v16 = vpack.c.bf16 %v3257_v56, %v3257_v56  ;;  %v3267_v7 = vld [vmem:[%s9237_s13 + $0xf7] sm:$0x1]  ;;  %v10237_v23 = vpop.f32.mrf.mxu1 }
 0x18c   : > { %v2877_v59 = vsel %vm803_vm5, %v2876_v38, %v2875_v18  ;;  %v3386_v22 = vpack.c.bf16 %v3258_v37, %v3258_v37  ;;  %v2889_v13 = vsel %vm800_vm4, %v2888_v63, %v2887_v55  ;;  %v3268_v50 = vld [vmem:[%s9237_s13 + $0xfb] sm:$0x1]  ;;  %v3387_v29 = vpack.c.bf16 %v3259_v26, %v3259_v26  ;;  %13356 = vst [vmem:[#allocation49_spill] sm:$0xff] %v10237_v23 }
 0x18d   : > { %v2879_v39 = vsel %vm806_vm6, %v2878_v19, %v2877_v59  ;;  %v3388_v11 = vpack.c.bf16 %v3260_v0, %v3260_v0  ;;  %v2891_v62 = vsel %vm803_vm5, %v2890_v34, %v2889_v13  ;;  %v3389_v54 = vpack.c.bf16 %v3261_v3, %v3261_v3  ;;  %v10242_v34 = vpop.f32.mrf.mxu0  ;;  %v10244_v3 = vpop.f32.mrf.mxu2 }
 0x18e   : > { %v3390_v38 = vpack.c.bf16 %v3262_v35, %v3262_v35  ;;  %v3391_v18 = vpack.c.bf16 %v3263_v9, %v3263_v9  ;;  %v2893_v41 = vsel %vm806_vm6, %v2892_v8, %v2891_v62  ;;  %v3392_v56 = vpack.c.bf16 %v3264_v58, %v3264_v58  ;;  %13357 = vst [vmem:[#allocation50_spill] sm:$0xff] %v10242_v34 }
 0x18f   : > { %v3393_v37 = vpack.c.bf16 %v3265_v31, %v3265_v31  ;;  %v3394_v25 = vpack.c.bf16 %v3266_v51, %v3266_v51  ;;  %v10240_v19 = vpack.c.b16 %v2893_v41, %v2879_v39  ;;  %v3395_v63 = vpack.c.bf16 %v3267_v7, %v3267_v7  ;;  %13358 = vst [vmem:[#allocation51_spill] sm:$0xff] %v10244_v3 }
 0x190   : > { %v3396_v59 = vpack.c.bf16 %v3268_v50, %v3268_v50  ;;  %v3397_v55 = vpack.c.bf16 %v3269_v47, %v3269_v47  ;;  %v3639_v5 = vunpack.c.l.b16 %v3383_v14  ;;  %v3640_v26 = vunpack.c.l.b16 %v3384_v21 }
 0x191   : > { %v3641_v0 = vunpack.c.l.b16 %v3385_v16  ;;  %v3642_v45 = vunpack.c.l.b16 %v3386_v22  ;;  %8175 = vmatmul.msk.bf16.gmra.mxu2 %vm1058_vm7, %v10240_v19  ;;  %v3638_v8 = vunpack.c.l.b16 %v3382_v42  ;;  %v3643_v35 = vunpack.c.l.b16 %v3387_v29  ;;  %8191 = vmatmul.msk.bf16.gmra.mxu0 %vm1058_vm7, %v10240_v19 }
 0x192   : > { %v3644_v9 = vunpack.c.l.b16 %v3388_v11  ;;  %v3645_v58 = vunpack.c.l.b16 %v3389_v54  ;;  %v3647_v31 = vunpack.c.l.b16 %v3391_v18  ;;  %v3648_v47 = vunpack.c.l.b16 %v3392_v56  ;;  %v8462_v11 = vld [vmem:[%s13307_s2 + $0x44] sm:$0xf] }
 0x193   : > { %v3649_v14 = vunpack.c.l.b16 %v3393_v37  ;;  %v3650_v21 = vunpack.c.l.b16 %v3394_v25  ;;  %v3646_v51 = vunpack.c.l.b16 %v3390_v38  ;;  %v3651_v22 = vunpack.c.l.b16 %v3395_v63  ;;  %v8255_v25 = vld [vmem:[%s13307_s2 + $0x48] sm:$0xf0] }
 0x194   : > { %v3652_v16 = vunpack.c.l.b16 %v3396_v59  ;;  %v3802_v39 = vrot.slane %v3639_v5, 7  ;;  %v3653_v13 = vunpack.c.l.b16 %v3397_v55  ;;  %v3804_v7 = vrot.slane %v3640_v26, 6  ;;  %v10260_v55 = vpop.f32.mrf.mxu1 }
 0x195   : > { %v3806_v50 = vrot.slane %v3641_v0, 5  ;;  %v3808_v62 = vrot.slane %v3642_v45, 4  ;;  %v3810_v42 = vrot.slane %v3643_v35, 3  ;;  %v3812_v54 = vrot.slane %v3644_v9, 2  ;;  %13359 = vst [vmem:[#allocation52_spill] sm:$0xff] %v10260_v55 }
 0x196   : > { %v3803_v29 = vsel %vm788_vm0, %v3802_v39, %v3638_v8  ;;  %v3816_v18 = vrot.slane %v3647_v31, 7  ;;  %v3818_v38 = vrot.slane %v3648_v47, 6  ;;  %v3820_v41 = vrot.slane %v3649_v14, 5  ;;  %v2322_v9 = vld [vmem:[%s9237_s13 + $0x142] sm:$0x1] }
 0x197   : > { %v3805_v5 = vsel %vm791_vm1, %v3804_v7, %v3803_v29  ;;  %v3822_v45 = vrot.slane %v3650_v21, 4  ;;  %v3814_v37 = vrot.slane %v3645_v58, 1  ;;  %v3824_v59 = vrot.slane %v3651_v22, 3  ;;  %v2323_v31 = vld [vmem:[%s9237_s13 + $0x146] sm:$0x1] }
 0x198   : > { %v3807_v56 = vsel %vm794_vm2, %v3806_v50, %v3805_v5  ;;  %v3817_v63 = vsel %vm788_vm0, %v3816_v18, %v3646_v51  ;;  %v3826_v8 = vrot.slane %v3652_v16, 2  ;;  %v10264_v35 = vor.u32 %v8462_v11, %v8255_v25  ;;  %v2324_v21 = vld [vmem:[%s9237_s13 + $0x14a] sm:$0x1]  ;;  %v2325_v51 = vld [vmem:[%s9237_s13 + $0x14e] sm:$0x1] }
 0x199   : > { %v3809_v26 = vsel %vm797_vm3, %v3808_v62, %v3807_v56  ;;  %v3819_v0 = vsel %vm791_vm1, %v3818_v38, %v3817_v63  ;;  %v3828_v14 = vrot.slane %v3653_v13, 1  ;;  %v2326_v39 = vld [vmem:[%s9237_s13 + $0x152] sm:$0x1]  ;;  %v2327_v7 = vld [vmem:[%s9237_s13 + $0x156] sm:$0x1]  ;;  %v10278_v62 = vpop.f32.mrf.mxu2 }
 0x19a   : > { %v3811_v58 = vsel %vm800_vm4, %v3810_v42, %v3809_v26  ;;  %v3821_v47 = vsel %vm794_vm2, %v3820_v41, %v3819_v0  ;;  %4302 = vmatpush.bf16.msrb.mxu1 %v10264_v35  ;;  %v2328_v50 = vld [vmem:[%s9237_s13 + $0x15a] sm:$0x1]  ;;  %13360 = vst [vmem:[#allocation53_spill] sm:$0xff] %v10278_v62  ;;  %v2329_v29 = vld [vmem:[%s9237_s13 + $0x15e] sm:$0x1]  ;;  %v2450_v41 = vpack.c.bf16 %v2322_v9, %v2322_v9 }
 0x19b   : > { %v3813_v22 = vsel %vm803_vm5, %v3812_v54, %v3811_v58  ;;  %v3823_v16 = vsel %vm797_vm3, %v3822_v45, %v3821_v47  ;;  %v2330_v42 = vld [vmem:[%s9237_s13 + $0x162] sm:$0x1]  ;;  %v2331_v18 = vld [vmem:[%s9237_s13 + $0x166] sm:$0x1]  ;;  %v2332_v25 = vld [vmem:[%s9237_s13 + $0x16a] sm:$0x1]  ;;  %v2451_v45 = vpack.c.bf16 %v2323_v31, %v2323_v31  ;;  %v2452_v58 = vpack.c.bf16 %v2324_v21, %v2324_v21 }
 0x19c   : > { %v3815_v13 = vsel %vm806_vm6, %v3814_v37, %v3813_v22  ;;  %v3825_v11 = vsel %vm800_vm4, %v3824_v59, %v3823_v16  ;;  %v2333_v5 = vld [vmem:[%s9237_s13 + $0x16e] sm:$0x1]  ;;  %v2334_v38 = vld [vmem:[%s9237_s13 + $0x172] sm:$0x1]  ;;  %v2335_v63 = vld [vmem:[%s9237_s13 + $0x176] sm:$0x1]  ;;  %v2453_v47 = vpack.c.bf16 %v2325_v51, %v2325_v51  ;;  %v2454_v37 = vpack.c.bf16 %v2326_v39, %v2326_v39 }
 0x19d   : > { %v3827_v54 = vsel %vm803_vm5, %v3826_v8, %v3825_v11  ;;  %v2336_v26 = vld [vmem:[%s9237_s13 + $0x17a] sm:$0x1]  ;;  %v2337_v0 = vld [vmem:[%s9237_s13 + $0x17e] sm:$0x1]  ;;  %v2455_v59 = vpack.c.bf16 %v2327_v7, %v2327_v7  ;;  %v2456_v16 = vpack.c.bf16 %v2328_v50, %v2328_v50  ;;  %v2457_v62 = vpack.c.bf16 %v2329_v29, %v2329_v29 }
 0x19e   : > { %v3829_v56 = vsel %vm806_vm6, %v3828_v14, %v3827_v54  ;;  %v2459_v3 = vpack.c.bf16 %v2331_v18, %v2331_v18  ;;  %v2460_v8 = vpack.c.bf16 %v2332_v25, %v2332_v25  ;;  %v2461_v11 = vpack.c.bf16 %v2333_v5, %v2333_v5 }
 0x19f   : > { %v10293_v22 = vpack.c.b16 %v3829_v56, %v3815_v13  ;;  %v2462_v40 = vpack.c.bf16 %v2334_v38, %v2334_v38  ;;  %v2458_v9 = vpack.c.bf16 %v2330_v42, %v2330_v42  ;;  %v2463_v31 = vpack.c.bf16 %v2335_v63, %v2335_v63  ;;  %v10297_v13 = vpop.f32.mrf.mxu1 }
 0x1a0   : > { %v2464_v14 = vpack.c.bf16 %v2336_v26, %v2336_v26  ;;  %v2465_v54 = vpack.c.bf16 %v2337_v0, %v2337_v0  ;;  %v2707_v27 = vunpack.c.l.b16 %v2451_v45  ;;  %v2708_v21 = vunpack.c.l.b16 %v2452_v58  ;;  %13361 = vst [vmem:[#allocation54_spill] sm:$0xff] %v10297_v13 }
 0x1a1   : > { %8198 = vmatmul.msk.bf16.gmra.mxu1 %vm1058_vm7, %v10293_v22  ;;  %v2709_v51 = vunpack.c.l.b16 %v2453_v47  ;;  %v2710_v39 = vunpack.c.l.b16 %v2454_v37  ;;  %v2706_v7 = vunpack.c.l.b16 %v2450_v41  ;;  %v2711_v50 = vunpack.c.l.b16 %v2455_v59  ;;  %v10299_v45 = vpop.f32.mrf.mxu2 }
 0x1a2   : > { %v2712_v29 = vunpack.c.l.b16 %v2456_v16  ;;  %v2713_v18 = vunpack.c.l.b16 %v2457_v62  ;;  %v2715_v25 = vunpack.c.l.b16 %v2459_v3  ;;  %v2716_v5 = vunpack.c.l.b16 %v2460_v8  ;;  %13362 = vst [vmem:[#allocation55_spill] sm:$0xff] %v10299_v45  ;;  %v3270_v16 = vld [vmem:[%s9237_s13 + $0x103] sm:$0x1] }
 0x1a3   : > { %v2717_v38 = vunpack.c.l.b16 %v2461_v11  ;;  %v2718_v56 = vunpack.c.l.b16 %v2462_v40  ;;  %v2714_v48 = vunpack.c.l.b16 %v2458_v9  ;;  %v2719_v42 = vunpack.c.l.b16 %v2463_v31  ;;  %v10303_v40 = vpop.f32.mrf.mxu0  ;;  %v3271_v31 = vld [vmem:[%s9237_s13 + $0x107] sm:$0x1] }
 0x1a4   : > { %v2720_v63 = vunpack.c.l.b16 %v2464_v14  ;;  %v2894_v26 = vrot.slane %v2707_v27, 7  ;;  %v2721_v0 = vunpack.c.l.b16 %v2465_v54  ;;  %v2896_v58 = vrot.slane %v2708_v21, 6  ;;  %13363 = vst [vmem:[#allocation56_spill] sm:$0xff] %v10303_v40 }
 0x1a5   : > { %v2898_v47 = vrot.slane %v2709_v51, 5  ;;  %v2900_v37 = vrot.slane %v2710_v39, 4  ;;  %v2902_v3 = vrot.slane %v2711_v50, 3  ;;  %v2904_v62 = vrot.slane %v2712_v29, 2  ;;  %v3272_v39 = vld [vmem:[%s9237_s13 + $0x10b] sm:$0x1] }
 0x1a6   : > { %v2895_v41 = vsel %vm788_vm0, %v2894_v26, %v2706_v7  ;;  %v2908_v59 = vrot.slane %v2715_v25, 7  ;;  %v2910_v8 = vrot.slane %v2716_v5, 6  ;;  %v2912_v11 = vrot.slane %v2717_v38, 5  ;;  %v3273_v7 = vld [vmem:[%s9237_s13 + $0x10f] sm:$0x1] }
 0x1a7   : > { %v2897_v27 = vsel %vm791_vm1, %v2896_v58, %v2895_v41  ;;  %v2914_v9 = vrot.slane %v2718_v56, 4  ;;  %v2906_v54 = vrot.slane %v2713_v18, 1  ;;  %v2916_v51 = vrot.slane %v2719_v42, 3  ;;  %v3274_v38 = vld [vmem:[%s9237_s13 + $0x113] sm:$0x1] }
 0x1a8   : > { %v2899_v14 = vsel %vm794_vm2, %v2898_v47, %v2897_v27  ;;  %v2909_v21 = vsel %vm788_vm0, %v2908_v59, %v2714_v48  ;;  %v2918_v25 = vrot.slane %v2720_v63, 2  ;;  %v2920_v5 = vrot.slane %v2721_v0, 1  ;;  %v3275_v56 = vld [vmem:[%s9237_s13 + $0x117] sm:$0x1]  ;;  %v3276_v48 = vld [vmem:[%s9237_s13 + $0x11b] sm:$0x1] }
 0x1a9   : > { %v2901_v50 = vsel %vm797_vm3, %v2900_v37, %v2899_v14  ;;  %v2911_v29 = vsel %vm791_vm1, %v2910_v8, %v2909_v21  ;;  %v3277_v42 = vld [vmem:[%s9237_s13 + $0x11f] sm:$0x1]  ;;  %v3278_v58 = vld [vmem:[%s9237_s13 + $0x123] sm:$0x1]  ;;  %v3398_v47 = vpack.c.bf16 %v3270_v16, %v3270_v16  ;;  %v3399_v37 = vpack.c.bf16 %v3271_v31, %v3271_v31  ;;  %v3279_v0 = vld [vmem:[%s9237_s13 + $0x127] sm:$0x1]  ;;  %v10325_v14 = vpop.f32.mrf.mxu1  ;;  %v10335_v2 = vpop.f32.mrf.mxu2 }
 0x1aa   : > { %v2903_v26 = vsel %vm800_vm4, %v2902_v3, %v2901_v50  ;;  %v2913_v18 = vsel %vm794_vm2, %v2912_v11, %v2911_v29  ;;  %v3280_v59 = vld [vmem:[%s9237_s13 + $0x12b] sm:$0x1]  ;;  %v3281_v27 = vld [vmem:[%s9237_s13 + $0x12f] sm:$0x1]  ;;  %v3400_v8 = vpack.c.bf16 %v3272_v39, %v3272_v39  ;;  %v3401_v3 = vpack.c.bf16 %v3273_v7, %v3273_v7  ;;  %13364 = vst [vmem:[#allocation57_spill] sm:$0xff] %v10325_v14 }
 0x1ab   : > { %v2905_v41 = vsel %vm803_vm5, %v2904_v62, %v2903_v26  ;;  %v2915_v63 = vsel %vm797_vm3, %v2914_v9, %v2913_v18  ;;  %v3282_v50 = vld [vmem:[%s9237_s13 + $0x133] sm:$0x1]  ;;  %v3283_v29 = vld [vmem:[%s9237_s13 + $0x137] sm:$0x1]  ;;  %v3284_v16 = vld [vmem:[%s9237_s13 + $0x13b] sm:$0x1]  ;;  %v3402_v31 = vpack.c.bf16 %v3274_v38, %v3274_v38  ;;  %v3403_v45 = vpack.c.bf16 %v3275_v56, %v3275_v56 }
 0x1ac   : > { %v2907_v11 = vsel %vm806_vm6, %v2906_v54, %v2905_v41  ;;  %v2917_v21 = vsel %vm800_vm4, %v2916_v51, %v2915_v63  ;;  %v3285_v26 = vld [vmem:[%s9237_s13 + $0x13f] sm:$0x1]  ;;  %v3404_v9 = vpack.c.bf16 %v3276_v48, %v3276_v48  ;;  %v3405_v18 = vpack.c.bf16 %v3277_v42, %v3277_v42  ;;  %13365 = vst [vmem:[#allocation58_spill] sm:$0xff] %v10335_v2 }
 0x1ad   : > { %v2919_v62 = vsel %vm803_vm5, %v2918_v25, %v2917_v21  ;;  %v3406_v36 = vpack.c.bf16 %v3278_v58, %v3278_v58  ;;  %v3407_v7 = vpack.c.bf16 %v3279_v0, %v3279_v0  ;;  %v3408_v46 = vpack.c.bf16 %v3280_v59, %v3280_v59  ;;  %v10339_v21 = vpop.f32.mrf.mxu0 }
 0x1ae   : > { %v2921_v39 = vsel %vm806_vm6, %v2920_v5, %v2919_v62  ;;  %v3409_v15 = vpack.c.bf16 %v3281_v27, %v3281_v27  ;;  %v3410_v51 = vpack.c.bf16 %v3282_v50, %v3282_v50  ;;  %v3411_v41 = vpack.c.bf16 %v3283_v29, %v3283_v29  ;;  %13366 = vst [vmem:[#allocation59_spill] sm:$0xff] %v10339_v21 }
 0x1af   : > { %v10337_v54 = vpack.c.b16 %v2921_v39, %v2907_v11  ;;  %v3412_v63 = vpack.c.bf16 %v3284_v16, %v3284_v16  ;;  %v3413_v38 = vpack.c.bf16 %v3285_v26, %v3285_v26  ;;  %v3655_v56 = vunpack.c.l.b16 %v3399_v37 }
 0x1b0   : > { %v3656_v57 = vunpack.c.l.b16 %v3400_v8  ;;  %v3657_v25 = vunpack.c.l.b16 %v3401_v3  ;;  %v3654_v5 = vunpack.c.l.b16 %v3398_v47  ;;  %v3658_v48 = vunpack.c.l.b16 %v3402_v31 }
 0x1b1   : > { %8176 = vmatmul.msk.bf16.gmra.mxu2 %vm1058_vm7, %v10337_v54  ;;  %v3659_v42 = vunpack.c.l.b16 %v3403_v45  ;;  %v3660_v58 = vunpack.c.l.b16 %v3404_v9  ;;  %8192 = vmatmul.msk.bf16.gmra.mxu0 %vm1058_vm7, %v10337_v54  ;;  %v3661_v0 = vunpack.c.l.b16 %v3405_v18  ;;  %v3663_v59 = vunpack.c.l.b16 %v3407_v7  ;;  %v8460_v45 = vld [vmem:[%s13307_s2 + $0x34] sm:$0xf] }
 0x1b2   : > { %v3664_v27 = vunpack.c.l.b16 %v3408_v46  ;;  %v3665_v11 = vunpack.c.l.b16 %v3409_v15  ;;  %v3662_v50 = vunpack.c.l.b16 %v3406_v36  ;;  %v3666_v37 = vunpack.c.l.b16 %v3410_v51  ;;  %v8247_v15 = vld [vmem:[%s13307_s2 + $0x38] sm:$0xf0]  ;;  %v10351_v46 = vpop.f32.mrf.mxu1 }
 0x1b3   : > { %v3667_v8 = vunpack.c.l.b16 %v3411_v41  ;;  %v3668_v3 = vunpack.c.l.b16 %v3412_v63  ;;  %v3669_v29 = vunpack.c.l.b16 %v3413_v38  ;;  %v3830_v16 = vrot.slane %v3655_v56, 7  ;;  %13367 = vst [vmem:[#allocation60_spill] sm:$0xff] %v10351_v46 }
 0x1b4   : > { %v3832_v62 = vrot.slane %v3656_v57, 6  ;;  %v3834_v26 = vrot.slane %v3657_v25, 5  ;;  %v3836_v47 = vrot.slane %v3658_v48, 4  ;;  %v3838_v31 = vrot.slane %v3659_v42, 3 }
 0x1b5   : > { %v3840_v9 = vrot.slane %v3660_v58, 2  ;;  %v3844_v39 = vrot.slane %v3663_v59, 7  ;;  %v3831_v36 = vsel %vm788_vm0, %v3830_v16, %v3654_v5  ;;  %v3846_v18 = vrot.slane %v3664_v27, 6  ;;  %v10362_v59 = vpop.f32.mrf.mxu2  ;;  %v2338_v27 = vld [vmem:[%s9237_s13 + $0x182] sm:$0x1] }
 0x1b6   : > { %v3848_v57 = vrot.slane %v3665_v11, 5  ;;  %v3850_v7 = vrot.slane %v3666_v37, 4  ;;  %v3833_v51 = vsel %vm791_vm1, %v3832_v62, %v3831_v36  ;;  %v3842_v41 = vrot.slane %v3661_v0, 1  ;;  %13368 = vst [vmem:[#allocation61_spill] sm:$0xff] %v10362_v59  ;;  %v2339_v11 = vld [vmem:[%s9237_s13 + $0x186] sm:$0x1] }
 0x1b7   : > { %v3845_v63 = vsel %vm788_vm0, %v3844_v39, %v3662_v50  ;;  %v3852_v38 = vrot.slane %v3667_v8, 3  ;;  %v3835_v56 = vsel %vm794_vm2, %v3834_v26, %v3833_v51  ;;  %v3854_v48 = vrot.slane %v3668_v3, 2  ;;  %v2340_v8 = vld [vmem:[%s9237_s13 + $0x18a] sm:$0x1]  ;;  %v2341_v3 = vld [vmem:[%s9237_s13 + $0x18e] sm:$0x1] }
 0x1b8   : > { %v3847_v25 = vsel %vm791_vm1, %v3846_v18, %v3845_v63  ;;  %v10358_v5 = vor.u32 %v8460_v45, %v8247_v15  ;;  %v3837_v42 = vsel %vm797_vm3, %v3836_v47, %v3835_v56  ;;  %v3856_v0 = vrot.slane %v3669_v29, 1  ;;  %v2342_v16 = vld [vmem:[%s9237_s13 + $0x192] sm:$0x1]  ;;  %v2343_v26 = vld [vmem:[%s9237_s13 + $0x196] sm:$0x1] }
 0x1b9   : > { %v3849_v58 = vsel %vm794_vm2, %v3848_v57, %v3847_v25  ;;  %v3839_v50 = vsel %vm800_vm4, %v3838_v31, %v3837_v42  ;;  %v2344_v45 = vld [vmem:[%s9237_s13 + $0x19a] sm:$0x1]  ;;  %v2345_v47 = vld [vmem:[%s9237_s13 + $0x19e] sm:$0x1]  ;;  %v2347_v15 = vld [vmem:[%s9237_s13 + $0x1a6] sm:$0x1]  ;;  %v2468_v56 = vpack.c.bf16 %v2340_v8, %v2340_v8 }
 0x1ba   : > { %v3851_v37 = vsel %vm797_vm3, %v3850_v7, %v3849_v58  ;;  %4303 = vmatpush.bf16.msrb.mxu1 %v10358_v5  ;;  %v3841_v29 = vsel %vm803_vm5, %v3840_v9, %v3839_v50  ;;  %v2348_v36 = vld [vmem:[%s9237_s13 + $0x1aa] sm:$0x1]  ;;  %v2349_v18 = vld [vmem:[%s9237_s13 + $0x1ae] sm:$0x1]  ;;  %v2346_v7 = vld [vmem:[%s9237_s13 + $0x1a2] sm:$0x1]  ;;  %v2467_v9 = vpack.c.bf16 %v2339_v11, %v2339_v11  ;;  %v2466_v58 = vpack.c.bf16 %v2338_v27, %v2338_v27 }
 0x1bb   : > { %v3853_v62 = vsel %vm800_vm4, %v3852_v38, %v3851_v37  ;;  %v3843_v31 = vsel %vm806_vm6, %v3842_v41, %v3841_v29  ;;  %v2350_v51 = vld [vmem:[%s9237_s13 + $0x1b2] sm:$0x1]  ;;  %v2351_v63 = vld [vmem:[%s9237_s13 + $0x1b6] sm:$0x1]  ;;  %v2469_v38 = vpack.c.bf16 %v2341_v3, %v2341_v3  ;;  %v2352_v42 = vld [vmem:[%s9237_s13 + $0x1ba] sm:$0x1]  ;;  %v2470_v50 = vpack.c.bf16 %v2342_v16, %v2342_v16 }
 0x1bc   : > { %v3855_v39 = vsel %vm803_vm5, %v3854_v48, %v3853_v62  ;;  %v2471_v41 = vpack.c.bf16 %v2343_v26, %v2343_v26  ;;  %v2353_v37 = vld [vmem:[%s9237_s13 + $0x1be] sm:$0x1]  ;;  %v2472_v48 = vpack.c.bf16 %v2344_v45, %v2344_v45  ;;  %v2475_v29 = vpack.c.bf16 %v2347_v15, %v2347_v15 }
 0x1bd   : > { %v3857_v57 = vsel %vm806_vm6, %v3856_v0, %v3855_v39  ;;  %v2476_v62 = vpack.c.bf16 %v2348_v36, %v2348_v36  ;;  %v2477_v59 = vpack.c.bf16 %v2349_v18, %v2349_v18  ;;  %v10392_v0 = vpop.f32.mrf.mxu1  ;;  %v2473_v39 = vpack.c.bf16 %v2345_v47, %v2345_v47  ;;  %v10394_v15 = vpop.f32.mrf.mxu2 }
 0x1be   : > { %v10386_v25 = vpack.c.b16 %v3857_v57, %v3843_v31  ;;  %13369 = vst [vmem:[#allocation62_spill] sm:$0xff] %v10392_v0  ;;  %v2474_v11 = vpack.c.bf16 %v2346_v7, %v2346_v7  ;;  %v2478_v8 = vpack.c.bf16 %v2350_v51, %v2350_v51  ;;  %v2479_v3 = vpack.c.bf16 %v2351_v63, %v2351_v63 }
 0x1bf   : > { %v2480_v31 = vpack.c.bf16 %v2352_v42, %v2352_v42  ;;  %v2723_v57 = vunpack.c.l.b16 %v2467_v9  ;;  %v2724_v2 = vunpack.c.l.b16 %v2468_v56  ;;  %v2725_v27 = vunpack.c.l.b16 %v2469_v38  ;;  %13370 = vst [vmem:[#allocation63_spill] sm:$0xff] %v10394_v15 }
 0x1c0   : > { %8199 = vmatmul.msk.bf16.gmra.mxu1 %vm1058_vm7, %v10386_v25  ;;  %v2481_v16 = vpack.c.bf16 %v2353_v37, %v2353_v37  ;;  %v2722_v26 = vunpack.c.l.b16 %v2466_v58  ;;  %v2726_v4 = vunpack.c.l.b16 %v2470_v50  ;;  %v2727_v45 = vunpack.c.l.b16 %v2471_v41  ;;  %v10396_v41 = vpop.f32.mrf.mxu0 }
 0x1c1   : > { %v2728_v36 = vunpack.c.l.b16 %v2472_v48  ;;  %v2731_v18 = vunpack.c.l.b16 %v2475_v29  ;;  %v2732_v60 = vunpack.c.l.b16 %v2476_v62  ;;  %v2733_v61 = vunpack.c.l.b16 %v2477_v59  ;;  %13371 = vst [vmem:[#allocation64_spill] sm:$0xff] %v10396_v41  ;;  %v3286_v62 = vld [vmem:[%s9237_s13 + $0x143] sm:$0x1] }
 0x1c2   : > { %v2729_v12 = vunpack.c.l.b16 %v2473_v39  ;;  %v2730_v17 = vunpack.c.l.b16 %v2474_v11  ;;  %v2734_v47 = vunpack.c.l.b16 %v2478_v8  ;;  %v2735_v7 = vunpack.c.l.b16 %v2479_v3  ;;  %v3287_v8 = vld [vmem:[%s9237_s13 + $0x147] sm:$0x1]  ;;  %v3288_v3 = vld [vmem:[%s9237_s13 + $0x14b] sm:$0x1] }
 0x1c3   : > { %v2736_v51 = vunpack.c.l.b16 %v2480_v31  ;;  %v2922_v63 = vrot.slane %v2723_v57, 7  ;;  %v2924_v9 = vrot.slane %v2724_v2, 6  ;;  %v2926_v56 = vrot.slane %v2725_v27, 5  ;;  %v3289_v27 = vld [vmem:[%s9237_s13 + $0x14f] sm:$0x1] }
 0x1c4   : > { %v2737_v38 = vunpack.c.l.b16 %v2481_v16  ;;  %v2928_v42 = vrot.slane %v2726_v4, 4  ;;  %v2930_v58 = vrot.slane %v2727_v45, 3  ;;  %v2936_v50 = vrot.slane %v2731_v18, 7  ;;  %v3290_v16 = vld [vmem:[%s9237_s13 + $0x153] sm:$0x1] }
 0x1c5   : > { %v2923_v59 = vsel %vm788_vm0, %v2922_v63, %v2722_v26  ;;  %v2938_v37 = vrot.slane %v2732_v60, 6  ;;  %v2940_v48 = vrot.slane %v2733_v61, 5  ;;  %v2942_v29 = vrot.slane %v2734_v47, 4  ;;  %v10408_v26 = vpop.f32.mrf.mxu1  ;;  %v3291_v18 = vld [vmem:[%s9237_s13 + $0x157] sm:$0x1] }
 0x1c6   : > { %v2925_v39 = vsel %vm791_vm1, %v2924_v9, %v2923_v59  ;;  %v2932_v2 = vrot.slane %v2728_v36, 2  ;;  %v2937_v11 = vsel %vm788_vm0, %v2936_v50, %v2730_v17  ;;  %v2944_v4 = vrot.slane %v2735_v7, 3  ;;  %13372 = vst [vmem:[#allocation65_spill] sm:$0xff] %v10408_v26  ;;  %v3292_v47 = vld [vmem:[%s9237_s13 + $0x15b] sm:$0x1] }
 0x1c7   : > { %v2927_v31 = vsel %vm794_vm2, %v2926_v56, %v2925_v39  ;;  %v2934_v57 = vrot.slane %v2729_v12, 1  ;;  %v2939_v61 = vsel %vm791_vm1, %v2938_v37, %v2937_v11  ;;  %v2946_v60 = vrot.slane %v2736_v51, 2  ;;  %v3293_v63 = vld [vmem:[%s9237_s13 + $0x15f] sm:$0x1]  ;;  %v3295_v9 = vld [vmem:[%s9237_s13 + $0x167] sm:$0x1] }
 0x1c8   : > { %v2929_v45 = vsel %vm797_vm3, %v2928_v42, %v2927_v31  ;;  %v2941_v17 = vsel %vm794_vm2, %v2940_v48, %v2939_v61  ;;  %v2948_v36 = vrot.slane %v2737_v38, 1  ;;  %v3414_v7 = vpack.c.bf16 %v3286_v62, %v3286_v62  ;;  %v3296_v56 = vld [vmem:[%s9237_s13 + $0x16b] sm:$0x1]  ;;  %v3294_v38 = vld [vmem:[%s9237_s13 + $0x163] sm:$0x1]  ;;  %v10434_v43 = vpop.f32.mrf.mxu0 }
 0x1c9   : > { %v2931_v12 = vsel %vm800_vm4, %v2930_v58, %v2929_v45  ;;  %v2943_v51 = vsel %vm797_vm3, %v2942_v29, %v2941_v17  ;;  %v3415_v50 = vpack.c.bf16 %v3287_v8, %v3287_v8  ;;  %v3416_v59 = vpack.c.bf16 %v3288_v3, %v3288_v3  ;;  %v3297_v48 = vld [vmem:[%s9237_s13 + $0x16f] sm:$0x1]  ;;  %v3298_v39 = vld [vmem:[%s9237_s13 + $0x173] sm:$0x1]  ;;  %v3299_v31 = vld [vmem:[%s9237_s13 + $0x177] sm:$0x1]  ;;  %v10428_v8 = vpop.f32.mrf.mxu2 }
 0x1ca   : > { %v2933_v42 = vsel %vm803_vm5, %v2932_v2, %v2931_v12  ;;  %v2945_v37 = vsel %vm800_vm4, %v2944_v4, %v2943_v51  ;;  %v3417_v62 = vpack.c.bf16 %v3289_v27, %v3289_v27  ;;  %v3418_v11 = vpack.c.bf16 %v3290_v16, %v3290_v16  ;;  %v3300_v61 = vld [vmem:[%s9237_s13 + $0x17b] sm:$0x1]  ;;  %13373 = vst [vmem:[#allocation66_spill] sm:$0xff] %v10428_v8  ;;  %v3301_v2 = vld [vmem:[%s9237_s13 + $0x17f] sm:$0x1] }
 0x1cb   : > { %v2935_v58 = vsel %vm806_vm6, %v2934_v57, %v2933_v42  ;;  %v2947_v29 = vsel %vm803_vm5, %v2946_v60, %v2945_v37  ;;  %v3419_v45 = vpack.c.bf16 %v3291_v18, %v3291_v18  ;;  %v3420_v17 = vpack.c.bf16 %v3292_v47, %v3292_v47  ;;  %13374 = vst [vmem:[#allocation67_spill] sm:$0xff] %v10434_v43  ;;  %v8472_v43 = vld [vmem:[%s13308_s3 + $0x10] sm:$0xff] }
 0x1cc   : > { %v2949_v3 = vsel %vm806_vm6, %v2948_v36, %v2947_v29  ;;  %v3421_v12 = vpack.c.bf16 %v3293_v63, %v3293_v63  ;;  %v3423_v4 = vpack.c.bf16 %v3295_v9, %v3295_v9  ;;  %v3424_v51 = vpack.c.bf16 %v3296_v56, %v3296_v56 }
 0x1cd   : > { %v10432_v15 = vpack.c.b16 %v2949_v3, %v2935_v58  ;;  %v3422_v27 = vpack.c.bf16 %v3294_v38, %v3294_v38  ;;  %v3425_v16 = vpack.c.bf16 %v3297_v48, %v3297_v48  ;;  %v3426_v52 = vpack.c.bf16 %v3298_v39, %v3298_v39  ;;  %v10440_v8 = vpop.f32.mrf.mxu1 }
 0x1ce   : > { %v3427_v57 = vpack.c.bf16 %v3299_v31, %v3299_v31  ;;  %v3428_v42 = vpack.c.bf16 %v3300_v61, %v3300_v61  ;;  %v3671_v60 = vunpack.c.l.b16 %v3415_v50  ;;  %v3672_v37 = vunpack.c.l.b16 %v3416_v59  ;;  %13375 = vst [vmem:[#allocation68_spill] sm:$0xff] %v10440_v8 }
 0x1cf   : > { %8177 = vmatmul.msk.bf16.gmra.mxu2 %vm1058_vm7, %v10432_v15  ;;  %v3429_v18 = vpack.c.bf16 %v3301_v2, %v3301_v2  ;;  %v3673_v36 = vunpack.c.l.b16 %v3417_v62  ;;  %v3674_v47 = vunpack.c.l.b16 %v3418_v11  ;;  %v3675_v63 = vunpack.c.l.b16 %v3419_v45  ;;  %8193 = vmatmul.msk.bf16.gmra.mxu0 %vm1058_vm7, %v10432_v15 }
 0x1d0   : > { %v3670_v9 = vunpack.c.l.b16 %v3414_v7  ;;  %v3676_v56 = vunpack.c.l.b16 %v3420_v17  ;;  %v3679_v38 = vunpack.c.l.b16 %v3423_v4  ;;  %v3680_v48 = vunpack.c.l.b16 %v3424_v51  ;;  %v8458_v7 = vld [vmem:[%s13307_s2 + $0x24] sm:$0xf] }
 0x1d1   : > { %v3677_v39 = vunpack.c.l.b16 %v3421_v12  ;;  %v3678_v58 = vunpack.c.l.b16 %v3422_v27  ;;  %v3681_v50 = vunpack.c.l.b16 %v3425_v16  ;;  %v3682_v59 = vunpack.c.l.b16 %v3426_v52  ;;  %v8239_v52 = vld [vmem:[%s13307_s2 + $0x28] sm:$0xf0] }
 0x1d2   : > { %v3683_v29 = vunpack.c.l.b16 %v3427_v57  ;;  %v3858_v31 = vrot.slane %v3671_v60, 7  ;;  %v3860_v61 = vrot.slane %v3672_v37, 6  ;;  %v3862_v3 = vrot.slane %v3673_v36, 5  ;;  %v10450_v60 = vpop.f32.mrf.mxu2 }
 0x1d3   : > { %v3684_v62 = vunpack.c.l.b16 %v3428_v42  ;;  %v3685_v11 = vunpack.c.l.b16 %v3429_v18  ;;  %v3864_v45 = vrot.slane %v3674_v47, 4  ;;  %v3866_v2 = vrot.slane %v3675_v63, 3  ;;  %13376 = vst [vmem:[#allocation69_spill] sm:$0xff] %v10450_v60  ;;  %v2354_v63 = vld [vmem:[%s9237_s13 + $0x1c2] sm:$0x1] }
 0x1d4   : > { %v3859_v17 = vsel %vm788_vm0, %v3858_v31, %v3670_v9  ;;  %v3872_v12 = vrot.slane %v3679_v38, 7  ;;  %v3874_v4 = vrot.slane %v3680_v48, 6  ;;  %v3876_v51 = vrot.slane %v3681_v50, 5  ;;  %v2355_v9 = vld [vmem:[%s9237_s13 + $0x1c6] sm:$0x1] }
 0x1d5   : > { %v3861_v27 = vsel %vm791_vm1, %v3860_v61, %v3859_v17  ;;  %v3868_v16 = vrot.slane %v3676_v56, 2  ;;  %v3870_v57 = vrot.slane %v3677_v39, 1  ;;  %v3878_v42 = vrot.slane %v3682_v59, 4  ;;  %v2356_v39 = vld [vmem:[%s9237_s13 + $0x1ca] sm:$0x1]  ;;  %v10482_v60 = vpop.f32.mrf.mxu1 }
 0x1d6   : > { %v3863_v37 = vsel %vm794_vm2, %v3862_v3, %v3861_v27  ;;  %v3873_v18 = vsel %vm788_vm0, %v3872_v12, %v3678_v58  ;;  %v3880_v36 = vrot.slane %v3683_v29, 3  ;;  %v10454_v47 = vor.u32 %v8458_v7, %v8239_v52  ;;  %v2357_v50 = vld [vmem:[%s9237_s13 + $0x1ce] sm:$0x1]  ;;  %v2358_v31 = vld [vmem:[%s9237_s13 + $0x1d2] sm:$0x1]  ;;  %13377 = vst [vmem:[#allocation70_spill] sm:$0xff] %v10482_v60 }
 0x1d7   : > { %v3865_v56 = vsel %vm797_vm3, %v3864_v45, %v3863_v37  ;;  %v3875_v38 = vsel %vm791_vm1, %v3874_v4, %v3873_v18  ;;  %v3882_v48 = vrot.slane %v3684_v62, 2  ;;  %v3884_v29 = vrot.slane %v3685_v11, 1  ;;  %v2359_v61 = vld [vmem:[%s9237_s13 + $0x1d6] sm:$0x1]  ;;  %v2360_v45 = vld [vmem:[%s9237_s13 + $0x1da] sm:$0x1] }
 0x1d8   : > { %v3867_v58 = vsel %vm800_vm4, %v3866_v2, %v3865_v56  ;;  %v3877_v59 = vsel %vm794_vm2, %v3876_v51, %v3875_v38  ;;  %4304 = vmatpush.bf16.msrb.mxu1 %v10454_v47  ;;  %v2361_v7 = vld [vmem:[%s9237_s13 + $0x1de] sm:$0x1]  ;;  %v2362_v52 = vld [vmem:[%s9237_s13 + $0x1e2] sm:$0x1]  ;;  %v2363_v11 = vld [vmem:[%s9237_s13 + $0x1e6] sm:$0x1]  ;;  %v2482_v51 = vpack.c.bf16 %v2354_v63, %v2354_v63  ;;  %v2483_v27 = vpack.c.bf16 %v2355_v9, %v2355_v9 }
 0x1d9   : > { %v3869_v3 = vsel %vm803_vm5, %v3868_v16, %v3867_v58  ;;  %v3879_v62 = vsel %vm797_vm3, %v3878_v42, %v3877_v59  ;;  %v2364_v12 = vld [vmem:[%s9237_s13 + $0x1ea] sm:$0x1]  ;;  %v2365_v4 = vld [vmem:[%s9237_s13 + $0x1ee] sm:$0x1]  ;;  %v2366_v18 = vld [vmem:[%s9237_s13 + $0x1f2] sm:$0x1]  ;;  %v2484_v38 = vpack.c.bf16 %v2356_v39, %v2356_v39  ;;  %v2485_v42 = vpack.c.bf16 %v2357_v50, %v2357_v50 }
 0x1da   : > { %v3871_v17 = vsel %vm806_vm6, %v3870_v57, %v3869_v3  ;;  %v3881_v2 = vsel %vm800_vm4, %v3880_v36, %v3879_v62  ;;  %v2367_v56 = vld [vmem:[%s9237_s13 + $0x1f6] sm:$0x1]  ;;  %v2368_v16 = vld [vmem:[%s9237_s13 + $0x1fa] sm:$0x1]  ;;  %v2486_v58 = vpack.c.bf16 %v2358_v31, %v2358_v31  ;;  %v2369_v57 = vld [vmem:[%s9237_s13 + $0x1fe] sm:$0x1]  ;;  %v2487_v3 = vpack.c.bf16 %v2359_v61, %v2359_v61 }
 0x1db   : > { %v3883_v37 = vsel %vm803_vm5, %v3882_v48, %v3881_v2  ;;  %v2488_v36 = vpack.c.bf16 %v2360_v45, %v2360_v45  ;;  %v2489_v62 = vpack.c.bf16 %v2361_v7, %v2361_v7  ;;  %v2490_v63 = vpack.c.bf16 %v2362_v52, %v2362_v52 }
 0x1dc   : > { %v3885_v59 = vsel %vm806_vm6, %v3884_v29, %v3883_v37  ;;  %v2491_v9 = vpack.c.bf16 %v2363_v11, %v2363_v11  ;;  %v2492_v8 = vpack.c.bf16 %v2364_v12, %v2364_v12  ;;  %v2493_v48 = vpack.c.bf16 %v2365_v4, %v2365_v4  ;;  %v10489_v37 = vpop.f32.mrf.mxu2 }
 0x1dd   : > { %v10485_v10 = vpack.c.b16 %v3885_v59, %v3871_v17  ;;  %v2494_v2 = vpack.c.bf16 %v2366_v18, %v2366_v18  ;;  %v2495_v26 = vpack.c.bf16 %v2367_v56, %v2367_v56  ;;  %v2496_v0 = vpack.c.bf16 %v2368_v16, %v2368_v16  ;;  %13378 = vst [vmem:[#allocation71_spill] sm:$0xff] %v10489_v37  ;;  %v10491_v17 = vpop.f32.mrf.mxu0 }
 0x1de   : > { %v2497_v39 = vpack.c.bf16 %v2369_v57, %v2369_v57  ;;  %v2738_v50 = vunpack.c.l.b16 %v2482_v51  ;;  %v2739_v29 = vunpack.c.l.b16 %v2483_v27  ;;  %v2740_v31 = vunpack.c.l.b16 %v2484_v38  ;;  %13379 = vst [vmem:[#allocation72_spill] sm:$0xff] %v10491_v17 }
 0x1df   : > { %8200 = vmatmul.msk.bf16.gmra.mxu1 %vm1058_vm7, %v10485_v10  ;;  %v2741_v61 = vunpack.c.l.b16 %v2485_v42  ;;  %v2742_v45 = vunpack.c.l.b16 %v2486_v58  ;;  %v2743_v7 = vunpack.c.l.b16 %v2487_v3  ;;  %v2744_v52 = vunpack.c.l.b16 %v2488_v36  ;;  %v10494_v58 = vld [vmem:[%s9237_s13 + $0x183] sm:$0x1] }
 0x1e0   : > { %v2745_v11 = vunpack.c.l.b16 %v2489_v62  ;;  %v2746_v12 = vunpack.c.l.b16 %v2490_v63  ;;  %v2747_v4 = vunpack.c.l.b16 %v2491_v9  ;;  %v2748_v18 = vunpack.c.l.b16 %v2492_v8  ;;  %v3303_v62 = vld [vmem:[%s9237_s13 + $0x187] sm:$0x1] }
 0x1e1   : > { %v2749_v56 = vunpack.c.l.b16 %v2493_v48  ;;  %v2750_v16 = vunpack.c.l.b16 %v2494_v2  ;;  %v2751_v51 = vunpack.c.l.b16 %v2495_v26  ;;  %v2752_v27 = vunpack.c.l.b16 %v2496_v0  ;;  %v3304_v26 = vld [vmem:[%s9237_s13 + $0x18b] sm:$0x1] }
 0x1e2   : > { %v2753_v38 = vunpack.c.l.b16 %v2497_v39  ;;  %v2950_v59 = vrot.slane %v2739_v29, 7  ;;  %v2952_v57 = vrot.slane %v2740_v31, 6  ;;  %v2954_v42 = vrot.slane %v2741_v61, 5  ;;  %v3305_v31 = vld [vmem:[%s9237_s13 + $0x18f] sm:$0x1]  ;;  %v10501_v61 = vpop.f32.mrf.mxu1 }
 0x1e3   : > { %v2956_v3 = vrot.slane %v2742_v45, 4  ;;  %v2958_v36 = vrot.slane %v2743_v7, 3  ;;  %v2960_v37 = vrot.slane %v2744_v52, 2  ;;  %v2964_v8 = vrot.slane %v2747_v4, 7  ;;  %13380 = vst [vmem:[#allocation73_spill] sm:$0xff] %v10501_v61 }
 0x1e4   : > { %v2951_v63 = vsel %vm788_vm0, %v2950_v59, %v2738_v50  ;;  %v2966_v9 = vrot.slane %v2748_v18, 6  ;;  %v2968_v48 = vrot.slane %v2749_v56, 5  ;;  %v2962_v2 = vrot.slane %v2745_v11, 1  ;;  %v3306_v4 = vld [vmem:[%s9237_s13 + $0x193] sm:$0x1]  ;;  %v10507_v56 = vpop.f32.mrf.mxu2 }
 0x1e5   : > { %v2953_v0 = vsel %vm791_vm1, %v2952_v57, %v2951_v63  ;;  %v2970_v39 = vrot.slane %v2750_v16, 4  ;;  %v2972_v29 = vrot.slane %v2751_v51, 3  ;;  %v2965_v50 = vsel %vm788_vm0, %v2964_v8, %v2746_v12  ;;  %v3307_v18 = vld [vmem:[%s9237_s13 + $0x197] sm:$0x1]  ;;  %13381 = vst [vmem:[#allocation74_spill] sm:$0xff] %v10507_v56  ;;  %v10525_v60 = vpop.f32.mrf.mxu0 }
 0x1e6   : > { %v2955_v45 = vsel %vm794_vm2, %v2954_v42, %v2953_v0  ;;  %v2974_v7 = vrot.slane %v2752_v27, 2  ;;  %v2976_v52 = vrot.slane %v2753_v38, 1  ;;  %v2967_v16 = vsel %vm791_vm1, %v2966_v9, %v2965_v50  ;;  %v3308_v51 = vld [vmem:[%s9237_s13 + $0x19b] sm:$0x1]  ;;  %v3309_v59 = vld [vmem:[%s9237_s13 + $0x19f] sm:$0x1] }
 0x1e7   : > { %v2957_v11 = vsel %vm797_vm3, %v2956_v3, %v2955_v45  ;;  %v3430_v57 = vpack.c.bf16 %v10494_v58, %v10494_v58  ;;  %v3431_v12 = vpack.c.bf16 %v3303_v62, %v3303_v62  ;;  %v2969_v38 = vsel %vm794_vm2, %v2968_v48, %v2967_v16  ;;  %v3310_v42 = vld [vmem:[%s9237_s13 + $0x1a3] sm:$0x1]  ;;  %v3311_v63 = vld [vmem:[%s9237_s13 + $0x1a7] sm:$0x1]  ;;  %v3312_v8 = vld [vmem:[%s9237_s13 + $0x1ab] sm:$0x1] }
 0x1e8   : > { %v2959_v27 = vsel %vm800_vm4, %v2958_v36, %v2957_v11  ;;  %v3432_v3 = vpack.c.bf16 %v3304_v26, %v3304_v26  ;;  %v3433_v0 = vpack.c.bf16 %v3305_v31, %v3305_v31  ;;  %v2971_v45 = vsel %vm797_vm3, %v2970_v39, %v2969_v38  ;;  %v3313_v50 = vld [vmem:[%s9237_s13 + $0x1af] sm:$0x1]  ;;  %v3314_v56 = vld [vmem:[%s9237_s13 + $0x1b3] sm:$0x1]  ;;  %v3315_v61 = vld [vmem:[%s9237_s13 + $0x1b7] sm:$0x1] }
 0x1e9   : > { %v2961_v9 = vsel %vm803_vm5, %v2960_v37, %v2959_v27  ;;  %v3434_v58 = vpack.c.bf16 %v3306_v4, %v3306_v4  ;;  %v3435_v62 = vpack.c.bf16 %v3307_v18, %v3307_v18  ;;  %13382 = vst [vmem:[#allocation75_spill] sm:$0xff] %v10525_v60  ;;  %v2973_v48 = vsel %vm800_vm4, %v2972_v29, %v2971_v45  ;;  %v3316_v11 = vld [vmem:[%s9237_s13 + $0x1bb] sm:$0x1]  ;;  %v3317_v16 = vld [vmem:[%s9237_s13 + $0x1bf] sm:$0x1] }
 0x1ea   : > { %v2963_v36 = vsel %vm806_vm6, %v2962_v2, %v2961_v9  ;;  %v3436_v46 = vpack.c.bf16 %v3308_v51, %v3308_v51  ;;  %v3437_v26 = vpack.c.bf16 %v3309_v59, %v3309_v59  ;;  %v2975_v31 = vsel %vm803_vm5, %v2974_v7, %v2973_v48 }
 0x1eb   : > { %v3438_v37 = vpack.c.bf16 %v3310_v42, %v3310_v42  ;;  %v3439_v27 = vpack.c.bf16 %v3311_v63, %v3311_v63  ;;  %v3440_v39 = vpack.c.bf16 %v3312_v8, %v3312_v8  ;;  %v2977_v38 = vsel %vm806_vm6, %v2976_v52, %v2975_v31  ;;  %v10537_v52 = vpop.f32.mrf.mxu1 }
 0x1ec   : > { %v3441_v14 = vpack.c.bf16 %v3313_v50, %v3313_v50  ;;  %v3442_v4 = vpack.c.bf16 %v3314_v56, %v3314_v56  ;;  %v3443_v18 = vpack.c.bf16 %v3315_v61, %v3315_v61  ;;  %v10533_v13 = vpack.c.b16 %v2977_v38, %v2963_v36  ;;  %13383 = vst [vmem:[#allocation76_spill] sm:$0xff] %v10537_v52 }
 0x1ed   : > { %v3444_v55 = vpack.c.bf16 %v3316_v11, %v3316_v11  ;;  %v3445_v2 = vpack.c.bf16 %v3317_v16, %v3317_v16  ;;  %v3687_v9 = vunpack.c.l.b16 %v3431_v12  ;;  %v3688_v29 = vunpack.c.l.b16 %v3432_v3  ;;  %v10541_v3 = vpop.f32.mrf.mxu2 }
 0x1ee   : > { %v3689_v45 = vunpack.c.l.b16 %v3433_v0  ;;  %v3690_v23 = vunpack.c.l.b16 %v3434_v58  ;;  %v3691_v51 = vunpack.c.l.b16 %v3435_v62  ;;  %8178 = vmatmul.msk.bf16.gmra.mxu2 %vm1058_vm7, %v10533_v13  ;;  %v3686_v7 = vunpack.c.l.b16 %v3430_v57  ;;  %8194 = vmatmul.msk.bf16.gmra.mxu0 %vm1058_vm7, %v10533_v13  ;;  %13384 = vst [vmem:[#allocation77_spill] sm:$0xff] %v10541_v3  ;;  %v8469_v57 = vld [vmem:[%s13307_s2 + $0x74] sm:$0xf0] }
 0x1ef   : > { %v3692_v59 = vunpack.c.l.b16 %v3436_v46  ;;  %v3693_v42 = vunpack.c.l.b16 %v3437_v26  ;;  %v3695_v63 = vunpack.c.l.b16 %v3439_v27  ;;  %v3694_v61 = vunpack.c.l.b16 %v3438_v37  ;;  %v8277_v46 = vld [vmem:[%s13307_s2 + $0x70] sm:$0xf]  ;;  %v8231_v27 = vld [vmem:[%s13307_s2 + $0x18] sm:$0xf0] }
 0x1f0   : > { %v3696_v56 = vunpack.c.l.b16 %v3440_v39  ;;  %v3697_v8 = vunpack.c.l.b16 %v3441_v14  ;;  %v3698_v12 = vunpack.c.l.b16 %v3442_v4  ;;  %v3699_v0 = vunpack.c.l.b16 %v3443_v18  ;;  %v8456_v14 = vld [vmem:[%s13307_s2 + $0x14] sm:$0xf]  ;;  %v10556_v39 = vpop.f32.mrf.mxu0 }
 0x1f1   : > { %v3700_v50 = vunpack.c.l.b16 %v3444_v55  ;;  %v3886_v58 = vrot.slane %v3687_v9, 7  ;;  %v3888_v62 = vrot.slane %v3688_v29, 6  ;;  %v3701_v36 = vunpack.c.l.b16 %v3445_v2  ;;  %13385 = vst [vmem:[#allocation78_spill] sm:$0xff] %v10556_v39 }
 0x1f2   : > { %v3890_v48 = vrot.slane %v3689_v45, 5  ;;  %v3892_v11 = vrot.slane %v3690_v23, 4  ;;  %v3894_v16 = vrot.slane %v3691_v51, 3  ;;  %v3896_v26 = vrot.slane %v3692_v59, 2  ;;  %v8269_v51 = vld [vmem:[%s13307_s2 + $0x60] sm:$0xf] }
 0x1f3   : > { %v3887_v55 = vsel %vm788_vm0, %v3886_v58, %v3686_v7  ;;  %v3900_v31 = vrot.slane %v3695_v63, 7  ;;  %v3902_v37 = vrot.slane %v3696_v56, 6  ;;  %v3898_v4 = vrot.slane %v3693_v42, 1  ;;  %v8261_v56 = vld [vmem:[%s13307_s2 + $0x50] sm:$0xf] }
 0x1f4   : > { %v3889_v38 = vsel %vm791_vm1, %v3888_v62, %v3887_v55  ;;  %v3904_v23 = vrot.slane %v3697_v8, 5  ;;  %v3906_v18 = vrot.slane %v3698_v12, 4  ;;  %v3908_v29 = vrot.slane %v3699_v0, 3  ;;  %v8465_v8 = vld [vmem:[%s13307_s2 + $0x54] sm:$0xf0] }
 0x1f5   : > { %v3891_v2 = vsel %vm794_vm2, %v3890_v48, %v3889_v38  ;;  %v3901_v9 = vsel %vm788_vm0, %v3900_v31, %v3694_v61  ;;  %v3910_v45 = vrot.slane %v3700_v50, 2  ;;  %v10566_v63 = vor.u32 %v8456_v14, %v8231_v27  ;;  %v8467_v61 = vld [vmem:[%s13307_s2 + $0x64] sm:$0xf0]  ;;  %v8253_v58 = vld [vmem:[%s13307_s2 + $0x40] sm:$0xf]  ;;  %v10595_v14 = vpop.f32.mrf.mxu2 }
 0x1f6   : > { %v3893_v7 = vsel %vm797_vm3, %v3892_v11, %v3891_v2  ;;  %v3903_v59 = vsel %vm791_vm1, %v3902_v37, %v3901_v9  ;;  %v10568_v42 = vor.u32 %v8469_v57, %v8277_v46  ;;  %v3912_v50 = vrot.slane %v3701_v36, 1  ;;  %v8463_v62 = vld [vmem:[%s13307_s2 + $0x44] sm:$0xf0]  ;;  %v3318_v36 = vld [vmem:[%s9237_s13 + $0x1c3] sm:$0x1]  ;;  %13386 = vst [vmem:[#allocation79_spill] sm:$0xff] %v10595_v14 }
 0x1f7   : > { %v3895_v12 = vsel %vm800_vm4, %v3894_v16, %v3893_v7  ;;  %v3905_v0 = vsel %vm794_vm2, %v3904_v23, %v3903_v59  ;;  %4305 = vmatpush.bf16.msrb.mxu1 %v10566_v63  ;;  %v3319_v48 = vld [vmem:[%s9237_s13 + $0x1c7] sm:$0x1]  ;;  %v3320_v11 = vld [vmem:[%s9237_s13 + $0x1cb] sm:$0x1]  ;;  %v3321_v16 = vld [vmem:[%s9237_s13 + $0x1cf] sm:$0x1]  ;;  %v10599_v31 = vor.u32 %v8467_v61, %v8269_v51  ;;  %v10604_v23 = vpop.f32.mrf.mxu1  ;;  %v10612_v7 = vor.u32 %v8465_v8, %v8261_v56 }
 0x1f8   : > { %v3897_v46 = vsel %vm803_vm5, %v3896_v26, %v3895_v12  ;;  %v3907_v57 = vsel %vm797_vm3, %v3906_v18, %v3905_v0  ;;  %4250 = vmatpush.bf16.msrb.mxu0 %v10568_v42  ;;  %v3322_v37 = vld [vmem:[%s9237_s13 + $0x1d3] sm:$0x1]  ;;  %v3323_v27 = vld [vmem:[%s9237_s13 + $0x1d7] sm:$0x1]  ;;  %v3324_v38 = vld [vmem:[%s9237_s13 + $0x1db] sm:$0x1]  ;;  %5213 = vmatpush.bf16.msrb.mxu3 %v10568_v42  ;;  %v10614_v51 = vor.u32 %v8463_v62, %v8253_v58  ;;  %v10626_v58 = vpop.f32.mrf.mxu0 }
 0x1f9   : > { %v3899_v55 = vsel %vm806_vm6, %v3898_v4, %v3897_v46  ;;  %v3909_v26 = vsel %vm800_vm4, %v3908_v29, %v3907_v57  ;;  %13387 = vst [vmem:[#allocation80_spill] sm:$0xff] %v10604_v23  ;;  %v3325_v2 = vld [vmem:[%s9237_s13 + $0x1df] sm:$0x1]  ;;  %v3326_v4 = vld [vmem:[%s9237_s13 + $0x1e3] sm:$0x1]  ;;  %v3447_v0 = vpack.c.bf16 %v3319_v48, %v3319_v48  ;;  %v3449_v52 = vpack.c.bf16 %v3321_v16, %v3321_v16 }
 0x1fa   : > { %v3911_v18 = vsel %vm803_vm5, %v3910_v45, %v3909_v26  ;;  %v3327_v9 = vld [vmem:[%s9237_s13 + $0x1e7] sm:$0x1]  ;;  %v3328_v59 = vld [vmem:[%s9237_s13 + $0x1eb] sm:$0x1]  ;;  %v3329_v61 = vld [vmem:[%s9237_s13 + $0x1ef] sm:$0x1]  ;;  %v3448_v26 = vpack.c.bf16 %v3320_v11, %v3320_v11  ;;  %v3450_v20 = vpack.c.bf16 %v3322_v37, %v3322_v37  ;;  %v3446_v53 = vpack.c.bf16 %v3318_v36, %v3318_v36 }
 0x1fb   : > { %v3913_v29 = vsel %vm806_vm6, %v3912_v50, %v3911_v18  ;;  %v3330_v12 = vld [vmem:[%s9237_s13 + $0x1f3] sm:$0x1]  ;;  %v3331_v57 = vld [vmem:[%s9237_s13 + $0x1f7] sm:$0x1]  ;;  %v3332_v23 = vld [vmem:[%s9237_s13 + $0x1fb] sm:$0x1]  ;;  %v3451_v50 = vpack.c.bf16 %v3323_v27, %v3323_v27  ;;  %v3452_v56 = vpack.c.bf16 %v3324_v38, %v3324_v38  ;;  %v3453_v8 = vpack.c.bf16 %v3325_v2, %v3325_v2 }
 0x1fc   : > { %v10619_v46 = vpack.c.b16 %v3913_v29, %v3899_v55  ;;  %4251 = vmatpush.bf16.msrb.mxu0 %v10599_v31  ;;  %v3333_v45 = vld [vmem:[%s9237_s13 + $0x1ff] sm:$0x1]  ;;  %5214 = vmatpush.bf16.msrb.mxu3 %v10599_v31  ;;  %13388 = vst [vmem:[#allocation81_spill] sm:$0xff] %v10626_v58  ;;  %v3455_v62 = vpack.c.bf16 %v3327_v9, %v3327_v9  ;;  %v3703_v36 = vunpack.c.l.b16 %v3447_v0  ;;  %v3704_v37 = vunpack.c.l.b16 %v3448_v26  ;;  %s8015_s13 = scalar_lea.sflag [#allocation4], %s216_s22 }
 0x1fd   : > { %v3456_v48 = vpack.c.bf16 %v3328_v59, %v3328_v59  ;;  %v3457_v55 = vpack.c.bf16 %v3329_v61, %v3329_v61  ;;  %v3458_v18 = vpack.c.bf16 %v3330_v12, %v3330_v12  ;;  %v3454_v29 = vpack.c.bf16 %v3326_v4, %v3326_v4  ;;  %v10633_v2 = vpop.f32.mrf.mxu2 }
 0x1fe   : > { %8201 = vmatmul.msk.bf16.gmra.mxu1 %vm1058_vm7, %v10619_v46  ;;  %v3459_v33 = vpack.c.bf16 %v3331_v57, %v3331_v57  ;;  %v3460_v11 = vpack.c.bf16 %v3332_v23, %v3332_v23  ;;  %v3461_v16 = vpack.c.bf16 %v3333_v45, %v3333_v45  ;;  %8203 = vmatmul.msk.bf16.vlgmr.msra.gmra.mxu2 %vm1058_vm7, %v10004_v32  ;;  %v3705_v27 = vunpack.c.l.b16 %v3449_v52 }
 0x1ff   : > { %v3706_v38 = vunpack.c.l.b16 %v3450_v20  ;;  %13389 = vst [vmem:[#allocation82_spill] sm:$0xff] %v10633_v2  ;;  %v3702_v28 = vunpack.c.l.b16 %v3446_v53  ;;  %v3707_v9 = vunpack.c.l.b16 %v3451_v50  ;;  %v3708_v59 = vunpack.c.l.b16 %v3452_v56  ;;  %v10636_v0 = vpop.f32.mrf.mxu1  ;;  %v8454_v50 = vld [vmem:[%s13307_s2 + $0x4] sm:$0xf]  ;;  %v8245_v56 = vld [vmem:[%s13307_s2 + $0x30] sm:$0xf] }
 0x200   : > { %4252 = vmatpush.bf16.msrb.mxu0 %v10612_v7  ;;  %v3709_v61 = vunpack.c.l.b16 %v3453_v8  ;;  %5215 = vmatpush.bf16.msrb.mxu3 %v10612_v7  ;;  %v3711_v4 = vunpack.c.l.b16 %v3455_v62  ;;  %v3712_v23 = vunpack.c.l.b16 %v3456_v48  ;;  %v3713_v12 = vunpack.c.l.b16 %v3457_v55  ;;  %v8223_v55 = vld [vmem:[%s13307_s2 + $0x8] sm:$0xf0] }
 0x201   : > { %v3714_v57 = vunpack.c.l.b16 %v3458_v18  ;;  %v3710_v45 = vunpack.c.l.b16 %v3454_v29  ;;  %v3715_v58 = vunpack.c.l.b16 %v3459_v33  ;;  %v3716_v39 = vunpack.c.l.b16 %v3460_v11 }
 0x202   : > { %v3914_v60 = vrot.slane %v3703_v36, 7  ;;  %v3717_v20 = vunpack.c.l.b16 %v3461_v16  ;;  %v3916_v52 = vrot.slane %v3704_v37, 6  ;;  %v3918_v53 = vrot.slane %v3705_v27, 5  ;;  %v8461_v36 = vld [vmem:[%s13307_s2 + $0x34] sm:$0xf0] }
 0x203   : > { %v3920_v26 = vrot.slane %v3706_v38, 4  ;;  %v3922_v8 = vrot.slane %v3707_v9, 3  ;;  %v3924_v62 = vrot.slane %v3708_v59, 2  ;;  %v3928_v48 = vrot.slane %v3711_v4, 7  ;;  %v10656_v38 = vpop.f32.mrf.mxu0 }
 0x204   : > { %4253 = vmatpush.bf16.msrb.mxu0 %v10614_v51  ;;  %v3915_v33 = vsel %vm788_vm0, %v3914_v60, %v3702_v28  ;;  %5216 = vmatpush.bf16.msrb.mxu3 %v10614_v51  ;;  %v3930_v29 = vrot.slane %v3712_v23, 6  ;;  %v3932_v11 = vrot.slane %v3713_v12, 5  ;;  %v3934_v16 = vrot.slane %v3714_v57, 4  ;;  %13390 = vst [vmem:[#allocation83_spill] sm:$0xff] %v10656_v38  ;;  %v8237_v12 = vld [vmem:[%s13307_s2 + $0x20] sm:$0xf] }
 0x205   : > { %v3917_v18 = vsel %vm791_vm1, %v3916_v52, %v3915_v33  ;;  %v3926_v60 = vrot.slane %v3709_v61, 1  ;;  %v3929_v37 = vsel %vm788_vm0, %v3928_v48, %v3710_v45  ;;  %v3936_v27 = vrot.slane %v3715_v58, 3  ;;  %v8459_v61 = vld [vmem:[%s13307_s2 + $0x24] sm:$0xf0]  ;;  %v10668_v57 = vpop.f32.mrf.mxu2 }
 0x206   : > { %v3919_v28 = vsel %vm794_vm2, %v3918_v53, %v3917_v18  ;;  %v3931_v59 = vsel %vm791_vm1, %v3930_v29, %v3929_v37  ;;  %v3938_v4 = vrot.slane %v3716_v39, 2  ;;  %v10660_v23 = vor.u32 %v8454_v50, %v8223_v55  ;;  %13391 = vst [vmem:[#allocation84_spill] sm:$0xff] %v10668_v57 }
 0x207   : > { %v3921_v9 = vsel %vm797_vm3, %v3920_v26, %v3919_v28  ;;  %v3933_v45 = vsel %vm794_vm2, %v3932_v11, %v3931_v59  ;;  %v3940_v52 = vrot.slane %v3717_v20, 1  ;;  %v10672_v53 = vor.u32 %v8461_v36, %v8245_v56  ;;  %v8229_v20 = vld [vmem:[%s13307_s2 + $0x10] sm:$0xf]  ;;  %v8457_v56 = vld [vmem:[%s13307_s2 + $0x14] sm:$0xf0]  ;;  %v10691_v55 = vpop.f32.mrf.mxu1 }
 0x208   : > { %v3923_v58 = vsel %vm800_vm4, %v3922_v8, %v3921_v9  ;;  %v3935_v26 = vsel %vm797_vm3, %v3934_v16, %v3933_v45  ;;  %4306 = vmatpush.bf16.msrb.mxu1 %v10660_v23  ;;  %v10680_v48 = vor.u32 %v8459_v61, %v8237_v12  ;;  %v10696_v29 = vor.u32 %v8457_v56, %v8229_v20  ;;  %v8221_v11 = vld [vmem:[%s13307_s2] sm:$0xf]  ;;  %v8455_v16 = vld [vmem:[%s13307_s2 + $0x4] sm:$0xf0]  ;;  %v8477_v12 = vld [vmem:[%s13308_s3 + $0x38] sm:$0xff] }
 0x209   : > { %v3925_v39 = vsel %vm803_vm5, %v3924_v62, %v3923_v58  ;;  %v3937_v33 = vsel %vm800_vm4, %v3936_v27, %v3935_v26  ;;  %4254 = vmatpush.bf16.msrb.mxu0 %v10672_v53  ;;  %5217 = vmatpush.bf16.msrb.mxu3 %v10672_v53  ;;  %v9106_v9 = vmov 0  }
 0x20a   : > { %v3927_v50 = vsel %vm806_vm6, %v3926_v60, %v3925_v39  ;;  %v3939_v8 = vsel %vm803_vm5, %v3938_v4, %v3937_v33  ;;  %v10714_v60 = vor.u32 %v8455_v16, %v8221_v11  ;;  %v10731_v4 = vpop.f32.mrf.mxu3  ;;  %5108 = vmatpush.bf16.msrb.mxu2 %v8477_v12 }
 0x20b   : > { %v3941_v62 = vsel %vm806_vm6, %v3940_v52, %v3939_v8  ;;  %v10711_v28 = vpop.f32.mrf.mxu0  ;;  %13396 = vst [vmem:[#allocation89_spill] sm:$0xff] %v10731_v4 }
 0x20c   : > { %v10693_v18 = vpack.c.b16 %v3941_v62, %v3927_v50  ;;  %13393 = vst [vmem:[#allocation86_spill] sm:$0xff] %v10711_v28  ;;  %6023 = vmatpush.bf16.msra.mxu1 %v8477_v12 }
 0x20d   : > { %4255 = vmatpush.bf16.msrb.mxu0 %v10680_v48  ;;  %v10708_v36 = vpop.f32.mrf.mxu2  ;;  %5218 = vmatpush.bf16.msrb.mxu3 %v10680_v48 }
 0x20e   : > { %8204 = vmatmul.msk.bf16.gmra.mxu2 %vm1058_vm7, %v10096_v30  ;;  %8202 = vmatmul.msk.bf16.gmra.mxu1 %vm1058_vm7, %v10693_v18  ;;  %13392 = vst [vmem:[#allocation85_spill] sm:$0xff] %v10708_v36 }
 0x20f   : > { %v10718_v37 = vpop.f32.mrf.mxu1 }
 0x211   : > { %4256 = vmatpush.bf16.msrb.mxu0 %v10696_v29  ;;  %5219 = vmatpush.bf16.msrb.mxu3 %v10696_v29 }
 0x212   : > { %v10744_v52 = vpop.f32.mrf.mxu3  ;;  %8183 = vmatmul.msk.bf16.gmra.mxu3 %vm1058_vm7, %v10240_v19  ;;  %v8476_v19 = vld [vmem:[%s13308_s3 + $0x30] sm:$0xff] }
 0x213   : > { %v10725_v59 = vpop.f32.mrf.mxu0  ;;  %13399 = vst [vmem:[#allocation92_spill] sm:$0xff] %v10744_v52  ;;  %5109 = vmatpush.bf16.msrb.mxu2 %v8476_v19  ;;  %6024 = vmatpush.bf16.msra.mxu1 %v8476_v19 }
 0x214   : > { %13395 = vst [vmem:[#allocation88_spill] sm:$0xff] %v10725_v59 }
 0x215   : > { %4257 = vmatpush.bf16.msrb.mxu0 %v10714_v60  ;;  %v10720_v27 = vpop.f32.mrf.mxu2  ;;  %5220 = vmatpush.bf16.msrb.mxu3 %v10714_v60 }
 0x216   : > { %13394 = vst [vmem:[#allocation87_spill] sm:$0xff] %v10720_v27 }
 0x217   : > { %v10737_v61 = vpop.f32.mrf.mxu1 }
 0x218   : > { %4258 = vmatmul.bf16.vlgmr.msrb.gmra.mxu0 %v9106_v9 }
 0x219   : > { %5262 = vmatpush.bf16.msra.mxu0 %v9978_v44 }
 0x21a   : > { %v10760_v33 = vpop.f32.mrf.mxu3 }
 0x21b   : > { %v10742_v45 = vpop.f32.mrf.mxu0  ;;  %13402 = vst [vmem:[#allocation95_spill] sm:$0xff] %v10760_v33 }
 0x21c   : > { %13398 = vst [vmem:[#allocation91_spill] sm:$0xff] %v10742_v45 }
 0x21d   : > { %5263 = vmatpush.bf16.msra.mxu0 %v10065_v49  ;;  %v10739_v58 = vpop.f32.mrf.mxu2 }
 0x21e   : > { %8205 = vmatmul.msk.bf16.gmra.mxu2 %vm1058_vm7, %v10194_v6  ;;  %4307 = vmatmul.bf16.vlgmr.msrb.gmra.mxu1 %v9106_v9  ;;  %13397 = vst [vmem:[#allocation90_spill] sm:$0xff] %v10739_v58 }
 0x21f   : > { %v10750_v39 = vpop.f32.mrf.mxu1 }
 0x221   : > { %5264 = vmatpush.bf16.msra.mxu0 %v10163_v1 }
 0x222   : > { %v10771_v56 = vpop.f32.mrf.mxu3  ;;  %8184 = vmatmul.msk.bf16.gmra.mxu3 %vm1058_vm7, %v10337_v54  ;;  %v8475_v54 = vld [vmem:[%s13308_s3 + $0x28] sm:$0xff] }
 0x223   : > { %v10757_v50 = vpop.f32.mrf.mxu0  ;;  %13404 = vst [vmem:[#allocation97_spill] sm:$0xff] %v10771_v56  ;;  %5110 = vmatpush.bf16.msrb.mxu2 %v8475_v54  ;;  %6025 = vmatpush.bf16.msra.mxu1 %v8475_v54 }
 0x224   : > { %13401 = vst [vmem:[#allocation94_spill] sm:$0xff] %v10757_v50 }
 0x225   : > { %5265 = vmatpush.bf16.msra.mxu0 %v10264_v35  ;;  %v10752_v26 = vpop.f32.mrf.mxu2 }
 0x226   : > { %13400 = vst [vmem:[#allocation93_spill] sm:$0xff] %v10752_v26 }
 0x227   : > { %v10767_v8 = vpop.f32.mrf.mxu1 }
 0x228   : > { %4263 = vmatmul.bf16.gmra.mxu0 %v9106_v9 }
 0x229   : > { %5266 = vmatpush.bf16.msra.mxu0 %v10358_v5 }
 0x22b   : > { %v10775_v62 = vpop.f32.mrf.mxu0 }
 0x22c   : > { %13405 = vst [vmem:[#allocation98_spill] sm:$0xff] %v10775_v62 }
 0x22d   : > { %5267 = vmatpush.bf16.msra.mxu0 %v10454_v47  ;;  %v10769_v20 = vpop.f32.mrf.mxu2 }
 0x22e   : > { %8206 = vmatmul.msk.bf16.gmra.mxu2 %vm1058_vm7, %v10293_v22  ;;  %4312 = vmatmul.bf16.gmra.mxu1 %v9106_v9  ;;  %13403 = vst [vmem:[#allocation96_spill] sm:$0xff] %v10769_v20 }
 0x22f   : > { %v10778_v11 = vpop.f32.mrf.mxu1 }
 0x231   : > { %5268 = vmatpush.bf16.msra.mxu0 %v10566_v63 }
 0x235   : > { %5269 = vmatpush.bf16.msra.mxu0 %v10660_v23  ;;  %v10783_v16 = vpop.f32.mrf.mxu2 }
 0x236   : > { %13406 = vst [vmem:[#allocation99_spill] sm:$0xff] %v10783_v16 }
 0x237   : > { %v10796_v33 = vpop.f32.mrf.mxu1 }
 0x238   : > { %4268 = vmatmul.bf16.gmra.mxu0 %v9106_v9 }
 0x239   : > { %6954 = vmatpush.bf16.msrb.mxu0 %v8477_v12  ;;  %v10785_v12 = vpop.f32.mrf.mxu3 }
 0x23a   : > { %13407 = vst [vmem:[#allocation100_spill] sm:$0xff] %v10785_v12 }
 0x23d   : > { %6955 = vmatpush.bf16.msrb.mxu0 %v8476_v19  ;;  %v10790_v19 = vpop.f32.mrf.mxu0  ;;  %v10799_v52 = vpop.f32.mrf.mxu2 }
 0x23e   : > { %8207 = vmatmul.msk.bf16.gmra.mxu2 %vm1058_vm7, %v10386_v25  ;;  %4317 = vmatmul.bf16.gmra.mxu1 %v9106_v9  ;;  %13408 = vst [vmem:[#allocation101_spill] sm:$0xff] %v10790_v19 }
 0x23f   : > { %13410 = vst [vmem:[#allocation103_spill] sm:$0xff] %v10799_v52 }
 0x241   : > { %6956 = vmatpush.bf16.msrb.mxu0 %v8475_v54  ;;  %v10792_v56 = vpop.f32.mrf.mxu3  ;;  %8185 = vmatmul.msk.bf16.gmra.mxu3 %vm1058_vm7, %v10432_v15  ;;  %v10811_v15 = vpop.f32.mrf.mxu1 }
 0x242   : > { %13409 = vst [vmem:[#allocation102_spill] sm:$0xff] %v10792_v56  ;;  %v8474_v56 = vld [vmem:[%s13308_s3 + $0x20] sm:$0xff] }
 0x243   : > { %5111 = vmatpush.bf16.msrb.mxu2 %v8474_v56  ;;  %6026 = vmatpush.bf16.msra.mxu1 %v8474_v56 }
 0x245   : > { %v10801_v12 = vpop.f32.mrf.mxu0  ;;  %6957 = vmatpush.bf16.msrb.mxu0 %v8474_v56  ;;  %v10813_v4 = vpop.f32.mrf.mxu2 }
 0x246   : > { %13411 = vst [vmem:[#allocation104_spill] sm:$0xff] %v10801_v12 }
 0x247   : > { %13413 = vst [vmem:[#allocation106_spill] sm:$0xff] %v10813_v4 }
 0x248   : > { %4273 = vmatmul.bf16.gmra.mxu0 %v9106_v9 }
 0x249   : > { %v10806_v54 = vpop.f32.mrf.mxu3 }
 0x24a   : > { %13412 = vst [vmem:[#allocation105_spill] sm:$0xff] %v10806_v54  ;;  %v10822_v54 = vpop.f32.mrf.mxu1 }
 0x24d   : > { %v10815_v62 = vpop.f32.mrf.mxu0 }
 0x24e   : > { %8208 = vmatmul.msk.bf16.gmra.mxu2 %vm1058_vm7, %v10485_v10  ;;  %4322 = vmatmul.bf16.gmra.mxu1 %v9106_v9  ;;  %13414 = vst [vmem:[#allocation107_spill] sm:$0xff] %v10815_v62 }
 0x251   : > { %v10817_v50 = vpop.f32.mrf.mxu3  ;;  %8186 = vmatmul.msk.bf16.gmra.mxu3 %vm1058_vm7, %v10533_v13 }
 0x252   : > { %13415 = vst [vmem:[#allocation108_spill] sm:$0xff] %v10817_v50  ;;  %v10824_v45 = vpop.f32.mrf.mxu2  ;;  %v8473_v50 = vld [vmem:[%s13308_s3 + $0x18] sm:$0xff] }
 0x253   : > { %13416 = vst [vmem:[#allocation109_spill] sm:$0xff] %v10824_v45  ;;  %5112 = vmatpush.bf16.msrb.mxu2 %v8473_v50  ;;  %6027 = vmatpush.bf16.msra.mxu1 %v8473_v50  ;;  %v10900_v45 = vld [vmem:[%s13309_s4] sm:$0x7] }
 0x254   : > { %6958 = vmatpush.bf16.msrb.mxu0 %v8473_v50 }
 0x255   : > { %v10831_v59 = vpop.f32.mrf.mxu0 }
 0x256   : > { %13418 = vst [vmem:[#allocation111_spill] sm:$0xff] %v10831_v59 }
 0x257   : > { %5113 = vmatpush.bf16.msrb.mxu2 %v8472_v43  ;;  %6028 = vmatpush.bf16.msra.mxu1 %v8472_v43 }
 0x258   : > { %4278 = vmatmul.bf16.gmra.mxu0 %v9106_v9 }
 0x259   : > { %v10829_v56 = vpop.f32.mrf.mxu3  ;;  %6959 = vmatpush.bf16.msrb.mxu0 %v8472_v43 }
 0x25a   : > { %13417 = vst [vmem:[#allocation110_spill] sm:$0xff] %v10829_v56  ;;  %v10838_v28 = vpop.f32.mrf.mxu2 }
 0x25b   : > { %13419 = vst [vmem:[#allocation112_spill] sm:$0xff] %v10838_v28 }
 0x25c   : > { %v10836_v13 = vpop.f32.mrf.mxu1 }
 0x25d   : > { %v10846_v56 = vpop.f32.mrf.mxu0 }
 0x25e   : > { %8209 = vmatmul.msk.bf16.gmra.mxu2 %vm1058_vm7, %v10619_v46  ;;  %4327 = vmatmul.bf16.gmra.mxu1 %v9106_v9  ;;  %13421 = vst [vmem:[#allocation114_spill] sm:$0xff] %v10846_v56 }
 0x261   : > { %v10840_v38 = vpop.f32.mrf.mxu3  ;;  %8211 = vmatmul.msk.bf16.vlgmr.msra.gmra.mxu3 %vm1058_vm7, %v10004_v32 }
 0x262   : > { %13420 = vst [vmem:[#allocation113_spill] sm:$0xff] %v10840_v38  ;;  %6193 = vmatpush.bf16.msra.mxu3 %v9978_v44 }
 0x264   : > { %v10854_v17 = vpop.f32.mrf.mxu1 }
 0x265   : > { %v10860_v38 = vpop.f32.mrf.mxu0 }
 0x266   : > { %6194 = vmatpush.bf16.msra.mxu3 %v10065_v49  ;;  %13424 = vst [vmem:[#allocation117_spill] sm:$0xff] %v10860_v38  ;;  %v8471_v38 = vld [vmem:[%s13308_s3 + $0x8] sm:$0xff] }
 0x267   : > { %5114 = vmatpush.bf16.msrb.mxu2 %v8471_v38  ;;  %6029 = vmatpush.bf16.msra.mxu1 %v8471_v38 }
 0x268   : > { %4283 = vmatmul.bf16.gmra.mxu0 %v9106_v9 }
 0x269   : > { %v10852_v50 = vpop.f32.mrf.mxu3  ;;  %6960 = vmatpush.bf16.msrb.mxu0 %v8471_v38 }
 0x26a   : > { %13422 = vst [vmem:[#allocation115_spill] sm:$0xff] %v10852_v50  ;;  %6195 = vmatpush.bf16.msra.mxu3 %v10163_v1 }
 0x26d   : > { %v10876_v40 = vpop.f32.mrf.mxu0 }
 0x26e   : > { %8210 = vmatmul.msk.bf16.gmra.mxu2 %vm1058_vm7, %v10693_v18  ;;  %4332 = vmatmul.bf16.gmra.mxu1 %v9106_v9  ;;  %13427 = vst [vmem:[#allocation120_spill] sm:$0xff] %v10876_v40 }
 0x26f   : > { %6196 = vmatpush.bf16.msra.mxu3 %v10264_v35 }
 0x271   : > { %v10857_v32 = vpop.f32.mrf.mxu2  ;;  %v10865_v41 = vpop.f32.mrf.mxu3  ;;  %8212 = vmatmul.msk.bf16.gmra.mxu3 %vm1058_vm7, %v10096_v30 }
 0x272   : > { %13423 = vst [vmem:[#allocation116_spill] sm:$0xff] %v10857_v32 }
 0x273   : > { %13425 = vst [vmem:[#allocation118_spill] sm:$0xff] %v10865_v41  ;;  %6197 = vmatpush.bf16.msra.mxu3 %v10358_v5 }
 0x275   : > { %v10889_v43 = vpop.f32.mrf.mxu0 }
 0x276   : > { %13430 = vst [vmem:[#allocation123_spill] sm:$0xff] %v10889_v43 }
 0x277   : > { %6198 = vmatpush.bf16.msra.mxu3 %v10454_v47 }
 0x278   : > { %4288 = vmatmul.bf16.gmra.mxu0 %v9106_v9 }
 0x279   : > { %v10871_v50 = vpop.f32.mrf.mxu2  ;;  %v10879_v41 = vpop.f32.mrf.mxu3 }
 0x27a   : > { %13426 = vst [vmem:[#allocation119_spill] sm:$0xff] %v10871_v50 }
 0x27b   : > { %v10873_v21 = vpop.f32.mrf.mxu1  ;;  %13428 = vst [vmem:[#allocation121_spill] sm:$0xff] %v10879_v41  ;;  %6199 = vmatpush.bf16.msra.mxu3 %v10566_v63 }
 0x27e   : > { %4337 = vmatmul.bf16.gmra.mxu1 %v9106_v9 }
 0x27f   : > { %6200 = vmatpush.bf16.msra.mxu3 %v10660_v23 }
 0x281   : > { %v4032_v30 = vpop.f32.mrf.mxu2  ;;  %v10885_v24 = vpop.f32.mrf.mxu3  ;;  %8213 = vmatmul.msk.bf16.gmra.mxu3 %vm1058_vm7, %v10194_v6  ;;  %v10905_v6 = vperm.slane %v10900_v45, 1 }
 0x282   : > { %13429 = vst [vmem:[#allocation122_spill] sm:$0xff] %v10885_v24 }
 0x283   : > { %v10882_v34 = vpop.f32.mrf.mxu1 }
 0x288   : > { %4293 = vmatmul.bf16.gmra.mxu0 %v9106_v9 }
 0x289   : > { %v4034_v50 = vpop.f32.mrf.mxu2  ;;  %v10895_v41 = vpop.f32.mrf.mxu3 }
 0x28a   : > { %13431 = vst [vmem:[#allocation124_spill] sm:$0xff] %v10895_v41 }
 0x28b   : > { %v10892_v32 = vpop.f32.mrf.mxu1 }
 0x28e   : > { %4342 = vmatmul.bf16.gmra.mxu1 %v9106_v9  ;;  %v4033_v9 = vadd.f32 %v4032_v30, %v10905_v6  ;;  %v4035_v30 = vadd.f32 %v4034_v50, %v10905_v6 }
 0x291   : > { %v4037_v28 = vpop.f32.mrf.mxu2  ;;  %v10907_v43 = vpop.f32.mrf.mxu3  ;;  %8214 = vmatmul.msk.bf16.gmra.mxu3 %vm1058_vm7, %v10293_v22  ;;  %v8470_v22 = vld [vmem:[%s13308_s3] sm:$0xff] }
 0x292   : > { %13432 = vst [vmem:[#allocation125_spill] sm:$0xff] %v10907_v43  ;;  %5115 = vmatpush.bf16.msrb.mxu2 %v8470_v22  ;;  %6030 = vmatpush.bf16.msra.mxu1 %v8470_v22 }
 0x293   : > { %v10902_v24 = vpop.f32.mrf.mxu1  ;;  %6961 = vmatpush.bf16.msrb.mxu0 %v8470_v22 }
 0x296   : > { %6144 = vmatpush.bf16.msra.mxu2 %v10568_v42  ;;  %7075 = vmatpush.bf16.msrb.mxu1 %v10568_v42 }
 0x299   : > { %v4039_v40 = vpop.f32.mrf.mxu2  ;;  %v10915_v56 = vpop.f32.mrf.mxu3 }
 0x29a   : > { %6145 = vmatpush.bf16.msra.mxu2 %v10599_v31  ;;  %7076 = vmatpush.bf16.msrb.mxu1 %v10599_v31 }
 0x29b   : > { %v4308_v41 = vpop.f32.mrf.mxu1 }
 0x29c   : > { %v4700_v4 = vadd.f32 %v4308_v41, %v4033_v9 }
 0x29e   : > { %v8299_v52 = vmul.f32 -1.442695, %v4700_v4  ;;  %6146 = vmatpush.bf16.msra.mxu2 %v10612_v7  ;;  %7077 = vmatpush.bf16.msrb.mxu1 %v10612_v7 }
 0x2a0   : > { %8521 = vpow2.f32 %v8299_v52  ;;  %v4038_v52 = vadd.f32 %v4037_v28, %v10905_v6 }
 0x2a1   : > { %v4042_v43 = vpop.f32.mrf.mxu2  ;;  %v10926_v59 = vpop.f32.mrf.mxu3  ;;  %8215 = vmatmul.msk.bf16.gmra.mxu3 %vm1058_vm7, %v10386_v25 }
 0x2a2   : > { %6147 = vmatpush.bf16.msra.mxu2 %v10614_v51  ;;  %7078 = vmatpush.bf16.msrb.mxu1 %v10614_v51  ;;  %v4043_v51 = vadd.f32 %v4042_v43, %v10905_v6 }
 0x2a3   : > { %v4310_v16 = vpop.f32.mrf.mxu1 }
 0x2a4   : > { %v4701_v41 = vadd.f32 %v4310_v16, %v4035_v30  ;;  %v10933_v16 = vpop.f32.mrf.mxu0 }
 0x2a5   : > { %13433 = vst [vmem:[#allocation126_spill] sm:$0xff] %v10933_v16 }
 0x2a6   : > { %v8522_v4 = vpop.eup %8521  ;;  %v8300_v9 = vmul.f32 -1.442695, %v4701_v41  ;;  %6148 = vmatpush.bf16.msra.mxu2 %v10672_v53  ;;  %7079 = vmatpush.bf16.msrb.mxu1 %v10672_v53 }
 0x2a7   : > { %v10923_v38 = vadd.f32 1.0, %v8522_v4 }
 0x2a8   : > { %8523 = vpow2.f32 %v8300_v9 }
 0x2a9   : > { %8525 = vrcp.f32 %v10923_v38  ;;  %v10935_v50 = vpop.f32.mrf.mxu2  ;;  %v10940_v9 = vpop.f32.mrf.mxu3  ;;  %vm4785_vm9 = vweird.f32 %v10923_v38  ;;  %v4789_v53 = vand.u32 2147483647, %v10923_v38 }
 0x2aa   : > { %6149 = vmatpush.bf16.msra.mxu2 %v10680_v48  ;;  %7080 = vmatpush.bf16.msrb.mxu1 %v10680_v48 }
 0x2ab   : > { %v4313_v42 = vpop.f32.mrf.mxu1  ;;  %vm4790_vm12 = vcmp.eq.f32.partialorder %v4789_v53, 8.507059e+37 }
 0x2ac   : > { %v4702_v22 = vadd.f32 %v4313_v42, %v4038_v52  ;;  %v4040_v52 = vadd.f32 %v4039_v40, %v10905_v6  ;;  %v10945_v16 = vpop.f32.mrf.mxu0 }
 0x2ad   : > { %13434 = vst [vmem:[#allocation127_spill] sm:$0xff] %v10945_v16 }
 0x2ae   : > { %v8524_v28 = vpop.eup %8523  ;;  %v8301_v30 = vmul.f32 -1.442695, %v4702_v22  ;;  %6150 = vmatpush.bf16.msra.mxu2 %v10696_v29  ;;  %7081 = vmatpush.bf16.msrb.mxu1 %v10696_v29 }
 0x2af   : > { %v8526_v41 = vpop.eup %8525  ;;  %v4765_v25 = vadd.f32 1.0, %v8524_v28 }
 0x2b0   : > { %v4781_v4 = vmul.f32 %v8526_v41, %v10923_v38  ;;  %8527 = vpow2.f32 %v8301_v30  ;;  %vm4786_vm8 = vweird.f32 %v8526_v41 }
 0x2b1   : > { %8529 = vrcp.f32 %v4765_v25  ;;  %v10948_v28 = vpop.f32.mrf.mxu2  ;;  %vm10964_vm10 = vmor %vm4785_vm9, %vm4786_vm8  ;;  %v4806_v43 = vand.u32 2147483648, %v4765_v25  ;;  %vm4800_vm13 = vweird.f32 %v4765_v25 }
 0x2b2   : > { %v4782_v31 = vsub.f32 1.0, %v4781_v4  ;;  %6151 = vmatpush.bf16.msra.mxu2 %v10714_v60  ;;  %7082 = vmatpush.bf16.msrb.mxu1 %v10714_v60  ;;  %v4048_v60 = vadd.f32 %v10948_v28, %v10905_v6 }
 0x2b3   : > { %v4315_v42 = vpop.f32.mrf.mxu1 }
 0x2b4   : > { %v4783_v7 = vmul.f32 %v8526_v41, %v4782_v31  ;;  %v4703_v22 = vadd.f32 %v4315_v42, %v4040_v52  ;;  %v4791_v31 = vand.u32 2147483648, %v10923_v38  ;;  %v10960_v42 = vpop.f32.mrf.mxu3  ;;  %8216 = vmatmul.msk.bf16.gmra.mxu3 %vm1058_vm7, %v10485_v10  ;;  %v10972_v10 = vpop.f32.mrf.mxu0 }
 0x2b5   : > { %13437 = vst [vmem:[#allocation128_spill] sm:$0xff] %v10972_v10 }
 0x2b6   : > { %v8528_v30 = vpop.eup %8527  ;;  %v8302_v20 = vmul.f32 -1.442695, %v4703_v22  ;;  %v4784_v4 = vadd.f32 %v8526_v41, %v4783_v7  ;;  %v4804_v22 = vand.u32 2147483647, %v4765_v25  ;;  %v4792_v38 = vor.u32 1.1754944e-38, %v4791_v31 }
 0x2b7   : > { %v8530_v62 = vpop.eup %8529  ;;  %v10951_v26 = vadd.f32 1.0, %v8528_v30  ;;  %v4045_v31 = vadd.f32 %v10935_v50, %v10905_v6 }
 0x2b8   : > { %v4796_v40 = vmul.f32 %v8530_v62, %v4765_v25  ;;  %8531 = vpow2.f32 %v8302_v20  ;;  %vm4801_vm11 = vweird.f32 %v8530_v62  ;;  %v4788_v16 = vsel %vm10964_vm10, %v8526_v41, %v4784_v4 }
 0x2b9   : > { %8533 = vrcp.f32 %v10951_v26  ;;  %vm4802_vm14 = vmor %vm4800_vm13, %vm4801_vm11  ;;  %v10976_v20 = vpop.f32.mrf.mxu2  ;;  %vm4805_vm15 = vcmp.eq.f32.partialorder %v4804_v22, 8.507059e+37  ;;  %vm4815_vm1 = vweird.f32 %v10951_v26 }
 0x2ba   : > { %v4797_v52 = vsub.f32 1.0, %v4796_v40 }
 0x2bb   : > { %v4318_v7 = vpop.f32.mrf.mxu1 }
 0x2bc   : > { %v4798_v30 = vmul.f32 %v8530_v62, %v4797_v52  ;;  %v4704_v48 = vadd.f32 %v4318_v7, %v4043_v51  ;;  %v4807_v52 = vor.u32 1.1754944e-38, %v4806_v43  ;;  %v4793_v51 = vsel %vm4790_vm12, %v4792_v38, %v4788_v16  ;;  %v10984_v43 = vpop.f32.mrf.mxu3  ;;  %v10991_v50 = vpop.f32.mrf.mxu0 }
 0x2bd   : > { %v5020_v53 = vmul.f32 0.0, %v4793_v51  ;;  %13438 = vst [vmem:[#allocation129_spill] sm:$0xff] %v10991_v50 }
 0x2be   : > { %v8532_v40 = vpop.eup %8531  ;;  %v8303_v12 = vmul.f32 -1.442695, %v4704_v48  ;;  %v4799_v58 = vadd.f32 %v8530_v62, %v4798_v30 }
 0x2bf   : > { %v8534_v19 = vpop.eup %8533  ;;  %v10974_v27 = vadd.f32 1.0, %v8532_v40 }
 0x2c0   : > { %v4811_v41 = vmul.f32 %v8534_v19, %v10951_v26  ;;  %8535 = vpow2.f32 %v8303_v12  ;;  %v4803_v4 = vsel %vm4802_vm14, %v8530_v62, %v4799_v58  ;;  %vm4816_vm0 = vweird.f32 %v8534_v19 }
 0x2c1   : > { %8537 = vrcp.f32 %v10974_v27  ;;  %v4808_v29 = vsel %vm4805_vm15, %v4807_v52, %v4803_v4  ;;  %v4052_v51 = vpop.f32.mrf.mxu2  ;;  %v4819_v4 = vand.u32 2147483647, %v10951_v26  ;;  %vm11002_vm2 = vmor %vm4815_vm1, %vm4816_vm0  ;;  %vm4830_vm5 = vweird.f32 %v10974_v27 }
 0x2c2   : > { %v4812_v25 = vsub.f32 1.0, %v4811_v41  ;;  %v5021_v16 = vmul.f32 0.0, %v4808_v29  ;;  %v4821_v41 = vand.u32 2147483648, %v10951_v26 }
 0x2c3   : > { %v4320_v7 = vpop.f32.mrf.mxu1  ;;  %vm4820_vm4 = vcmp.eq.f32.partialorder %v4819_v4, 8.507059e+37  ;;  %v4050_v4 = vadd.f32 %v10976_v20, %v10905_v6  ;;  %v4053_v20 = vadd.f32 %v4052_v51, %v10905_v6 }
 0x2c4   : > { %v4705_v30 = vadd.f32 %v4320_v7, %v4045_v31  ;;  %v5036_v12 = vpack.c.bf16 %v5021_v16, %v5020_v53  ;;  %v4813_v58 = vmul.f32 %v8534_v19, %v4812_v25  ;;  %v10998_v28 = vpop.f32.mrf.mxu3  ;;  %8217 = vmatmul.msk.bf16.gmra.mxu3 %vm1058_vm7, %v10619_v46  ;;  %v4834_v31 = vand.u32 2147483647, %v10974_v27 }
 0x2c5   : > { %v4836_v53 = vand.u32 2147483648, %v10974_v27 }
 0x2c6   : > { %v8536_v62 = vpop.eup %8535  ;;  %v8304_v22 = vmul.f32 -1.442695, %v4705_v30  ;;  %5116 = vmatmul.bf16.vlgmr.msrb.gmra.mxu2 %v5036_v12  ;;  %v4814_v52 = vadd.f32 %v8534_v19, %v4813_v58  ;;  %v4822_v30 = vor.u32 1.1754944e-38, %v4821_v41  ;;  %vm4835_vm8 = vcmp.eq.f32.partialorder %v4834_v31, 8.507059e+37  ;;  %v11020_v41 = vpop.f32.mrf.mxu0 }
 0x2c7   : > { %v8538_v48 = vpop.eup %8537  ;;  %v10986_v38 = vadd.f32 1.0, %v8536_v62  ;;  %7124 = vmatpush.bf16.msrb.mxu2 %v9978_v44  ;;  %13441 = vst [vmem:[#allocation130_spill] sm:$0xff] %v11020_v41 }
 0x2c8   : > { %v4826_v40 = vmul.f32 %v8538_v48, %v10974_v27  ;;  %8539 = vpow2.f32 %v8304_v22  ;;  %v4818_v26 = vsel %vm11002_vm2, %v8534_v19, %v4814_v52  ;;  %vm4831_vm3 = vweird.f32 %v8538_v48 }
 0x2c9   : > { %8541 = vrcp.f32 %v10986_v38  ;;  %vm4832_vm6 = vmor %vm4830_vm5, %vm4831_vm3  ;;  %vm4845_vm10 = vweird.f32 %v10986_v38 }
 0x2ca   : > { %v4827_v29 = vsub.f32 1.0, %v4826_v40  ;;  %v4823_v40 = vsel %vm4820_vm4, %v4822_v30, %v4818_v26 }
 0x2cb   : > { %v4323_v44 = vpop.f32.mrf.mxu1  ;;  %7125 = vmatpush.bf16.msrb.mxu2 %v10065_v49  ;;  %v4837_v49 = vor.u32 1.1754944e-38, %v4836_v53  ;;  %v4054_v53 = vpop.f32.mrf.mxu2 }
 0x2cc   : > { %v4706_v16 = vadd.f32 %v4323_v44, %v4048_v60  ;;  %v4828_v7 = vmul.f32 %v8538_v48, %v4827_v29  ;;  %v5022_v29 = vmul.f32 0.0, %v4823_v40  ;;  %v11024_v25 = vpop.f32.mrf.mxu3  ;;  %v4849_v40 = vand.u32 2147483647, %v10986_v38 }
 0x2ce   : > { %v8540_v12 = vpop.eup %8539  ;;  %v8305_v46 = vmul.f32 -1.442695, %v4706_v16  ;;  %v4829_v58 = vadd.f32 %v8538_v48, %v4828_v7  ;;  %vm4850_vm12 = vcmp.eq.f32.partialorder %v4849_v40, 8.507059e+37 }
 0x2cf   : > { %v11012_v62 = vpop.eup %8541  ;;  %v11014_v22 = vadd.f32 1.0, %v8540_v12  ;;  %7126 = vmatpush.bf16.msrb.mxu2 %v10163_v1 }
 0x2d0   : > { %v4841_v19 = vmul.f32 %v11012_v62, %v10986_v38  ;;  %8543 = vpow2.f32 %v8305_v46  ;;  %v4833_v60 = vsel %vm4832_vm6, %v8538_v48, %v4829_v58  ;;  %vm4846_vm9 = vweird.f32 %v11012_v62 }
 0x2d1   : > { %8545 = vrcp.f32 %v11014_v22  ;;  %v4838_v52 = vsel %vm4835_vm8, %v4837_v49, %v4833_v60  ;;  %vm11043_vm11 = vmor %vm4845_vm10, %vm4846_vm9  ;;  %v4864_v60 = vand.u32 2147483647, %v11014_v22  ;;  %vm4860_vm13 = vweird.f32 %v11014_v22 }
 0x2d2   : > { %v4842_v27 = vsub.f32 1.0, %v4841_v19  ;;  %v5023_v44 = vmul.f32 0.0, %v4838_v52  ;;  %v4866_v52 = vand.u32 2147483648, %v11014_v22 }
 0x2d3   : > { %v4325_v1 = vpop.f32.mrf.mxu1  ;;  %7127 = vmatpush.bf16.msrb.mxu2 %v10264_v35  ;;  %v4851_v35 = vand.u32 2147483648, %v10986_v38  ;;  %vm4865_vm15 = vcmp.eq.f32.partialorder %v4864_v60, 8.507059e+37 }
 0x2d4   : > { %v4707_v16 = vadd.f32 %v4325_v1, %v4050_v4  ;;  %v5037_v48 = vpack.c.bf16 %v5023_v44, %v5022_v29  ;;  %v4843_v31 = vmul.f32 %v11012_v62, %v4842_v27  ;;  %v11039_v19 = vpop.f32.mrf.mxu3  ;;  %8218 = vmatmul.msk.bf16.gmra.mxu3 %vm1058_vm7, %v10693_v18  ;;  %v11050_v27 = vpop.f32.mrf.mxu0 }
 0x2d5   : > { %13444 = vst [vmem:[#allocation131_spill] sm:$0xff] %v11050_v27  ;;  %v4057_v18 = vpop.f32.mrf.mxu2  ;;  %v4852_v44 = vor.u32 1.1754944e-38, %v4851_v35  ;;  %v4055_v35 = vadd.f32 %v4054_v53, %v10905_v6 }
 0x2d6   : > { %v8544_v26 = vpop.eup %8543  ;;  %v8306_v7 = vmul.f32 -1.442695, %v4707_v16  ;;  %5121 = vmatmul.bf16.gmra.mxu2 %v5037_v48  ;;  %v4844_v58 = vadd.f32 %v11012_v62, %v4843_v31  ;;  %v4058_v53 = vadd.f32 %v4057_v18, %v10905_v6 }
 0x2d7   : > { %v8546_v30 = vpop.eup %8545  ;;  %v11028_v12 = vadd.f32 1.0, %v8544_v26  ;;  %7128 = vmatpush.bf16.msrb.mxu2 %v10358_v5 }
 0x2d8   : > { %v4856_v46 = vmul.f32 %v8546_v30, %v11014_v22  ;;  %8547 = vpow2.f32 %v8306_v7  ;;  %v4848_v4 = vsel %vm11043_vm11, %v11012_v62, %v4844_v58  ;;  %vm4861_vm7 = vweird.f32 %v8546_v30 }
 0x2d9   : > { %8549 = vrcp.f32 %v11028_v12  ;;  %vm4862_vm14 = vmor %vm4860_vm13, %vm4861_vm7  ;;  %v4867_v7 = vor.u32 1.1754944e-38, %v4866_v52  ;;  %vm4875_vm1 = vweird.f32 %v11028_v12 }
 0x2da   : > { %v4857_v49 = vsub.f32 1.0, %v4856_v46 }
 0x2db   : > { %v4328_v5 = vpop.f32.mrf.mxu1  ;;  %7129 = vmatpush.bf16.msrb.mxu2 %v10454_v47  ;;  %v4853_v47 = vsel %vm4850_vm12, %v4852_v44, %v4848_v4 }
 0x2dc   : > { %v4708_v38 = vadd.f32 %v4328_v5, %v4053_v20  ;;  %v4858_v29 = vmul.f32 %v8546_v30, %v4857_v49  ;;  %v5024_v22 = vmul.f32 0.0, %v4853_v47  ;;  %v11062_v49 = vpop.f32.mrf.mxu3  ;;  %v11065_v4 = vpop.f32.mrf.mxu0 }
 0x2dd   : > { %13445 = vst [vmem:[#allocation132_spill] sm:$0xff] %v11065_v4  ;;  %v4059_v44 = vpop.f32.mrf.mxu2 }
 0x2de   : > { %v8548_v1 = vpop.eup %8547  ;;  %v8307_v16 = vmul.f32 -1.442695, %v4708_v38  ;;  %v4859_v48 = vadd.f32 %v8546_v30, %v4858_v29 }
 0x2df   : > { %v8550_v31 = vpop.eup %8549  ;;  %v11056_v26 = vadd.f32 1.0, %v8548_v1  ;;  %7130 = vmatpush.bf16.msrb.mxu2 %v10566_v63 }
 0x2e0   : > { %v4871_v62 = vmul.f32 %v8550_v31, %v11028_v12  ;;  %8551 = vpow2.f32 %v8307_v16  ;;  %v4863_v20 = vsel %vm4862_vm14, %v8546_v30, %v4859_v48  ;;  %vm4876_vm0 = vweird.f32 %v8550_v31 }
 0x2e1   : > { %8553 = vrcp.f32 %v11056_v26  ;;  %v4868_v46 = vsel %vm4865_vm15, %v4867_v7, %v4863_v20  ;;  %v4879_v48 = vand.u32 2147483647, %v11028_v12  ;;  %vm11077_vm2 = vmor %vm4875_vm1, %vm4876_vm0  ;;  %v4894_v20 = vand.u32 2147483647, %v11056_v26 }
 0x2e2   : > { %v4872_v58 = vsub.f32 1.0, %v4871_v62  ;;  %v5025_v40 = vmul.f32 0.0, %v4868_v46  ;;  %v4896_v46 = vand.u32 2147483648, %v11056_v26  ;;  %vm4890_vm5 = vweird.f32 %v11056_v26 }
 0x2e3   : > { %v4330_v5 = vpop.f32.mrf.mxu1  ;;  %7131 = vmatpush.bf16.msrb.mxu2 %v10660_v23  ;;  %v4881_v23 = vand.u32 2147483648, %v11028_v12  ;;  %vm4880_vm4 = vcmp.eq.f32.partialorder %v4879_v48, 8.507059e+37  ;;  %vm4895_vm8 = vcmp.eq.f32.partialorder %v4894_v20, 8.507059e+37  ;;  %v4060_v48 = vadd.f32 %v4059_v44, %v10905_v6 }
 0x2e4   : > { %v4709_v51 = vadd.f32 %v4330_v5, %v4055_v35  ;;  %v5038_v63 = vpack.c.bf16 %v5025_v40, %v5024_v22  ;;  %v4873_v52 = vmul.f32 %v8550_v31, %v4872_v58  ;;  %v11075_v7 = vpop.f32.mrf.mxu3 }
 0x2e5   : > { %v4882_v40 = vor.u32 1.1754944e-38, %v4881_v23 }
 0x2e6   : > { %v8552_v38 = vpop.eup %8551  ;;  %v8308_v30 = vmul.f32 -1.442695, %v4709_v51  ;;  %5126 = vmatmul.bf16.gmra.mxu2 %v5038_v63  ;;  %v4874_v16 = vadd.f32 %v8550_v31, %v4873_v52 }
 0x2e7   : > { %v8554_v60 = vpop.eup %8553  ;;  %v11067_v29 = vadd.f32 1.0, %v8552_v38 }
 0x2e8   : > { %v4886_v1 = vmul.f32 %v8554_v60, %v11056_v26  ;;  %8555 = vpow2.f32 %v8308_v30  ;;  %v4878_v35 = vsel %vm11077_vm2, %v8550_v31, %v4874_v16  ;;  %vm4891_vm3 = vweird.f32 %v8554_v60  ;;  %v4062_v16 = vpop.f32.mrf.mxu2 }
 0x2e9   : > { %8557 = vrcp.f32 %v11067_v29  ;;  %v4883_v38 = vsel %vm4880_vm4, %v4882_v40, %v4878_v35  ;;  %vm4892_vm6 = vmor %vm4890_vm5, %vm4891_vm3  ;;  %v4897_v30 = vor.u32 1.1754944e-38, %v4896_v46  ;;  %v4063_v20 = vadd.f32 %v4062_v16, %v10905_v6 }
 0x2ea   : > { %v4887_v47 = vsub.f32 1.0, %v4886_v1  ;;  %v11086_v1 = vpop.f32.mrf.mxu0  ;;  %v4911_v44 = vand.u32 2147483648, %v11067_v29  ;;  %vm4905_vm10 = vweird.f32 %v11067_v29 }
 0x2eb   : > { %v4333_v62 = vpop.f32.mrf.mxu1  ;;  %13448 = vst [vmem:[#allocation133_spill] sm:$0xff] %v11086_v1 }
 0x2ec   : > { %v4710_v58 = vadd.f32 %v4333_v62, %v4058_v53  ;;  %v4888_v22 = vmul.f32 %v8554_v60, %v4887_v47  ;;  %v5026_v62 = vmul.f32 0.0, %v4883_v38  ;;  %v11090_v18 = vpop.f32.mrf.mxu3 }
 0x2ee   : > { %v8556_v12 = vpop.eup %8555  ;;  %v8309_v5 = vmul.f32 -1.442695, %v4710_v58  ;;  %v4889_v51 = vadd.f32 %v8554_v60, %v4888_v22 }
 0x2ef   : > { %v8558_v63 = vpop.eup %8557  ;;  %v4773_v52 = vadd.f32 1.0, %v8556_v12 }
 0x2f0   : > { %v4901_v53 = vmul.f32 %v8558_v63, %v11067_v29  ;;  %8559 = vpow2.f32 %v8309_v5  ;;  %v4893_v31 = vsel %vm4892_vm6, %v8554_v60, %v4889_v51  ;;  %vm4906_vm9 = vweird.f32 %v8558_v63 }
 0x2f1   : > { %8561 = vrcp.f32 %v4773_v52  ;;  %v4898_v23 = vsel %vm4895_vm8, %v4897_v30, %v4893_v31  ;;  %vm11103_vm11 = vmor %vm4905_vm10, %vm4906_vm9  ;;  %vm4920_vm13 = vweird.f32 %v4773_v52 }
 0x2f2   : > { %v4902_v47 = vsub.f32 1.0, %v4901_v53  ;;  %v5027_v26 = vmul.f32 0.0, %v4898_v23  ;;  %v11097_v38 = vpop.f32.mrf.mxu0  ;;  %v4909_v53 = vand.u32 2147483647, %v11067_v29 }
 0x2f3   : > { %v4335_v58 = vpop.f32.mrf.mxu1 }
 0x2f4   : > { %v4711_v35 = vadd.f32 %v4335_v58, %v4060_v48  ;;  %v5039_v46 = vpack.c.bf16 %v5027_v26, %v5026_v62  ;;  %v4903_v22 = vmul.f32 %v8558_v63, %v4902_v47  ;;  %v11101_v23 = vpop.f32.mrf.mxu3  ;;  %v4064_v47 = vpop.f32.mrf.mxu2  ;;  %v4924_v62 = vand.u32 2147483647, %v4773_v52 }
 0x2f5   : > { %v4926_v26 = vand.u32 2147483648, %v4773_v52  ;;  %vm4910_vm12 = vcmp.eq.f32.partialorder %v4909_v53, 8.507059e+37 }
 0x2f6   : > { %v8560_v40 = vpop.eup %8559  ;;  %v8310_v12 = vmul.f32 -1.442695, %v4711_v35  ;;  %5131 = vmatmul.bf16.gmra.mxu2 %v5039_v46  ;;  %v4904_v30 = vadd.f32 %v8558_v63, %v4903_v22  ;;  %v4912_v22 = vor.u32 1.1754944e-38, %v4911_v44  ;;  %vm4925_vm15 = vcmp.eq.f32.partialorder %v4924_v62, 8.507059e+37 }
 0x2f7   : > { %v8562_v5 = vpop.eup %8561  ;;  %v11092_v60 = vadd.f32 1.0, %v8560_v40  ;;  %v4927_v27 = vor.u32 1.1754944e-38, %v4926_v26  ;;  %v4065_v44 = vadd.f32 %v4064_v47, %v10905_v6 }
 0x2f8   : > { %v4916_v51 = vmul.f32 %v8562_v5, %v4773_v52  ;;  %8563 = vpow2.f32 %v8310_v12  ;;  %v4908_v35 = vsel %vm11103_vm11, %v8558_v63, %v4904_v30  ;;  %vm4921_vm7 = vweird.f32 %v8562_v5 }
 0x2f9   : > { %8565 = vrcp.f32 %v11092_v60  ;;  %v4913_v4 = vsel %vm4910_vm12, %v4912_v22, %v4908_v35  ;;  %vm4922_vm14 = vmor %vm4920_vm13, %vm4921_vm7  ;;  %v4941_v47 = vand.u32 2147483648, %v11092_v60  ;;  %vm4935_vm1 = vweird.f32 %v11092_v60 }
 0x2fa   : > { %v4917_v31 = vsub.f32 1.0, %v4916_v51 }
 0x2fb   : > { %v4338_v48 = vpop.f32.mrf.mxu1 }
 0x2fc   : > { %v4712_v58 = vadd.f32 %v4338_v48, %v4063_v20  ;;  %v4918_v46 = vmul.f32 %v8562_v5, %v4917_v31  ;;  %v5028_v31 = vmul.f32 0.0, %v4913_v4  ;;  %v11111_v53 = vpop.f32.mrf.mxu3  ;;  %v4067_v26 = vpop.f32.mrf.mxu2 }
 0x2fe   : > { %v8564_v40 = vpop.eup %8563  ;;  %v8311_v29 = vmul.f32 -1.442695, %v4712_v58  ;;  %v4919_v12 = vadd.f32 %v8562_v5, %v4918_v46  ;;  %v11113_v46 = vpop.f32.mrf.mxu0 }
 0x2ff   : > { %v8566_v51 = vpop.eup %8565  ;;  %v4775_v1 = vadd.f32 1.0, %v8564_v40 }
 0x300   : > { %v4931_v41 = vmul.f32 %v8566_v51, %v11092_v60  ;;  %8567 = vpow2.f32 %v8311_v29  ;;  %v4923_v20 = vsel %vm4922_vm14, %v8562_v5, %v4919_v12  ;;  %vm4936_vm0 = vweird.f32 %v8566_v51 }
 0x301   : > { %8569 = vrcp.f32 %v4775_v1  ;;  %v4928_v63 = vsel %vm4925_vm15, %v4927_v27, %v4923_v20  ;;  %v4939_v29 = vand.u32 2147483647, %v11092_v60  ;;  %vm11124_vm2 = vmor %vm4935_vm1, %vm4936_vm0  ;;  %vm4950_vm5 = vweird.f32 %v4775_v1 }
 0x302   : > { %v4932_v30 = vsub.f32 1.0, %v4931_v41  ;;  %v5029_v48 = vmul.f32 0.0, %v4928_v63  ;;  %v4068_v41 = vadd.f32 %v4067_v26, %v10905_v6 }
 0x303   : > { %v4340_v52 = vpop.f32.mrf.mxu1  ;;  %vm4940_vm4 = vcmp.eq.f32.partialorder %v4939_v29, 8.507059e+37 }
 0x304   : > { %v4713_v16 = vadd.f32 %v4340_v52, %v4065_v44  ;;  %v5040_v58 = vpack.c.bf16 %v5029_v48, %v5028_v31  ;;  %v4933_v35 = vmul.f32 %v8566_v51, %v4932_v30  ;;  %v11122_v20 = vpop.f32.mrf.mxu3  ;;  %v4954_v44 = vand.u32 2147483647, %v4775_v1  ;;  %v4069_v50 = vpop.f32.mrf.mxu2 }
 0x305   : > { %v4956_v31 = vand.u32 2147483648, %v4775_v1  ;;  %v4070_v29 = vadd.f32 %v4069_v50, %v10905_v6 }
 0x306   : > { %v8568_v22 = vpop.eup %8567  ;;  %v8312_v40 = vmul.f32 -1.442695, %v4713_v16  ;;  %5136 = vmatmul.bf16.gmra.mxu2 %v5040_v58  ;;  %v4934_v4 = vadd.f32 %v8566_v51, %v4933_v35  ;;  %v4942_v58 = vor.u32 1.1754944e-38, %v4941_v47  ;;  %vm4955_vm8 = vcmp.eq.f32.partialorder %v4954_v44, 8.507059e+37 }
 0x307   : > { %v8570_v5 = vpop.eup %8569  ;;  %v11115_v62 = vadd.f32 1.0, %v8568_v22  ;;  %v4957_v36 = vor.u32 1.1754944e-38, %v4956_v31 }
 0x308   : > { %v4946_v27 = vmul.f32 %v8570_v5, %v4775_v1  ;;  %8571 = vpow2.f32 %v8312_v40  ;;  %v4938_v52 = vsel %vm11124_vm2, %v8566_v51, %v4934_v4  ;;  %vm4951_vm3 = vweird.f32 %v8570_v5  ;;  %v11130_v40 = vpop.f32.mrf.mxu0 }
 0x309   : > { %8573 = vrcp.f32 %v11115_v62  ;;  %v4943_v10 = vsel %vm4940_vm4, %v4942_v58, %v4938_v52  ;;  %vm4952_vm6 = vmor %vm4950_vm5, %vm4951_vm3  ;;  %vm4965_vm10 = vweird.f32 %v11115_v62  ;;  %v4969_v50 = vand.u32 2147483647, %v11115_v62 }
 0x30a   : > { %v4947_v12 = vsub.f32 1.0, %v4946_v27 }
 0x30b   : > { %v4343_v63 = vpop.f32.mrf.mxu1  ;;  %vm4970_vm12 = vcmp.eq.f32.partialorder %v4969_v50, 8.507059e+37 }
 0x30c   : > { %v4714_v48 = vadd.f32 %v4343_v63, %v4068_v41  ;;  %v4948_v16 = vmul.f32 %v8570_v5, %v4947_v12  ;;  %v5030_v12 = vmul.f32 0.0, %v4943_v10  ;;  %v11134_v30 = vpop.f32.mrf.mxu3  ;;  %v4971_v10 = vand.u32 2147483648, %v11115_v62 }
 0x30e   : > { %v8572_v35 = vpop.eup %8571  ;;  %v8313_v26 = vmul.f32 -1.442695, %v4714_v48  ;;  %v4949_v60 = vadd.f32 %v8570_v5, %v4948_v16 }
 0x30f   : > { %v8574_v22 = vpop.eup %8573  ;;  %v4777_v27 = vadd.f32 1.0, %v8572_v35 }
 0x310   : > { %v4961_v41 = vmul.f32 %v8574_v22, %v11115_v62  ;;  %8575 = vpow2.f32 %v8313_v26  ;;  %v4953_v51 = vsel %vm4952_vm6, %v8570_v5, %v4949_v60  ;;  %vm4966_vm9 = vweird.f32 %v8574_v22  ;;  %v11138_v44 = vpop.f32.mrf.mxu0 }
 0x311   : > { %8577 = vrcp.f32 %v4777_v27  ;;  %v4958_v4 = vsel %vm4955_vm8, %v4957_v36, %v4953_v51  ;;  %vm11144_vm11 = vmor %vm4965_vm10, %vm4966_vm9  ;;  %v4986_v51 = vand.u32 2147483648, %v4777_v27  ;;  %vm4980_vm13 = vweird.f32 %v4777_v27 }
 0x312   : > { %v4962_v47 = vsub.f32 1.0, %v4961_v41  ;;  %v5031_v1 = vmul.f32 0.0, %v4958_v4 }
 0x313   : > { %v4345_v63 = vpop.f32.mrf.mxu1 }
 0x314   : > { %v4715_v48 = vadd.f32 %v4345_v63, %v4070_v29  ;;  %v5041_v16 = vpack.c.bf16 %v5031_v1, %v5030_v12  ;;  %v4963_v52 = vmul.f32 %v8574_v22, %v4962_v47  ;;  %v4984_v29 = vand.u32 2147483647, %v4777_v27  ;;  %v11150_v1 = vpop.f32.mrf.mxu3 }
 0x315   : > { %v4972_v12 = vor.u32 1.1754944e-38, %v4971_v10  ;;  %13455 = vst [vmem:[#allocation134_spill] sm:$0xff] %v11150_v1 }
 0x316   : > { %v8576_v58 = vpop.eup %8575  ;;  %v8314_v31 = vmul.f32 -1.442695, %v4715_v48  ;;  %5141 = vmatmul.bf16.gmra.mxu2 %v5041_v16  ;;  %v4964_v36 = vadd.f32 %v8574_v22, %v4963_v52  ;;  %v11153_v48 = vperm.slane %v10900_v45, 0  ;;  %vm4985_vm15 = vcmp.eq.f32.partialorder %v4984_v29, 8.507059e+37 }
 0x317   : > { %v8578_v35 = vpop.eup %8577  ;;  %v11136_v26 = vadd.f32 1.0, %v8576_v58 }
 0x318   : > { %v4976_v5 = vmul.f32 %v8578_v35, %v4777_v27  ;;  %8579 = vpow2.f32 %v8314_v31  ;;  %v4968_v4 = vsel %vm11144_vm11, %v8574_v22, %v4964_v36  ;;  %vm4981_vm7 = vweird.f32 %v8578_v35 }
 0x319   : > { %8581 = vrcp.f32 %v11136_v26  ;;  %v4973_v58 = vsel %vm4970_vm12, %v4972_v12, %v4968_v4  ;;  %vm4982_vm14 = vmor %vm4980_vm13, %vm4981_vm7  ;;  %v4987_v31 = vor.u32 1.1754944e-38, %v4986_v51  ;;  %v3984_v22 = vadd.f32 %v10636_v0, %v11153_v48  ;;  %v11162_v51 = vpop.f32.mrf.mxu0 }
 0x31a   : > { %v4977_v60 = vsub.f32 1.0, %v4976_v5  ;;  %v3986_v10 = vadd.f32 %v10691_v55, %v11153_v48  ;;  %vm4995_vm1 = vweird.f32 %v11136_v26 }
 0x31b   : > { %v4364_v50 = vadd.f32 %v11097_v38, %v3984_v22  ;;  %v5001_v38 = vand.u32 2147483648, %v11136_v26 }
 0x31c   : > { %v4978_v47 = vmul.f32 %v8578_v35, %v4977_v60  ;;  %v5032_v60 = vmul.f32 0.0, %v4973_v58  ;;  %v4365_v4 = vadd.f32 %v11113_v46, %v3986_v10  ;;  %v4999_v46 = vand.u32 2147483647, %v11136_v26 }
 0x31d   : > { %v8283_v12 = vmul.f32 -1.442695, %v4364_v50 }
 0x31e   : > { %v8580_v63 = vpop.eup %8579  ;;  %v4979_v62 = vadd.f32 %v8578_v35, %v4978_v47  ;;  %v8284_v29 = vmul.f32 -1.442695, %v4365_v4  ;;  %vm5000_vm4 = vcmp.eq.f32.partialorder %v4999_v46, 8.507059e+37 }
 0x31f   : > { %v8582_v16 = vpop.eup %8581  ;;  %v4779_v52 = vadd.f32 1.0, %v8580_v63  ;;  %v11164_v63 = vpop.f32.mrf.mxu3 }
 0x320   : > { %v4991_v5 = vmul.f32 %v8582_v16, %v11136_v26  ;;  %v4983_v36 = vsel %vm4982_vm14, %v8578_v35, %v4979_v62  ;;  %vm4996_vm0 = vweird.f32 %v8582_v16 }
 0x321   : > { %8583 = vrcp.f32 %v4779_v52  ;;  %v4988_v45 = vsel %vm4985_vm15, %v4987_v31, %v4983_v36  ;;  %vm4997_vm2 = vmor %vm4995_vm1, %vm4996_vm0  ;;  %v5016_v31 = vand.u32 2147483648, %v4779_v52  ;;  %v5014_v36 = vand.u32 2147483647, %v4779_v52  ;;  %v4271_v10 = vpop.f32.mrf.mxu0 }
 0x322   : > { %v4992_v27 = vsub.f32 1.0, %v4991_v5  ;;  %v5033_v41 = vmul.f32 0.0, %v4988_v45  ;;  %8585 = vpow2.f32 %v8283_v12  ;;  %v5002_v45 = vor.u32 1.1754944e-38, %v5001_v38 }
 0x323   : > { %8587 = vpow2.f32 %v8284_v29  ;;  %vm5010_vm5 = vweird.f32 %v4779_v52  ;;  %vm5015_vm8 = vcmp.eq.f32.partialorder %v5014_v36, 8.507059e+37  ;;  %v3991_v12 = vadd.f32 %v10737_v61, %v11153_v48 }
 0x324   : > { %v5042_v47 = vpack.c.bf16 %v5033_v41, %v5032_v60  ;;  %v4993_v0 = vmul.f32 %v8582_v16, %v4992_v27  ;;  %v5017_v60 = vor.u32 1.1754944e-38, %v5016_v31 }
 0x325   : > { %v4367_v38 = vadd.f32 %v11138_v44, %v3991_v12 }
 0x326   : > { %5146 = vmatmul.bf16.gmra.mxu2 %v5042_v47  ;;  %v4994_v62 = vadd.f32 %v8582_v16, %v4993_v0  ;;  %v3989_v47 = vadd.f32 %v10718_v37, %v11153_v48 }
 0x327   : > { %v8584_v35 = vpop.eup %8583  ;;  %v8286_v37 = vmul.f32 -1.442695, %v4367_v38 }
 0x328   : > { %v5006_v55 = vmul.f32 %v8584_v35, %v4779_v52  ;;  %v4998_v22 = vsel %vm4997_vm2, %v8582_v16, %v4994_v62  ;;  %vm5011_vm3 = vweird.f32 %v8584_v35  ;;  %v8586_v41 = vpop.eup %8585  ;;  %v4083_v16 = vpop.f32.mrf.mxu3  ;;  %v4366_v62 = vadd.f32 %v11130_v40, %v3989_v47 }
 0x329   : > { %v5003_v27 = vsel %vm5000_vm4, %v5002_v45, %v4998_v22  ;;  %vm5012_vm6 = vmor %vm5010_vm5, %vm5011_vm3  ;;  %v8588_v26 = vpop.eup %8587  ;;  %v11174_v52 = vadd.f32 1.0, %v8586_v41  ;;  %v11179_v31 = vpop.f32.mrf.mxu0 }
 0x32a   : > { %v5007_v58 = vsub.f32 1.0, %v5006_v55  ;;  %v5034_v29 = vmul.f32 0.0, %v5003_v27  ;;  %v3996_v27 = vadd.f32 %v10767_v8, %v11153_v48 }
 0x32b   : > { %8589 = vrcp.f32 %v11174_v52  ;;  %vm4449_vm11 = vweird.f32 %v11174_v52 }
 0x32c   : > { %v5008_v5 = vmul.f32 %v8584_v35, %v5007_v58  ;;  %v8285_v58 = vmul.f32 -1.442695, %v4366_v62 }
 0x32e   : > { %v5009_v50 = vadd.f32 %v8584_v35, %v5008_v5  ;;  %v3994_v5 = vadd.f32 %v10750_v39, %v11153_v48 }
 0x330   : > { %v5013_v4 = vsel %vm5012_vm6, %v8584_v35, %v5009_v50  ;;  %v11177_v35 = vadd.f32 1.0, %v8588_v26  ;;  %v11183_v61 = vpop.f32.mrf.mxu3  ;;  %v4368_v41 = vadd.f32 %v11162_v51, %v3994_v5  ;;  %v4369_v26 = vadd.f32 %v4271_v10, %v3996_v27 }
 0x331   : > { %v5018_v0 = vsel %vm5015_vm8, %v5017_v60, %v5013_v4  ;;  %v11185_v40 = vpop.eup %8589  ;;  %v4276_v36 = vpop.f32.mrf.mxu0  ;;  %v4455_v27 = vand.u32 2147483648, %v11174_v52 }
 0x332   : > { %v5035_v55 = vmul.f32 0.0, %v5018_v0  ;;  %8591 = vrcp.f32 %v11177_v35  ;;  %v4445_v45 = vmul.f32 %v11185_v40, %v11174_v52  ;;  %v8288_v62 = vmul.f32 -1.442695, %v4369_v26 }
 0x333   : > { %8593 = vpow2.f32 %v8285_v58  ;;  %vm4450_vm9 = vweird.f32 %v11185_v40  ;;  %vm4464_vm12 = vweird.f32 %v11177_v35 }
 0x334   : > { %v5043_v46 = vpack.c.bf16 %v5035_v55, %v5034_v29  ;;  %8595 = vpow2.f32 %v8286_v37  ;;  %v4446_v0 = vsub.f32 1.0, %v4445_v45  ;;  %v8287_v29 = vmul.f32 -1.442695, %v4368_v41  ;;  %v9033_v55 = vld [vmem:[%s13309_s4] sm:$0x7]  ;;  %vm11232_vm7 = vmor %vm4449_vm11, %vm4450_vm9 }
 0x335   : > { %v11207_v8 = vperm.slane %v9033_v55, 2  ;;  %v3999_v55 = vadd.f32 %v10778_v11, %v11153_v48 }
 0x336   : > { %5151 = vmatmul.bf16.gmra.mxu2 %v5043_v46  ;;  %v4447_v51 = vmul.f32 %v11185_v40, %v4446_v0 }
 0x337   : > { %v4082_v38 = vadd.f32 %v11164_v63, %v11207_v8  ;;  %v4453_v63 = vand.u32 2147483647, %v11174_v52  ;;  %v4084_v26 = vadd.f32 %v4083_v16, %v11207_v8  ;;  %v4001_v52 = vadd.f32 %v10796_v33, %v11153_v48 }
 0x338   : > { %v11187_v22 = vpop.eup %8591  ;;  %v11202_v39 = vpop.f32.mrf.mxu3  ;;  %v4448_v37 = vadd.f32 %v11185_v40, %v4447_v51 }
 0x339   : > { %v8594_v44 = vpop.eup %8593  ;;  %v4460_v60 = vmul.f32 %v11187_v22, %v11177_v35  ;;  %v11215_v58 = vpop.f32.mrf.mxu0  ;;  %vm4465_vm10 = vweird.f32 %v11187_v22  ;;  %vm4454_vm14 = vcmp.eq.f32.partialorder %v4453_v63, 8.507059e+37  ;;  %v4371_v2 = vadd.f32 %v4276_v36, %v4001_v52 }
 0x33a   : > { %v8596_v50 = vpop.eup %8595  ;;  %v11198_v4 = vadd.f32 1.0, %v8594_v44  ;;  %vm11247_vm13 = vmor %vm4464_vm12, %vm4465_vm10 }
 0x33b   : > { %v11200_v47 = vadd.f32 1.0, %v8596_v50  ;;  %v4461_v12 = vsub.f32 1.0, %v4460_v60  ;;  %v4470_v60 = vand.u32 2147483648, %v11177_v35  ;;  %v8290_v63 = vmul.f32 -1.442695, %v4371_v2  ;;  %v9034_v2 = vld [vmem:[%s13308_s3 + $0x38] sm:$0xff] }
 0x33c   : > { %8597 = vrcp.f32 %v11198_v4  ;;  %vm4479_vm2 = vweird.f32 %v11198_v4 }
 0x33d   : > { %8599 = vrcp.f32 %v11200_v47  ;;  %v4462_v46 = vmul.f32 %v11187_v22, %v4461_v12  ;;  %v4468_v12 = vand.u32 2147483647, %v11177_v35  ;;  %v4471_v0 = vor.u32 1.1754944e-38, %v4470_v60 }
 0x33e   : > { %8601 = vpow2.f32 %v8287_v29  ;;  %vm4494_vm4 = vweird.f32 %v11200_v47 }
 0x33f   : > { %8603 = vpow2.f32 %v8288_v62  ;;  %v4463_v45 = vadd.f32 %v11187_v22, %v4462_v46  ;;  %v4452_v62 = vsel %vm11232_vm7, %v11185_v40, %v4448_v37  ;;  %v4370_v46 = vadd.f32 %v11179_v31, %v3999_v55 }
 0x340   : > { %v11229_v41 = vpop.f32.mrf.mxu3  ;;  %v4456_v37 = vor.u32 1.1754944e-38, %v4455_v27  ;;  %vm4469_vm15 = vcmp.eq.f32.partialorder %v4468_v12, 8.507059e+37 }
 0x341   : > { %v4467_v33 = vsel %vm11247_vm13, %v11187_v22, %v4463_v45  ;;  %v8289_v31 = vmul.f32 -1.442695, %v4370_v46  ;;  %v9037_v46 = vld [vmem:[%s13308_s3 + $0x20] sm:$0xff] }
 0x342   : > { %v11219_v44 = vpop.eup %8597  ;;  %v4457_v1 = vsel %vm4454_vm14, %v4456_v37, %v4452_v62  ;;  %v4472_v16 = vsel %vm4469_vm15, %v4471_v0, %v4467_v33  ;;  %v4500_v33 = vand.u32 2147483648, %v11200_v47  ;;  %v4498_v37 = vand.u32 2147483647, %v11200_v47 }
 0x343   : > { %v11223_v50 = vpop.eup %8599  ;;  %v4475_v35 = vmul.f32 %v11219_v44, %v11198_v4  ;;  %vm4480_vm0 = vweird.f32 %v11219_v44 }
 0x344   : > { %v8602_v29 = vpop.eup %8601  ;;  %v4490_v40 = vmul.f32 %v11223_v50, %v11200_v47  ;;  %vm4495_vm1 = vweird.f32 %v11223_v50  ;;  %vm11299_vm3 = vmor %vm4479_vm2, %vm4480_vm0  ;;  %vm4499_vm8 = vcmp.eq.f32.partialorder %v4498_v37, 8.507059e+37 }
 0x345   : > { %v11259_v57 = vadd.f32 1.0, %v8602_v29  ;;  %v4476_v22 = vsub.f32 1.0, %v4475_v35  ;;  %vm11314_vm5 = vmor %vm4494_vm4, %vm4495_vm1 }
 0x347   : > { %8605 = vrcp.f32 %v11259_v57  ;;  %v4477_v27 = vmul.f32 %v11219_v44, %v4476_v22  ;;  %vm4509_vm11 = vweird.f32 %v11259_v57 }
 0x348   : > { %v11272_v12 = vpop.f32.mrf.mxu3 }
 0x349   : > { %v5117_v10 = vpop.f32.mrf.mxu2  ;;  %v4478_v29 = vadd.f32 %v11219_v44, %v4477_v27 }
 0x34a   : > { %v5118_v5 = vadd.f32 %v5117_v10, %v4082_v38  ;;  %v8604_v10 = vpop.eup %8603 }
 0x34b   : > { %v11261_v3 = vadd.f32 1.0, %v8604_v10  ;;  %v4483_v10 = vand.u32 2147483647, %v11198_v4  ;;  %v4482_v22 = vsel %vm11299_vm3, %v11219_v44, %v4478_v29 }
 0x34c   : > { %v5157_v38 = vmax.f32 %v5118_v5, 0.0  ;;  %v4281_v5 = vpop.f32.mrf.mxu0 }
 0x34d   : > { %8607 = vrcp.f32 %v11261_v3  ;;  %v11282_v55 = vpop.eup %8605  ;;  %vm4484_vm6 = vcmp.eq.f32.partialorder %v4483_v10, 8.507059e+37  ;;  %vm4524_vm12 = vweird.f32 %v11261_v3 }
 0x34e   : > { %v11263_v45 = vmul.f32 %v5157_v38, %v4457_v1  ;;  %v4087_v1 = vadd.f32 %v11183_v61, %v11207_v8  ;;  %8609 = vpow2.f32 %v8289_v31  ;;  %v4485_v38 = vand.u32 2147483648, %v11198_v4 }
 0x34f   : > { %8611 = vpow2.f32 %v8290_v63  ;;  %v4004_v4 = vadd.f32 %v10811_v15, %v11153_v48  ;;  %v4505_v47 = vmul.f32 %v11282_v55, %v11259_v57  ;;  %vm4510_vm9 = vweird.f32 %v11282_v55 }
 0x350   : > { %v4486_v27 = vor.u32 1.1754944e-38, %v4485_v38  ;;  %vm11376_vm7 = vmor %vm4509_vm11, %vm4510_vm9 }
 0x351   : > { %v5119_v51 = vpop.f32.mrf.mxu2 }
 0x352   : > { %v5120_v11 = vadd.f32 %v5119_v51, %v4084_v26  ;;  %v4491_v51 = vsub.f32 1.0, %v4490_v40  ;;  %v4089_v40 = vadd.f32 %v11202_v39, %v11207_v8 }
 0x353   : > { %v11286_v62 = vpop.eup %8607 }
 0x354   : > { %v5158_v14 = vmax.f32 %v5120_v11, 0.0  ;;  %v11288_v35 = vpop.f32.mrf.mxu0  ;;  %v9035_v11 = vld [vmem:[%s13308_s3 + $0x30] sm:$0xff]  ;;  %v8610_v0 = vpop.eup %8609  ;;  %v4520_v44 = vmul.f32 %v11286_v62, %v11261_v3  ;;  %vm4525_vm10 = vweird.f32 %v11286_v62 }
 0x355   : > { %v8612_v31 = vpop.eup %8611  ;;  %vm11390_vm13 = vmor %vm4524_vm12, %vm4525_vm10 }
 0x356   : > { %v11265_v26 = vmul.f32 %v5158_v14, %v4472_v16  ;;  %v4492_v14 = vmul.f32 %v11223_v50, %v4491_v51  ;;  %v4006_v16 = vadd.f32 %v10822_v54, %v11153_v48 }
 0x358   : > { %v5205_v36 = vpack.c.bf16 %v11265_v26, %v11263_v45  ;;  %v4493_v61 = vadd.f32 %v11223_v50, %v4492_v14  ;;  %v9036_v14 = vld [vmem:[%s13308_s3 + $0x28] sm:$0xff]  ;;  %v4373_v29 = vadd.f32 %v4281_v5, %v4006_v16 }
 0x359   : > { %v5122_v60 = vpop.f32.mrf.mxu2 }
 0x35a   : > { %5221 = vmatmul.bf16.vlgmr.msrb.gmra.mxu3 %v5205_v36  ;;  %5270 = vmatmul.bf16.vlgmr.msra.gmra.mxu0 %v5205_v36  ;;  %v5123_v52 = vadd.f32 %v5122_v60, %v4087_v1  ;;  %v4497_v54 = vsel %vm11314_vm5, %v11223_v50, %v4493_v61  ;;  %v4372_v36 = vadd.f32 %v11215_v58, %v4004_v4  ;;  %v4501_v60 = vor.u32 1.1754944e-38, %v4500_v33  ;;  %v11326_v1 = vpop.f32.mrf.mxu3 }
 0x35b   : > { %7885 = vmatpush.bf16.msrb.mxu3 %v9034_v2  ;;  %v11331_v2 = vadd.f32 1.0, %v8610_v0  ;;  %v4487_v61 = vsel %vm4484_vm6, %v4486_v27, %v4482_v22  ;;  %v4506_v58 = vsub.f32 1.0, %v4505_v47  ;;  %v4521_v33 = vsub.f32 1.0, %v4520_v44 }
 0x35c   : > { %v5159_v63 = vmax.f32 %v5123_v52, 0.0  ;;  %v11333_v52 = vadd.f32 1.0, %v8612_v31  ;;  %v8292_v5 = vmul.f32 -1.442695, %v4373_v29  ;;  %v4286_v0 = vpop.f32.mrf.mxu0  ;;  %v4092_v22 = vadd.f32 %v11229_v41, %v11207_v8 }
 0x35d   : > { %8613 = vrcp.f32 %v11331_v2  ;;  %v4507_v4 = vmul.f32 %v11282_v55, %v4506_v58  ;;  %v4522_v39 = vmul.f32 %v11286_v62, %v4521_v33  ;;  %v4009_v41 = vadd.f32 %v10836_v13, %v11153_v48 }
 0x35e   : > { %v11335_v10 = vmul.f32 %v5159_v63, %v4487_v61  ;;  %8615 = vrcp.f32 %v11333_v52  ;;  %v4515_v27 = vand.u32 2147483648, %v11259_v57  ;;  %v4094_v13 = vadd.f32 %v11272_v12, %v11207_v8 }
 0x35f   : > { %7886 = vmatpush.bf16.msrb.mxu3 %v9035_v11  ;;  %v4502_v11 = vsel %vm4499_vm8, %v4501_v60, %v4497_v54  ;;  %v4508_v47 = vadd.f32 %v11282_v55, %v4507_v4  ;;  %v4530_v60 = vand.u32 2147483648, %v11261_v3  ;;  %v4011_v61 = vadd.f32 %v10854_v17, %v11153_v48 }
 0x360   : > { %vm4539_vm2 = vweird.f32 %v11331_v2  ;;  %vm4554_vm4 = vweird.f32 %v11333_v52 }
 0x361   : > { %v5124_v51 = vpop.f32.mrf.mxu2  ;;  %v4512_v12 = vsel %vm11376_vm7, %v11282_v55, %v4508_v47  ;;  %v4531_v4 = vor.u32 1.1754944e-38, %v4530_v60 }
 0x362   : > { %v5125_v15 = vadd.f32 %v5124_v51, %v4089_v40  ;;  %v8291_v40 = vmul.f32 -1.442695, %v4372_v36  ;;  %v9038_v51 = vld [vmem:[%s13308_s3 + $0x18] sm:$0xff]  ;;  %v11355_v31 = vpop.f32.mrf.mxu3  ;;  %v4513_v36 = vand.u32 2147483647, %v11259_v57 }
 0x363   : > { %7887 = vmatpush.bf16.msrb.mxu3 %v9036_v14  ;;  %v11357_v63 = vpop.eup %8613  ;;  %v9039_v14 = vld [vmem:[%s13308_s3 + $0x10] sm:$0xff]  ;;  %v4528_v57 = vand.u32 2147483647, %v11261_v3 }
 0x364   : > { %v5160_v50 = vmax.f32 %v5125_v15, 0.0  ;;  %8617 = vpow2.f32 %v8291_v40  ;;  %v4523_v15 = vadd.f32 %v11286_v62, %v4522_v39  ;;  %v11363_v44 = vpop.eup %8615  ;;  %v4535_v3 = vmul.f32 %v11357_v63, %v11331_v2 }
 0x365   : > { %8619 = vpow2.f32 %v8292_v5  ;;  %v4550_v55 = vmul.f32 %v11363_v44, %v11333_v52  ;;  %v4289_v5 = vpop.f32.mrf.mxu0  ;;  %vm4514_vm14 = vcmp.eq.f32.partialorder %v4513_v36, 8.507059e+37  ;;  %v4375_v39 = vadd.f32 %v4286_v0, %v4011_v61 }
 0x366   : > { %v11337_v38 = vmul.f32 %v5160_v50, %v4502_v11  ;;  %v4374_v11 = vadd.f32 %v11288_v35, %v4009_v41  ;;  %v4527_v17 = vsel %vm11390_vm13, %v11286_v62, %v4523_v15  ;;  %vm4529_vm15 = vcmp.eq.f32.partialorder %v4528_v57, 8.507059e+37 }
 0x367   : > { %7888 = vmatpush.bf16.msrb.mxu3 %v9037_v46  ;;  %v4532_v41 = vsel %vm4529_vm15, %v4531_v4, %v4527_v17  ;;  %v8294_v0 = vmul.f32 -1.442695, %v4375_v39  ;;  %v4097_v61 = vadd.f32 %v11326_v1, %v11207_v8  ;;  %vm4540_vm0 = vweird.f32 %v11357_v63 }
 0x368   : > { %v5206_v37 = vpack.c.bf16 %v11337_v38, %v11335_v10  ;;  %v8293_v15 = vmul.f32 -1.442695, %v4374_v11  ;;  %vm4555_vm1 = vweird.f32 %v11363_v44  ;;  %v4014_v1 = vadd.f32 %v10873_v21, %v11153_v48  ;;  %vm11440_vm3 = vmor %vm4539_vm2, %vm4540_vm0 }
 0x369   : > { %v5127_v16 = vpop.f32.mrf.mxu2  ;;  %v4545_v17 = vand.u32 2147483648, %v11331_v2  ;;  %v4558_v21 = vand.u32 2147483647, %v11333_v52  ;;  %v4016_v39 = vadd.f32 %v10882_v34, %v11153_v48  ;;  %vm11454_vm5 = vmor %vm4554_vm4, %vm4555_vm1 }
 0x36a   : > { %5226 = vmatmul.bf16.gmra.mxu3 %v5206_v37  ;;  %5275 = vmatmul.bf16.gmra.mxu0 %v5206_v37  ;;  %v5128_v54 = vadd.f32 %v5127_v16, %v4092_v22  ;;  %v8618_v50 = vpop.eup %8617  ;;  %v4516_v37 = vor.u32 1.1754944e-38, %v4515_v27  ;;  %v9040_v16 = vld [vmem:[%s13308_s3 + $0x8] sm:$0xff]  ;;  %v4551_v27 = vsub.f32 1.0, %v4550_v55  ;;  %v11412_v60 = vpop.f32.mrf.mxu3 }
 0x36b   : > { %7889 = vmatpush.bf16.msrb.mxu3 %v9038_v51  ;;  %v8620_v40 = vpop.eup %8619  ;;  %v11404_v22 = vadd.f32 1.0, %v8618_v50  ;;  %vm4559_vm8 = vcmp.eq.f32.partialorder %v4558_v21, 8.507059e+37  ;;  %v4102_v4 = vadd.f32 %v11412_v60, %v11207_v8 }
 0x36c   : > { %v5161_v46 = vmax.f32 %v5128_v54, 0.0  ;;  %v11406_v47 = vadd.f32 1.0, %v8620_v40  ;;  %v4517_v62 = vsel %vm4514_vm14, %v4516_v37, %v4512_v12  ;;  %v4536_v54 = vsub.f32 1.0, %v4535_v3 }
 0x36d   : > { %8621 = vrcp.f32 %v11404_v22  ;;  %v4552_v11 = vmul.f32 %v11363_v44, %v4551_v27  ;;  %v4291_v12 = vpop.f32.mrf.mxu0  ;;  %v4099_v37 = vadd.f32 %v11355_v31, %v11207_v8  ;;  %vm4569_vm11 = vweird.f32 %v11404_v22 }
 0x36e   : > { %8623 = vrcp.f32 %v11406_v47  ;;  %v4537_v57 = vmul.f32 %v11357_v63, %v4536_v54  ;;  %v4575_v60 = vand.u32 2147483648, %v11404_v22  ;;  %vm4584_vm12 = vweird.f32 %v11406_v47 }
 0x36f   : > { %7890 = vmatpush.bf16.msrb.mxu3 %v9039_v14  ;;  %v11408_v14 = vmul.f32 %v5161_v46, %v4517_v62  ;;  %8625 = vpow2.f32 %v8293_v15  ;;  %v4553_v40 = vadd.f32 %v11363_v44, %v4552_v11 }
 0x370   : > { %8627 = vpow2.f32 %v8294_v0  ;;  %v4538_v58 = vadd.f32 %v11357_v63, %v4537_v57 }
 0x371   : > { %v5129_v33 = vpop.f32.mrf.mxu2  ;;  %v4557_v34 = vsel %vm11454_vm5, %v11363_v44, %v4553_v40 }
 0x372   : > { %v5130_v35 = vadd.f32 %v5129_v33, %v4094_v13  ;;  %v9041_v13 = vld [vmem:[%s13308_s3] sm:$0xff]  ;;  %v4542_v62 = vsel %vm11440_vm3, %v11357_v63, %v4538_v58 }
 0x373   : > { %7891 = vmatpush.bf16.msrb.mxu3 %v9040_v16  ;;  %v11427_v33 = vpop.eup %8621  ;;  %v4543_v16 = vand.u32 2147483647, %v11331_v2  ;;  %v4103_v2 = vpop.f32.mrf.mxu3 }
 0x374   : > { %v5162_v51 = vmax.f32 %v5130_v35, 0.0  ;;  %v11431_v46 = vpop.eup %8623  ;;  %v4560_v35 = vand.u32 2147483648, %v11333_v52  ;;  %v4565_v54 = vmul.f32 %v11427_v33, %v11404_v22  ;;  %vm4570_vm9 = vweird.f32 %v11427_v33 }
 0x375   : > { %v8626_v55 = vpop.eup %8625  ;;  %v4580_v63 = vmul.f32 %v11431_v46, %v11406_v47  ;;  %vm4544_vm6 = vcmp.eq.f32.partialorder %v4543_v16, 8.507059e+37  ;;  %vm4585_vm10 = vweird.f32 %v11431_v46  ;;  %vm11493_vm7 = vmor %vm4569_vm11, %vm4570_vm9 }
 0x376   : > { %v11410_v36 = vmul.f32 %v5162_v51, %v4532_v41  ;;  %v4376_v51 = vadd.f32 %v4289_v5, %v4014_v1  ;;  %v8628_v52 = vpop.eup %8627  ;;  %v11465_v27 = vadd.f32 1.0, %v8626_v55  ;;  %v4561_v0 = vor.u32 1.1754944e-38, %v4560_v35  ;;  %vm11509_vm13 = vmor %vm4584_vm12, %vm4585_vm10 }
 0x377   : > { %7892 = vmatpush.bf16.msrb.mxu3 %v9041_v13  ;;  %v4546_v13 = vor.u32 1.1754944e-38, %v4545_v17  ;;  %v4566_v58 = vsub.f32 1.0, %v4565_v54  ;;  %v4581_v40 = vsub.f32 1.0, %v4580_v63  ;;  %v4590_v54 = vand.u32 2147483648, %v11406_v47 }
 0x378   : > { %v5207_v29 = vpack.c.bf16 %v11410_v36, %v11408_v14  ;;  %v4562_v11 = vsel %vm4559_vm8, %v4561_v0, %v4557_v34  ;;  %8629 = vrcp.f32 %v11465_v27  ;;  %v4588_v63 = vand.u32 2147483647, %v11406_v47 }
 0x379   : > { %v5132_v50 = vpop.f32.mrf.mxu2  ;;  %v4567_v35 = vmul.f32 %v11427_v33, %v4566_v58  ;;  %v4582_v16 = vmul.f32 %v11431_v46, %v4581_v40  ;;  %v4021_v0 = vadd.f32 %v10902_v24, %v11153_v48  ;;  %v4576_v40 = vor.u32 1.1754944e-38, %v4575_v60 }
 0x37a   : > { %5231 = vmatmul.bf16.gmra.mxu3 %v5207_v29  ;;  %5280 = vmatmul.bf16.gmra.mxu0 %v5207_v29  ;;  %v5133_v3 = vadd.f32 %v5132_v50, %v4097_v61  ;;  %v4377_v29 = vadd.f32 %v4291_v12, %v4016_v39  ;;  %v11467_v50 = vadd.f32 1.0, %v8628_v52  ;;  %v4547_v61 = vsel %vm4544_vm6, %v4546_v13, %v4542_v62 }
 0x37b   : > { %v4106_v21 = vpop.f32.mrf.mxu3  ;;  %v4568_v39 = vadd.f32 %v11427_v33, %v4567_v35  ;;  %v4583_v31 = vadd.f32 %v11431_v46, %v4582_v16  ;;  %v4019_v13 = vadd.f32 %v10892_v32, %v11153_v48  ;;  %vm4589_vm15 = vcmp.eq.f32.partialorder %v4588_v63, 8.507059e+37 }
 0x37c   : > { %v5163_v15 = vmax.f32 %v5133_v3, 0.0  ;;  %v8295_v3 = vmul.f32 -1.442695, %v4376_v51  ;;  %v8296_v17 = vmul.f32 -1.442695, %v4377_v29  ;;  %8631 = vrcp.f32 %v11467_v50 }
 0x37d   : > { %v4587_v24 = vsel %vm11509_vm13, %v11431_v46, %v4583_v31  ;;  %vm4599_vm2 = vweird.f32 %v11465_v27  ;;  %vm4614_vm4 = vweird.f32 %v11467_v50 }
 0x37e   : > { %v11469_v1 = vmul.f32 %v5163_v15, %v4547_v61  ;;  %8633 = vpow2.f32 %v8295_v3  ;;  %v11483_v51 = vpop.eup %8629  ;;  %v4104_v15 = vadd.f32 %v4103_v2, %v11207_v8  ;;  %v4572_v2 = vsel %vm11493_vm7, %v11427_v33, %v4568_v39 }
 0x37f   : > { %8635 = vpow2.f32 %v8296_v17  ;;  %v4595_v47 = vmul.f32 %v11483_v51, %v11465_v27  ;;  %v4591_v17 = vor.u32 1.1754944e-38, %v4590_v54  ;;  %vm4600_vm0 = vweird.f32 %v11483_v51 }
 0x380   : > { %vm11547_vm3 = vmor %vm4599_vm2, %vm4600_vm0 }
 0x381   : > { %v5134_v41 = vpop.f32.mrf.mxu2  ;;  %v4592_v16 = vsel %vm4589_vm15, %v4591_v17, %v4587_v24  ;;  %v4603_v24 = vand.u32 2147483647, %v11465_v27 }
 0x382   : > { %v5135_v5 = vadd.f32 %v5134_v41, %v4099_v37  ;;  %v4294_v37 = vpop.f32.mrf.mxu0  ;;  %v11487_v41 = vpop.eup %8631 }
 0x383   : > { %v4610_v33 = vmul.f32 %v11487_v41, %v11467_v50  ;;  %v4378_v3 = vadd.f32 %v4294_v37, %v4019_v13  ;;  %v4108_v39 = vpop.f32.mrf.mxu3  ;;  %vm4615_vm1 = vweird.f32 %v11487_v41  ;;  %vm4604_vm6 = vcmp.eq.f32.partialorder %v4603_v24, 8.507059e+37 }
 0x384   : > { %v5164_v57 = vmax.f32 %v5135_v5, 0.0  ;;  %v8634_v52 = vpop.eup %8633  ;;  %v4573_v5 = vand.u32 2147483647, %v11404_v22  ;;  %vm11557_vm5 = vmor %vm4614_vm4, %vm4615_vm1 }
 0x385   : > { %v8636_v61 = vpop.eup %8635  ;;  %v11520_v58 = vadd.f32 1.0, %v8634_v52  ;;  %v8297_v52 = vmul.f32 -1.442695, %v4378_v3 }
 0x386   : > { %v11471_v44 = vmul.f32 %v5164_v57, %v4562_v11  ;;  %vm4574_vm14 = vcmp.eq.f32.partialorder %v4573_v5, 8.507059e+37  ;;  %v4107_v5 = vadd.f32 %v4106_v21, %v11207_v8  ;;  %v4605_v21 = vand.u32 2147483648, %v11465_v27 }
 0x387   : > { %8637 = vrcp.f32 %v11520_v58  ;;  %vm4629_vm11 = vweird.f32 %v11520_v58 }
 0x388   : > { %v5208_v12 = vpack.c.bf16 %v11471_v44, %v11469_v1 }
 0x389   : > { %v5137_v55 = vpop.f32.mrf.mxu2 }
 0x38a   : > { %5236 = vmatmul.bf16.gmra.mxu3 %v5208_v12  ;;  %5285 = vmatmul.bf16.gmra.mxu0 %v5208_v12  ;;  %v5138_v62 = vadd.f32 %v5137_v55, %v4102_v4  ;;  %v4296_v29 = vpop.f32.mrf.mxu0  ;;  %v11522_v55 = vadd.f32 1.0, %v8636_v61  ;;  %v4577_v4 = vsel %vm4574_vm14, %v4576_v40, %v4572_v2  ;;  %v4109_v61 = vadd.f32 %v4108_v39, %v11207_v8 }
 0x38b   : > { %v4379_v12 = vadd.f32 %v4296_v29, %v4021_v0  ;;  %v4606_v39 = vor.u32 1.1754944e-38, %v4605_v21 }
 0x38c   : > { %v5165_v32 = vmax.f32 %v5138_v62, 0.0  ;;  %v4596_v62 = vsub.f32 1.0, %v4595_v47  ;;  %8639 = vrcp.f32 %v11522_v55  ;;  %v4620_v47 = vand.u32 2147483648, %v11467_v50 }
 0x38d   : > { %v8298_v37 = vmul.f32 -1.442695, %v4379_v12  ;;  %8641 = vpow2.f32 %v8297_v52  ;;  %v11537_v0 = vpop.eup %8637  ;;  %vm4644_vm12 = vweird.f32 %v11522_v55 }
 0x38e   : > { %v11524_v46 = vmul.f32 %v5165_v32, %v4577_v4  ;;  %v4597_v54 = vmul.f32 %v11483_v51, %v4596_v62  ;;  %v4625_v12 = vmul.f32 %v11537_v0, %v11520_v58  ;;  %vm4630_vm9 = vweird.f32 %v11537_v0 }
 0x38f   : > { %8643 = vpow2.f32 %v8298_v37  ;;  %vm11595_vm7 = vmor %vm4629_vm11, %vm4630_vm9 }
 0x390   : > { %v4598_v13 = vadd.f32 %v11483_v51, %v4597_v54  ;;  %v4626_v54 = vsub.f32 1.0, %v4625_v12  ;;  %v4633_v12 = vand.u32 2147483647, %v11520_v58 }
 0x391   : > { %v5139_v22 = vpop.f32.mrf.mxu2 }
 0x392   : > { %v5140_v11 = vadd.f32 %v5139_v22, %v4104_v15  ;;  %v4611_v15 = vsub.f32 1.0, %v4610_v33  ;;  %v11541_v57 = vpop.eup %8639  ;;  %v4111_v22 = vpop.f32.mrf.mxu3  ;;  %v4602_v3 = vsel %vm11547_vm3, %v11483_v51, %v4598_v13  ;;  %v4621_v51 = vor.u32 1.1754944e-38, %v4620_v47 }
 0x393   : > { %v8642_v33 = vpop.eup %8641  ;;  %v4607_v37 = vsel %vm4604_vm6, %v4606_v39, %v4602_v3  ;;  %v4112_v21 = vadd.f32 %v4111_v22, %v11207_v8  ;;  %vm4645_vm10 = vweird.f32 %v11541_v57  ;;  %v4635_v22 = vand.u32 2147483648, %v11520_v58 }
 0x394   : > { %v5166_v35 = vmax.f32 %v5140_v11, 0.0  ;;  %v4612_v63 = vmul.f32 %v11487_v41, %v4611_v15  ;;  %v4618_v11 = vand.u32 2147483647, %v11467_v50  ;;  %v11568_v62 = vadd.f32 1.0, %v8642_v33  ;;  %vm4646_vm13 = vmor %vm4644_vm12, %vm4645_vm10 }
 0x395   : > { %v4650_v3 = vand.u32 2147483648, %v11522_v55  ;;  %vm4634_vm14 = vcmp.eq.f32.partialorder %v4633_v12, 8.507059e+37 }
 0x396   : > { %v11526_v31 = vmul.f32 %v5166_v35, %v4592_v16  ;;  %v4613_v2 = vadd.f32 %v11487_v41, %v4612_v63  ;;  %v8644_v35 = vpop.eup %8643  ;;  %v4640_v16 = vmul.f32 %v11541_v57, %v11522_v55  ;;  %vm4619_vm8 = vcmp.eq.f32.partialorder %v4618_v11, 8.507059e+37 }
 0x397   : > { %v11570_v52 = vadd.f32 1.0, %v8644_v35  ;;  %8645 = vrcp.f32 %v11568_v62  ;;  %v4648_v35 = vand.u32 2147483647, %v11522_v55  ;;  %vm4659_vm2 = vweird.f32 %v11568_v62 }
 0x398   : > { %v5209_v60 = vpack.c.bf16 %v11526_v31, %v11524_v46  ;;  %v4617_v27 = vsel %vm11557_vm5, %v11487_v41, %v4613_v2  ;;  %v4641_v41 = vsub.f32 1.0, %v4640_v16 }
 0x399   : > { %v5142_v34 = vpop.f32.mrf.mxu2  ;;  %8647 = vrcp.f32 %v11570_v52  ;;  %vm4649_vm15 = vcmp.eq.f32.partialorder %v4648_v35, 8.507059e+37  ;;  %vm4674_vm4 = vweird.f32 %v11570_v52 }
 0x39a   : > { %5241 = vmatmul.bf16.gmra.mxu3 %v5209_v60  ;;  %5290 = vmatmul.bf16.gmra.mxu0 %v5209_v60  ;;  %v5143_v29 = vadd.f32 %v5142_v34, %v4107_v5  ;;  %v4622_v60 = vsel %vm4619_vm8, %v4621_v51, %v4617_v27  ;;  %v4113_v13 = vpop.f32.mrf.mxu3  ;;  %v4642_v47 = vmul.f32 %v11541_v57, %v4641_v41 }
 0x39b   : > { %v4114_v40 = vadd.f32 %v4113_v13, %v11207_v8 }
 0x39c   : > { %v5167_v4 = vmax.f32 %v5143_v29, 0.0  ;;  %v4627_v29 = vmul.f32 %v11537_v0, %v4626_v54  ;;  %v4643_v11 = vadd.f32 %v11541_v57, %v4642_v47 }
 0x39d   : > { %v11585_v32 = vpop.eup %8645 }
 0x39e   : > { %v11572_v34 = vmul.f32 %v5167_v4, %v4607_v37  ;;  %v4647_v39 = vsel %vm4646_vm13, %v11541_v57, %v4643_v11  ;;  %vm4660_vm0 = vweird.f32 %v11585_v32 }
 0x39f   : > { %v11589_v33 = vpop.eup %8647  ;;  %vm11627_vm3 = vmor %vm4659_vm2, %vm4660_vm0 }
 0x3a0   : > { %v4670_v58 = vmul.f32 %v11589_v33, %v11570_v52  ;;  %vm4675_vm1 = vweird.f32 %v11589_v33 }
 0x3a1   : > { %v5144_v17 = vpop.f32.mrf.mxu2  ;;  %vm4676_vm5 = vmor %vm4674_vm4, %vm4675_vm1 }
 0x3a2   : > { %v5145_v50 = vadd.f32 %v5144_v17, %v4109_v61  ;;  %v4628_v61 = vadd.f32 %v11537_v0, %v4627_v29  ;;  %v4116_v37 = vpop.f32.mrf.mxu3  ;;  %v4671_v29 = vsub.f32 1.0, %v4670_v58  ;;  %v4680_v17 = vand.u32 2147483648, %v11570_v52 }
 0x3a4   : > { %v5168_v15 = vmax.f32 %v5145_v50, 0.0  ;;  %v4632_v4 = vsel %vm11595_vm7, %v11537_v0, %v4628_v61  ;;  %v4655_v50 = vmul.f32 %v11585_v32, %v11568_v62  ;;  %v4672_v61 = vmul.f32 %v11589_v33, %v4671_v29 }
 0x3a6   : > { %v11574_v5 = vmul.f32 %v5168_v15, %v4622_v60  ;;  %v4636_v15 = vor.u32 1.1754944e-38, %v4635_v22  ;;  %v4651_v60 = vor.u32 1.1754944e-38, %v4650_v3  ;;  %v4656_v13 = vsub.f32 1.0, %v4655_v50 }
 0x3a7   : > { %v4673_v3 = vadd.f32 %v11589_v33, %v4672_v61 }
 0x3a8   : > { %v5210_v63 = vpack.c.bf16 %v11574_v5, %v11572_v34  ;;  %v4637_v54 = vsel %vm4634_vm14, %v4636_v15, %v4632_v4  ;;  %v4652_v0 = vsel %vm4649_vm15, %v4651_v60, %v4647_v39  ;;  %v4657_v47 = vmul.f32 %v11585_v32, %v4656_v13 }
 0x3a9   : > { %v5147_v2 = vpop.f32.mrf.mxu2  ;;  %v4663_v4 = vand.u32 2147483647, %v11568_v62 }
 0x3aa   : > { %5246 = vmatmul.bf16.gmra.mxu3 %v5210_v63  ;;  %5295 = vmatmul.bf16.gmra.mxu0 %v5210_v63  ;;  %v5148_v24 = vadd.f32 %v5147_v2, %v4112_v21  ;;  %v4117_v21 = vadd.f32 %v4116_v37, %v11207_v8  ;;  %v4658_v11 = vadd.f32 %v11585_v32, %v4657_v47  ;;  %v4681_v37 = vor.u32 1.1754944e-38, %v4680_v17 }
 0x3ab   : > { %vm4664_vm6 = vcmp.eq.f32.partialorder %v4663_v4, 8.507059e+37 }
 0x3ac   : > { %v5169_v16 = vmax.f32 %v5148_v24, 0.0  ;;  %v4118_v24 = vpop.f32.mrf.mxu3 }
 0x3ad   : > { %v4119_v12 = vadd.f32 %v4118_v24, %v11207_v8 }
 0x3ae   : > { %v11610_v41 = vmul.f32 %v5169_v16, %v4637_v54  ;;  %v4662_v16 = vsel %vm11627_vm3, %v11585_v32, %v4658_v11  ;;  %v3069_v32 = vadd.f32 %v10915_v56, %v10905_v6  ;;  %v3074_v11 = vadd.f32 %v10940_v9, %v10905_v6 }
 0x3b1   : > { %v5149_v27 = vpop.f32.mrf.mxu2 }
 0x3b2   : > { %v5150_v51 = vadd.f32 %v5149_v27, %v4114_v40  ;;  %v4665_v40 = vand.u32 2147483648, %v11568_v62  ;;  %v4678_v27 = vand.u32 2147483647, %v11570_v52 }
 0x3b4   : > { %v5170_v55 = vmax.f32 %v5150_v51, 0.0  ;;  %v4677_v51 = vsel %vm4676_vm5, %v11589_v33, %v4673_v3  ;;  %v4666_v15 = vor.u32 1.1754944e-38, %v4665_v40  ;;  %vm4679_vm8 = vcmp.eq.f32.partialorder %v4678_v27, 8.507059e+37 }
 0x3b6   : > { %v11612_v63 = vmul.f32 %v5170_v55, %v4652_v0  ;;  %v4667_v62 = vsel %vm4664_vm6, %v4666_v15, %v4662_v16  ;;  %v4682_v55 = vsel %vm4679_vm8, %v4681_v37, %v4677_v51 }
 0x3b8   : > { %v5211_v57 = vpack.c.bf16 %v11612_v63, %v11610_v41 }
 0x3b9   : > { %v5152_v2 = vpop.f32.mrf.mxu2 }
 0x3ba   : > { %5251 = vmatmul.bf16.gmra.mxu3 %v5211_v57  ;;  %5300 = vmatmul.bf16.gmra.mxu0 %v5211_v57  ;;  %v5153_v22 = vadd.f32 %v5152_v2, %v4117_v21  ;;  %v3071_v57 = vadd.f32 %v10926_v59, %v10905_v6  ;;  %v3076_v59 = vadd.f32 %v10960_v42, %v10905_v6 }
 0x3bc   : > { %v5171_v39 = vmax.f32 %v5153_v22, 0.0 }
 0x3be   : > { %v11638_v54 = vmul.f32 %v5171_v39, %v4667_v62  ;;  %v3079_v62 = vadd.f32 %v10984_v43, %v10905_v6 }
 0x3c1   : > { %v5154_v50 = vpop.f32.mrf.mxu2 }
 0x3c2   : > { %v5155_v58 = vadd.f32 %v5154_v50, %v4119_v12 }
 0x3c4   : > { %v5172_v60 = vmax.f32 %v5155_v58, 0.0 }
 0x3c6   : > { %v11640_v52 = vmul.f32 %v5172_v60, %v4682_v55 }
 0x3c8   : > { %v5212_v0 = vpack.c.bf16 %v11640_v52, %v11638_v54 }
 0x3ca   : > { %5256 = vmatmul.bf16.gmra.mxu3 %v5212_v0  ;;  %5305 = vmatmul.bf16.gmra.mxu0 %v5212_v0 }
 0x3d7   : > { %v5271_v33 = vpop.f32.mrf.mxu0 }
 0x3d8   : > { %v5663_v13 = vadd.f32 %v5271_v33, %v3069_v32 }
 0x3da   : > { %v8363_v29 = vmul.f32 -1.442695, %v5663_v13 }
 0x3dc   : > { %8649 = vpow2.f32 %v8363_v29 }
 0x3df   : > { %v5273_v2 = vpop.f32.mrf.mxu0 }
 0x3e0   : > { %v5664_v21 = vadd.f32 %v5273_v2, %v3071_v57 }
 0x3e2   : > { %v8650_v47 = vpop.eup %8649  ;;  %v8364_v61 = vmul.f32 -1.442695, %v5664_v21 }
 0x3e3   : > { %v5727_v24 = vadd.f32 1.0, %v8650_v47 }
 0x3e4   : > { %8651 = vpow2.f32 %v8364_v61 }
 0x3e5   : > { %8653 = vrcp.f32 %v5727_v24  ;;  %v5754_v60 = vand.u32 2147483648, %v5727_v24  ;;  %vm5748_vm10 = vweird.f32 %v5727_v24  ;;  %v5752_v42 = vand.u32 2147483647, %v5727_v24 }
 0x3e7   : > { %v5276_v22 = vpop.f32.mrf.mxu0  ;;  %v5755_v21 = vor.u32 1.1754944e-38, %v5754_v60  ;;  %vm5753_vm12 = vcmp.eq.f32.partialorder %v5752_v42, 8.507059e+37 }
 0x3e8   : > { %v5665_v3 = vadd.f32 %v5276_v22, %v3074_v11 }
 0x3ea   : > { %v8652_v56 = vpop.eup %8651  ;;  %v8365_v40 = vmul.f32 -1.442695, %v5665_v3 }
 0x3eb   : > { %v8654_v17 = vpop.eup %8653  ;;  %v5728_v12 = vadd.f32 1.0, %v8652_v56 }
 0x3ec   : > { %v5744_v35 = vmul.f32 %v8654_v17, %v5727_v24  ;;  %8655 = vpow2.f32 %v8365_v40  ;;  %vm5749_vm9 = vweird.f32 %v8654_v17 }
 0x3ed   : > { %8657 = vrcp.f32 %v5728_v12  ;;  %vm11657_vm11 = vmor %vm5748_vm10, %vm5749_vm9  ;;  %v5767_v32 = vand.u32 2147483647, %v5728_v12  ;;  %v5769_v33 = vand.u32 2147483648, %v5728_v12  ;;  %vm5763_vm13 = vweird.f32 %v5728_v12 }
 0x3ee   : > { %v5745_v4 = vsub.f32 1.0, %v5744_v35  ;;  %v3081_v35 = vadd.f32 %v10998_v28, %v10905_v6  ;;  %v3084_v28 = vadd.f32 %v11024_v25, %v10905_v6 }
 0x3ef   : > { %v5278_v27 = vpop.f32.mrf.mxu0  ;;  %v5770_v11 = vor.u32 1.1754944e-38, %v5769_v33  ;;  %vm5768_vm15 = vcmp.eq.f32.partialorder %v5767_v32, 8.507059e+37 }
 0x3f0   : > { %v5746_v50 = vmul.f32 %v8654_v17, %v5745_v4  ;;  %v5666_v16 = vadd.f32 %v5278_v27, %v3076_v59 }
 0x3f2   : > { %v8656_v39 = vpop.eup %8655  ;;  %v8366_v51 = vmul.f32 -1.442695, %v5666_v16  ;;  %v5747_v15 = vadd.f32 %v8654_v17, %v5746_v50 }
 0x3f3   : > { %v8658_v58 = vpop.eup %8657  ;;  %v11652_v9 = vadd.f32 1.0, %v8656_v39 }
 0x3f4   : > { %v5759_v37 = vmul.f32 %v8658_v58, %v5728_v12  ;;  %8659 = vpow2.f32 %v8366_v51  ;;  %vm5764_vm7 = vweird.f32 %v8658_v58  ;;  %v5751_v2 = vsel %vm11657_vm11, %v8654_v17, %v5747_v15 }
 0x3f5   : > { %8661 = vrcp.f32 %v11652_v9  ;;  %vm5765_vm14 = vmor %vm5763_vm13, %vm5764_vm7  ;;  %v5756_v3 = vsel %vm5753_vm12, %v5755_v21, %v5751_v2  ;;  %vm5778_vm1 = vweird.f32 %v11652_v9  ;;  %v5782_v33 = vand.u32 2147483647, %v11652_v9 }
 0x3f6   : > { %v5760_v55 = vsub.f32 1.0, %v5759_v37  ;;  %v5983_v59 = vmul.f32 %v5756_v3, %v11263_v45 }
 0x3f7   : > { %v5281_v13 = vpop.f32.mrf.mxu0  ;;  %vm5783_vm5 = vcmp.eq.f32.partialorder %v5782_v33, 8.507059e+37 }
 0x3f8   : > { %v5761_v29 = vmul.f32 %v8658_v58, %v5760_v55  ;;  %v5667_v57 = vadd.f32 %v5281_v13, %v3079_v62  ;;  %v5784_v55 = vand.u32 2147483648, %v11652_v9 }
 0x3fa   : > { %v8660_v47 = vpop.eup %8659  ;;  %v5762_v43 = vadd.f32 %v8658_v58, %v5761_v29  ;;  %v8367_v61 = vmul.f32 -1.442695, %v5667_v57 }
 0x3fb   : > { %v8662_v24 = vpop.eup %8661  ;;  %v5730_v22 = vadd.f32 1.0, %v8660_v47 }
 0x3fc   : > { %8663 = vpow2.f32 %v8367_v61  ;;  %v5766_v56 = vsel %vm5765_vm14, %v8658_v58, %v5762_v43  ;;  %v5774_v17 = vmul.f32 %v8662_v24, %v11652_v9  ;;  %vm5779_vm0 = vweird.f32 %v8662_v24 }
 0x3fd   : > { %8665 = vrcp.f32 %v5730_v22  ;;  %v5771_v40 = vsel %vm5768_vm15, %v5770_v11, %v5766_v56  ;;  %vm11676_vm2 = vmor %vm5778_vm1, %vm5779_vm0  ;;  %v5799_v57 = vand.u32 2147483648, %v5730_v22  ;;  %v5797_v47 = vand.u32 2147483647, %v5730_v22 }
 0x3fe   : > { %v5984_v12 = vmul.f32 %v5771_v40, %v11265_v26  ;;  %v5775_v39 = vsub.f32 1.0, %v5774_v17  ;;  %v5785_v11 = vor.u32 1.1754944e-38, %v5784_v55  ;;  %vm5793_vm4 = vweird.f32 %v5730_v22 }
 0x3ff   : > { %v5283_v4 = vpop.f32.mrf.mxu0  ;;  %v5800_v40 = vor.u32 1.1754944e-38, %v5799_v57  ;;  %vm5798_vm8 = vcmp.eq.f32.partialorder %v5797_v47, 8.507059e+37 }
 0x400   : > { %v5668_v27 = vadd.f32 %v5283_v4, %v3081_v35  ;;  %v5999_v50 = vpack.c.bf16 %v5984_v12, %v5983_v59  ;;  %v5776_v62 = vmul.f32 %v8662_v24, %v5775_v39  ;;  %v3086_v35 = vadd.f32 %v11039_v19, %v10905_v6 }
 0x401   : > { %v3089_v19 = vadd.f32 %v11062_v49, %v10905_v6 }
 0x402   : > { %v8664_v16 = vpop.eup %8663  ;;  %v8368_v51 = vmul.f32 -1.442695, %v5668_v27  ;;  %6031 = vmatmul.bf16.vlgmr.msra.gmra.mxu1 %v5999_v50  ;;  %v5777_v32 = vadd.f32 %v8662_v24, %v5776_v62 }
 0x403   : > { %v8666_v58 = vpop.eup %8665  ;;  %v11668_v15 = vadd.f32 1.0, %v8664_v16 }
 0x404   : > { %v5789_v37 = vmul.f32 %v8666_v58, %v5730_v22  ;;  %8667 = vpow2.f32 %v8368_v51  ;;  %vm5794_vm3 = vweird.f32 %v8666_v58  ;;  %v5781_v21 = vsel %vm11676_vm2, %v8662_v24, %v5777_v32 }
 0x405   : > { %8669 = vrcp.f32 %v11668_v15  ;;  %vm5795_vm6 = vmor %vm5793_vm4, %vm5794_vm3  ;;  %v5786_v9 = vsel %vm5783_vm5, %v5785_v11, %v5781_v21  ;;  %vm5808_vm10 = vweird.f32 %v11668_v15  ;;  %v5812_v32 = vand.u32 2147483647, %v11668_v15 }
 0x406   : > { %v5790_v60 = vsub.f32 1.0, %v5789_v37  ;;  %v5985_v4 = vmul.f32 %v5786_v9, %v11335_v10 }
 0x407   : > { %v5286_v42 = vpop.f32.mrf.mxu0  ;;  %vm5813_vm13 = vcmp.eq.f32.partialorder %v5812_v32, 8.507059e+37 }
 0x408   : > { %v5669_v0 = vadd.f32 %v5286_v42, %v3084_v28  ;;  %v5791_v13 = vmul.f32 %v8666_v58, %v5790_v60  ;;  %v5814_v42 = vand.u32 2147483648, %v11668_v15 }
 0x40a   : > { %v8668_v25 = vpop.eup %8667  ;;  %v8369_v2 = vmul.f32 -1.442695, %v5669_v0  ;;  %v5792_v3 = vadd.f32 %v8666_v58, %v5791_v13  ;;  %v5815_v11 = vor.u32 1.1754944e-38, %v5814_v42 }
 0x40b   : > { %v8670_v43 = vpop.eup %8669  ;;  %v5732_v61 = vadd.f32 1.0, %v8668_v25 }
 0x40c   : > { %8671 = vpow2.f32 %v8369_v2  ;;  %v5796_v56 = vsel %vm5795_vm6, %v8666_v58, %v5792_v3  ;;  %v5804_v17 = vmul.f32 %v8670_v43, %v11668_v15  ;;  %vm5809_vm9 = vweird.f32 %v8670_v43 }
 0x40d   : > { %8673 = vrcp.f32 %v5732_v61  ;;  %v5801_v59 = vsel %vm5798_vm8, %v5800_v40, %v5796_v56  ;;  %vm11695_vm11 = vmor %vm5808_vm10, %vm5809_vm9  ;;  %v5829_v29 = vand.u32 2147483648, %v5732_v61  ;;  %v5827_v2 = vand.u32 2147483647, %v5732_v61 }
 0x40e   : > { %v5986_v22 = vmul.f32 %v5801_v59, %v11337_v38  ;;  %v5805_v50 = vsub.f32 1.0, %v5804_v17  ;;  %vm5823_vm12 = vweird.f32 %v5732_v61  ;;  %v3091_v40 = vadd.f32 %v11075_v7, %v10905_v6 }
 0x40f   : > { %v5288_v24 = vpop.f32.mrf.mxu0  ;;  %v5830_v56 = vor.u32 1.1754944e-38, %v5829_v29  ;;  %vm5828_vm15 = vcmp.eq.f32.partialorder %v5827_v2, 8.507059e+37  ;;  %v3094_v7 = vadd.f32 %v11090_v18, %v10905_v6 }
 0x410   : > { %v5670_v12 = vadd.f32 %v5288_v24, %v3086_v35  ;;  %v6000_v39 = vpack.c.bf16 %v5986_v22, %v5985_v4  ;;  %v5806_v60 = vmul.f32 %v8670_v43, %v5805_v50 }
 0x412   : > { %v8672_v27 = vpop.eup %8671  ;;  %v8370_v16 = vmul.f32 -1.442695, %v5670_v12  ;;  %6036 = vmatmul.bf16.gmra.mxu1 %v6000_v39  ;;  %v5807_v0 = vadd.f32 %v8670_v43, %v5806_v60 }
 0x413   : > { %v8674_v51 = vpop.eup %8673  ;;  %v11687_v58 = vadd.f32 1.0, %v8672_v27 }
 0x414   : > { %v5819_v37 = vmul.f32 %v8674_v51, %v5732_v61  ;;  %8675 = vpow2.f32 %v8370_v16  ;;  %vm5824_vm7 = vweird.f32 %v8674_v51  ;;  %v5811_v25 = vsel %vm11695_vm11, %v8670_v43, %v5807_v0 }
 0x415   : > { %8677 = vrcp.f32 %v11687_v58  ;;  %vm5825_vm14 = vmor %vm5823_vm12, %vm5824_vm7  ;;  %v5816_v15 = vsel %vm5813_vm13, %v5815_v11, %v5811_v25  ;;  %vm5838_vm1 = vweird.f32 %v11687_v58  ;;  %v5842_v42 = vand.u32 2147483647, %v11687_v58 }
 0x416   : > { %v5820_v28 = vsub.f32 1.0, %v5819_v37  ;;  %v5987_v59 = vmul.f32 %v5816_v15, %v11408_v14  ;;  %v3096_v15 = vadd.f32 %v11101_v23, %v10905_v6 }
 0x417   : > { %v5291_v62 = vpop.f32.mrf.mxu0  ;;  %vm5843_vm5 = vcmp.eq.f32.partialorder %v5842_v42, 8.507059e+37 }
 0x418   : > { %v5671_v55 = vadd.f32 %v5291_v62, %v3089_v19  ;;  %v5821_v33 = vmul.f32 %v8674_v51, %v5820_v28  ;;  %v5844_v28 = vand.u32 2147483648, %v11687_v58 }
 0x41a   : > { %v8676_v49 = vpop.eup %8675  ;;  %v8371_v57 = vmul.f32 -1.442695, %v5671_v55  ;;  %v5822_v3 = vadd.f32 %v8674_v51, %v5821_v33  ;;  %v5845_v25 = vor.u32 1.1754944e-38, %v5844_v28 }
 0x41b   : > { %v8678_v21 = vpop.eup %8677  ;;  %v5734_v47 = vadd.f32 1.0, %v8676_v49 }
 0x41c   : > { %8679 = vpow2.f32 %v8371_v57  ;;  %v5826_v9 = vsel %vm5825_vm14, %v8674_v51, %v5822_v3  ;;  %v5834_v35 = vmul.f32 %v8678_v21, %v11687_v58  ;;  %vm5839_vm0 = vweird.f32 %v8678_v21 }
 0x41d   : > { %8681 = vrcp.f32 %v5734_v47  ;;  %v5831_v17 = vsel %vm5828_vm15, %v5830_v56, %v5826_v9  ;;  %vm11714_vm2 = vmor %vm5838_vm1, %vm5839_vm0  ;;  %v5859_v32 = vand.u32 2147483648, %v5734_v47  ;;  %v5857_v29 = vand.u32 2147483647, %v5734_v47 }
 0x41e   : > { %v5988_v61 = vmul.f32 %v5831_v17, %v11410_v36  ;;  %v5835_v4 = vsub.f32 1.0, %v5834_v35  ;;  %vm5853_vm4 = vweird.f32 %v5734_v47 }
 0x41f   : > { %v5293_v43 = vpop.f32.mrf.mxu0  ;;  %v5860_v3 = vor.u32 1.1754944e-38, %v5859_v32  ;;  %vm5858_vm8 = vcmp.eq.f32.partialorder %v5857_v29, 8.507059e+37 }
 0x420   : > { %v5672_v24 = vadd.f32 %v5293_v43, %v3091_v40  ;;  %v6001_v27 = vpack.c.bf16 %v5988_v61, %v5987_v59  ;;  %v5836_v37 = vmul.f32 %v8678_v21, %v5835_v4  ;;  %v11727_v4 = vpop.f32.mrf.mxu3 }
 0x422   : > { %v8680_v12 = vpop.eup %8679  ;;  %v8372_v22 = vmul.f32 -1.442695, %v5672_v24  ;;  %6041 = vmatmul.bf16.gmra.mxu1 %v6001_v27  ;;  %v5837_v62 = vadd.f32 %v8678_v21, %v5836_v37 }
 0x423   : > { %v8682_v50 = vpop.eup %8681  ;;  %v11706_v16 = vadd.f32 1.0, %v8680_v12 }
 0x424   : > { %v5849_v39 = vmul.f32 %v8682_v50, %v5734_v47  ;;  %8683 = vpow2.f32 %v8372_v22  ;;  %vm5854_vm3 = vweird.f32 %v8682_v50  ;;  %v5841_v13 = vsel %vm11714_vm2, %v8678_v21, %v5837_v62 }
 0x425   : > { %8685 = vrcp.f32 %v11706_v16  ;;  %vm5855_vm6 = vmor %vm5853_vm4, %vm5854_vm3  ;;  %v5846_v58 = vsel %vm5843_vm5, %v5845_v25, %v5841_v13  ;;  %v3099_v22 = vadd.f32 %v11111_v53, %v10905_v6  ;;  %vm5868_vm10 = vweird.f32 %v11706_v16 }
 0x426   : > { %v5850_v51 = vsub.f32 1.0, %v5849_v39  ;;  %v5989_v35 = vmul.f32 %v5846_v58, %v11469_v1  ;;  %v5874_v39 = vand.u32 2147483648, %v11706_v16  ;;  %v3101_v25 = vadd.f32 %v11122_v20, %v10905_v6 }
 0x427   : > { %v5296_v19 = vpop.f32.mrf.mxu0  ;;  %v3104_v20 = vadd.f32 %v11134_v30, %v10905_v6 }
 0x428   : > { %v5673_v60 = vadd.f32 %v5296_v19, %v3094_v7  ;;  %v5851_v55 = vmul.f32 %v8682_v50, %v5850_v51  ;;  %v5872_v51 = vand.u32 2147483647, %v11706_v16  ;;  %v5875_v0 = vor.u32 1.1754944e-38, %v5874_v39 }
 0x42a   : > { %v8684_v18 = vpop.eup %8683  ;;  %v8373_v33 = vmul.f32 -1.442695, %v5673_v60  ;;  %v5852_v2 = vadd.f32 %v8682_v50, %v5851_v55  ;;  %vm5873_vm12 = vcmp.eq.f32.partialorder %v5872_v51, 8.507059e+37 }
 0x42b   : > { %v8686_v49 = vpop.eup %8685  ;;  %v5736_v57 = vadd.f32 1.0, %v8684_v18 }
 0x42c   : > { %8687 = vpow2.f32 %v8373_v33  ;;  %v5856_v11 = vsel %vm5855_vm6, %v8682_v50, %v5852_v2  ;;  %v5864_v9 = vmul.f32 %v8686_v49, %v11706_v16  ;;  %vm5869_vm9 = vweird.f32 %v8686_v49  ;;  %v11737_v2 = vpop.f32.mrf.mxu3 }
 0x42d   : > { %8689 = vrcp.f32 %v5736_v57  ;;  %v5861_v56 = vsel %vm5858_vm8, %v5860_v3, %v5856_v11  ;;  %vm5870_vm11 = vmor %vm5868_vm10, %vm5869_vm9  ;;  %v5887_v60 = vand.u32 2147483647, %v5736_v57  ;;  %v5889_v62 = vand.u32 2147483648, %v5736_v57 }
 0x42e   : > { %v5990_v47 = vmul.f32 %v5861_v56, %v11471_v44  ;;  %v5865_v17 = vsub.f32 1.0, %v5864_v9  ;;  %vm5883_vm13 = vweird.f32 %v5736_v57 }
 0x42f   : > { %v5298_v21 = vpop.f32.mrf.mxu0  ;;  %v5890_v29 = vor.u32 1.1754944e-38, %v5889_v62  ;;  %vm5888_vm15 = vcmp.eq.f32.partialorder %v5887_v60, 8.507059e+37 }
 0x430   : > { %v5674_v40 = vadd.f32 %v5298_v21, %v3096_v15  ;;  %v6002_v59 = vpack.c.bf16 %v5990_v47, %v5989_v35  ;;  %v5866_v50 = vmul.f32 %v8686_v49, %v5865_v17 }
 0x432   : > { %v8688_v43 = vpop.eup %8687  ;;  %v8374_v24 = vmul.f32 -1.442695, %v5674_v40  ;;  %6046 = vmatmul.bf16.gmra.mxu1 %v6002_v59  ;;  %v5867_v19 = vadd.f32 %v8686_v49, %v5866_v50 }
 0x433   : > { %v8690_v61 = vpop.eup %8689  ;;  %v11725_v12 = vadd.f32 1.0, %v8688_v43 }
 0x434   : > { %v5879_v23 = vmul.f32 %v8690_v61, %v5736_v57  ;;  %8691 = vpow2.f32 %v8374_v24  ;;  %vm5884_vm7 = vweird.f32 %v8690_v61  ;;  %v5871_v55 = vsel %vm5870_vm11, %v8686_v49, %v5867_v19 }
 0x435   : > { %8693 = vrcp.f32 %v11725_v12  ;;  %v5876_v13 = vsel %vm5873_vm12, %v5875_v0, %v5871_v55  ;;  %vm5885_vm14 = vmor %vm5883_vm13, %vm5884_vm7  ;;  %v5904_v59 = vand.u32 2147483648, %v11725_v12  ;;  %vm5898_vm1 = vweird.f32 %v11725_v12 }
 0x436   : > { %v5880_v27 = vsub.f32 1.0, %v5879_v23  ;;  %v5991_v3 = vmul.f32 %v5876_v13, %v11524_v46  ;;  %v5902_v23 = vand.u32 2147483647, %v11725_v12  ;;  %v13494_v13 = vld [vmem:[#allocation134_spill] sm:$0xff] }
 0x437   : > { %v5301_v7 = vpop.f32.mrf.mxu0  ;;  %v5905_v60 = vor.u32 1.1754944e-38, %v5904_v59 }
 0x438   : > { %v5675_v37 = vadd.f32 %v5301_v7, %v3099_v22  ;;  %v5881_v28 = vmul.f32 %v8690_v61, %v5880_v27  ;;  %v11749_v22 = vpop.f32.mrf.mxu3  ;;  %vm5903_vm4 = vcmp.eq.f32.partialorder %v5902_v23, 8.507059e+37 }
 0x43a   : > { %v8692_v53 = vpop.eup %8691  ;;  %v8375_v42 = vmul.f32 -1.442695, %v5675_v37  ;;  %v5882_v33 = vadd.f32 %v8690_v61, %v5881_v28 }
 0x43b   : > { %v8694_v32 = vpop.eup %8693  ;;  %v5738_v18 = vadd.f32 1.0, %v8692_v53 }
 0x43c   : > { %8695 = vpow2.f32 %v8375_v42  ;;  %v5886_v16 = vsel %vm5885_vm14, %v8690_v61, %v5882_v33  ;;  %v5894_v49 = vmul.f32 %v8694_v32, %v11725_v12  ;;  %vm5899_vm0 = vweird.f32 %v8694_v32 }
 0x43d   : > { %8697 = vrcp.f32 %v5738_v18  ;;  %v5891_v58 = vsel %vm5888_vm15, %v5890_v29, %v5886_v16  ;;  %vm11752_vm2 = vmor %vm5898_vm1, %vm5899_vm0  ;;  %v5917_v30 = vand.u32 2147483647, %v5738_v18  ;;  %v5919_v51 = vand.u32 2147483648, %v5738_v18 }
 0x43e   : > { %v5992_v57 = vmul.f32 %v5891_v58, %v11526_v31  ;;  %v5895_v56 = vsub.f32 1.0, %v5894_v49  ;;  %vm5913_vm5 = vweird.f32 %v5738_v18  ;;  %v3106_v29 = vadd.f32 %v13494_v13, %v10905_v6 }
 0x43f   : > { %v5303_v11 = vpop.f32.mrf.mxu0  ;;  %v5920_v0 = vor.u32 1.1754944e-38, %v5919_v51  ;;  %vm5918_vm8 = vcmp.eq.f32.partialorder %v5917_v30, 8.507059e+37  ;;  %v13498_v30 = vld [vmem:[#allocation79_spill] sm:$0xff] }
 0x440   : > { %v5676_v15 = vadd.f32 %v5303_v11, %v3101_v25  ;;  %v6003_v9 = vpack.c.bf16 %v5992_v57, %v5991_v3  ;;  %v5896_v24 = vmul.f32 %v8694_v32, %v5895_v56  ;;  %v13495_v3 = vld [vmem:[#allocation77_spill] sm:$0xff]  ;;  %v3022_v51 = vadd.f32 %v13498_v30, %v11153_v48 }
 0x441   : > { %v3020_v57 = vadd.f32 %v13495_v3, %v11153_v48 }
 0x442   : > { %v8696_v21 = vpop.eup %8695  ;;  %v8376_v40 = vmul.f32 -1.442695, %v5676_v15  ;;  %6051 = vmatmul.bf16.gmra.mxu1 %v6003_v9  ;;  %v5897_v50 = vadd.f32 %v8694_v32, %v5896_v24 }
 0x443   : > { %v8698_v35 = vpop.eup %8697  ;;  %v11742_v47 = vadd.f32 1.0, %v8696_v21  ;;  %v11766_v21 = vpop.f32.mrf.mxu3 }
 0x444   : > { %v5909_v43 = vmul.f32 %v8698_v35, %v5738_v18  ;;  %8699 = vpow2.f32 %v8376_v40  ;;  %vm5914_vm3 = vweird.f32 %v8698_v35  ;;  %v5901_v28 = vsel %vm11752_vm2, %v8694_v32, %v5897_v50 }
 0x445   : > { %8701 = vrcp.f32 %v11742_v47  ;;  %v5906_v55 = vsel %vm5903_vm4, %v5905_v60, %v5901_v28  ;;  %vm5915_vm6 = vmor %vm5913_vm5, %vm5914_vm3  ;;  %v5934_v24 = vand.u32 2147483648, %v11742_v47  ;;  %vm5928_vm10 = vweird.f32 %v11742_v47 }
 0x446   : > { %v5910_v17 = vsub.f32 1.0, %v5909_v43  ;;  %v5993_v49 = vmul.f32 %v5906_v55, %v11572_v34  ;;  %v5328_v60 = vadd.f32 %v11737_v2, %v3022_v51 }
 0x447   : > { %v5306_v61 = vpop.f32.mrf.mxu0 }
 0x448   : > { %v5677_v27 = vadd.f32 %v5306_v61, %v3104_v20  ;;  %v5911_v39 = vmul.f32 %v8698_v35, %v5910_v17  ;;  %v5932_v61 = vand.u32 2147483647, %v11742_v47 }
 0x44a   : > { %v8700_v37 = vpop.eup %8699  ;;  %v8377_v19 = vmul.f32 -1.442695, %v5677_v27  ;;  %v5912_v42 = vadd.f32 %v8698_v35, %v5911_v39  ;;  %vm5933_vm12 = vcmp.eq.f32.partialorder %v5932_v61, 8.507059e+37  ;;  %v13500_v27 = vld [vmem:[#allocation84_spill] sm:$0xff] }
 0x44b   : > { %v8702_v62 = vpop.eup %8701  ;;  %v5740_v53 = vadd.f32 1.0, %v8700_v37  ;;  %v5935_v37 = vor.u32 1.1754944e-38, %v5934_v24 }
 0x44c   : > { %v5924_v12 = vmul.f32 %v8702_v62, %v11742_v47  ;;  %8703 = vpow2.f32 %v8377_v19  ;;  %v5916_v33 = vsel %vm5915_vm6, %v8698_v35, %v5912_v42  ;;  %v5327_v35 = vadd.f32 %v11727_v4, %v3020_v57 }
 0x44d   : > { %8705 = vrcp.f32 %v5740_v53  ;;  %v5921_v16 = vsel %vm5918_vm8, %v5920_v0, %v5916_v33  ;;  %vm5929_vm9 = vweird.f32 %v8702_v62  ;;  %v5949_v4 = vand.u32 2147483648, %v5740_v53 }
 0x44e   : > { %v5925_v32 = vsub.f32 1.0, %v5924_v12  ;;  %v5994_v18 = vmul.f32 %v5921_v16, %v11574_v5  ;;  %v8347_v23 = vmul.f32 -1.442695, %v5327_v35  ;;  %vm11775_vm11 = vmor %vm5928_vm10, %vm5929_vm9  ;;  %v5947_v7 = vand.u32 2147483647, %v5740_v53 }
 0x44f   : > { %v5308_v25 = vpop.f32.mrf.mxu0  ;;  %vm5943_vm13 = vweird.f32 %v5740_v53  ;;  %v5950_v55 = vor.u32 1.1754944e-38, %v5949_v4  ;;  %v8348_v16 = vmul.f32 -1.442695, %v5328_v60  ;;  %v3027_v4 = vadd.f32 %v13500_v27, %v11153_v48 }
 0x450   : > { %v5678_v58 = vadd.f32 %v5308_v25, %v3106_v29  ;;  %v5926_v11 = vmul.f32 %v8702_v62, %v5925_v32  ;;  %v6004_v15 = vpack.c.bf16 %v5994_v18, %v5993_v49  ;;  %vm5948_vm15 = vcmp.eq.f32.partialorder %v5947_v7, 8.507059e+37 }
 0x451   : > { %v5330_v51 = vadd.f32 %v11766_v21, %v3027_v4 }
 0x452   : > { %v8704_v9 = vpop.eup %8703  ;;  %v8378_v56 = vmul.f32 -1.442695, %v5678_v58  ;;  %6056 = vmatmul.bf16.gmra.mxu1 %v6004_v15  ;;  %v5927_v17 = vadd.f32 %v8702_v62, %v5926_v11  ;;  %v13499_v58 = vld [vmem:[#allocation82_spill] sm:$0xff] }
 0x453   : > { %v8706_v40 = vpop.eup %8705  ;;  %v11769_v43 = vadd.f32 1.0, %v8704_v9  ;;  %v3025_v11 = vadd.f32 %v13499_v58, %v11153_v48 }
 0x454   : > { %v5939_v20 = vmul.f32 %v8706_v40, %v5740_v53  ;;  %8707 = vpow2.f32 %v8378_v56  ;;  %v5931_v50 = vsel %vm11775_vm11, %v8702_v62, %v5927_v17  ;;  %vm5944_vm7 = vweird.f32 %v8706_v40  ;;  %v11784_v62 = vpop.f32.mrf.mxu3 }
 0x455   : > { %8709 = vrcp.f32 %v11769_v43  ;;  %v5936_v12 = vsel %vm5933_vm12, %v5935_v37, %v5931_v50  ;;  %vm5945_vm14 = vmor %vm5943_vm13, %vm5944_vm7  ;;  %v5964_v9 = vand.u32 2147483648, %v11769_v43  ;;  %v5329_v56 = vadd.f32 %v11749_v22, %v3025_v11  ;;  %v13502_v11 = vld [vmem:[#allocation87_spill] sm:$0xff] }
 0x456   : > { %v5940_v59 = vsub.f32 1.0, %v5939_v20  ;;  %8711 = vpow2.f32 %v8347_v23  ;;  %v5995_v32 = vmul.f32 %v5936_v12, %v11610_v41  ;;  %vm5958_vm1 = vweird.f32 %v11769_v43 }
 0x457   : > { %v5962_v20 = vand.u32 2147483647, %v11769_v43  ;;  %v5965_v50 = vor.u32 1.1754944e-38, %v5964_v9  ;;  %v8349_v22 = vmul.f32 -1.442695, %v5329_v56 }
 0x458   : > { %v5941_v39 = vmul.f32 %v8706_v40, %v5940_v59  ;;  %v8350_v12 = vmul.f32 -1.442695, %v5330_v51 }
 0x459   : > { %vm5963_vm4 = vcmp.eq.f32.partialorder %v5962_v20, 8.507059e+37 }
 0x45a   : > { %v8708_v19 = vpop.eup %8707  ;;  %v5942_v28 = vadd.f32 %v8706_v40, %v5941_v39 }
 0x45b   : > { %v8710_v47 = vpop.eup %8709  ;;  %v5742_v42 = vadd.f32 1.0, %v8708_v19 }
 0x45c   : > { %v5954_v0 = vmul.f32 %v8710_v47, %v11769_v43  ;;  %v5946_v33 = vsel %vm5945_vm14, %v8706_v40, %v5942_v28  ;;  %v8712_v49 = vpop.eup %8711  ;;  %vm5959_vm0 = vweird.f32 %v8710_v47  ;;  %v5234_v40 = vpop.f32.mrf.mxu3 }
 0x45d   : > { %8713 = vrcp.f32 %v5742_v42  ;;  %v5951_v13 = vsel %vm5948_vm15, %v5950_v55, %v5946_v33  ;;  %v11791_v15 = vadd.f32 1.0, %v8712_v49  ;;  %vm5960_vm2 = vmor %vm5958_vm1, %vm5959_vm0  ;;  %v5979_v17 = vand.u32 2147483648, %v5742_v42 }
 0x45e   : > { %v5955_v29 = vsub.f32 1.0, %v5954_v0  ;;  %v5996_v53 = vmul.f32 %v5951_v13, %v11612_v63  ;;  %8715 = vpow2.f32 %v8348_v16  ;;  %v5977_v61 = vand.u32 2147483647, %v5742_v42  ;;  %v13501_v13 = vld [vmem:[#allocation85_spill] sm:$0xff] }
 0x45f   : > { %8717 = vrcp.f32 %v11791_v15  ;;  %vm5973_vm5 = vweird.f32 %v5742_v42  ;;  %v5980_v43 = vor.u32 1.1754944e-38, %v5979_v17  ;;  %v3030_v21 = vadd.f32 %v13501_v13, %v11153_v48 }
 0x460   : > { %v6005_v2 = vpack.c.bf16 %v5996_v53, %v5995_v32  ;;  %v5956_v25 = vmul.f32 %v8710_v47, %v5955_v29  ;;  %vm5978_vm8 = vcmp.eq.f32.partialorder %v5977_v61, 8.507059e+37  ;;  %8719 = vpow2.f32 %v8349_v22  ;;  %v13504_v22 = vld [vmem:[#allocation90_spill] sm:$0xff] }
 0x461   : > { %v5331_v53 = vadd.f32 %v11784_v62, %v3030_v21  ;;  %v5418_v17 = vand.u32 2147483648, %v11791_v15  ;;  %vm5412_vm10 = vweird.f32 %v11791_v15 }
 0x462   : > { %6061 = vmatmul.bf16.gmra.mxu1 %v6005_v2  ;;  %v5957_v57 = vadd.f32 %v8710_v47, %v5956_v25 }
 0x463   : > { %v8714_v18 = vpop.eup %8713  ;;  %v8351_v49 = vmul.f32 -1.442695, %v5331_v53 }
 0x464   : > { %v5969_v3 = vmul.f32 %v8714_v18, %v5742_v42  ;;  %v5961_v24 = vsel %vm5960_vm2, %v8710_v47, %v5957_v57  ;;  %vm5974_vm3 = vweird.f32 %v8714_v18  ;;  %v8716_v23 = vpop.eup %8715  ;;  %v5237_v42 = vpop.f32.mrf.mxu3  ;;  %v13503_v57 = vld [vmem:[#allocation101_spill] sm:$0xff] }
 0x465   : > { %v5966_v7 = vsel %vm5963_vm4, %v5965_v50, %v5961_v24  ;;  %vm5975_vm6 = vmor %vm5973_vm5, %vm5974_vm3  ;;  %v11800_v30 = vadd.f32 1.0, %v8716_v23  ;;  %v8718_v60 = vpop.eup %8717  ;;  %v3118_v9 = vadd.f32 %v13503_v57, %v11207_v8  ;;  %v13506_v57 = vld [vmem:[#allocation93_spill] sm:$0xff] }
 0x466   : > { %v5970_v35 = vsub.f32 1.0, %v5969_v3  ;;  %v5997_v28 = vmul.f32 %v5966_v7, %v11638_v54  ;;  %v5408_v0 = vmul.f32 %v8718_v60, %v11791_v15  ;;  %v8720_v33 = vpop.eup %8719  ;;  %v3032_v3 = vadd.f32 %v13502_v11, %v11153_v48 }
 0x467   : > { %8721 = vrcp.f32 %v11800_v30  ;;  %v11812_v16 = vadd.f32 1.0, %v8720_v33  ;;  %vm5413_vm9 = vweird.f32 %v8718_v60  ;;  %v5419_v7 = vor.u32 1.1754944e-38, %v5418_v17 }
 0x468   : > { %v5971_v59 = vmul.f32 %v8714_v18, %v5970_v35  ;;  %8723 = vpow2.f32 %v8350_v12  ;;  %v5409_v32 = vsub.f32 1.0, %v5408_v0  ;;  %v5332_v62 = vadd.f32 %v5234_v40, %v3032_v3  ;;  %vm5414_vm11 = vmor %vm5412_vm10, %vm5413_vm9 }
 0x469   : > { %8725 = vrcp.f32 %v11812_v16  ;;  %v5433_v13 = vand.u32 2147483648, %v11800_v30  ;;  %vm5427_vm13 = vweird.f32 %v11800_v30  ;;  %v5431_v53 = vand.u32 2147483647, %v11800_v30 }
 0x46a   : > { %v5972_v39 = vadd.f32 %v8714_v18, %v5971_v59  ;;  %v5410_v58 = vmul.f32 %v8718_v60, %v5409_v32  ;;  %8727 = vpow2.f32 %v8351_v49  ;;  %v5416_v59 = vand.u32 2147483647, %v11791_v15 }
 0x46b   : > { %v8352_v27 = vmul.f32 -1.442695, %v5332_v62  ;;  %v5434_v11 = vor.u32 1.1754944e-38, %v5433_v13  ;;  %vm5432_vm15 = vcmp.eq.f32.partialorder %v5431_v53, 8.507059e+37  ;;  %vm5442_vm1 = vweird.f32 %v11812_v16 }
 0x46c   : > { %v5976_v37 = vsel %vm5975_vm6, %v8714_v18, %v5972_v39  ;;  %v5239_v18 = vpop.f32.mrf.mxu3  ;;  %v5411_v20 = vadd.f32 %v8718_v60, %v5410_v58  ;;  %v3035_v39 = vadd.f32 %v13504_v22, %v11153_v48  ;;  %vm5417_vm7 = vcmp.eq.f32.partialorder %v5416_v59, 8.507059e+37 }
 0x46d   : > { %v5981_v19 = vsel %vm5978_vm8, %v5980_v43, %v5976_v37  ;;  %v11809_v29 = vpop.eup %8721 }
 0x46e   : > { %v5998_v47 = vmul.f32 %v5981_v19, %v11640_v52  ;;  %v5423_v2 = vmul.f32 %v11809_v29, %v11800_v30  ;;  %v8724_v25 = vpop.eup %8723  ;;  %v5415_v4 = vsel %vm5414_vm11, %v8718_v60, %v5411_v20  ;;  %v13505_v19 = vld [vmem:[#allocation104_spill] sm:$0xff]  ;;  %vm5428_vm12 = vweird.f32 %v11809_v29 }
 0x46f   : > { %v11821_v35 = vadd.f32 1.0, %v8724_v25  ;;  %v11826_v23 = vpop.eup %8725  ;;  %v5420_v60 = vsel %vm5417_vm7, %v5419_v7, %v5415_v4  ;;  %vm5429_vm14 = vmor %vm5427_vm13, %vm5428_vm12 }
 0x470   : > { %v6006_v55 = vpack.c.bf16 %v5998_v47, %v5997_v28  ;;  %v5424_v56 = vsub.f32 1.0, %v5423_v2  ;;  %v8728_v43 = vpop.eup %8727  ;;  %v5438_v51 = vmul.f32 %v11826_v23, %v11812_v16  ;;  %v3120_v28 = vadd.f32 %v13505_v19, %v11207_v8 }
 0x471   : > { %8729 = vrcp.f32 %v11821_v35  ;;  %v5333_v47 = vadd.f32 %v5237_v42, %v3035_v39  ;;  %v11841_v33 = vadd.f32 1.0, %v8728_v43  ;;  %vm5443_vm0 = vweird.f32 %v11826_v23 }
 0x472   : > { %6066 = vmatmul.bf16.gmra.mxu1 %v6006_v55  ;;  %v5425_v40 = vmul.f32 %v11809_v29, %v5424_v56  ;;  %8731 = vpow2.f32 %v8352_v27  ;;  %v5439_v32 = vsub.f32 1.0, %v5438_v51  ;;  %v5446_v43 = vand.u32 2147483647, %v11812_v16  ;;  %vm5444_vm2 = vmor %vm5442_vm1, %vm5443_vm0 }
 0x473   : > { %v8353_v2 = vmul.f32 -1.442695, %v5333_v47  ;;  %8733 = vrcp.f32 %v11841_v33  ;;  %vm5457_vm5 = vweird.f32 %v11821_v35  ;;  %vm5472_vm10 = vweird.f32 %v11841_v33 }
 0x474   : > { %v5242_v15 = vpop.f32.mrf.mxu3  ;;  %v5426_v55 = vadd.f32 %v11809_v29, %v5425_v40  ;;  %v5440_v30 = vmul.f32 %v11826_v23, %v5439_v32  ;;  %vm5447_vm3 = vcmp.eq.f32.partialorder %v5446_v43, 8.507059e+37  ;;  %v13509_v32 = vld [vmem:[#allocation111_spill] sm:$0xff] }
 0x475   : > { %8735 = vpow2.f32 %v8353_v2  ;;  %v3125_v53 = vadd.f32 %v13509_v32, %v11207_v8 }
 0x476   : > { %v5430_v25 = vsel %vm5429_vm14, %v11809_v29, %v5426_v55  ;;  %v5441_v40 = vadd.f32 %v11826_v23, %v5440_v30 }
 0x477   : > { %v11839_v0 = vpop.eup %8729  ;;  %v5435_v62 = vsel %vm5432_vm15, %v5434_v11, %v5430_v25  ;;  %v5463_v11 = vand.u32 2147483648, %v11821_v35 }
 0x478   : > { %v5453_v58 = vmul.f32 %v11839_v0, %v11821_v35  ;;  %v8732_v3 = vpop.eup %8731  ;;  %v5445_v47 = vsel %vm5444_vm2, %v11826_v23, %v5441_v40  ;;  %vm5458_vm4 = vweird.f32 %v11839_v0 }
 0x479   : > { %v11856_v27 = vadd.f32 1.0, %v8732_v3  ;;  %v11866_v22 = vpop.eup %8733  ;;  %vm5459_vm6 = vmor %vm5457_vm5, %vm5458_vm4  ;;  %v5464_v40 = vor.u32 1.1754944e-38, %v5463_v11  ;;  %v13513_v11 = vld [vmem:[#allocation117_spill] sm:$0xff] }
 0x47a   : > { %vm5473_vm9 = vweird.f32 %v11866_v22 }
 0x47b   : > { %8737 = vrcp.f32 %v11856_v27  ;;  %vm5474_vm11 = vmor %vm5472_vm10, %vm5473_vm9  ;;  %vm5487_vm13 = vweird.f32 %v11856_v27 }
 0x47c   : > { %v5244_v29 = vpop.f32.mrf.mxu3 }
 0x47f   : > { %v6032_v24 = vpop.f32.mrf.mxu1 }
 0x480   : > { %v6033_v61 = vadd.f32 %v6032_v24, %v3118_v9  ;;  %v3037_v9 = vadd.f32 %v13506_v57, %v11153_v48  ;;  %v13507_v24 = vld [vmem:[#allocation107_spill] sm:$0xff]  ;;  %v5461_v57 = vand.u32 2147483647, %v11821_v35 }
 0x481   : > { %v3123_v59 = vadd.f32 %v13507_v24, %v11207_v8 }
 0x482   : > { %v6072_v50 = vmax.f32 %v6033_v61, 0.0  ;;  %v5334_v20 = vadd.f32 %v5239_v18, %v3037_v9  ;;  %v5454_v61 = vsub.f32 1.0, %v5453_v58  ;;  %v5448_v18 = vand.u32 2147483648, %v11812_v16 }
 0x483   : > { %vm5462_vm8 = vcmp.eq.f32.partialorder %v5461_v57, 8.507059e+37 }
 0x484   : > { %v6088_v37 = vsub.f32 %v6072_v50, %v11263_v45  ;;  %v8354_v7 = vmul.f32 -1.442695, %v5334_v20  ;;  %v5455_v16 = vmul.f32 %v11839_v0, %v5454_v61  ;;  %v5449_v55 = vor.u32 1.1754944e-38, %v5448_v18  ;;  %v5247_v25 = vpop.f32.mrf.mxu3  ;;  %v13511_v18 = vld [vmem:[#allocation114_spill] sm:$0xff] }
 0x486   : > { %v6104_v12 = vmul.f32 %v6088_v37, %v5420_v60  ;;  %v13508_v37 = vld [vmem:[#allocation96_spill] sm:$0xff]  ;;  %8739 = vpow2.f32 %v8354_v7 }
 0x487   : > { %v6034_v21 = vpop.f32.mrf.mxu1  ;;  %v3040_v19 = vadd.f32 %v13508_v37, %v11153_v48 }
 0x488   : > { %v6035_v42 = vadd.f32 %v6034_v21, %v3120_v28  ;;  %v11859_v4 = vadd.f32 %v6104_v12, %v11263_v45  ;;  %v5468_v28 = vmul.f32 %v11866_v22, %v11841_v33 }
 0x489   : > { %v5335_v12 = vadd.f32 %v5242_v15, %v3040_v19 }
 0x48a   : > { %v6073_v49 = vmax.f32 %v6035_v42, 0.0  ;;  %v5450_v42 = vsel %vm5447_vm3, %v5449_v55, %v5445_v47  ;;  %v5469_v2 = vsub.f32 1.0, %v5468_v28 }
 0x48b   : > { %v8355_v15 = vmul.f32 -1.442695, %v5335_v12 }
 0x48c   : > { %v6089_v56 = vsub.f32 %v6073_v49, %v11265_v26  ;;  %v5456_v49 = vadd.f32 %v11839_v0, %v5455_v16  ;;  %v5249_v28 = vpop.f32.mrf.mxu3  ;;  %v5476_v16 = vand.u32 2147483647, %v11841_v33 }
 0x48e   : > { %v6105_v17 = vmul.f32 %v6089_v56, %v5435_v62  ;;  %v13510_v56 = vld [vmem:[#allocation99_spill] sm:$0xff]  ;;  %vm5477_vm7 = vcmp.eq.f32.partialorder %v5476_v16, 8.507059e+37 }
 0x48f   : > { %v6037_v39 = vpop.f32.mrf.mxu1  ;;  %v3042_v30 = vadd.f32 %v13510_v56, %v11153_v48 }
 0x490   : > { %v11862_v50 = vadd.f32 %v6105_v17, %v11265_v26  ;;  %v6038_v51 = vadd.f32 %v6037_v39, %v3123_v59  ;;  %v8736_v26 = vpop.eup %8735  ;;  %v5460_v17 = vsel %vm5459_vm6, %v11839_v0, %v5456_v49  ;;  %v5470_v59 = vmul.f32 %v11866_v22, %v5469_v2 }
 0x491   : > { %v11880_v13 = vadd.f32 1.0, %v8736_v26  ;;  %v11887_v58 = vpop.eup %8737  ;;  %v5336_v61 = vadd.f32 %v5244_v29, %v3042_v30  ;;  %v3128_v39 = vadd.f32 %v13511_v18, %v11207_v8  ;;  %v5465_v43 = vsel %vm5462_vm8, %v5464_v40, %v5460_v17 }
 0x492   : > { %v6136_v45 = vpack.c.bf16 %v11862_v50, %v11859_v4  ;;  %v6074_v60 = vmax.f32 %v6038_v51, 0.0  ;;  %v8740_v62 = vpop.eup %8739  ;;  %v5483_v20 = vmul.f32 %v11887_v58, %v11856_v27  ;;  %v5471_v0 = vadd.f32 %v11866_v22, %v5470_v59  ;;  %v13514_v59 = vld [vmem:[#allocation106_spill] sm:$0xff] }
 0x493   : > { %8741 = vrcp.f32 %v11880_v13  ;;  %v11902_v7 = vadd.f32 1.0, %v8740_v62  ;;  %v8356_v37 = vmul.f32 -1.442695, %v5336_v61  ;;  %v5478_v29 = vand.u32 2147483648, %v11841_v33 }
 0x494   : > { %6152 = vmatmul.bf16.vlgmr.msra.gmra.mxu2 %v6136_v45  ;;  %6201 = vmatmul.bf16.vlgmr.msra.gmra.mxu3 %v6136_v45  ;;  %v6090_v21 = vsub.f32 %v6074_v60, %v11335_v10  ;;  %8743 = vpow2.f32 %v8355_v15  ;;  %v5484_v45 = vsub.f32 1.0, %v5483_v20  ;;  %vm5488_vm12 = vweird.f32 %v11887_v58  ;;  %v5252_v18 = vpop.f32.mrf.mxu3 }
 0x495   : > { %8745 = vrcp.f32 %v11902_v7  ;;  %v5493_v62 = vand.u32 2147483648, %v11856_v27  ;;  %v5491_v17 = vand.u32 2147483647, %v11856_v27  ;;  %v3047_v61 = vadd.f32 %v13514_v59, %v11153_v48  ;;  %vm5489_vm14 = vmor %vm5487_vm13, %vm5488_vm12 }
 0x496   : > { %v6106_v23 = vmul.f32 %v6090_v21, %v5450_v42  ;;  %v13512_v21 = vld [vmem:[#allocation103_spill] sm:$0xff]  ;;  %v5475_v42 = vsel %vm5474_vm11, %v11866_v22, %v5471_v0  ;;  %v5485_v2 = vmul.f32 %v11887_v58, %v5484_v45  ;;  %8747 = vpow2.f32 %v8356_v37  ;;  %v13515_v37 = vld [vmem:[#allocation120_spill] sm:$0xff] }
 0x497   : > { %v6039_v3 = vpop.f32.mrf.mxu1  ;;  %v3045_v32 = vadd.f32 %v13512_v21, %v11153_v48  ;;  %v5494_v0 = vor.u32 1.1754944e-38, %v5493_v62  ;;  %vm5492_vm15 = vcmp.eq.f32.partialorder %v5491_v17, 8.507059e+37  ;;  %vm5502_vm1 = vweird.f32 %v11880_v13 }
 0x498   : > { %v6040_v9 = vadd.f32 %v6039_v3, %v3125_v53  ;;  %v11911_v47 = vadd.f32 %v6106_v23, %v11335_v10  ;;  %v5479_v23 = vor.u32 1.1754944e-38, %v5478_v29  ;;  %v3130_v3 = vadd.f32 %v13513_v11, %v11207_v8 }
 0x499   : > { %v11904_v51 = vpop.eup %8741  ;;  %v5337_v33 = vadd.f32 %v5247_v25, %v3045_v32  ;;  %v5486_v56 = vadd.f32 %v11887_v58, %v5485_v2  ;;  %v3133_v29 = vadd.f32 %v13515_v37, %v11207_v8  ;;  %vm5517_vm5 = vweird.f32 %v11902_v7 }
 0x49a   : > { %v6075_v24 = vmax.f32 %v6040_v9, 0.0  ;;  %v8744_v55 = vpop.eup %8743  ;;  %v5498_v53 = vmul.f32 %v11904_v51, %v11880_v13  ;;  %v5480_v22 = vsel %vm5477_vm7, %v5479_v23, %v5475_v42  ;;  %vm5503_vm0 = vweird.f32 %v11904_v51  ;;  %v13516_v23 = vld [vmem:[#allocation109_spill] sm:$0xff] }
 0x49b   : > { %v11926_v49 = vadd.f32 1.0, %v8744_v55  ;;  %v11933_v25 = vpop.eup %8745  ;;  %v8357_v30 = vmul.f32 -1.442695, %v5337_v33  ;;  %vm11968_vm2 = vmor %vm5502_vm1, %vm5503_vm0 }
 0x49c   : > { %v6091_v35 = vsub.f32 %v6075_v24, %v11337_v38  ;;  %v5499_v57 = vsub.f32 1.0, %v5498_v53  ;;  %v8748_v40 = vpop.eup %8747  ;;  %vm5518_vm4 = vweird.f32 %v11933_v25 }
 0x49d   : > { %8749 = vrcp.f32 %v11926_v49  ;;  %vm5519_vm6 = vmor %vm5517_vm5, %vm5518_vm4  ;;  %vm5532_vm10 = vweird.f32 %v11926_v49 }
 0x49e   : > { %v6107_v26 = vmul.f32 %v6091_v35, %v5465_v43  ;;  %v5513_v35 = vmul.f32 %v11933_v25, %v11902_v7  ;;  %v5500_v45 = vmul.f32 %v11904_v51, %v5499_v57  ;;  %8751 = vpow2.f32 %v8357_v30  ;;  %v5254_v30 = vpop.f32.mrf.mxu3 }
 0x49f   : > { %v6042_v19 = vpop.f32.mrf.mxu1 }
 0x4a0   : > { %v11914_v60 = vadd.f32 %v6107_v26, %v11337_v38  ;;  %v6043_v12 = vadd.f32 %v6042_v19, %v3128_v39  ;;  %v5490_v39 = vsel %vm5489_vm14, %v11887_v58, %v5486_v56  ;;  %v5338_v26 = vadd.f32 %v5249_v28, %v3047_v61 }
 0x4a1   : > { %v11948_v19 = vadd.f32 1.0, %v8748_v40  ;;  %v5495_v16 = vsel %vm5492_vm15, %v5494_v0, %v5490_v39  ;;  %v5514_v55 = vsub.f32 1.0, %v5513_v35  ;;  %v5501_v58 = vadd.f32 %v11904_v51, %v5500_v45 }
 0x4a2   : > { %v6076_v10 = vmax.f32 %v6043_v12, 0.0  ;;  %v6137_v38 = vpack.c.bf16 %v11914_v60, %v11911_v47  ;;  %v8358_v32 = vmul.f32 -1.442695, %v5338_v26  ;;  %v5508_v28 = vand.u32 2147483648, %v11880_v13  ;;  %v13520_v26 = vld [vmem:[#allocation112_spill] sm:$0xff] }
 0x4a3   : > { %v11950_v12 = vpop.eup %8749  ;;  %8753 = vrcp.f32 %v11948_v19  ;;  %v3052_v0 = vadd.f32 %v13520_v26, %v11153_v48  ;;  %vm5547_vm13 = vweird.f32 %v11948_v19 }
 0x4a4   : > { %v6092_v15 = vsub.f32 %v6076_v10, %v11408_v14  ;;  %6157 = vmatmul.bf16.gmra.mxu2 %v6137_v38  ;;  %6206 = vmatmul.bf16.gmra.mxu3 %v6137_v38  ;;  %v5506_v38 = vand.u32 2147483647, %v11880_v13  ;;  %v8752_v33 = vpop.eup %8751  ;;  %v5528_v11 = vmul.f32 %v11950_v12, %v11926_v49  ;;  %8755 = vpow2.f32 %v8358_v32  ;;  %v13521_v32 = vld [vmem:[#allocation126_spill] sm:$0xff] }
 0x4a5   : > { %v11978_v56 = vadd.f32 1.0, %v8752_v33  ;;  %vm5533_vm9 = vweird.f32 %v11950_v12 }
 0x4a6   : > { %v6108_v9 = vmul.f32 %v6092_v15, %v5480_v22  ;;  %v3050_v15 = vadd.f32 %v13516_v23, %v11153_v48  ;;  %v5515_v22 = vmul.f32 %v11933_v25, %v5514_v55  ;;  %vm5507_vm3 = vcmp.eq.f32.partialorder %v5506_v38, 8.507059e+37  ;;  %v5257_v33 = vpop.f32.mrf.mxu3  ;;  %vm5534_vm11 = vmor %vm5532_vm10, %vm5533_vm9 }
 0x4a7   : > { %v6044_v20 = vpop.f32.mrf.mxu1  ;;  %8757 = vrcp.f32 %v11978_v56  ;;  %vm5562_vm1 = vweird.f32 %v11978_v56 }
 0x4a8   : > { %v6045_v24 = vadd.f32 %v6044_v20, %v3130_v3  ;;  %v11957_v42 = vadd.f32 %v6108_v9, %v11408_v14  ;;  %v5505_v14 = vsel %vm11968_vm2, %v11904_v51, %v5501_v58  ;;  %v5339_v57 = vadd.f32 %v5252_v18, %v3050_v15  ;;  %v13519_v20 = vld [vmem:[#allocation123_spill] sm:$0xff] }
 0x4a9   : > { %v5509_v9 = vor.u32 1.1754944e-38, %v5508_v28  ;;  %v3135_v51 = vadd.f32 %v13519_v20, %v11207_v8  ;;  %v5516_v61 = vadd.f32 %v11933_v25, %v5515_v22  ;;  %v11985_v40 = vpop.eup %8753  ;;  %v5523_v18 = vand.u32 2147483648, %v11902_v7 }
 0x4aa   : > { %v6077_v43 = vmax.f32 %v6045_v24, 0.0  ;;  %v5529_v24 = vsub.f32 1.0, %v5528_v11  ;;  %v8359_v35 = vmul.f32 -1.442695, %v5339_v57  ;;  %v5543_v37 = vmul.f32 %v11985_v40, %v11948_v19 }
 0x4ab   : > { %v5510_v17 = vsel %vm5507_vm3, %v5509_v9, %v5505_v14  ;;  %v5524_v58 = vor.u32 1.1754944e-38, %v5523_v18  ;;  %v3138_v28 = vadd.f32 %v13521_v32, %v11207_v8  ;;  %v5538_v3 = vand.u32 2147483648, %v11926_v49 }
 0x4ac   : > { %v6093_v27 = vsub.f32 %v6077_v43, %v11410_v36  ;;  %v5521_v43 = vand.u32 2147483647, %v11902_v7  ;;  %v5530_v55 = vmul.f32 %v11950_v12, %v5529_v24  ;;  %8759 = vpow2.f32 %v8359_v35  ;;  %v13523_v35 = vld [vmem:[#allocation127_spill] sm:$0xff] }
 0x4ad   : > { %v5544_v15 = vsub.f32 1.0, %v5543_v37  ;;  %v5536_v22 = vand.u32 2147483647, %v11926_v49  ;;  %v5539_v24 = vor.u32 1.1754944e-38, %v5538_v3  ;;  %v3140_v18 = vadd.f32 %v13523_v35, %v11207_v8 }
 0x4ae   : > { %v6109_v21 = vmul.f32 %v6093_v27, %v5495_v16  ;;  %v8756_v27 = vpop.eup %8755  ;;  %vm5522_vm8 = vcmp.eq.f32.partialorder %v5521_v43, 8.507059e+37  ;;  %vm5548_vm12 = vweird.f32 %v11985_v40 }
 0x4af   : > { %v6047_v53 = vpop.f32.mrf.mxu1  ;;  %vm5537_vm7 = vcmp.eq.f32.partialorder %v5536_v22, 8.507059e+37  ;;  %vm5549_vm14 = vmor %vm5547_vm13, %vm5548_vm12 }
 0x4b0   : > { %v11960_v10 = vadd.f32 %v6109_v21, %v11410_v36  ;;  %v6048_v2 = vadd.f32 %v6047_v53, %v3133_v29  ;;  %v5520_v29 = vsel %vm5519_vm6, %v11933_v25, %v5516_v61  ;;  %v5340_v21 = vadd.f32 %v5254_v30, %v3052_v0  ;;  %v13522_v30 = vld [vmem:[#allocation116_spill] sm:$0xff] }
 0x4b1   : > { %v12000_v53 = vadd.f32 1.0, %v8756_v27  ;;  %v5525_v38 = vsel %vm5522_vm8, %v5524_v58, %v5520_v29  ;;  %v5531_v25 = vadd.f32 %v11950_v12, %v5530_v55  ;;  %v5553_v27 = vand.u32 2147483648, %v11948_v19  ;;  %v5259_v29 = vpop.f32.mrf.mxu3 }
 0x4b2   : > { %v6078_v36 = vmax.f32 %v6048_v2, 0.0  ;;  %v6138_v13 = vpack.c.bf16 %v11960_v10, %v11957_v42  ;;  %v12002_v2 = vpop.eup %8757  ;;  %v8360_v11 = vmul.f32 -1.442695, %v5340_v21  ;;  %v13524_v21 = vld [vmem:[#allocation119_spill] sm:$0xff] }
 0x4b3   : > { %v8760_v9 = vpop.eup %8759  ;;  %v5558_v20 = vmul.f32 %v12002_v2, %v11978_v56  ;;  %8761 = vrcp.f32 %v12000_v53  ;;  %v3057_v58 = vadd.f32 %v13524_v21, %v11153_v48  ;;  %vm5563_vm0 = vweird.f32 %v12002_v2 }
 0x4b4   : > { %v6094_v62 = vsub.f32 %v6078_v36, %v11469_v1  ;;  %6162 = vmatmul.bf16.gmra.mxu2 %v6138_v13  ;;  %6211 = vmatmul.bf16.gmra.mxu3 %v6138_v13  ;;  %8763 = vpow2.f32 %v8360_v11  ;;  %vm5564_vm2 = vmor %vm5562_vm1, %vm5563_vm0  ;;  %vm5577_vm5 = vweird.f32 %v12000_v53 }
 0x4b6   : > { %v6110_v59 = vmul.f32 %v6094_v62, %v5510_v17  ;;  %v3055_v62 = vadd.f32 %v13522_v30, %v11153_v48  ;;  %v5545_v17 = vmul.f32 %v11985_v40, %v5544_v15  ;;  %v13525_v15 = vld [vmem:[#allocation128_spill] sm:$0xff] }
 0x4b7   : > { %v6049_v39 = vpop.f32.mrf.mxu1  ;;  %v3143_v11 = vadd.f32 %v13525_v15, %v11207_v8 }
 0x4b8   : > { %v6050_v45 = vadd.f32 %v6049_v39, %v3135_v51  ;;  %v12009_v36 = vadd.f32 %v6110_v59, %v11469_v1  ;;  %v5535_v51 = vsel %vm5534_vm11, %v11950_v12, %v5531_v25  ;;  %v5341_v49 = vadd.f32 %v5257_v33, %v3055_v62 }
 0x4b9   : > { %v12024_v59 = vadd.f32 1.0, %v8760_v9  ;;  %v5540_v12 = vsel %vm5537_vm7, %v5539_v24, %v5535_v51  ;;  %v5559_v39 = vsub.f32 1.0, %v5558_v20  ;;  %v12031_v26 = vpop.eup %8761  ;;  %v5554_v25 = vor.u32 1.1754944e-38, %v5553_v27 }
 0x4ba   : > { %v6079_v16 = vmax.f32 %v6050_v45, 0.0  ;;  %v5546_v45 = vadd.f32 %v11985_v40, %v5545_v17  ;;  %v8361_v0 = vmul.f32 -1.442695, %v5341_v49  ;;  %v5573_v32 = vmul.f32 %v12031_v26, %v12000_v53 }
 0x4bb   : > { %8765 = vrcp.f32 %v12024_v59  ;;  %v5560_v33 = vmul.f32 %v12002_v2, %v5559_v39  ;;  %v5568_v62 = vand.u32 2147483648, %v11978_v56  ;;  %v13526_v39 = vld [vmem:[#allocation129_spill] sm:$0xff]  ;;  %vm5578_vm4 = vweird.f32 %v12031_v26 }
 0x4bc   : > { %v6095_v7 = vsub.f32 %v6079_v16, %v11471_v44  ;;  %v5551_v16 = vand.u32 2147483647, %v11948_v19  ;;  %8767 = vpow2.f32 %v8361_v0  ;;  %v5574_v9 = vsub.f32 1.0, %v5573_v32  ;;  %vm5579_vm6 = vmor %vm5577_vm5, %vm5578_vm4 }
 0x4bd   : > { %vm5592_vm10 = vweird.f32 %v12024_v59 }
 0x4be   : > { %v6111_v23 = vmul.f32 %v6095_v7, %v5525_v38  ;;  %v8764_v7 = vpop.eup %8763  ;;  %vm5552_vm15 = vcmp.eq.f32.partialorder %v5551_v16, 8.507059e+37 }
 0x4bf   : > { %v6052_v14 = vpop.f32.mrf.mxu1  ;;  %v12046_v3 = vadd.f32 1.0, %v8764_v7 }
 0x4c0   : > { %v12012_v13 = vadd.f32 %v6111_v23, %v11471_v44  ;;  %v6053_v57 = vadd.f32 %v6052_v14, %v3138_v28  ;;  %v5550_v28 = vsel %vm5549_vm14, %v11985_v40, %v5546_v45  ;;  %v5342_v23 = vadd.f32 %v5259_v29, %v3057_v58 }
 0x4c1   : > { %v5555_v14 = vsel %vm5552_vm15, %v5554_v25, %v5550_v28  ;;  %v12048_v22 = vpop.eup %8765  ;;  %v5561_v40 = vadd.f32 %v12002_v2, %v5560_v33  ;;  %8769 = vrcp.f32 %v12046_v3  ;;  %v5583_v29 = vand.u32 2147483648, %v12000_v53  ;;  %v13527_v25 = vld [vmem:[#allocation130_spill] sm:$0xff] }
 0x4c2   : > { %v6080_v1 = vmax.f32 %v6053_v57, 0.0  ;;  %v6139_v44 = vpack.c.bf16 %v12012_v13, %v12009_v36  ;;  %v8362_v30 = vmul.f32 -1.442695, %v5342_v23  ;;  %v8768_v49 = vpop.eup %8767  ;;  %v5588_v24 = vmul.f32 %v12048_v22, %v12024_v59 }
 0x4c3   : > { %v5584_v33 = vor.u32 1.1754944e-38, %v5583_v29  ;;  %vm5593_vm9 = vweird.f32 %v12048_v22  ;;  %vm5607_vm13 = vweird.f32 %v12046_v3 }
 0x4c4   : > { %v6096_v61 = vsub.f32 %v6080_v1, %v11524_v46  ;;  %6167 = vmatmul.bf16.gmra.mxu2 %v6139_v44  ;;  %6216 = vmatmul.bf16.gmra.mxu3 %v6139_v44  ;;  %v5566_v44 = vand.u32 2147483647, %v11978_v56  ;;  %8771 = vpow2.f32 %v8362_v30  ;;  %vm5594_vm11 = vmor %vm5592_vm10, %vm5593_vm9 }
 0x4c6   : > { %v6112_v43 = vmul.f32 %v6096_v61, %v5540_v12  ;;  %v5565_v61 = vsel %vm5564_vm2, %v12002_v2, %v5561_v40  ;;  %v12068_v12 = vadd.f32 1.0, %v8768_v49  ;;  %vm5567_vm3 = vcmp.eq.f32.partialorder %v5566_v44, 8.507059e+37 }
 0x4c7   : > { %v6054_v37 = vpop.f32.mrf.mxu1  ;;  %v5589_v2 = vsub.f32 1.0, %v5588_v24  ;;  %v5598_v40 = vand.u32 2147483648, %v12024_v59 }
 0x4c8   : > { %v6055_v55 = vadd.f32 %v6054_v37, %v3140_v18  ;;  %v12055_v51 = vadd.f32 %v6112_v43, %v11524_v46  ;;  %v5575_v18 = vmul.f32 %v12031_v26, %v5574_v9  ;;  %v3145_v43 = vadd.f32 %v13526_v39, %v11207_v8  ;;  %v12075_v37 = vpop.eup %8769 }
 0x4c9   : > { %8773 = vrcp.f32 %v12068_v12  ;;  %v5603_v7 = vmul.f32 %v12075_v37, %v12046_v3  ;;  %vm5608_vm12 = vweird.f32 %v12075_v37  ;;  %vm5622_vm1 = vweird.f32 %v12068_v12 }
 0x4ca   : > { %v6081_v38 = vmax.f32 %v6055_v55, 0.0  ;;  %v5576_v27 = vadd.f32 %v12031_v26, %v5575_v18  ;;  %v5581_v55 = vand.u32 2147483647, %v12000_v53  ;;  %v8772_v58 = vpop.eup %8771  ;;  %vm5609_vm14 = vmor %vm5607_vm13, %vm5608_vm12 }
 0x4cb   : > { %v12088_v15 = vadd.f32 1.0, %v8772_v58 }
 0x4cc   : > { %v6097_v19 = vsub.f32 %v6081_v38, %v11526_v31  ;;  %v5580_v32 = vsel %vm5579_vm6, %v12031_v26, %v5576_v27  ;;  %v5590_v38 = vmul.f32 %v12048_v22, %v5589_v2  ;;  %vm5582_vm8 = vcmp.eq.f32.partialorder %v5581_v55, 8.507059e+37 }
 0x4cd   : > { %v5585_v53 = vsel %vm5582_vm8, %v5584_v33, %v5580_v32  ;;  %v5604_v26 = vsub.f32 1.0, %v5603_v7  ;;  %8775 = vrcp.f32 %v12088_v15  ;;  %v5611_v2 = vand.u32 2147483647, %v12046_v3  ;;  %v13529_v7 = vld [vmem:[#allocation132_spill] sm:$0xff] }
 0x4ce   : > { %v6113_v57 = vmul.f32 %v6097_v19, %v5555_v14  ;;  %v3148_v19 = vadd.f32 %v13527_v25, %v11207_v8  ;;  %v3153_v32 = vadd.f32 %v13529_v7, %v11207_v8  ;;  %vm5637_vm5 = vweird.f32 %v12088_v15 }
 0x4cf   : > { %v6057_v20 = vpop.f32.mrf.mxu1  ;;  %vm5612_vm15 = vcmp.eq.f32.partialorder %v5611_v2, 8.507059e+37 }
 0x4d0   : > { %v12058_v1 = vadd.f32 %v6113_v57, %v11526_v31  ;;  %v6058_v17 = vadd.f32 %v6057_v20, %v3143_v11  ;;  %v5569_v31 = vor.u32 1.1754944e-38, %v5568_v62  ;;  %v12090_v11 = vpop.eup %8773  ;;  %v5591_v57 = vadd.f32 %v12048_v22, %v5590_v38 }
 0x4d1   : > { %v5596_v20 = vand.u32 2147483647, %v12024_v59  ;;  %v13528_v59 = vld [vmem:[#allocation131_spill] sm:$0xff]  ;;  %vm5623_vm0 = vweird.f32 %v12090_v11 }
 0x4d2   : > { %v6082_v35 = vmax.f32 %v6058_v17, 0.0  ;;  %v6140_v46 = vpack.c.bf16 %v12058_v1, %v12055_v51  ;;  %v5570_v45 = vsel %vm5567_vm3, %v5569_v31, %v5565_v61  ;;  %v5618_v17 = vmul.f32 %v12090_v11, %v12068_v12  ;;  %vm5624_vm2 = vmor %vm5622_vm1, %vm5623_vm0 }
 0x4d3   : > { %v5595_v49 = vsel %vm5594_vm11, %v12048_v22, %v5591_v57  ;;  %vm5597_vm7 = vcmp.eq.f32.partialorder %v5596_v20, 8.507059e+37  ;;  %v8776_v39 = vpop.eup %8775 }
 0x4d4   : > { %v6098_v56 = vsub.f32 %v6082_v35, %v11572_v34  ;;  %6172 = vmatmul.bf16.gmra.mxu2 %v6140_v46  ;;  %6221 = vmatmul.bf16.gmra.mxu3 %v6140_v46  ;;  %v5599_v35 = vor.u32 1.1754944e-38, %v5598_v40  ;;  %v3150_v46 = vadd.f32 %v13528_v59, %v11207_v8  ;;  %v5619_v31 = vsub.f32 1.0, %v5618_v17 }
 0x4d5   : > { %v5633_v27 = vmul.f32 %v8776_v39, %v12088_v15  ;;  %vm5638_vm4 = vweird.f32 %v8776_v39 }
 0x4d6   : > { %v6114_v0 = vmul.f32 %v6098_v56, %v5570_v45  ;;  %v5600_v18 = vsel %vm5597_vm7, %v5599_v35, %v5595_v49  ;;  %v5620_v55 = vmul.f32 %v12090_v11, %v5619_v31  ;;  %vm5639_vm6 = vmor %vm5637_vm5, %vm5638_vm4 }
 0x4d7   : > { %v6059_v16 = vpop.f32.mrf.mxu1  ;;  %v5634_v33 = vsub.f32 1.0, %v5633_v27  ;;  %v13532_v27 = vld [vmem:[#allocation50_spill] sm:$0xff] }
 0x4d8   : > { %v6060_v21 = vadd.f32 %v6059_v16, %v3145_v43  ;;  %v12097_v30 = vadd.f32 %v6114_v0, %v11572_v34  ;;  %v5605_v34 = vmul.f32 %v12075_v37, %v5604_v26  ;;  %v5613_v43 = vand.u32 2147483648, %v12046_v3 }
 0x4d9   : > { %v5621_v3 = vadd.f32 %v12090_v11, %v5620_v55 }
 0x4da   : > { %v6083_v28 = vmax.f32 %v6060_v21, 0.0  ;;  %v5606_v22 = vadd.f32 %v12075_v37, %v5605_v34  ;;  %v5614_v21 = vor.u32 1.1754944e-38, %v5613_v43 }
 0x4db   : > { %v5625_v57 = vsel %vm5624_vm2, %v12090_v11, %v5621_v3  ;;  %v5643_v11 = vand.u32 2147483648, %v12088_v15 }
 0x4dc   : > { %v6099_v23 = vsub.f32 %v6083_v28, %v11574_v5  ;;  %v5610_v29 = vsel %vm5609_vm14, %v12075_v37, %v5606_v22  ;;  %v5628_v37 = vand.u32 2147483648, %v12068_v12 }
 0x4dd   : > { %v5615_v28 = vsel %vm5612_vm15, %v5614_v21, %v5610_v29  ;;  %v5644_v59 = vor.u32 1.1754944e-38, %v5643_v11  ;;  %v2107_v29 = vadd.f32 %v13532_v27, %v10905_v6 }
 0x4de   : > { %v6115_v14 = vmul.f32 %v6099_v23, %v5585_v53  ;;  %v5626_v53 = vand.u32 2147483647, %v12068_v12  ;;  %v5629_v20 = vor.u32 1.1754944e-38, %v5628_v37 }
 0x4df   : > { %v6062_v9 = vpop.f32.mrf.mxu1 }
 0x4e0   : > { %v12100_v62 = vadd.f32 %v6115_v14, %v11574_v5  ;;  %v6063_v44 = vadd.f32 %v6062_v9, %v3148_v19  ;;  %v5635_v9 = vmul.f32 %v8776_v39, %v5634_v33  ;;  %vm5627_vm3 = vcmp.eq.f32.partialorder %v5626_v53, 8.507059e+37 }
 0x4e2   : > { %v6084_v24 = vmax.f32 %v6063_v44, 0.0  ;;  %v6141_v61 = vpack.c.bf16 %v12100_v62, %v12097_v30  ;;  %v5636_v49 = vadd.f32 %v8776_v39, %v5635_v9 }
 0x4e4   : > { %v6100_v5 = vsub.f32 %v6084_v24, %v11610_v41  ;;  %6177 = vmatmul.bf16.gmra.mxu2 %v6141_v61  ;;  %6226 = vmatmul.bf16.gmra.mxu3 %v6141_v61  ;;  %v5641_v61 = vand.u32 2147483647, %v12088_v15  ;;  %v5640_v35 = vsel %vm5639_vm6, %v8776_v39, %v5636_v49  ;;  %v13531_v15 = vld [vmem:[#allocation47_spill] sm:$0xff]  ;;  %v13535_v49 = vld [vmem:[#allocation64_spill] sm:$0xff] }
 0x4e5   : > { %v2105_v39 = vadd.f32 %v13531_v15, %v10905_v6  ;;  %v2115_v11 = vadd.f32 %v13535_v49, %v10905_v6 }
 0x4e6   : > { %v6116_v56 = vmul.f32 %v6100_v5, %v5600_v18  ;;  %vm5642_vm8 = vcmp.eq.f32.partialorder %v5641_v61, 8.507059e+37 }
 0x4e7   : > { %v6064_v45 = vpop.f32.mrf.mxu1  ;;  %v5645_v18 = vsel %vm5642_vm8, %v5644_v59, %v5640_v35 }
 0x4e8   : > { %v6065_v0 = vadd.f32 %v6064_v45, %v3150_v46  ;;  %v12129_v25 = vadd.f32 %v6116_v56, %v11610_v41  ;;  %v5630_v41 = vsel %vm5627_vm3, %v5629_v20, %v5625_v57 }
 0x4ea   : > { %v6085_v16 = vmax.f32 %v6065_v0, 0.0 }
 0x4ec   : > { %v6101_v58 = vsub.f32 %v6085_v16, %v11612_v63 }
 0x4ee   : > { %v6117_v38 = vmul.f32 %v6101_v58, %v5615_v28  ;;  %v13533_v58 = vld [vmem:[#allocation56_spill] sm:$0xff] }
 0x4ef   : > { %v6067_v23 = vpop.f32.mrf.mxu1  ;;  %v2110_v7 = vadd.f32 %v13533_v58, %v10905_v6 }
 0x4f0   : > { %v12132_v19 = vadd.f32 %v6117_v38, %v11612_v63  ;;  %v6068_v14 = vadd.f32 %v6067_v23, %v3153_v32  ;;  %v13530_v63 = vld [vmem:[#allocation133_spill] sm:$0xff] }
 0x4f1   : > { %v3155_v17 = vadd.f32 %v13530_v63, %v11207_v8 }
 0x4f2   : > { %v6086_v26 = vmax.f32 %v6068_v14, 0.0  ;;  %v6142_v40 = vpack.c.bf16 %v12132_v19, %v12129_v25  ;;  %v13534_v14 = vld [vmem:[#allocation59_spill] sm:$0xff] }
 0x4f3   : > { %v2112_v57 = vadd.f32 %v13534_v14, %v10905_v6 }
 0x4f4   : > { %v6102_v44 = vsub.f32 %v6086_v26, %v11638_v54  ;;  %6182 = vmatmul.bf16.gmra.mxu2 %v6142_v40  ;;  %6231 = vmatmul.bf16.gmra.mxu3 %v6142_v40 }
 0x4f6   : > { %v6118_v12 = vmul.f32 %v6102_v44, %v5630_v41 }
 0x4f7   : > { %v6069_v24 = vpop.f32.mrf.mxu1 }
 0x4f8   : > { %v6070_v34 = vadd.f32 %v6069_v24, %v3155_v17  ;;  %v12146_v56 = vadd.f32 %v6118_v12, %v11638_v54 }
 0x4fa   : > { %v6087_v5 = vmax.f32 %v6070_v34, 0.0 }
 0x4fc   : > { %v6103_v46 = vsub.f32 %v6087_v5, %v11640_v52 }
 0x4fe   : > { %v6119_v31 = vmul.f32 %v6103_v46, %v5645_v18 }
 0x500   : > { %v12149_v22 = vadd.f32 %v6119_v31, %v11640_v52 }
 0x502   : > { %v6143_v43 = vpack.c.bf16 %v12149_v22, %v12146_v56 }
 0x504   : > { %6187 = vmatmul.bf16.gmra.mxu2 %v6143_v43  ;;  %6236 = vmatmul.bf16.gmra.mxu3 %v6143_v43 }
 0x517   : > { %v6202_v45 = vpop.f32.mrf.mxu3 }
 0x518   : > { %v6594_v2 = vadd.f32 %v6202_v45, %v2105_v39 }
 0x51a   : > { %v8395_v0 = vmul.f32 -1.442695, %v6594_v2 }
 0x51c   : > { %8777 = vpow2.f32 %v8395_v0 }
 0x51f   : > { %v6204_v54 = vpop.f32.mrf.mxu3 }
 0x520   : > { %v6595_v16 = vadd.f32 %v6204_v54, %v2107_v29 }
 0x522   : > { %v8778_v55 = vpop.eup %8777  ;;  %v8396_v52 = vmul.f32 -1.442695, %v6595_v16  ;;  %v13538_v16 = vld [vmem:[#allocation67_spill] sm:$0xff] }
 0x523   : > { %v6658_v21 = vadd.f32 1.0, %v8778_v55  ;;  %v2117_v55 = vadd.f32 %v13538_v16, %v10905_v6 }
 0x525   : > { %8779 = vrcp.f32 %v6658_v21  ;;  %v6685_v24 = vand.u32 2147483648, %v6658_v21  ;;  %vm6679_vm10 = vweird.f32 %v6658_v21  ;;  %v6683_v61 = vand.u32 2147483647, %v6658_v21 }
 0x526   : > { %8781 = vpow2.f32 %v8396_v52 }
 0x527   : > { %v6207_v32 = vpop.f32.mrf.mxu3  ;;  %v6686_v15 = vor.u32 1.1754944e-38, %v6685_v24  ;;  %vm6684_vm12 = vcmp.eq.f32.partialorder %v6683_v61, 8.507059e+37 }
 0x528   : > { %v6596_v28 = vadd.f32 %v6207_v32, %v2110_v7 }
 0x52a   : > { %v8397_v3 = vmul.f32 -1.442695, %v6596_v28 }
 0x52b   : > { %v8780_v38 = vpop.eup %8779 }
 0x52c   : > { %v8782_v33 = vpop.eup %8781  ;;  %v6675_v37 = vmul.f32 %v8780_v38, %v6658_v21  ;;  %8783 = vpow2.f32 %v8397_v3  ;;  %vm6680_vm9 = vweird.f32 %v8780_v38 }
 0x52d   : > { %v6659_v23 = vadd.f32 1.0, %v8782_v33  ;;  %vm12166_vm11 = vmor %vm6679_vm10, %vm6680_vm9 }
 0x52e   : > { %v6676_v53 = vsub.f32 1.0, %v6675_v37 }
 0x52f   : > { %8785 = vrcp.f32 %v6659_v23  ;;  %v6209_v26 = vpop.f32.mrf.mxu3  ;;  %v6700_v59 = vand.u32 2147483648, %v6659_v23  ;;  %v6698_v31 = vand.u32 2147483647, %v6659_v23  ;;  %vm6694_vm13 = vweird.f32 %v6659_v23 }
 0x530   : > { %v6597_v40 = vadd.f32 %v6209_v26, %v2112_v57  ;;  %v6677_v9 = vmul.f32 %v8780_v38, %v6676_v53  ;;  %v13539_v57 = vld [vmem:[#allocation72_spill] sm:$0xff] }
 0x531   : > { %v6701_v0 = vor.u32 1.1754944e-38, %v6700_v59  ;;  %vm6699_vm15 = vcmp.eq.f32.partialorder %v6698_v31, 8.507059e+37  ;;  %v2120_v26 = vadd.f32 %v13539_v57, %v10905_v6 }
 0x532   : > { %v8784_v20 = vpop.eup %8783  ;;  %v8398_v44 = vmul.f32 -1.442695, %v6597_v40  ;;  %v6678_v17 = vadd.f32 %v8780_v38, %v6677_v9 }
 0x533   : > { %v12161_v63 = vadd.f32 1.0, %v8784_v20 }
 0x534   : > { %v6682_v43 = vsel %vm12166_vm11, %v8780_v38, %v6678_v17 }
 0x535   : > { %v8786_v41 = vpop.eup %8785  ;;  %8787 = vrcp.f32 %v12161_v63  ;;  %v6687_v27 = vsel %vm6684_vm12, %v6686_v15, %v6682_v43  ;;  %v6715_v49 = vand.u32 2147483648, %v12161_v63  ;;  %vm6709_vm1 = vweird.f32 %v12161_v63 }
 0x536   : > { %v6690_v12 = vmul.f32 %v8786_v41, %v6659_v23  ;;  %8789 = vpow2.f32 %v8398_v44  ;;  %vm6695_vm7 = vweird.f32 %v8786_v41  ;;  %v6914_v7 = vmul.f32 %v6687_v27, %v11859_v4 }
 0x537   : > { %v6212_v35 = vpop.f32.mrf.mxu3  ;;  %vm6696_vm14 = vmor %vm6694_vm13, %vm6695_vm7  ;;  %v6713_v61 = vand.u32 2147483647, %v12161_v63  ;;  %v6716_v15 = vor.u32 1.1754944e-38, %v6715_v49  ;;  %v13544_v49 = vld [vmem:[#allocation81_spill] sm:$0xff] }
 0x538   : > { %v6691_v34 = vsub.f32 1.0, %v6690_v12  ;;  %v6598_v46 = vadd.f32 %v6212_v35, %v2115_v11  ;;  %v13540_v35 = vld [vmem:[#allocation75_spill] sm:$0xff] }
 0x539   : > { %v2122_v5 = vadd.f32 %v13540_v35, %v10905_v6  ;;  %vm6714_vm6 = vcmp.eq.f32.partialorder %v6713_v61, 8.507059e+37 }
 0x53a   : > { %v6692_v18 = vmul.f32 %v8786_v41, %v6691_v34  ;;  %v8399_v39 = vmul.f32 -1.442695, %v6598_v46 }
 0x53b   : > { %v8788_v2 = vpop.eup %8787 }
 0x53c   : > { %v6693_v45 = vadd.f32 %v8786_v41, %v6692_v18  ;;  %v8790_v29 = vpop.eup %8789  ;;  %8791 = vpow2.f32 %v8399_v39  ;;  %v6705_v28 = vmul.f32 %v8788_v2, %v12161_v63  ;;  %vm6710_vm0 = vweird.f32 %v8788_v2 }
 0x53d   : > { %v6661_v52 = vadd.f32 1.0, %v8790_v29  ;;  %vm12191_vm3 = vmor %vm6709_vm1, %vm6710_vm0 }
 0x53e   : > { %v6697_v54 = vsel %vm6696_vm14, %v8786_v41, %v6693_v45  ;;  %v6706_v23 = vsub.f32 1.0, %v6705_v28 }
 0x53f   : > { %v6702_v21 = vsel %vm6699_vm15, %v6701_v0, %v6697_v54  ;;  %v6214_v58 = vpop.f32.mrf.mxu3  ;;  %8793 = vrcp.f32 %v6661_v52  ;;  %vm6724_vm4 = vweird.f32 %v6661_v52  ;;  %v6728_v43 = vand.u32 2147483647, %v6661_v52 }
 0x540   : > { %v6915_v32 = vmul.f32 %v6702_v21, %v11862_v50  ;;  %v6599_v38 = vadd.f32 %v6214_v58, %v2117_v55  ;;  %v6707_v44 = vmul.f32 %v8788_v2, %v6706_v23  ;;  %v6730_v39 = vand.u32 2147483648, %v6661_v52 }
 0x541   : > { %vm6729_vm8 = vcmp.eq.f32.partialorder %v6728_v43, 8.507059e+37 }
 0x542   : > { %v6930_v3 = vpack.c.bf16 %v6915_v32, %v6914_v7  ;;  %v8400_v33 = vmul.f32 -1.442695, %v6599_v38  ;;  %v8792_v37 = vpop.eup %8791  ;;  %v6708_v12 = vadd.f32 %v8788_v2, %v6707_v44  ;;  %v6731_v54 = vor.u32 1.1754944e-38, %v6730_v39 }
 0x543   : > { %v12177_v53 = vadd.f32 1.0, %v8792_v37 }
 0x544   : > { %6962 = vmatmul.bf16.vlgmr.msrb.gmra.mxu0 %v6930_v3  ;;  %8795 = vpow2.f32 %v8400_v33  ;;  %v6712_v31 = vsel %vm12191_vm3, %v8788_v2, %v6708_v12 }
 0x545   : > { %v8794_v14 = vpop.eup %8793  ;;  %8797 = vrcp.f32 %v12177_v53  ;;  %v6717_v29 = vsel %vm6714_vm6, %v6716_v15, %v6712_v31  ;;  %vm6739_vm10 = vweird.f32 %v12177_v53 }
 0x546   : > { %v6720_v40 = vmul.f32 %v8794_v14, %v6661_v52  ;;  %vm6725_vm2 = vweird.f32 %v8794_v14  ;;  %v6916_v58 = vmul.f32 %v6717_v29, %v11911_v47  ;;  %v13543_v52 = vld [vmem:[#allocation78_spill] sm:$0xff] }
 0x547   : > { %v6217_v9 = vpop.f32.mrf.mxu3  ;;  %vm6726_vm5 = vmor %vm6724_vm4, %vm6725_vm2  ;;  %v2125_v38 = vadd.f32 %v13543_v52, %v10905_v6 }
 0x548   : > { %v6600_v20 = vadd.f32 %v6217_v9, %v2120_v26  ;;  %v6721_v41 = vsub.f32 1.0, %v6720_v40 }
 0x54a   : > { %v8401_v17 = vmul.f32 -1.442695, %v6600_v20  ;;  %v6722_v11 = vmul.f32 %v8794_v14, %v6721_v41  ;;  %v8796_v24 = vpop.eup %8795  ;;  %v6745_v20 = vand.u32 2147483648, %v12177_v53  ;;  %v6743_v41 = vand.u32 2147483647, %v12177_v53 }
 0x54b   : > { %v12185_v34 = vpop.eup %8797  ;;  %v12189_v59 = vadd.f32 1.0, %v8796_v24 }
 0x54c   : > { %v6723_v18 = vadd.f32 %v8794_v14, %v6722_v11  ;;  %8799 = vpow2.f32 %v8401_v17  ;;  %v6735_v45 = vmul.f32 %v12185_v34, %v12177_v53  ;;  %vm6740_vm9 = vweird.f32 %v12185_v34 }
 0x54d   : > { %8801 = vrcp.f32 %v12189_v59  ;;  %v2127_v11 = vadd.f32 %v13544_v49, %v10905_v6  ;;  %vm12220_vm11 = vmor %vm6739_vm10, %vm6740_vm9  ;;  %vm6754_vm12 = vweird.f32 %v12189_v59  ;;  %v6758_v53 = vand.u32 2147483647, %v12189_v59 }
 0x54e   : > { %v6727_v27 = vsel %vm6726_vm5, %v8794_v14, %v6723_v18  ;;  %v6736_v21 = vsub.f32 1.0, %v6735_v45  ;;  %v6746_v46 = vor.u32 1.1754944e-38, %v6745_v20  ;;  %v6760_v18 = vand.u32 2147483648, %v12189_v59 }
 0x54f   : > { %v6219_v63 = vpop.f32.mrf.mxu3  ;;  %v6732_v55 = vsel %vm6729_vm8, %v6731_v54, %v6727_v27  ;;  %vm6744_vm14 = vcmp.eq.f32.partialorder %v6743_v41, 8.507059e+37  ;;  %vm6759_vm15 = vcmp.eq.f32.partialorder %v6758_v53, 8.507059e+37 }
 0x550   : > { %v6601_v0 = vadd.f32 %v6219_v63, %v2122_v5  ;;  %v6917_v7 = vmul.f32 %v6732_v55, %v11914_v60  ;;  %v6737_v57 = vmul.f32 %v12185_v34, %v6736_v21  ;;  %v6761_v39 = vor.u32 1.1754944e-38, %v6760_v18 }
 0x552   : > { %v8402_v16 = vmul.f32 -1.442695, %v6601_v0  ;;  %v8800_v2 = vpop.eup %8799  ;;  %v6931_v33 = vpack.c.bf16 %v6917_v7, %v6916_v58  ;;  %v6738_v40 = vadd.f32 %v12185_v34, %v6737_v57 }
 0x553   : > { %v8802_v32 = vpop.eup %8801  ;;  %v12202_v28 = vadd.f32 1.0, %v8800_v2 }
 0x554   : > { %v6750_v3 = vmul.f32 %v8802_v32, %v12189_v59  ;;  %8803 = vpow2.f32 %v8402_v16  ;;  %6967 = vmatmul.bf16.gmra.mxu0 %v6931_v33  ;;  %vm6755_vm7 = vweird.f32 %v8802_v32  ;;  %v6742_v35 = vsel %vm12220_vm11, %v12185_v34, %v6738_v40  ;;  %v13547_v59 = vld [vmem:[#allocation83_spill] sm:$0xff] }
 0x555   : > { %8805 = vrcp.f32 %v12202_v28  ;;  %vm6756_vm13 = vmor %vm6754_vm12, %vm6755_vm7  ;;  %v6747_v15 = vsel %vm6744_vm14, %v6746_v46, %v6742_v35  ;;  %v2130_v2 = vadd.f32 %v13547_v59, %v10905_v6  ;;  %vm6769_vm1 = vweird.f32 %v12202_v28 }
 0x556   : > { %v6751_v23 = vsub.f32 1.0, %v6750_v3  ;;  %v6918_v29 = vmul.f32 %v6747_v15, %v11957_v42  ;;  %v6773_v57 = vand.u32 2147483647, %v12202_v28 }
 0x557   : > { %v6222_v37 = vpop.f32.mrf.mxu3 }
 0x558   : > { %v6602_v14 = vadd.f32 %v6222_v37, %v2125_v38  ;;  %v6752_v9 = vmul.f32 %v8802_v32, %v6751_v23  ;;  %v6775_v23 = vand.u32 2147483648, %v12202_v28  ;;  %vm6774_vm6 = vcmp.eq.f32.partialorder %v6773_v57, 8.507059e+37 }
 0x55a   : > { %v8403_v26 = vmul.f32 -1.442695, %v6602_v14  ;;  %v8804_v44 = vpop.eup %8803  ;;  %v6753_v17 = vadd.f32 %v8802_v32, %v6752_v9  ;;  %v13548_v9 = vld [vmem:[#allocation86_spill] sm:$0xff] }
 0x55b   : > { %v12214_v12 = vpop.eup %8805  ;;  %v12218_v24 = vadd.f32 1.0, %v8804_v44  ;;  %v2132_v20 = vadd.f32 %v13548_v9, %v10905_v6 }
 0x55c   : > { %8807 = vpow2.f32 %v8403_v26  ;;  %v6765_v31 = vmul.f32 %v12214_v12, %v12202_v28  ;;  %v6757_v63 = vsel %vm6756_vm13, %v8802_v32, %v6753_v17  ;;  %vm6770_vm0 = vweird.f32 %v12214_v12 }
 0x55d   : > { %8809 = vrcp.f32 %v12218_v24  ;;  %v6762_v45 = vsel %vm6759_vm15, %v6761_v39, %v6757_v63  ;;  %vm12253_vm2 = vmor %vm6769_vm1, %vm6770_vm0  ;;  %vm6784_vm4 = vweird.f32 %v12218_v24  ;;  %v6788_v28 = vand.u32 2147483647, %v12218_v24 }
 0x55e   : > { %v6766_v27 = vsub.f32 1.0, %v6765_v31  ;;  %v6919_v54 = vmul.f32 %v6762_v45, %v11960_v10  ;;  %v6790_v61 = vand.u32 2147483648, %v12218_v24 }
 0x55f   : > { %v6224_v5 = vpop.f32.mrf.mxu3  ;;  %vm6789_vm8 = vcmp.eq.f32.partialorder %v6788_v28, 8.507059e+37 }
 0x560   : > { %v6603_v43 = vadd.f32 %v6224_v5, %v2127_v11  ;;  %v6932_v58 = vpack.c.bf16 %v6919_v54, %v6918_v29  ;;  %v6767_v38 = vmul.f32 %v12214_v12, %v6766_v27  ;;  %v6776_v11 = vor.u32 1.1754944e-38, %v6775_v23  ;;  %v13552_v23 = vld [vmem:[#allocation91_spill] sm:$0xff] }
 0x561   : > { %v6791_v18 = vor.u32 1.1754944e-38, %v6790_v61 }
 0x562   : > { %v8404_v34 = vmul.f32 -1.442695, %v6603_v43  ;;  %v8808_v0 = vpop.eup %8807  ;;  %v6768_v33 = vadd.f32 %v12214_v12, %v6767_v38 }
 0x563   : > { %v8810_v16 = vpop.eup %8809  ;;  %v12235_v55 = vadd.f32 1.0, %v8808_v0 }
 0x564   : > { %v6780_v21 = vmul.f32 %v8810_v16, %v12218_v24  ;;  %8811 = vpow2.f32 %v8404_v34  ;;  %6972 = vmatmul.bf16.gmra.mxu0 %v6932_v58  ;;  %vm6785_vm3 = vweird.f32 %v8810_v16  ;;  %v6772_v17 = vsel %vm12253_vm2, %v12214_v12, %v6768_v33  ;;  %v13551_v24 = vld [vmem:[#allocation88_spill] sm:$0xff] }
 0x565   : > { %8813 = vrcp.f32 %v12235_v55  ;;  %vm6786_vm5 = vmor %vm6784_vm4, %vm6785_vm3  ;;  %v6777_v46 = vsel %vm6774_vm6, %v6776_v11, %v6772_v17  ;;  %v2135_v0 = vadd.f32 %v13551_v24, %v10905_v6  ;;  %vm6799_vm10 = vweird.f32 %v12235_v55 }
 0x566   : > { %v6781_v32 = vsub.f32 1.0, %v6780_v21  ;;  %v6920_v15 = vmul.f32 %v6777_v46, %v12009_v36 }
 0x567   : > { %v6227_v7 = vpop.f32.mrf.mxu3 }
 0x568   : > { %v6604_v52 = vadd.f32 %v6227_v7, %v2130_v2  ;;  %v6782_v37 = vmul.f32 %v8810_v16, %v6781_v32 }
 0x56a   : > { %v8405_v3 = vmul.f32 -1.442695, %v6604_v52  ;;  %v8812_v14 = vpop.eup %8811  ;;  %v6783_v26 = vadd.f32 %v8810_v16, %v6782_v37  ;;  %v6805_v52 = vand.u32 2147483648, %v12235_v55 }
 0x56b   : > { %v12247_v40 = vpop.eup %8813  ;;  %v12251_v44 = vadd.f32 1.0, %v8812_v14  ;;  %v2137_v14 = vadd.f32 %v13552_v23, %v10905_v6 }
 0x56c   : > { %8815 = vpow2.f32 %v8405_v3  ;;  %v6795_v35 = vmul.f32 %v12247_v40, %v12235_v55  ;;  %v6787_v5 = vsel %vm6786_vm5, %v8810_v16, %v6783_v26  ;;  %v12274_v16 = vpop.f32.mrf.mxu2  ;;  %vm6800_vm9 = vweird.f32 %v12247_v40 }
 0x56d   : > { %8817 = vrcp.f32 %v12251_v44  ;;  %v6792_v31 = vsel %vm6789_vm8, %v6791_v18, %v6787_v5  ;;  %v6803_v3 = vand.u32 2147483647, %v12235_v55  ;;  %vm12288_vm11 = vmor %vm6799_vm10, %vm6800_vm9  ;;  %vm6814_vm12 = vweird.f32 %v12251_v44 }
 0x56e   : > { %v6796_v63 = vsub.f32 1.0, %v6795_v35  ;;  %v6921_v39 = vmul.f32 %v6792_v31, %v12012_v13  ;;  %v6818_v55 = vand.u32 2147483647, %v12251_v44  ;;  %v6806_v41 = vor.u32 1.1754944e-38, %v6805_v52 }
 0x56f   : > { %v6229_v49 = vpop.f32.mrf.mxu3  ;;  %v6820_v17 = vand.u32 2147483648, %v12251_v44  ;;  %vm6804_vm14 = vcmp.eq.f32.partialorder %v6803_v3, 8.507059e+37  ;;  %v13556_v3 = vld [vmem:[#allocation98_spill] sm:$0xff] }
 0x570   : > { %v6605_v53 = vadd.f32 %v6229_v49, %v2132_v20  ;;  %v6933_v29 = vpack.c.bf16 %v6921_v39, %v6920_v15  ;;  %v6797_v21 = vmul.f32 %v12247_v40, %v6796_v63  ;;  %vm6819_vm15 = vcmp.eq.f32.partialorder %v6818_v55, 8.507059e+37  ;;  %v13555_v63 = vld [vmem:[#allocation94_spill] sm:$0xff] }
 0x571   : > { %v6821_v35 = vor.u32 1.1754944e-38, %v6820_v17  ;;  %v2140_v15 = vadd.f32 %v13555_v63, %v10905_v6 }
 0x572   : > { %v8406_v12 = vmul.f32 -1.442695, %v6605_v53  ;;  %v8816_v43 = vpop.eup %8815  ;;  %v6798_v7 = vadd.f32 %v12247_v40, %v6797_v21 }
 0x573   : > { %v8818_v34 = vpop.eup %8817  ;;  %v12268_v45 = vadd.f32 1.0, %v8816_v43 }
 0x574   : > { %v6810_v27 = vmul.f32 %v8818_v34, %v12251_v44  ;;  %8819 = vpow2.f32 %v8406_v12  ;;  %6977 = vmatmul.bf16.gmra.mxu0 %v6933_v29  ;;  %vm6815_vm7 = vweird.f32 %v8818_v34  ;;  %v6802_v9 = vsel %vm12288_vm11, %v12247_v40, %v6798_v7  ;;  %v12301_v40 = vpop.f32.mrf.mxu2 }
 0x575   : > { %8821 = vrcp.f32 %v12268_v45  ;;  %vm6816_vm13 = vmor %vm6814_vm12, %vm6815_vm7  ;;  %v6807_v61 = vsel %vm6804_vm14, %v6806_v41, %v6802_v9  ;;  %v6835_v21 = vand.u32 2147483648, %v12268_v45  ;;  %vm6829_vm1 = vweird.f32 %v12268_v45 }
 0x576   : > { %v6811_v59 = vsub.f32 1.0, %v6810_v27  ;;  %v6922_v12 = vmul.f32 %v6807_v61, %v12055_v51 }
 0x577   : > { %v6232_v54 = vpop.f32.mrf.mxu3 }
 0x578   : > { %v6606_v2 = vadd.f32 %v6232_v54, %v2135_v0  ;;  %v6812_v32 = vmul.f32 %v8818_v34, %v6811_v59 }
 0x57a   : > { %v8407_v58 = vmul.f32 -1.442695, %v6606_v2  ;;  %v8820_v38 = vpop.eup %8819  ;;  %v6813_v33 = vadd.f32 %v8818_v34, %v6812_v32  ;;  %v6833_v32 = vand.u32 2147483647, %v12268_v45 }
 0x57b   : > { %v12282_v37 = vpop.eup %8821  ;;  %v12286_v57 = vadd.f32 1.0, %v8820_v38 }
 0x57c   : > { %8823 = vpow2.f32 %v8407_v58  ;;  %v6825_v28 = vmul.f32 %v12282_v37, %v12268_v45  ;;  %v6817_v11 = vsel %vm6816_vm13, %v8818_v34, %v6813_v33  ;;  %vm6830_vm0 = vweird.f32 %v12282_v37  ;;  %v12315_v7 = vpop.f32.mrf.mxu2 }
 0x57d   : > { %8825 = vrcp.f32 %v12286_v57  ;;  %v6822_v5 = vsel %vm6819_vm15, %v6821_v35, %v6817_v11  ;;  %v2142_v33 = vadd.f32 %v13556_v3, %v10905_v6  ;;  %vm12325_vm2 = vmor %vm6829_vm1, %vm6830_vm0  ;;  %vm6844_vm3 = vweird.f32 %v12286_v57  ;;  %v13559_v11 = vld [vmem:[#allocation89_spill] sm:$0xff] }
 0x57e   : > { %v6826_v18 = vsub.f32 1.0, %v6825_v28  ;;  %v6923_v31 = vmul.f32 %v6822_v5, %v12058_v1  ;;  %v6848_v9 = vand.u32 2147483647, %v12286_v57  ;;  %v6850_v41 = vand.u32 2147483648, %v12286_v57 }
 0x57f   : > { %v6234_v20 = vpop.f32.mrf.mxu3  ;;  %vm6834_vm6 = vcmp.eq.f32.partialorder %v6833_v32, 8.507059e+37  ;;  %v2056_v61 = vadd.f32 %v13559_v11, %v11153_v48 }
 0x580   : > { %v6607_v49 = vadd.f32 %v6234_v20, %v2137_v14  ;;  %v6934_v34 = vpack.c.bf16 %v6923_v31, %v6922_v12  ;;  %v6827_v29 = vmul.f32 %v12282_v37, %v6826_v18  ;;  %v6836_v20 = vor.u32 1.1754944e-38, %v6835_v21 }
 0x581   : > { %vm6849_vm8 = vcmp.eq.f32.partialorder %v6848_v9, 8.507059e+37 }
 0x582   : > { %v8408_v53 = vmul.f32 -1.442695, %v6607_v49  ;;  %v8824_v46 = vpop.eup %8823  ;;  %v6828_v59 = vadd.f32 %v12282_v37, %v6827_v29 }
 0x583   : > { %v8826_v44 = vpop.eup %8825  ;;  %v12305_v43 = vadd.f32 1.0, %v8824_v46 }
 0x584   : > { %v6840_v39 = vmul.f32 %v8826_v44, %v12286_v57  ;;  %8827 = vpow2.f32 %v8408_v53  ;;  %6982 = vmatmul.bf16.gmra.mxu0 %v6934_v34  ;;  %vm6845_vm4 = vweird.f32 %v8826_v44  ;;  %v6832_v45 = vsel %vm12325_vm2, %v12282_v37, %v6828_v59 }
 0x585   : > { %8829 = vrcp.f32 %v12305_v43  ;;  %vm6846_vm5 = vmor %vm6844_vm3, %vm6845_vm4  ;;  %v6837_v35 = vsel %vm6834_vm6, %v6836_v20, %v6832_v45  ;;  %v6851_v53 = vor.u32 1.1754944e-38, %v6850_v41  ;;  %v6258_v37 = vadd.f32 %v12274_v16, %v2056_v61 }
 0x586   : > { %v6841_v0 = vsub.f32 1.0, %v6840_v39  ;;  %v6924_v12 = vmul.f32 %v6837_v35, %v12097_v30  ;;  %vm6859_vm10 = vweird.f32 %v12305_v43 }
 0x587   : > { %v6237_v24 = vpop.f32.mrf.mxu3 }
 0x588   : > { %v6608_v27 = vadd.f32 %v6237_v24, %v2140_v15  ;;  %v6842_v2 = vmul.f32 %v8826_v44, %v6841_v0  ;;  %v8379_v24 = vmul.f32 -1.442695, %v6258_v37 }
 0x58a   : > { %v8409_v54 = vmul.f32 -1.442695, %v6608_v27  ;;  %v8828_v58 = vpop.eup %8827  ;;  %v6843_v52 = vadd.f32 %v8826_v44, %v6842_v2  ;;  %v13560_v27 = vld [vmem:[#allocation92_spill] sm:$0xff]  ;;  %v6863_v2 = vand.u32 2147483647, %v12305_v43 }
 0x58b   : > { %v12319_v38 = vpop.eup %8829  ;;  %v12323_v23 = vadd.f32 1.0, %v8828_v58  ;;  %v2058_v29 = vadd.f32 %v13560_v27, %v11153_v48 }
 0x58c   : > { %v6855_v26 = vmul.f32 %v12319_v38, %v12305_v43  ;;  %8831 = vpow2.f32 %v8409_v54  ;;  %v6847_v49 = vsel %vm6846_vm5, %v8826_v44, %v6843_v52  ;;  %v12346_v44 = vpop.f32.mrf.mxu2  ;;  %vm6860_vm9 = vweird.f32 %v12319_v38 }
 0x58d   : > { %8833 = vrcp.f32 %v12323_v23  ;;  %v6852_v46 = vsel %vm6849_vm8, %v6851_v53, %v6847_v49  ;;  %v6865_v54 = vand.u32 2147483648, %v12305_v43  ;;  %v6880_v59 = vand.u32 2147483648, %v12323_v23  ;;  %vm12359_vm7 = vmor %vm6859_vm10, %vm6860_vm9 }
 0x58e   : > { %v6856_v17 = vsub.f32 1.0, %v6855_v26  ;;  %v6925_v31 = vmul.f32 %v6852_v46, %v12100_v62  ;;  %v6878_v58 = vand.u32 2147483647, %v12323_v23  ;;  %v6259_v3 = vadd.f32 %v12301_v40, %v2058_v29  ;;  %v13563_v46 = vld [vmem:[#allocation95_spill] sm:$0xff] }
 0x58f   : > { %v6239_v55 = vpop.f32.mrf.mxu3  ;;  %vm6874_vm12 = vweird.f32 %v12323_v23  ;;  %v6866_v45 = vor.u32 1.1754944e-38, %v6865_v54  ;;  %v6881_v9 = vor.u32 1.1754944e-38, %v6880_v59  ;;  %vm6864_vm14 = vcmp.eq.f32.partialorder %v6863_v2, 8.507059e+37 }
 0x590   : > { %v6609_v28 = vadd.f32 %v6239_v55, %v2142_v33  ;;  %v6857_v57 = vmul.f32 %v12319_v38, %v6856_v17  ;;  %v6935_v34 = vpack.c.bf16 %v6925_v31, %v6924_v12  ;;  %vm6879_vm15 = vcmp.eq.f32.partialorder %v6878_v58, 8.507059e+37 }
 0x591   : > { %v8380_v17 = vmul.f32 -1.442695, %v6259_v3 }
 0x592   : > { %v8410_v5 = vmul.f32 -1.442695, %v6609_v28  ;;  %v8832_v18 = vpop.eup %8831  ;;  %v6858_v0 = vadd.f32 %v12319_v38, %v6857_v57 }
 0x593   : > { %v8834_v63 = vpop.eup %8833  ;;  %v12344_v15 = vadd.f32 1.0, %v8832_v18  ;;  %v2061_v18 = vadd.f32 %v13563_v46, %v11153_v48 }
 0x594   : > { %v6870_v39 = vmul.f32 %v8834_v63, %v12323_v23  ;;  %8835 = vpow2.f32 %v8410_v5  ;;  %6987 = vmatmul.bf16.gmra.mxu0 %v6935_v34  ;;  %vm6875_vm11 = vweird.f32 %v8834_v63  ;;  %v6862_v33 = vsel %vm12359_vm7, %v12319_v38, %v6858_v0  ;;  %v6163_v28 = vpop.f32.mrf.mxu2 }
 0x595   : > { %8837 = vrcp.f32 %v12344_v15  ;;  %vm6876_vm13 = vmor %vm6874_vm12, %vm6875_vm11  ;;  %v6867_v41 = vsel %vm6864_vm14, %v6866_v45, %v6862_v33  ;;  %v6260_v57 = vadd.f32 %v12315_v7, %v2061_v18  ;;  %vm6889_vm1 = vweird.f32 %v12344_v15 }
 0x596   : > { %v6871_v16 = vsub.f32 1.0, %v6870_v39  ;;  %8839 = vpow2.f32 %v8379_v24  ;;  %v6926_v23 = vmul.f32 %v6867_v41, %v12129_v25 }
 0x597   : > { %v8381_v58 = vmul.f32 -1.442695, %v6260_v57  ;;  %v13567_v57 = vld [vmem:[#allocation102_spill] sm:$0xff] }
 0x598   : > { %v6872_v21 = vmul.f32 %v8834_v63, %v6871_v16  ;;  %v6893_v16 = vand.u32 2147483647, %v12344_v15 }
 0x59a   : > { %v8836_v52 = vpop.eup %8835  ;;  %v6873_v14 = vadd.f32 %v8834_v63, %v6872_v21  ;;  %vm6894_vm6 = vcmp.eq.f32.partialorder %v6893_v16, 8.507059e+37 }
 0x59b   : > { %v8838_v43 = vpop.eup %8837  ;;  %v6673_v26 = vadd.f32 1.0, %v8836_v52 }
 0x59c   : > { %v6885_v55 = vmul.f32 %v8838_v43, %v12344_v15  ;;  %v6877_v20 = vsel %vm6876_vm13, %v8834_v63, %v6873_v14  ;;  %v8840_v11 = vpop.eup %8839  ;;  %vm6890_vm0 = vweird.f32 %v8838_v43  ;;  %v6895_v63 = vand.u32 2147483648, %v12344_v15  ;;  %v6165_v24 = vpop.f32.mrf.mxu2  ;;  %v13564_v15 = vld [vmem:[#allocation97_spill] sm:$0xff] }
 0x59d   : > { %8841 = vrcp.f32 %v6673_v26  ;;  %v6882_v40 = vsel %vm6879_vm15, %v6881_v9, %v6877_v20  ;;  %v12371_v61 = vadd.f32 1.0, %v8840_v11  ;;  %v6910_v39 = vand.u32 2147483648, %v6673_v26  ;;  %vm6891_vm3 = vmor %vm6889_vm1, %vm6890_vm0 }
 0x59e   : > { %v6886_v49 = vsub.f32 1.0, %v6885_v55  ;;  %v6927_v38 = vmul.f32 %v6882_v40, %v12132_v19  ;;  %8843 = vpow2.f32 %v8380_v17  ;;  %v6908_v27 = vand.u32 2147483647, %v6673_v26 }
 0x59f   : > { %8845 = vrcp.f32 %v12371_v61  ;;  %vm6904_vm4 = vweird.f32 %v6673_v26  ;;  %v6896_v2 = vor.u32 1.1754944e-38, %v6895_v63  ;;  %v6911_v7 = vor.u32 1.1754944e-38, %v6910_v39 }
 0x5a0   : > { %v6936_v35 = vpack.c.bf16 %v6927_v38, %v6926_v23  ;;  %v6887_v53 = vmul.f32 %v8838_v43, %v6886_v49  ;;  %vm6909_vm8 = vcmp.eq.f32.partialorder %v6908_v27, 8.507059e+37  ;;  %v2063_v33 = vadd.f32 %v13564_v15, %v11153_v48  ;;  %v13565_v49 = vld [vmem:[#allocation100_spill] sm:$0xff] }
 0x5a1   : > { %v2066_v38 = vadd.f32 %v13565_v49, %v11153_v48  ;;  %v6349_v63 = vand.u32 2147483648, %v12371_v61  ;;  %vm6343_vm10 = vweird.f32 %v12371_v61 }
 0x5a2   : > { %v6888_v31 = vadd.f32 %v8838_v43, %v6887_v53  ;;  %v13566_v53 = vld [vmem:[#allocation38_spill] sm:$0xff] }
 0x5a3   : > { %v8842_v5 = vpop.eup %8841  ;;  %v6262_v11 = vadd.f32 %v6163_v28, %v2066_v38  ;;  %v2068_v28 = vadd.f32 %v13567_v57, %v11153_v48 }
 0x5a4   : > { %v6900_v37 = vmul.f32 %v8842_v5, %v6673_v26  ;;  %6992 = vmatmul.bf16.gmra.mxu0 %v6936_v35  ;;  %v8844_v34 = vpop.eup %8843  ;;  %vm6905_vm2 = vweird.f32 %v8842_v5  ;;  %v6892_v29 = vsel %vm6891_vm3, %v8838_v43, %v6888_v31  ;;  %v6261_v43 = vadd.f32 %v12346_v44, %v2063_v33  ;;  %v6168_v9 = vpop.f32.mrf.mxu2 }
 0x5a5   : > { %v12380_v59 = vadd.f32 1.0, %v8844_v34  ;;  %vm6906_vm5 = vmor %vm6904_vm4, %vm6905_vm2  ;;  %v8846_v21 = vpop.eup %8845  ;;  %v6897_v52 = vsel %vm6894_vm6, %v6896_v2, %v6892_v29  ;;  %v6347_v34 = vand.u32 2147483647, %v12371_v61 }
 0x5a6   : > { %v6901_v12 = vsub.f32 1.0, %v6900_v37  ;;  %v6928_v26 = vmul.f32 %v6897_v52, %v12146_v56  ;;  %v6339_v45 = vmul.f32 %v8846_v21, %v12371_v61  ;;  %v8382_v20 = vmul.f32 -1.442695, %v6261_v43  ;;  %v13568_v52 = vld [vmem:[#allocation41_spill] sm:$0xff] }
 0x5a7   : > { %8847 = vrcp.f32 %v12380_v59  ;;  %v8383_v37 = vmul.f32 -1.442695, %v6262_v11  ;;  %vm6344_vm9 = vweird.f32 %v8846_v21  ;;  %vm6348_vm7 = vcmp.eq.f32.partialorder %v6347_v34, 8.507059e+37  ;;  %v13569_v61 = vld [vmem:[#allocation105_spill] sm:$0xff] }
 0x5a8   : > { %v6902_v0 = vmul.f32 %v8842_v5, %v6901_v12  ;;  %8849 = vpow2.f32 %v8381_v58  ;;  %v6340_v40 = vsub.f32 1.0, %v6339_v45  ;;  %vm6345_vm11 = vmor %vm6343_vm10, %vm6344_vm9  ;;  %v2071_v15 = vadd.f32 %v13569_v61, %v11153_v48 }
 0x5a9   : > { %8851 = vpow2.f32 %v8382_v20  ;;  %vm6358_vm13 = vweird.f32 %v12380_v59 }
 0x5aa   : > { %v6903_v54 = vadd.f32 %v8842_v5, %v6902_v0  ;;  %v6341_v35 = vmul.f32 %v8846_v21, %v6340_v40  ;;  %v6263_v0 = vadd.f32 %v6165_v24, %v2068_v28  ;;  %v6264_v40 = vadd.f32 %v6168_v9, %v2071_v15 }
 0x5ac   : > { %v6907_v32 = vsel %vm6906_vm5, %v8842_v5, %v6903_v54  ;;  %v2154_v5 = vadd.f32 %v13566_v53, %v11207_v8  ;;  %v6170_v46 = vpop.f32.mrf.mxu2  ;;  %v6342_v18 = vadd.f32 %v8846_v21, %v6341_v35  ;;  %v8384_v24 = vmul.f32 -1.442695, %v6263_v0 }
 0x5ad   : > { %v6912_v3 = vsel %vm6909_vm8, %v6911_v7, %v6907_v32  ;;  %v12389_v41 = vpop.eup %8847  ;;  %v6350_v7 = vor.u32 1.1754944e-38, %v6349_v63 }
 0x5ae   : > { %v6929_v14 = vmul.f32 %v6912_v3, %v12149_v22  ;;  %v8850_v17 = vpop.eup %8849  ;;  %v6354_v44 = vmul.f32 %v12389_v41, %v12380_v59  ;;  %v6346_v29 = vsel %vm6345_vm11, %v8846_v21, %v6342_v18  ;;  %v2156_v3 = vadd.f32 %v13568_v52, %v11207_v8 }
 0x5af   : > { %v12395_v23 = vadd.f32 1.0, %v8850_v17  ;;  %v8852_v31 = vpop.eup %8851  ;;  %v6351_v33 = vsel %vm6348_vm7, %v6350_v7, %v6346_v29  ;;  %vm6359_vm12 = vweird.f32 %v12389_v41  ;;  %v6362_v17 = vand.u32 2147483647, %v12380_v59 }
 0x5b0   : > { %v6937_v55 = vpack.c.bf16 %v6929_v14, %v6928_v26  ;;  %v6355_v12 = vsub.f32 1.0, %v6354_v44  ;;  %v12405_v27 = vadd.f32 1.0, %v8852_v31  ;;  %vm6360_vm14 = vmor %vm6358_vm13, %vm6359_vm12  ;;  %v13570_v31 = vld [vmem:[#allocation108_spill] sm:$0xff] }
 0x5b1   : > { %8853 = vrcp.f32 %v12395_v23  ;;  %vm6363_vm15 = vcmp.eq.f32.partialorder %v6362_v17, 8.507059e+37  ;;  %v2073_v57 = vadd.f32 %v13570_v31, %v11153_v48  ;;  %vm6373_vm1 = vweird.f32 %v12395_v23  ;;  %v13573_v17 = vld [vmem:[#allocation46_spill] sm:$0xff]  ;;  %v13574_v31 = vld [vmem:[#allocation113_spill] sm:$0xff] }
 0x5b2   : > { %8855 = vpow2.f32 %v8383_v37  ;;  %v6356_v2 = vmul.f32 %v12389_v41, %v6355_v12  ;;  %v8385_v37 = vmul.f32 -1.442695, %v6264_v40  ;;  %vm6388_vm5 = vweird.f32 %v12405_v27 }
 0x5b3   : > { %8857 = vrcp.f32 %v12405_v27  ;;  %v6265_v34 = vadd.f32 %v6170_v46, %v2073_v57  ;;  %v2078_v57 = vadd.f32 %v13574_v31, %v11153_v48 }
 0x5b4   : > { %6997 = vmatmul.bf16.gmra.mxu0 %v6937_v55  ;;  %v6357_v14 = vadd.f32 %v12389_v41, %v6356_v2  ;;  %v6173_v45 = vpop.f32.mrf.mxu2  ;;  %v6364_v55 = vand.u32 2147483648, %v12380_v59  ;;  %8859 = vpow2.f32 %v8384_v24  ;;  %v13572_v24 = vld [vmem:[#allocation110_spill] sm:$0xff] }
 0x5b5   : > { %v8386_v46 = vmul.f32 -1.442695, %v6265_v34 }
 0x5b6   : > { %v6361_v11 = vsel %vm6360_vm14, %v12389_v41, %v6357_v14  ;;  %v6365_v53 = vor.u32 1.1754944e-38, %v6364_v55 }
 0x5b7   : > { %v12408_v58 = vpop.eup %8853 }
 0x5b8   : > { %v8856_v43 = vpop.eup %8855  ;;  %v6369_v26 = vmul.f32 %v12408_v58, %v12395_v23  ;;  %v6366_v18 = vsel %vm6363_vm15, %v6365_v53, %v6361_v11  ;;  %vm6374_vm0 = vweird.f32 %v12408_v58 }
 0x5b9   : > { %v12423_v38 = vadd.f32 1.0, %v8856_v43  ;;  %vm6375_vm2 = vmor %vm6373_vm1, %vm6374_vm0 }
 0x5ba   : > { %v6370_v35 = vsub.f32 1.0, %v6369_v26 }
 0x5bb   : > { %8861 = vrcp.f32 %v12423_v38  ;;  %vm6403_vm10 = vweird.f32 %v12423_v38 }
 0x5bc   : > { %v6371_v28 = vmul.f32 %v12408_v58, %v6370_v35  ;;  %8863 = vpow2.f32 %v8385_v37 }
 0x5be   : > { %v6372_v7 = vadd.f32 %v12408_v58, %v6371_v28 }
 0x5c0   : > { %v6376_v14 = vsel %vm6375_vm2, %v12408_v58, %v6372_v7 }
 0x5c1   : > { %v6963_v39 = vpop.f32.mrf.mxu0 }
 0x5c2   : > { %v6964_v16 = vadd.f32 %v6963_v39, %v2154_v5  ;;  %v12426_v5 = vpop.eup %8857 }
 0x5c3   : > { %v8860_v12 = vpop.eup %8859  ;;  %v6384_v41 = vmul.f32 %v12426_v5, %v12405_v27  ;;  %vm6389_vm4 = vweird.f32 %v12426_v5 }
 0x5c4   : > { %v7003_v54 = vmax.f32 %v6964_v16, 0.0  ;;  %v6175_v16 = vpop.f32.mrf.mxu2  ;;  %v12441_v0 = vadd.f32 1.0, %v8860_v12  ;;  %vm6390_vm6 = vmor %vm6388_vm5, %vm6389_vm4 }
 0x5c6   : > { %v7019_v32 = vsub.f32 %v7003_v54, %v11859_v4  ;;  %v13571_v54 = vld [vmem:[#allocation44_spill] sm:$0xff]  ;;  %8865 = vrcp.f32 %v12441_v0  ;;  %vm6418_vm13 = vweird.f32 %v12441_v0 }
 0x5c7   : > { %v2159_v2 = vadd.f32 %v13571_v54, %v11207_v8  ;;  %8867 = vpow2.f32 %v8386_v46 }
 0x5c8   : > { %v7035_v21 = vmul.f32 %v7019_v32, %v6351_v33  ;;  %v6385_v32 = vsub.f32 1.0, %v6384_v41  ;;  %v2076_v33 = vadd.f32 %v13572_v24, %v11153_v48 }
 0x5c9   : > { %v6965_v20 = vpop.f32.mrf.mxu0 }
 0x5ca   : > { %v6966_v49 = vadd.f32 %v6965_v20, %v2156_v3  ;;  %v12436_v63 = vadd.f32 %v7035_v21, %v11859_v4  ;;  %v12449_v4 = vpop.eup %8861  ;;  %v6377_v3 = vand.u32 2147483647, %v12395_v23  ;;  %v6386_v26 = vmul.f32 %v12426_v5, %v6385_v32  ;;  %v13575_v32 = vld [vmem:[#allocation49_spill] sm:$0xff] }
 0x5cb   : > { %v8864_v15 = vpop.eup %8863  ;;  %v6399_v21 = vmul.f32 %v12449_v4, %v12423_v38  ;;  %v6266_v55 = vadd.f32 %v6173_v45, %v2076_v33  ;;  %vm6404_vm9 = vweird.f32 %v12449_v4 }
 0x5cc   : > { %v7004_v44 = vmax.f32 %v6966_v49, 0.0  ;;  %v12461_v40 = vadd.f32 1.0, %v8864_v15  ;;  %vm6378_vm3 = vcmp.eq.f32.partialorder %v6377_v3, 8.507059e+37  ;;  %v2161_v49 = vadd.f32 %v13573_v17, %v11207_v8  ;;  %v6178_v35 = vpop.f32.mrf.mxu2  ;;  %v12468_v37 = vpop.eup %8865  ;;  %vm6405_vm11 = vmor %vm6403_vm10, %vm6404_vm9 }
 0x5cd   : > { %v6387_v58 = vadd.f32 %v12426_v5, %v6386_v26  ;;  %v8387_v45 = vmul.f32 -1.442695, %v6266_v55  ;;  %v8868_v41 = vpop.eup %8867  ;;  %v6414_v28 = vmul.f32 %v12468_v37, %v12441_v0  ;;  %v6407_v26 = vand.u32 2147483647, %v12423_v38 }
 0x5ce   : > { %v7020_v9 = vsub.f32 %v7004_v44, %v11862_v50  ;;  %v6400_v44 = vsub.f32 1.0, %v6399_v21  ;;  %8869 = vrcp.f32 %v12461_v40  ;;  %vm6419_vm12 = vweird.f32 %v12468_v37 }
 0x5cf   : > { %v6391_v34 = vsel %vm6390_vm6, %v12426_v5, %v6387_v58  ;;  %8871 = vpow2.f32 %v8387_v45  ;;  %v6415_v15 = vsub.f32 1.0, %v6414_v28  ;;  %vm6408_vm7 = vcmp.eq.f32.partialorder %v6407_v26, 8.507059e+37  ;;  %vm6420_vm14 = vmor %vm6418_vm13, %vm6419_vm12 }
 0x5d0   : > { %v7036_v59 = vmul.f32 %v7020_v9, %v6366_v18  ;;  %v6394_v9 = vand.u32 2147483648, %v12405_v27  ;;  %v6401_v54 = vmul.f32 %v12449_v4, %v6400_v44  ;;  %vm6433_vm1 = vweird.f32 %v12461_v40 }
 0x5d1   : > { %v6968_v52 = vpop.f32.mrf.mxu0 }
 0x5d2   : > { %v12439_v39 = vadd.f32 %v7036_v59, %v11862_v50  ;;  %v6379_v50 = vand.u32 2147483648, %v12395_v23  ;;  %v6969_v61 = vadd.f32 %v6968_v52, %v2159_v2  ;;  %v6392_v59 = vand.u32 2147483647, %v12405_v27 }
 0x5d3   : > { %v6267_v2 = vadd.f32 %v6175_v16, %v2078_v57  ;;  %v6395_v7 = vor.u32 1.1754944e-38, %v6394_v9  ;;  %v12483_v52 = vadd.f32 1.0, %v8868_v41  ;;  %v6402_v5 = vadd.f32 %v12449_v4, %v6401_v54  ;;  %v13577_v9 = vld [vmem:[#allocation52_spill] sm:$0xff]  ;;  %v13578_v54 = vld [vmem:[#allocation118_spill] sm:$0xff] }
 0x5d4   : > { %v7067_v29 = vpack.c.bf16 %v12439_v39, %v12436_v63  ;;  %v7005_v43 = vmax.f32 %v6969_v61, 0.0  ;;  %v6380_v20 = vor.u32 1.1754944e-38, %v6379_v50  ;;  %vm6393_vm8 = vcmp.eq.f32.partialorder %v6392_v59, 8.507059e+37  ;;  %v12485_v3 = vpop.eup %8869  ;;  %v6180_v21 = vpop.f32.mrf.mxu2 }
 0x5d5   : > { %v2164_v50 = vadd.f32 %v13575_v32, %v11207_v8  ;;  %v6396_v46 = vsel %vm6393_vm8, %v6395_v7, %v6391_v34  ;;  %v8388_v24 = vmul.f32 -1.442695, %v6267_v2  ;;  %v6409_v16 = vand.u32 2147483648, %v12423_v38 }
 0x5d6   : > { %7083 = vmatmul.bf16.vlgmr.msrb.gmra.mxu1 %v7067_v29  ;;  %7132 = vmatmul.bf16.vlgmr.msrb.gmra.mxu2 %v7067_v29  ;;  %v7021_v23 = vsub.f32 %v7005_v43, %v11911_v47  ;;  %v6381_v11 = vsel %vm6378_vm3, %v6380_v20, %v6376_v14  ;;  %v8872_v20 = vpop.eup %8871  ;;  %8873 = vrcp.f32 %v12483_v52  ;;  %v6416_v38 = vmul.f32 %v12468_v37, %v6415_v15 }
 0x5d7   : > { %v12509_v58 = vadd.f32 1.0, %v8872_v20  ;;  %8875 = vpow2.f32 %v8388_v24  ;;  %v6424_v41 = vand.u32 2147483648, %v12441_v0  ;;  %v6422_v34 = vand.u32 2147483647, %v12441_v0  ;;  %v13579_v24 = vld [vmem:[#allocation54_spill] sm:$0xff] }
 0x5d8   : > { %v7037_v53 = vmul.f32 %v7021_v23, %v6381_v11  ;;  %v13576_v23 = vld [vmem:[#allocation115_spill] sm:$0xff]  ;;  %v6417_v31 = vadd.f32 %v12468_v37, %v6416_v38  ;;  %v2083_v2 = vadd.f32 %v13578_v54, %v11153_v48  ;;  %vm6434_vm0 = vweird.f32 %v12485_v3 }
 0x5d9   : > { %v6970_v18 = vpop.f32.mrf.mxu0  ;;  %v2081_v17 = vadd.f32 %v13576_v23, %v11153_v48  ;;  %8877 = vrcp.f32 %v12509_v58  ;;  %v6425_v15 = vor.u32 1.1754944e-38, %v6424_v41  ;;  %vm6423_vm15 = vcmp.eq.f32.partialorder %v6422_v34, 8.507059e+37  ;;  %vm12551_vm2 = vmor %vm6433_vm1, %vm6434_vm0 }
 0x5da   : > { %v6971_v12 = vadd.f32 %v6970_v18, %v2161_v49  ;;  %v12492_v14 = vadd.f32 %v7037_v53, %v11911_v47  ;;  %v6429_v49 = vmul.f32 %v12485_v3, %v12461_v40  ;;  %v6406_v47 = vsel %vm6405_vm11, %v12449_v4, %v6402_v5 }
 0x5db   : > { %v6268_v44 = vadd.f32 %v6178_v35, %v2081_v17  ;;  %v6410_v53 = vor.u32 1.1754944e-38, %v6409_v16  ;;  %v2166_v18 = vadd.f32 %v13577_v9, %v11207_v8  ;;  %v6269_v5 = vadd.f32 %v6180_v21, %v2083_v2 }
 0x5dc   : > { %v7006_v29 = vmax.f32 %v6971_v12, 0.0  ;;  %v6430_v59 = vsub.f32 1.0, %v6429_v49  ;;  %v12516_v35 = vpop.eup %8873  ;;  %v6183_v32 = vpop.f32.mrf.mxu2  ;;  %v2169_v16 = vadd.f32 %v13579_v24, %v11207_v8  ;;  %v6439_v21 = vand.u32 2147483648, %v12461_v40 }
 0x5dd   : > { %v6411_v4 = vsel %vm6408_vm7, %v6410_v53, %v6406_v47  ;;  %v8389_v57 = vmul.f32 -1.442695, %v6268_v44  ;;  %v8876_v7 = vpop.eup %8875  ;;  %v8390_v17 = vmul.f32 -1.442695, %v6269_v5  ;;  %v13580_v53 = vld [vmem:[#allocation121_spill] sm:$0xff]  ;;  %vm6449_vm4 = vweird.f32 %v12516_v35  ;;  %v13584_v5 = vld [vmem:[#allocation122_spill] sm:$0xff] }
 0x5de   : > { %v7022_v27 = vsub.f32 %v7006_v29, %v11914_v60  ;;  %vm6448_vm5 = vweird.f32 %v12483_v52  ;;  %vm6463_vm10 = vweird.f32 %v12509_v58 }
 0x5df   : > { %8879 = vpow2.f32 %v8389_v57  ;;  %vm6450_vm6 = vmor %vm6448_vm5, %vm6449_vm4 }
 0x5e0   : > { %v7038_v61 = vmul.f32 %v7022_v27, %v6396_v46  ;;  %v6444_v27 = vmul.f32 %v12516_v35, %v12483_v52 }
 0x5e1   : > { %v6973_v33 = vpop.f32.mrf.mxu0 }
 0x5e2   : > { %v12495_v43 = vadd.f32 %v7038_v61, %v11914_v60  ;;  %v6974_v55 = vadd.f32 %v6973_v33, %v2164_v50  ;;  %v6421_v50 = vsel %vm6420_vm14, %v12468_v37, %v6417_v31  ;;  %v6431_v61 = vmul.f32 %v12485_v3, %v6430_v59 }
 0x5e3   : > { %v12531_v33 = vadd.f32 1.0, %v8876_v7  ;;  %v6426_v26 = vsel %vm6423_vm15, %v6425_v15, %v6421_v50  ;;  %v6445_v23 = vsub.f32 1.0, %v6444_v27  ;;  %v2088_v15 = vadd.f32 %v13584_v5, %v11153_v48 }
 0x5e4   : > { %v7007_v11 = vmax.f32 %v6974_v55, 0.0  ;;  %v7068_v60 = vpack.c.bf16 %v12495_v43, %v12492_v14  ;;  %v12533_v55 = vpop.eup %8877  ;;  %v6432_v37 = vadd.f32 %v12485_v3, %v6431_v61  ;;  %v6185_v57 = vpop.f32.mrf.mxu2 }
 0x5e5   : > { %v8880_v44 = vpop.eup %8879  ;;  %v6459_v9 = vmul.f32 %v12533_v55, %v12509_v58  ;;  %8881 = vrcp.f32 %v12531_v33  ;;  %vm6464_vm9 = vweird.f32 %v12533_v55  ;;  %vm6478_vm13 = vweird.f32 %v12531_v33 }
 0x5e6   : > { %v7023_v45 = vsub.f32 %v7007_v11, %v11957_v42  ;;  %7088 = vmatmul.bf16.gmra.mxu1 %v7068_v60  ;;  %7137 = vmatmul.bf16.gmra.mxu2 %v7068_v60  ;;  %v6437_v60 = vand.u32 2147483647, %v12461_v40  ;;  %v12561_v31 = vadd.f32 1.0, %v8880_v44  ;;  %8883 = vpow2.f32 %v8390_v17  ;;  %v13585_v17 = vld [vmem:[#allocation60_spill] sm:$0xff]  ;;  %vm6465_vm11 = vmor %vm6463_vm10, %vm6464_vm9 }
 0x5e8   : > { %v7039_v12 = vmul.f32 %v7023_v45, %v6411_v4  ;;  %v2086_v45 = vadd.f32 %v13580_v53, %v11153_v48  ;;  %v6446_v4 = vmul.f32 %v12516_v35, %v6445_v23  ;;  %vm6438_vm3 = vcmp.eq.f32.partialorder %v6437_v60, 8.507059e+37 }
 0x5e9   : > { %v6975_v28 = vpop.f32.mrf.mxu0  ;;  %8885 = vrcp.f32 %v12561_v31  ;;  %vm6493_vm1 = vweird.f32 %v12561_v31 }
 0x5ea   : > { %v6976_v29 = vadd.f32 %v6975_v28, %v2166_v18  ;;  %v12540_v47 = vadd.f32 %v7039_v12, %v11957_v42  ;;  %v6436_v42 = vsel %vm12551_vm2, %v12485_v3, %v6432_v37  ;;  %v6270_v59 = vadd.f32 %v6183_v32, %v2086_v45  ;;  %v13583_v28 = vld [vmem:[#allocation57_spill] sm:$0xff] }
 0x5eb   : > { %v6440_v12 = vor.u32 1.1754944e-38, %v6439_v21  ;;  %v2171_v3 = vadd.f32 %v13583_v28, %v11207_v8  ;;  %v6447_v2 = vadd.f32 %v12516_v35, %v6446_v4  ;;  %v12568_v7 = vpop.eup %8881  ;;  %v6454_v32 = vand.u32 2147483648, %v12483_v52 }
 0x5ec   : > { %v7008_v46 = vmax.f32 %v6976_v29, 0.0  ;;  %v6460_v29 = vsub.f32 1.0, %v6459_v9  ;;  %v8391_v27 = vmul.f32 -1.442695, %v6270_v59  ;;  %v6474_v24 = vmul.f32 %v12568_v7, %v12531_v33  ;;  %v6188_v53 = vpop.f32.mrf.mxu2 }
 0x5ed   : > { %v6441_v34 = vsel %vm6438_vm3, %v6440_v12, %v6436_v42  ;;  %v6271_v37 = vadd.f32 %v6185_v57, %v2088_v15  ;;  %v6455_v23 = vor.u32 1.1754944e-38, %v6454_v32  ;;  %v2174_v21 = vadd.f32 %v13585_v17, %v11207_v8  ;;  %v13586_v57 = vld [vmem:[#allocation124_spill] sm:$0xff] }
 0x5ee   : > { %v7024_v0 = vsub.f32 %v7008_v46, %v11960_v10  ;;  %v6452_v46 = vand.u32 2147483647, %v12483_v52  ;;  %8887 = vpow2.f32 %v8391_v27  ;;  %v6475_v44 = vsub.f32 1.0, %v6474_v24  ;;  %v13587_v27 = vld [vmem:[#allocation62_spill] sm:$0xff] }
 0x5ef   : > { %v8392_v9 = vmul.f32 -1.442695, %v6271_v37  ;;  %v6469_v18 = vand.u32 2147483648, %v12509_v58  ;;  %v6467_v4 = vand.u32 2147483647, %v12509_v58  ;;  %v2176_v32 = vadd.f32 %v13587_v27, %v11207_v8  ;;  %v13588_v37 = vld [vmem:[#allocation125_spill] sm:$0xff] }
 0x5f0   : > { %v7040_v20 = vmul.f32 %v7024_v0, %v6426_v26  ;;  %v8884_v0 = vpop.eup %8883  ;;  %vm6453_vm8 = vcmp.eq.f32.partialorder %v6452_v46, 8.507059e+37  ;;  %vm6479_vm12 = vweird.f32 %v12568_v7 }
 0x5f1   : > { %v6978_v49 = vpop.f32.mrf.mxu0  ;;  %vm6468_vm7 = vcmp.eq.f32.partialorder %v6467_v4, 8.507059e+37  ;;  %vm6480_vm14 = vmor %vm6478_vm13, %vm6479_vm12 }
 0x5f2   : > { %v12543_v11 = vadd.f32 %v7040_v20, %v11960_v10  ;;  %v6979_v38 = vadd.f32 %v6978_v49, %v2169_v16  ;;  %v6451_v16 = vsel %vm6450_vm6, %v12516_v35, %v6447_v2  ;;  %v6461_v20 = vmul.f32 %v12533_v55, %v6460_v29 }
 0x5f3   : > { %v12583_v49 = vadd.f32 1.0, %v8884_v0  ;;  %v6456_v60 = vsel %vm6453_vm8, %v6455_v23, %v6451_v16  ;;  %v6470_v29 = vor.u32 1.1754944e-38, %v6469_v18  ;;  %v6484_v0 = vand.u32 2147483648, %v12531_v33 }
 0x5f4   : > { %v7009_v10 = vmax.f32 %v6979_v38, 0.0  ;;  %v7069_v40 = vpack.c.bf16 %v12543_v11, %v12540_v47  ;;  %v12585_v38 = vpop.eup %8885  ;;  %v6462_v45 = vadd.f32 %v12533_v55, %v6461_v20  ;;  %v6190_v16 = vpop.f32.mrf.mxu2  ;;  %v2093_v23 = vadd.f32 %v13588_v37, %v11153_v48 }
 0x5f5   : > { %v8888_v12 = vpop.eup %8887  ;;  %v6489_v28 = vmul.f32 %v12585_v38, %v12561_v31  ;;  %8889 = vrcp.f32 %v12583_v49  ;;  %vm6494_vm0 = vweird.f32 %v12585_v38  ;;  %vm6508_vm5 = vweird.f32 %v12583_v49 }
 0x5f6   : > { %v7025_v41 = vsub.f32 %v7009_v10, %v12009_v36  ;;  %7093 = vmatmul.bf16.gmra.mxu1 %v7069_v40  ;;  %7142 = vmatmul.bf16.gmra.mxu2 %v7069_v40  ;;  %8891 = vpow2.f32 %v8392_v9  ;;  %vm6495_vm2 = vmor %vm6493_vm1, %vm6494_vm0 }
 0x5f8   : > { %v7041_v54 = vmul.f32 %v7025_v41, %v6441_v34  ;;  %v2091_v41 = vadd.f32 %v13586_v57, %v11153_v48  ;;  %v6476_v34 = vmul.f32 %v12568_v7, %v6475_v44 }
 0x5f9   : > { %v6980_v50 = vpop.f32.mrf.mxu0 }
 0x5fa   : > { %v6981_v61 = vadd.f32 %v6980_v50, %v2171_v3  ;;  %v12592_v10 = vadd.f32 %v7041_v54, %v12009_v36  ;;  %v6466_v3 = vsel %vm6465_vm11, %v12533_v55, %v6462_v45  ;;  %v6272_v58 = vadd.f32 %v6188_v53, %v2091_v41  ;;  %v13589_v45 = vld [vmem:[#allocation65_spill] sm:$0xff] }
 0x5fb   : > { %v12607_v54 = vadd.f32 1.0, %v8888_v12  ;;  %v6471_v55 = vsel %vm6468_vm7, %v6470_v29, %v6466_v3  ;;  %v6490_v50 = vsub.f32 1.0, %v6489_v28  ;;  %v12614_v5 = vpop.eup %8889  ;;  %v6273_v53 = vadd.f32 %v6190_v16, %v2093_v23 }
 0x5fc   : > { %v7010_v26 = vmax.f32 %v6981_v61, 0.0  ;;  %v6477_v61 = vadd.f32 %v12568_v7, %v6476_v34  ;;  %v8393_v15 = vmul.f32 -1.442695, %v6272_v58  ;;  %v6504_v17 = vmul.f32 %v12614_v5, %v12583_v49 }
 0x5fd   : > { %8893 = vrcp.f32 %v12607_v54  ;;  %v6491_v44 = vmul.f32 %v12585_v38, %v6490_v50  ;;  %v2179_v9 = vadd.f32 %v13589_v45, %v11207_v8  ;;  %v8394_v57 = vmul.f32 -1.442695, %v6273_v53  ;;  %v13590_v50 = vld [vmem:[#allocation68_spill] sm:$0xff] }
 0x5fe   : > { %v7026_v52 = vsub.f32 %v7010_v26, %v12012_v13  ;;  %v6482_v26 = vand.u32 2147483647, %v12531_v33  ;;  %8895 = vpow2.f32 %v8393_v15  ;;  %v6499_v41 = vand.u32 2147483648, %v12561_v31 }
 0x5ff   : > { %vm6509_vm4 = vweird.f32 %v12614_v5  ;;  %v6514_v16 = vand.u32 2147483648, %v12583_v49  ;;  %vm6523_vm10 = vweird.f32 %v12607_v54 }
 0x600   : > { %v7042_v35 = vmul.f32 %v7026_v52, %v6456_v60  ;;  %v8892_v52 = vpop.eup %8891  ;;  %vm6483_vm15 = vcmp.eq.f32.partialorder %v6482_v26, 8.507059e+37  ;;  %vm6510_vm6 = vmor %vm6508_vm5, %vm6509_vm4 }
 0x601   : > { %v6983_v42 = vpop.f32.mrf.mxu0  ;;  %v12629_v18 = vadd.f32 1.0, %v8892_v52 }
 0x602   : > { %v12595_v40 = vadd.f32 %v7042_v35, %v12012_v13  ;;  %v6984_v59 = vadd.f32 %v6983_v42, %v2174_v21  ;;  %v6481_v21 = vsel %vm6480_vm14, %v12568_v7, %v6477_v61  ;;  %v6485_v35 = vor.u32 1.1754944e-38, %v6484_v0 }
 0x603   : > { %v12631_v4 = vpop.eup %8893  ;;  %v6492_v7 = vadd.f32 %v12585_v38, %v6491_v44  ;;  %8897 = vrcp.f32 %v12629_v18  ;;  %v6515_v44 = vor.u32 1.1754944e-38, %v6514_v16  ;;  %vm6538_vm13 = vweird.f32 %v12629_v18 }
 0x604   : > { %v7011_v36 = vmax.f32 %v6984_v59, 0.0  ;;  %v7070_v13 = vpack.c.bf16 %v12595_v40, %v12592_v10  ;;  %v6486_v42 = vsel %vm6483_vm15, %v6485_v35, %v6481_v21  ;;  %v6505_v59 = vsub.f32 1.0, %v6504_v17  ;;  %v8896_v58 = vpop.eup %8895  ;;  %v13591_v35 = vld [vmem:[#allocation70_spill] sm:$0xff] }
 0x605   : > { %v6519_v29 = vmul.f32 %v12631_v4, %v12607_v54  ;;  %8899 = vpow2.f32 %v8394_v57  ;;  %vm6524_vm9 = vweird.f32 %v12631_v4 }
 0x606   : > { %v7027_v2 = vsub.f32 %v7011_v36, %v12055_v51  ;;  %7098 = vmatmul.bf16.gmra.mxu1 %v7070_v13  ;;  %7147 = vmatmul.bf16.gmra.mxu2 %v7070_v13  ;;  %v6497_v13 = vand.u32 2147483647, %v12561_v31  ;;  %vm6525_vm11 = vmor %vm6523_vm10, %vm6524_vm9 }
 0x608   : > { %v7043_v46 = vmul.f32 %v7027_v2, %v6471_v55  ;;  %v6496_v2 = vsel %vm6495_vm2, %v12585_v38, %v6492_v7  ;;  %v12651_v55 = vadd.f32 1.0, %v8896_v58  ;;  %vm6498_vm3 = vcmp.eq.f32.partialorder %v6497_v13, 8.507059e+37 }
 0x609   : > { %v6985_v24 = vpop.f32.mrf.mxu0  ;;  %v6520_v38 = vsub.f32 1.0, %v6519_v29 }
 0x60a   : > { %v6986_v20 = vadd.f32 %v6985_v24, %v2176_v32  ;;  %v12638_v3 = vadd.f32 %v7043_v46, %v12055_v51  ;;  %v6506_v32 = vmul.f32 %v12614_v5, %v6505_v59  ;;  %v2181_v46 = vadd.f32 %v13590_v50, %v11207_v8  ;;  %v12658_v24 = vpop.eup %8897 }
 0x60b   : > { %8901 = vrcp.f32 %v12651_v55  ;;  %v8900_v23 = vpop.eup %8899  ;;  %v6534_v52 = vmul.f32 %v12658_v24, %v12629_v18  ;;  %vm6539_vm12 = vweird.f32 %v12658_v24  ;;  %vm6553_vm1 = vweird.f32 %v12651_v55 }
 0x60c   : > { %v7012_v60 = vmax.f32 %v6986_v20, 0.0  ;;  %v6507_v0 = vadd.f32 %v12614_v5, %v6506_v32  ;;  %v6512_v20 = vand.u32 2147483647, %v12583_v49  ;;  %v12671_v45 = vadd.f32 1.0, %v8900_v23  ;;  %vm6540_vm14 = vmor %vm6538_vm13, %vm6539_vm12 }
 0x60e   : > { %v7028_v33 = vsub.f32 %v7012_v60, %v12058_v1  ;;  %v6511_v17 = vsel %vm6510_vm6, %v12614_v5, %v6507_v0  ;;  %v6521_v60 = vmul.f32 %v12631_v4, %v6520_v38  ;;  %vm6513_vm8 = vcmp.eq.f32.partialorder %v6512_v20, 8.507059e+37 }
 0x60f   : > { %v6516_v49 = vsel %vm6513_vm8, %v6515_v44, %v6511_v17  ;;  %v6529_v5 = vand.u32 2147483648, %v12607_v54  ;;  %8903 = vrcp.f32 %v12671_v45  ;;  %v6542_v38 = vand.u32 2147483647, %v12629_v18 }
 0x610   : > { %v7044_v12 = vmul.f32 %v7028_v33, %v6486_v42  ;;  %v2184_v33 = vadd.f32 %v13591_v35, %v11207_v8  ;;  %v6535_v42 = vsub.f32 1.0, %v6534_v52  ;;  %v13593_v52 = vld [vmem:[#allocation76_spill] sm:$0xff]  ;;  %vm6568_vm5 = vweird.f32 %v12671_v45 }
 0x611   : > { %v6988_v28 = vpop.f32.mrf.mxu0  ;;  %vm6543_vm15 = vcmp.eq.f32.partialorder %v6542_v38, 8.507059e+37  ;;  %v2189_v17 = vadd.f32 %v13593_v52, %v11207_v8 }
 0x612   : > { %v12641_v36 = vadd.f32 %v7044_v12, %v12058_v1  ;;  %v6989_v34 = vadd.f32 %v6988_v28, %v2179_v9  ;;  %v6500_v1 = vor.u32 1.1754944e-38, %v6499_v41  ;;  %v12673_v9 = vpop.eup %8901  ;;  %v6522_v12 = vadd.f32 %v12631_v4, %v6521_v60 }
 0x613   : > { %v6527_v28 = vand.u32 2147483647, %v12607_v54  ;;  %v13592_v54 = vld [vmem:[#allocation73_spill] sm:$0xff]  ;;  %vm6554_vm0 = vweird.f32 %v12673_v9 }
 0x614   : > { %v7013_v27 = vmax.f32 %v6989_v34, 0.0  ;;  %v7071_v51 = vpack.c.bf16 %v12641_v36, %v12638_v3  ;;  %v6501_v61 = vsel %vm6498_vm3, %v6500_v1, %v6496_v2  ;;  %v6549_v34 = vmul.f32 %v12673_v9, %v12651_v55  ;;  %vm6555_vm2 = vmor %vm6553_vm1, %vm6554_vm0 }
 0x615   : > { %v6526_v58 = vsel %vm6525_vm11, %v12631_v4, %v6522_v12  ;;  %vm6528_vm7 = vcmp.eq.f32.partialorder %v6527_v28, 8.507059e+37  ;;  %v8904_v50 = vpop.eup %8903 }
 0x616   : > { %v7029_v31 = vsub.f32 %v7013_v27, %v12097_v30  ;;  %7103 = vmatmul.bf16.gmra.mxu1 %v7071_v51  ;;  %7152 = vmatmul.bf16.gmra.mxu2 %v7071_v51  ;;  %v6530_v27 = vor.u32 1.1754944e-38, %v6529_v5  ;;  %v2186_v51 = vadd.f32 %v13592_v54, %v11207_v8  ;;  %v6550_v1 = vsub.f32 1.0, %v6549_v34 }
 0x617   : > { %v6564_v0 = vmul.f32 %v8904_v50, %v12671_v45  ;;  %vm6569_vm4 = vweird.f32 %v8904_v50 }
 0x618   : > { %v7045_v15 = vmul.f32 %v7029_v31, %v6501_v61  ;;  %v6531_v32 = vsel %vm6528_vm7, %v6530_v27, %v6526_v58  ;;  %v6551_v20 = vmul.f32 %v12673_v9, %v6550_v1  ;;  %vm6570_vm6 = vmor %vm6568_vm5, %vm6569_vm4 }
 0x619   : > { %v6990_v26 = vpop.f32.mrf.mxu0  ;;  %v6565_v60 = vsub.f32 1.0, %v6564_v0  ;;  %v13596_v0 = vld [vmem:[#allocation9_spill] sm:$0xff] }
 0x61a   : > { %v6991_v37 = vadd.f32 %v6990_v26, %v2181_v46  ;;  %v12680_v57 = vadd.f32 %v7045_v15, %v12097_v30  ;;  %v6536_v30 = vmul.f32 %v12658_v24, %v6535_v42  ;;  %v6544_v46 = vand.u32 2147483648, %v12629_v18 }
 0x61b   : > { %v6552_v18 = vadd.f32 %v12673_v9, %v6551_v20 }
 0x61c   : > { %v7014_v21 = vmax.f32 %v6991_v37, 0.0  ;;  %v6537_v4 = vadd.f32 %v12658_v24, %v6536_v30  ;;  %v6545_v37 = vor.u32 1.1754944e-38, %v6544_v46 }
 0x61e   : > { %v7030_v53 = vsub.f32 %v7014_v21, %v12100_v62  ;;  %v6541_v16 = vsel %vm6540_vm14, %v12658_v24, %v6537_v4  ;;  %v6559_v24 = vand.u32 2147483648, %v12651_v55 }
 0x61f   : > { %v6546_v21 = vsel %vm6543_vm15, %v6545_v37, %v6541_v16  ;;  %v1144_v16 = vadd.f32 %v13596_v0, %v10905_v6 }
 0x620   : > { %v7046_v59 = vmul.f32 %v7030_v53, %v6516_v49  ;;  %v6557_v49 = vand.u32 2147483647, %v12651_v55  ;;  %v6560_v28 = vor.u32 1.1754944e-38, %v6559_v24 }
 0x621   : > { %v6993_v7 = vpop.f32.mrf.mxu0 }
 0x622   : > { %v12683_v41 = vadd.f32 %v7046_v59, %v12100_v62  ;;  %v6994_v13 = vadd.f32 %v6993_v7, %v2184_v33  ;;  %v6556_v59 = vsel %vm6555_vm2, %v12673_v9, %v6552_v18  ;;  %v6566_v7 = vmul.f32 %v8904_v50, %v6565_v60 }
 0x623   : > { %vm6558_vm3 = vcmp.eq.f32.partialorder %v6557_v49, 8.507059e+37  ;;  %v6574_v9 = vand.u32 2147483648, %v12671_v45 }
 0x624   : > { %v7015_v29 = vmax.f32 %v6994_v13, 0.0  ;;  %v7072_v2 = vpack.c.bf16 %v12683_v41, %v12680_v57  ;;  %v6567_v58 = vadd.f32 %v8904_v50, %v6566_v7 }
 0x625   : > { %v6575_v54 = vor.u32 1.1754944e-38, %v6574_v9 }
 0x626   : > { %v7031_v62 = vsub.f32 %v7015_v29, %v12129_v25  ;;  %7108 = vmatmul.bf16.gmra.mxu1 %v7072_v2  ;;  %7157 = vmatmul.bf16.gmra.mxu2 %v7072_v2  ;;  %v6572_v2 = vand.u32 2147483647, %v12671_v45  ;;  %v6571_v27 = vsel %vm6570_vm6, %v8904_v50, %v6567_v58  ;;  %v13595_v45 = vld [vmem:[#allocation7_spill] sm:$0xff] }
 0x627   : > { %v1142_v50 = vadd.f32 %v13595_v45, %v10905_v6 }
 0x628   : > { %v7047_v31 = vmul.f32 %v7031_v62, %v6531_v32  ;;  %vm6573_vm8 = vcmp.eq.f32.partialorder %v6572_v2, 8.507059e+37 }
 0x629   : > { %v6995_v61 = vpop.f32.mrf.mxu0  ;;  %v6576_v32 = vsel %vm6573_vm8, %v6575_v54, %v6571_v27  ;;  %v13599_v54 = vld [vmem:[#allocation15_spill] sm:$0xff] }
 0x62a   : > { %v6996_v15 = vadd.f32 %v6995_v61, %v2186_v51  ;;  %v12712_v35 = vadd.f32 %v7047_v31, %v12129_v25  ;;  %v6561_v25 = vsel %vm6558_vm3, %v6560_v28, %v6556_v59  ;;  %v13598_v59 = vld [vmem:[#allocation13_spill] sm:$0xff] }
 0x62c   : > { %v7016_v26 = vmax.f32 %v6996_v15, 0.0 }
 0x62e   : > { %v7032_v23 = vsub.f32 %v7016_v26, %v12132_v19 }
 0x630   : > { %v7048_v44 = vmul.f32 %v7032_v23, %v6546_v21  ;;  %v13597_v21 = vld [vmem:[#allocation11_spill] sm:$0xff] }
 0x631   : > { %v6998_v53 = vpop.f32.mrf.mxu0  ;;  %v1147_v60 = vadd.f32 %v13597_v21, %v10905_v6 }
 0x632   : > { %v12715_v33 = vadd.f32 %v7048_v44, %v12132_v19  ;;  %v6999_v42 = vadd.f32 %v6998_v53, %v2189_v17  ;;  %v13594_v19 = vld [vmem:[#allocation80_spill] sm:$0xff] }
 0x633   : > { %v2191_v34 = vadd.f32 %v13594_v19, %v11207_v8 }
 0x634   : > { %v7017_v12 = vmax.f32 %v6999_v42, 0.0  ;;  %v7073_v5 = vpack.c.bf16 %v12715_v33, %v12712_v35 }
 0x636   : > { %v7033_v13 = vsub.f32 %v7017_v12, %v12146_v56  ;;  %7113 = vmatmul.bf16.gmra.mxu1 %v7073_v5  ;;  %7162 = vmatmul.bf16.gmra.mxu2 %v7073_v5  ;;  %v1149_v12 = vadd.f32 %v13598_v59, %v10905_v6  ;;  %v13601_v59 = vld [vmem:[#allocation19_spill] sm:$0xff] }
 0x638   : > { %v7049_v55 = vmul.f32 %v7033_v13, %v6561_v25 }
 0x639   : > { %v7000_v29 = vpop.f32.mrf.mxu0 }
 0x63a   : > { %v7001_v30 = vadd.f32 %v7000_v29, %v2191_v34  ;;  %v12729_v31 = vadd.f32 %v7049_v55, %v12146_v56 }
 0x63c   : > { %v7018_v62 = vmax.f32 %v7001_v30, 0.0 }
 0x63e   : > { %v7034_v51 = vsub.f32 %v7018_v62, %v12149_v22 }
 0x640   : > { %v7050_v1 = vmul.f32 %v7034_v51, %v6576_v32  ;;  %v1152_v51 = vadd.f32 %v13599_v54, %v10905_v6 }
 0x642   : > { %v12732_v4 = vadd.f32 %v7050_v1, %v12149_v22 }
 0x644   : > { %v7074_v46 = vpack.c.bf16 %v12732_v4, %v12729_v31 }
 0x646   : > { %7118 = vmatmul.bf16.gmra.mxu1 %v7074_v46  ;;  %7167 = vmatmul.bf16.gmra.mxu2 %v7074_v46 }
 0x659   : > { %v7133_v61 = vpop.f32.mrf.mxu2 }
 0x65a   : > { %v7525_v38 = vadd.f32 %v7133_v61, %v1142_v50 }
 0x65c   : > { %v8427_v15 = vmul.f32 -1.442695, %v7525_v38 }
 0x65e   : > { %8905 = vpow2.f32 %v8427_v15 }
 0x661   : > { %v7135_v56 = vpop.f32.mrf.mxu2 }
 0x662   : > { %v7526_v26 = vadd.f32 %v7135_v56, %v1144_v16 }
 0x664   : > { %v8906_v20 = vpop.eup %8905  ;;  %v8428_v22 = vmul.f32 -1.442695, %v7526_v26 }
 0x665   : > { %v7589_v37 = vadd.f32 1.0, %v8906_v20 }
 0x666   : > { %8907 = vpow2.f32 %v8428_v22 }
 0x667   : > { %8909 = vrcp.f32 %v7589_v37  ;;  %v7614_v55 = vand.u32 2147483647, %v7589_v37  ;;  %v7616_v58 = vand.u32 2147483648, %v7589_v37  ;;  %vm7610_vm11 = vweird.f32 %v7589_v37 }
 0x669   : > { %v7138_v44 = vpop.f32.mrf.mxu2  ;;  %v7617_v32 = vor.u32 1.1754944e-38, %v7616_v58  ;;  %vm7615_vm13 = vcmp.eq.f32.partialorder %v7614_v55, 8.507059e+37 }
 0x66a   : > { %v7527_v24 = vadd.f32 %v7138_v44, %v1147_v60 }
 0x66c   : > { %v8908_v23 = vpop.eup %8907  ;;  %v8429_v53 = vmul.f32 -1.442695, %v7527_v24 }
 0x66d   : > { %v8910_v52 = vpop.eup %8909  ;;  %v7590_v17 = vadd.f32 1.0, %v8908_v23  ;;  %v13600_v23 = vld [vmem:[#allocation17_spill] sm:$0xff] }
 0x66e   : > { %v7606_v18 = vmul.f32 %v8910_v52, %v7589_v37  ;;  %vm7611_vm9 = vweird.f32 %v8910_v52 }
 0x66f   : > { %8911 = vrcp.f32 %v7590_v17  ;;  %v7631_v2 = vand.u32 2147483648, %v7590_v17  ;;  %v7629_v62 = vand.u32 2147483647, %v7590_v17  ;;  %vm7612_vm7 = vmor %vm7610_vm11, %vm7611_vm9  ;;  %vm7625_vm12 = vweird.f32 %v7590_v17 }
 0x670   : > { %v7607_v49 = vsub.f32 1.0, %v7606_v18  ;;  %8913 = vpow2.f32 %v8429_v53 }
 0x671   : > { %v7140_v7 = vpop.f32.mrf.mxu2  ;;  %v7632_v46 = vor.u32 1.1754944e-38, %v7631_v2  ;;  %vm7630_vm15 = vcmp.eq.f32.partialorder %v7629_v62, 8.507059e+37  ;;  %v13602_v62 = vld [vmem:[#allocation21_spill] sm:$0xff] }
 0x672   : > { %v7608_v28 = vmul.f32 %v8910_v52, %v7607_v49  ;;  %v7528_v13 = vadd.f32 %v7140_v7, %v1149_v12  ;;  %v1157_v12 = vadd.f32 %v13601_v59, %v10905_v6  ;;  %v1159_v54 = vadd.f32 %v13602_v62, %v10905_v6 }
 0x674   : > { %v8430_v19 = vmul.f32 -1.442695, %v7528_v13  ;;  %v7609_v29 = vadd.f32 %v8910_v52, %v7608_v28 }
 0x675   : > { %v8912_v42 = vpop.eup %8911 }
 0x676   : > { %v7621_v5 = vmul.f32 %v8912_v42, %v7590_v17  ;;  %v8914_v34 = vpop.eup %8913  ;;  %8915 = vpow2.f32 %v8430_v19  ;;  %vm7626_vm10 = vweird.f32 %v8912_v42  ;;  %v7613_v50 = vsel %vm7612_vm7, %v8910_v52, %v7609_v29 }
 0x677   : > { %v12744_v30 = vadd.f32 1.0, %v8914_v34  ;;  %vm7627_vm14 = vmor %vm7625_vm12, %vm7626_vm10  ;;  %v7618_v61 = vsel %vm7615_vm13, %v7617_v32, %v7613_v50  ;;  %v1154_v17 = vadd.f32 %v13600_v23, %v10905_v6 }
 0x678   : > { %v7622_v25 = vsub.f32 1.0, %v7621_v5  ;;  %v7845_v26 = vmul.f32 %v7618_v61, %v12436_v63 }
 0x679   : > { %8917 = vrcp.f32 %v12744_v30  ;;  %v7143_v1 = vpop.f32.mrf.mxu2  ;;  %vm7640_vm1 = vweird.f32 %v12744_v30  ;;  %v7644_v2 = vand.u32 2147483647, %v12744_v30 }
 0x67a   : > { %v7623_v9 = vmul.f32 %v8912_v42, %v7622_v25  ;;  %v7529_v45 = vadd.f32 %v7143_v1, %v1152_v51 }
 0x67b   : > { %vm7645_vm6 = vcmp.eq.f32.partialorder %v7644_v2, 8.507059e+37 }
 0x67c   : > { %v7624_v27 = vadd.f32 %v8912_v42, %v7623_v9  ;;  %v8916_v15 = vpop.eup %8915  ;;  %v8431_v0 = vmul.f32 -1.442695, %v7529_v45  ;;  %v7646_v9 = vand.u32 2147483648, %v12744_v30 }
 0x67d   : > { %v7592_v56 = vadd.f32 1.0, %v8916_v15 }
 0x67e   : > { %v7628_v38 = vsel %vm7627_vm14, %v8912_v42, %v7624_v27  ;;  %8919 = vpow2.f32 %v8431_v0 }
 0x67f   : > { %v7633_v16 = vsel %vm7630_vm15, %v7632_v46, %v7628_v38  ;;  %v8918_v22 = vpop.eup %8917  ;;  %8921 = vrcp.f32 %v7592_v56  ;;  %vm7655_vm3 = vweird.f32 %v7592_v56  ;;  %v7647_v46 = vor.u32 1.1754944e-38, %v7646_v9 }
 0x680   : > { %v7846_v20 = vmul.f32 %v7633_v16, %v12439_v39  ;;  %v7636_v52 = vmul.f32 %v8918_v22, %v12744_v30  ;;  %vm7641_vm0 = vweird.f32 %v8918_v22  ;;  %v7659_v45 = vand.u32 2147483647, %v7592_v56 }
 0x681   : > { %v7145_v21 = vpop.f32.mrf.mxu2  ;;  %vm7642_vm2 = vmor %vm7640_vm1, %vm7641_vm0  ;;  %v7661_v50 = vand.u32 2147483648, %v7592_v56 }
 0x682   : > { %v7861_v37 = vpack.c.bf16 %v7846_v20, %v7845_v26  ;;  %v7530_v60 = vadd.f32 %v7145_v21, %v1154_v17  ;;  %v7637_v49 = vsub.f32 1.0, %v7636_v52  ;;  %vm7660_vm8 = vcmp.eq.f32.partialorder %v7659_v45, 8.507059e+37  ;;  %v13603_v21 = vld [vmem:[#allocation23_spill] sm:$0xff] }
 0x683   : > { %v7662_v15 = vor.u32 1.1754944e-38, %v7661_v50  ;;  %v1162_v52 = vadd.f32 %v13603_v21, %v10905_v6 }
 0x684   : > { %7893 = vmatmul.bf16.vlgmr.msrb.gmra.mxu3 %v7861_v37  ;;  %v8920_v44 = vpop.eup %8919  ;;  %v8432_v18 = vmul.f32 -1.442695, %v7530_v60  ;;  %v7638_v13 = vmul.f32 %v8918_v22, %v7637_v49 }
 0x685   : > { %v8922_v24 = vpop.eup %8921  ;;  %v12754_v53 = vadd.f32 1.0, %v8920_v44 }
 0x686   : > { %v7651_v42 = vmul.f32 %v8922_v24, %v7592_v56  ;;  %8923 = vpow2.f32 %v8432_v18  ;;  %v7639_v55 = vadd.f32 %v8918_v22, %v7638_v13  ;;  %vm7656_vm4 = vweird.f32 %v8922_v24 }
 0x687   : > { %8925 = vrcp.f32 %v12754_v53  ;;  %vm7657_vm5 = vmor %vm7655_vm3, %vm7656_vm4  ;;  %vm7670_vm10 = vweird.f32 %v12754_v53 }
 0x688   : > { %v7652_v5 = vsub.f32 1.0, %v7651_v42  ;;  %v7643_v51 = vsel %vm7642_vm2, %v8918_v22, %v7639_v55 }
 0x689   : > { %v7148_v7 = vpop.f32.mrf.mxu2  ;;  %v7648_v38 = vsel %vm7645_vm6, %v7647_v46, %v7643_v51 }
 0x68a   : > { %v7531_v28 = vadd.f32 %v7148_v7, %v1157_v12  ;;  %v7653_v25 = vmul.f32 %v8922_v24, %v7652_v5  ;;  %v7847_v17 = vmul.f32 %v7648_v38, %v12492_v14 }
 0x68c   : > { %v8924_v19 = vpop.eup %8923  ;;  %v8433_v34 = vmul.f32 -1.442695, %v7531_v28  ;;  %v7654_v27 = vadd.f32 %v8922_v24, %v7653_v25  ;;  %v7676_v28 = vand.u32 2147483648, %v12754_v53  ;;  %v7674_v25 = vand.u32 2147483647, %v12754_v53 }
 0x68d   : > { %v12759_v58 = vadd.f32 1.0, %v8924_v19  ;;  %v12762_v29 = vpop.eup %8925 }
 0x68e   : > { %8927 = vpow2.f32 %v8433_v34  ;;  %v7666_v32 = vmul.f32 %v12762_v29, %v12754_v53  ;;  %v7658_v30 = vsel %vm7657_vm5, %v8922_v24, %v7654_v27  ;;  %vm7671_vm9 = vweird.f32 %v12762_v29  ;;  %v13604_v34 = vld [vmem:[#allocation25_spill] sm:$0xff] }
 0x68f   : > { %8929 = vrcp.f32 %v12759_v58  ;;  %v7663_v37 = vsel %vm7660_vm8, %v7662_v15, %v7658_v30  ;;  %vm7672_vm11 = vmor %vm7670_vm10, %vm7671_vm9  ;;  %v1164_v55 = vadd.f32 %v13604_v34, %v10905_v6  ;;  %vm7685_vm12 = vweird.f32 %v12759_v58 }
 0x690   : > { %v7667_v20 = vsub.f32 1.0, %v7666_v32  ;;  %v7848_v56 = vmul.f32 %v7663_v37, %v12495_v43  ;;  %v7689_v2 = vand.u32 2147483647, %v12759_v58  ;;  %v7691_v53 = vand.u32 2147483648, %v12759_v58 }
 0x691   : > { %v7150_v1 = vpop.f32.mrf.mxu2  ;;  %vm7675_vm14 = vcmp.eq.f32.partialorder %v7674_v25, 8.507059e+37 }
 0x692   : > { %v7532_v61 = vadd.f32 %v7150_v1, %v1159_v54  ;;  %v7862_v44 = vpack.c.bf16 %v7848_v56, %v7847_v17  ;;  %v7668_v49 = vmul.f32 %v12762_v29, %v7667_v20  ;;  %v7677_v54 = vor.u32 1.1754944e-38, %v7676_v28 }
 0x693   : > { %v7692_v46 = vor.u32 1.1754944e-38, %v7691_v53  ;;  %vm7690_vm15 = vcmp.eq.f32.partialorder %v7689_v2, 8.507059e+37 }
 0x694   : > { %v8928_v0 = vpop.eup %8927  ;;  %v8434_v16 = vmul.f32 -1.442695, %v7532_v61  ;;  %7898 = vmatmul.bf16.gmra.mxu3 %v7862_v44  ;;  %v7669_v5 = vadd.f32 %v12762_v29, %v7668_v49 }
 0x695   : > { %v8930_v26 = vpop.eup %8929  ;;  %v12771_v22 = vadd.f32 1.0, %v8928_v0 }
 0x696   : > { %v7681_v23 = vmul.f32 %v8930_v26, %v12759_v58  ;;  %8931 = vpow2.f32 %v8434_v16  ;;  %vm7686_vm7 = vweird.f32 %v8930_v26  ;;  %v7673_v9 = vsel %vm7672_vm11, %v12762_v29, %v7669_v5  ;;  %v13605_v16 = vld [vmem:[#allocation27_spill] sm:$0xff] }
 0x697   : > { %8933 = vrcp.f32 %v12771_v22  ;;  %vm7687_vm13 = vmor %vm7685_vm12, %vm7686_vm7  ;;  %v7678_v1 = vsel %vm7675_vm14, %v7677_v54, %v7673_v9  ;;  %vm7700_vm1 = vweird.f32 %v12771_v22 }
 0x698   : > { %v7682_v60 = vsub.f32 1.0, %v7681_v23  ;;  %v7849_v0 = vmul.f32 %v7678_v1, %v12540_v47 }
 0x699   : > { %v7153_v18 = vpop.f32.mrf.mxu2 }
 0x69a   : > { %v7533_v24 = vadd.f32 %v7153_v18, %v1162_v52  ;;  %v7683_v42 = vmul.f32 %v8930_v26, %v7682_v60 }
 0x69c   : > { %v8932_v59 = vpop.eup %8931  ;;  %v8435_v12 = vmul.f32 -1.442695, %v7533_v24  ;;  %v7684_v19 = vadd.f32 %v8930_v26, %v7683_v42  ;;  %v7706_v24 = vand.u32 2147483648, %v12771_v22  ;;  %v7704_v42 = vand.u32 2147483647, %v12771_v22 }
 0x69d   : > { %v12782_v7 = vadd.f32 1.0, %v8932_v59  ;;  %v12785_v13 = vpop.eup %8933 }
 0x69e   : > { %8935 = vpow2.f32 %v8435_v12  ;;  %v7696_v27 = vmul.f32 %v12785_v13, %v12771_v22  ;;  %v7688_v32 = vsel %vm7687_vm13, %v8930_v26, %v7684_v19  ;;  %v1167_v26 = vadd.f32 %v13605_v16, %v10905_v6  ;;  %v13606_v12 = vld [vmem:[#allocation29_spill] sm:$0xff] }
 0x69f   : > { %8937 = vrcp.f32 %v12782_v7  ;;  %v7693_v38 = vsel %vm7690_vm15, %v7692_v46, %v7688_v32  ;;  %vm7701_vm0 = vweird.f32 %v12785_v13  ;;  %v1169_v5 = vadd.f32 %v13606_v12, %v10905_v6 }
 0x6a0   : > { %v7697_v61 = vsub.f32 1.0, %v7696_v27  ;;  %v7850_v58 = vmul.f32 %v7693_v38, %v12543_v11  ;;  %vm7702_vm2 = vmor %vm7700_vm1, %vm7701_vm0  ;;  %vm7715_vm4 = vweird.f32 %v12782_v7  ;;  %v7719_v25 = vand.u32 2147483647, %v12782_v7 }
 0x6a1   : > { %v7155_v62 = vpop.f32.mrf.mxu2  ;;  %v7721_v22 = vand.u32 2147483648, %v12782_v7  ;;  %vm7705_vm6 = vcmp.eq.f32.partialorder %v7704_v42, 8.507059e+37  ;;  %v12850_v42 = vpop.f32.mrf.mxu1 }
 0x6a2   : > { %v7534_v51 = vadd.f32 %v7155_v62, %v1164_v55  ;;  %v7863_v37 = vpack.c.bf16 %v7850_v58, %v7849_v0  ;;  %v7698_v56 = vmul.f32 %v12785_v13, %v7697_v61  ;;  %v7707_v55 = vor.u32 1.1754944e-38, %v7706_v24 }
 0x6a3   : > { %v7722_v62 = vor.u32 1.1754944e-38, %v7721_v22  ;;  %vm7720_vm8 = vcmp.eq.f32.partialorder %v7719_v25, 8.507059e+37 }
 0x6a4   : > { %v8936_v45 = vpop.eup %8935  ;;  %v8436_v50 = vmul.f32 -1.442695, %v7534_v51  ;;  %7903 = vmatmul.bf16.gmra.mxu3 %v7863_v37  ;;  %v7699_v44 = vadd.f32 %v12785_v13, %v7698_v56 }
 0x6a5   : > { %v8938_v29 = vpop.eup %8937  ;;  %v12798_v30 = vadd.f32 1.0, %v8936_v45 }
 0x6a6   : > { %v7711_v15 = vmul.f32 %v8938_v29, %v12782_v7  ;;  %8939 = vpow2.f32 %v8436_v50  ;;  %vm7716_vm3 = vweird.f32 %v8938_v29  ;;  %v7703_v28 = vsel %vm7702_vm2, %v12785_v13, %v7699_v44  ;;  %v13607_v50 = vld [vmem:[#allocation30_spill] sm:$0xff]  ;;  %v13610_v44 = vld [vmem:[#allocation32_spill] sm:$0xff] }
 0x6a7   : > { %8941 = vrcp.f32 %v12798_v30  ;;  %vm7717_vm5 = vmor %vm7715_vm4, %vm7716_vm3  ;;  %v7708_v27 = vsel %vm7705_vm6, %v7707_v55, %v7703_v28  ;;  %vm7730_vm10 = vweird.f32 %v12798_v30  ;;  %v1174_v24 = vadd.f32 %v13610_v44, %v10905_v6  ;;  %v13612_v44 = vld [vmem:[#allocation36_spill] sm:$0xff] }
 0x6a8   : > { %v7712_v20 = vsub.f32 1.0, %v7711_v15  ;;  %v7851_v45 = vmul.f32 %v7708_v27, %v12592_v10 }
 0x6a9   : > { %v7158_v23 = vpop.f32.mrf.mxu2 }
 0x6aa   : > { %v7535_v17 = vadd.f32 %v7158_v23, %v1167_v26  ;;  %v7713_v21 = vmul.f32 %v8938_v29, %v7712_v20 }
 0x6ac   : > { %v8940_v52 = vpop.eup %8939  ;;  %v8437_v60 = vmul.f32 -1.442695, %v7535_v17  ;;  %v7714_v59 = vadd.f32 %v8938_v29, %v7713_v21  ;;  %v7736_v17 = vand.u32 2147483648, %v12798_v30  ;;  %v7734_v21 = vand.u32 2147483647, %v12798_v30 }
 0x6ad   : > { %v12809_v18 = vadd.f32 1.0, %v8940_v52  ;;  %v12812_v49 = vpop.eup %8941 }
 0x6ae   : > { %8943 = vpow2.f32 %v8437_v60  ;;  %v7726_v19 = vmul.f32 %v12812_v49, %v12798_v30  ;;  %v7718_v2 = vsel %vm7717_vm5, %v8938_v29, %v7714_v59  ;;  %v1172_v29 = vadd.f32 %v13607_v50, %v10905_v6 }
 0x6af   : > { %8945 = vrcp.f32 %v12809_v18  ;;  %v7723_v1 = vsel %vm7720_vm8, %v7722_v62, %v7718_v2  ;;  %vm7731_vm9 = vweird.f32 %v12812_v49  ;;  %vm7745_vm12 = vweird.f32 %v12809_v18 }
 0x6b0   : > { %v7727_v51 = vsub.f32 1.0, %v7726_v19  ;;  %v7852_v7 = vmul.f32 %v7723_v1, %v12595_v40  ;;  %vm12844_vm11 = vmor %vm7730_vm10, %vm7731_vm9  ;;  %v7749_v30 = vand.u32 2147483647, %v12809_v18  ;;  %v7737_v28 = vor.u32 1.1754944e-38, %v7736_v17 }
 0x6b1   : > { %v7160_v34 = vpop.f32.mrf.mxu2  ;;  %v7751_v25 = vand.u32 2147483648, %v12809_v18  ;;  %vm7735_vm14 = vcmp.eq.f32.partialorder %v7734_v21, 8.507059e+37 }
 0x6b2   : > { %v7536_v9 = vadd.f32 %v7160_v34, %v1169_v5  ;;  %v7864_v38 = vpack.c.bf16 %v7852_v7, %v7851_v45  ;;  %v7728_v58 = vmul.f32 %v12812_v49, %v7727_v51  ;;  %vm7750_vm15 = vcmp.eq.f32.partialorder %v7749_v30, 8.507059e+37 }
 0x6b3   : > { %v7752_v22 = vor.u32 1.1754944e-38, %v7751_v25 }
 0x6b4   : > { %v8944_v54 = vpop.eup %8943  ;;  %v8438_v53 = vmul.f32 -1.442695, %v7536_v9  ;;  %7908 = vmatmul.bf16.gmra.mxu3 %v7864_v38  ;;  %v7729_v37 = vadd.f32 %v12812_v49, %v7728_v58 }
 0x6b5   : > { %v8946_v13 = vpop.eup %8945  ;;  %v12825_v32 = vadd.f32 1.0, %v8944_v54 }
 0x6b6   : > { %v7741_v46 = vmul.f32 %v8946_v13, %v12809_v18  ;;  %8947 = vpow2.f32 %v8438_v53  ;;  %vm7746_vm7 = vweird.f32 %v8946_v13  ;;  %v7733_v59 = vsel %vm12844_vm11, %v12812_v49, %v7729_v37 }
 0x6b7   : > { %8949 = vrcp.f32 %v12825_v32  ;;  %vm7747_vm13 = vmor %vm7745_vm12, %vm7746_vm7  ;;  %v7738_v55 = vsel %vm7735_vm14, %v7737_v28, %v7733_v59  ;;  %vm7760_vm1 = vweird.f32 %v12825_v32  ;;  %v7764_v37 = vand.u32 2147483647, %v12825_v32 }
 0x6b8   : > { %v7742_v61 = vsub.f32 1.0, %v7741_v46  ;;  %v7853_v51 = vmul.f32 %v7738_v55, %v12638_v3 }
 0x6b9   : > { %v7163_v15 = vpop.f32.mrf.mxu2  ;;  %vm7765_vm6 = vcmp.eq.f32.partialorder %v7764_v37, 8.507059e+37 }
 0x6ba   : > { %v7537_v0 = vadd.f32 %v7163_v15, %v1172_v29  ;;  %v7743_v16 = vmul.f32 %v8946_v13, %v7742_v61  ;;  %v12869_v29 = vpop.f32.mrf.mxu1 }
 0x6bc   : > { %v8948_v26 = vpop.eup %8947  ;;  %v8439_v20 = vmul.f32 -1.442695, %v7537_v0  ;;  %v7744_v52 = vadd.f32 %v8946_v13, %v7743_v16  ;;  %v7766_v16 = vand.u32 2147483648, %v12825_v32 }
 0x6bd   : > { %v12836_v23 = vadd.f32 1.0, %v8948_v26  ;;  %v12839_v56 = vpop.eup %8949 }
 0x6be   : > { %8951 = vpow2.f32 %v8439_v20  ;;  %v7756_v12 = vmul.f32 %v12839_v56, %v12825_v32  ;;  %v7748_v34 = vsel %vm7747_vm13, %v8946_v13, %v7744_v52  ;;  %v13611_v13 = vld [vmem:[#allocation34_spill] sm:$0xff]  ;;  %vm7761_vm0 = vweird.f32 %v12839_v56 }
 0x6bf   : > { %8953 = vrcp.f32 %v12836_v23  ;;  %v7753_v54 = vsel %vm7750_vm15, %v7752_v22, %v7748_v34  ;;  %v1177_v1 = vadd.f32 %v13611_v13, %v10905_v6  ;;  %vm7762_vm3 = vmor %vm7760_vm1, %vm7761_vm0  ;;  %vm7775_vm4 = vweird.f32 %v12836_v23 }
 0x6c0   : > { %v7757_v27 = vsub.f32 1.0, %v7756_v12  ;;  %v7854_v18 = vmul.f32 %v7753_v54, %v12641_v36  ;;  %v7779_v60 = vand.u32 2147483647, %v12836_v23  ;;  %v7767_v59 = vor.u32 1.1754944e-38, %v7766_v16 }
 0x6c1   : > { %v7165_v5 = vpop.f32.mrf.mxu2  ;;  %v7781_v32 = vand.u32 2147483648, %v12836_v23 }
 0x6c2   : > { %v7538_v19 = vadd.f32 %v7165_v5, %v1174_v24  ;;  %v7865_v45 = vpack.c.bf16 %v7854_v18, %v7853_v51  ;;  %v7758_v50 = vmul.f32 %v12839_v56, %v7757_v27  ;;  %v1179_v24 = vadd.f32 %v13612_v44, %v10905_v6  ;;  %v12889_v34 = vpop.f32.mrf.mxu1  ;;  %v13613_v27 = vld [vmem:[#allocation6_spill] sm:$0xff]  ;;  %v13616_v44 = vld [vmem:[#allocation8_spill] sm:$0xff] }
 0x6c3   : > { %vm7780_vm8 = vcmp.eq.f32.partialorder %v7779_v60, 8.507059e+37 }
 0x6c4   : > { %v8952_v9 = vpop.eup %8951  ;;  %v8440_v2 = vmul.f32 -1.442695, %v7538_v19  ;;  %7913 = vmatmul.bf16.gmra.mxu3 %v7865_v45  ;;  %v7759_v38 = vadd.f32 %v12839_v56, %v7758_v50  ;;  %v7782_v19 = vor.u32 1.1754944e-38, %v7781_v32 }
 0x6c5   : > { %v8954_v49 = vpop.eup %8953  ;;  %v12860_v62 = vadd.f32 1.0, %v8952_v9 }
 0x6c6   : > { %v7771_v53 = vmul.f32 %v8954_v49, %v12836_v23  ;;  %8955 = vpow2.f32 %v8440_v2  ;;  %vm7776_vm2 = vweird.f32 %v8954_v49  ;;  %v7763_v52 = vsel %vm7762_vm3, %v12839_v56, %v7759_v38 }
 0x6c7   : > { %8957 = vrcp.f32 %v12860_v62  ;;  %vm7777_vm5 = vmor %vm7775_vm4, %vm7776_vm2  ;;  %v7768_v25 = vsel %vm7765_vm6, %v7767_v59, %v7763_v52  ;;  %vm7790_vm11 = vweird.f32 %v12860_v62  ;;  %v7796_v50 = vand.u32 2147483648, %v12860_v62 }
 0x6c8   : > { %v7772_v46 = vsub.f32 1.0, %v7771_v53  ;;  %v7855_v6 = vmul.f32 %v7768_v25, %v12680_v57 }
 0x6c9   : > { %v7168_v7 = vpop.f32.mrf.mxu2 }
 0x6ca   : > { %v7539_v61 = vadd.f32 %v7168_v7, %v1177_v1  ;;  %v7773_v15 = vmul.f32 %v8954_v49, %v7772_v46 }
 0x6cc   : > { %v8956_v0 = vpop.eup %8955  ;;  %v8441_v58 = vmul.f32 -1.442695, %v7539_v61  ;;  %v7774_v17 = vadd.f32 %v8954_v49, %v7773_v15  ;;  %v7794_v15 = vand.u32 2147483647, %v12860_v62 }
 0x6cd   : > { %v12875_v26 = vpop.eup %8957  ;;  %v12877_v20 = vadd.f32 1.0, %v8956_v0 }
 0x6ce   : > { %v7786_v21 = vmul.f32 %v12875_v26, %v12860_v62  ;;  %8959 = vpow2.f32 %v8441_v58  ;;  %v7778_v12 = vsel %vm7777_vm5, %v8954_v49, %v7774_v17  ;;  %v1093_v49 = vadd.f32 %v13613_v27, %v11153_v48  ;;  %v12913_v17 = vpop.f32.mrf.mxu1 }
 0x6cf   : > { %8961 = vrcp.f32 %v12877_v20  ;;  %v7783_v22 = vsel %vm7780_vm8, %v7782_v19, %v7778_v12  ;;  %vm7791_vm9 = vweird.f32 %v12875_v26  ;;  %v7811_v1 = vand.u32 2147483648, %v12877_v20 }
 0x6d0   : > { %v7787_v5 = vsub.f32 1.0, %v7786_v21  ;;  %v7856_v23 = vmul.f32 %v7783_v22, %v12683_v41  ;;  %v7189_v18 = vadd.f32 %v12850_v42, %v1093_v49  ;;  %v7809_v7 = vand.u32 2147483647, %v12877_v20  ;;  %vm12907_vm7 = vmor %vm7790_vm11, %vm7791_vm9 }
 0x6d1   : > { %v7170_v30 = vpop.f32.mrf.mxu2  ;;  %vm7805_vm12 = vweird.f32 %v12877_v20  ;;  %v7812_v37 = vor.u32 1.1754944e-38, %v7811_v1  ;;  %v1095_v62 = vadd.f32 %v13616_v44, %v11153_v48  ;;  %vm7795_vm15 = vcmp.eq.f32.partialorder %v7794_v15, 8.507059e+37  ;;  %v13620_v44 = vld [vmem:[#allocation12_spill] sm:$0xff] }
 0x6d2   : > { %v7540_v28 = vadd.f32 %v7170_v30, %v1179_v24  ;;  %v7788_v53 = vmul.f32 %v12875_v26, %v7787_v5  ;;  %v7866_v51 = vpack.c.bf16 %v7856_v23, %v7855_v6  ;;  %v8411_v38 = vmul.f32 -1.442695, %v7189_v18 }
 0x6d3   : > { %vm7810_vm14 = vcmp.eq.f32.partialorder %v7809_v7, 8.507059e+37  ;;  %v7797_v24 = vor.u32 1.1754944e-38, %v7796_v50  ;;  %v7190_v59 = vadd.f32 %v12869_v29, %v1095_v62  ;;  %v1100_v62 = vadd.f32 %v13620_v44, %v11153_v48 }
 0x6d4   : > { %v8960_v56 = vpop.eup %8959  ;;  %v8442_v55 = vmul.f32 -1.442695, %v7540_v28  ;;  %7918 = vmatmul.bf16.gmra.mxu3 %v7866_v51  ;;  %v7789_v46 = vadd.f32 %v12875_v26, %v7788_v53 }
 0x6d5   : > { %v8962_v9 = vpop.eup %8961  ;;  %v12891_v2 = vadd.f32 1.0, %v8960_v56 }
 0x6d6   : > { %v7801_v54 = vmul.f32 %v8962_v9, %v12877_v20  ;;  %8963 = vpow2.f32 %v8442_v55  ;;  %vm7806_vm10 = vweird.f32 %v8962_v9  ;;  %v7793_v52 = vsel %vm12907_vm7, %v12875_v26, %v7789_v46  ;;  %v7094_v22 = vpop.f32.mrf.mxu1 }
 0x6d7   : > { %8965 = vrcp.f32 %v12891_v2  ;;  %vm7807_vm13 = vmor %vm7805_vm12, %vm7806_vm10  ;;  %v7798_v32 = vsel %vm7795_vm15, %v7797_v24, %v7793_v52  ;;  %v8412_v26 = vmul.f32 -1.442695, %v7190_v59  ;;  %vm7820_vm2 = vweird.f32 %v12891_v2 }
 0x6d8   : > { %v7802_v13 = vsub.f32 1.0, %v7801_v54  ;;  %v7857_v5 = vmul.f32 %v7798_v32, %v12712_v35  ;;  %v7826_v54 = vand.u32 2147483648, %v12891_v2  ;;  %v7824_v51 = vand.u32 2147483647, %v12891_v2 }
 0x6d9   : > { %v7192_v24 = vadd.f32 %v12913_v17, %v1100_v62  ;;  %v13631_v62 = vld [vmem:[#allocation43_spill] sm:$0xff] }
 0x6da   : > { %v7803_v45 = vmul.f32 %v8962_v9, %v7802_v13  ;;  %v7827_v7 = vor.u32 1.1754944e-38, %v7826_v54  ;;  %vm7825_vm8 = vcmp.eq.f32.partialorder %v7824_v51, 8.507059e+37 }
 0x6db   : > { %v8414_v32 = vmul.f32 -1.442695, %v7192_v24 }
 0x6dc   : > { %v8964_v61 = vpop.eup %8963  ;;  %v7804_v0 = vadd.f32 %v8962_v9, %v7803_v45 }
 0x6dd   : > { %v8966_v58 = vpop.eup %8965  ;;  %v7604_v16 = vadd.f32 1.0, %v8964_v61  ;;  %v13619_v61 = vld [vmem:[#allocation10_spill] sm:$0xff] }
 0x6de   : > { %v7816_v21 = vmul.f32 %v8966_v58, %v12891_v2  ;;  %v7808_v60 = vsel %vm7807_vm13, %v8962_v9, %v7804_v0  ;;  %vm7821_vm0 = vweird.f32 %v8966_v58  ;;  %v7096_v0 = vpop.f32.mrf.mxu1 }
 0x6df   : > { %8967 = vrcp.f32 %v7604_v16  ;;  %v7813_v20 = vsel %vm7810_vm14, %v7812_v37, %v7808_v60  ;;  %v7841_v23 = vand.u32 2147483648, %v7604_v16  ;;  %v7839_v49 = vand.u32 2147483647, %v7604_v16  ;;  %vm12928_vm3 = vmor %vm7820_vm2, %vm7821_vm0 }
 0x6e0   : > { %8969 = vpow2.f32 %v8411_v38  ;;  %v7817_v30 = vsub.f32 1.0, %v7816_v21  ;;  %v7858_v12 = vmul.f32 %v7813_v20, %v12715_v33  ;;  %vm7835_vm4 = vweird.f32 %v7604_v16 }
 0x6e1   : > { %8971 = vpow2.f32 %v8412_v26  ;;  %v7842_v13 = vor.u32 1.1754944e-38, %v7841_v23  ;;  %vm7840_vm6 = vcmp.eq.f32.partialorder %v7839_v49, 8.507059e+37  ;;  %v1098_v38 = vadd.f32 %v13619_v61, %v11153_v48 }
 0x6e2   : > { %v7867_v56 = vpack.c.bf16 %v7858_v12, %v7857_v5  ;;  %v7818_v55 = vmul.f32 %v8966_v58, %v7817_v30 }
 0x6e3   : > { %v7191_v15 = vadd.f32 %v12889_v34, %v1098_v38 }
 0x6e4   : > { %7923 = vmatmul.bf16.gmra.mxu3 %v7867_v56  ;;  %v7819_v29 = vadd.f32 %v8966_v58, %v7818_v55 }
 0x6e5   : > { %v8968_v28 = vpop.eup %8967  ;;  %v8413_v21 = vmul.f32 -1.442695, %v7191_v15 }
 0x6e6   : > { %v8970_v25 = vpop.eup %8969  ;;  %v7831_v19 = vmul.f32 %v8968_v28, %v7604_v16  ;;  %vm7836_vm1 = vweird.f32 %v8968_v28  ;;  %v7823_v1 = vsel %vm12928_vm3, %v8966_v58, %v7819_v29  ;;  %v7099_v59 = vpop.f32.mrf.mxu1 }
 0x6e7   : > { %v12924_v6 = vadd.f32 1.0, %v8970_v25  ;;  %vm7837_vm5 = vmor %vm7835_vm4, %vm7836_vm1  ;;  %v8972_v45 = vpop.eup %8971  ;;  %v7828_v42 = vsel %vm7825_vm8, %v7827_v7, %v7823_v1  ;;  %v13622_v25 = vld [vmem:[#allocation35_spill] sm:$0xff]  ;;  %v13623_v1 = vld [vmem:[#allocation16_spill] sm:$0xff] }
 0x6e8   : > { %v7832_v9 = vsub.f32 1.0, %v7831_v19  ;;  %v12938_v2 = vadd.f32 1.0, %v8972_v45  ;;  %v7859_v58 = vmul.f32 %v7828_v42, %v12729_v31  ;;  %v1191_v19 = vadd.f32 %v13622_v25, %v11207_v8  ;;  %v13624_v7 = vld [vmem:[#allocation37_spill] sm:$0xff] }
 0x6e9   : > { %8973 = vrcp.f32 %v12924_v6  ;;  %v7280_v23 = vand.u32 2147483648, %v12924_v6  ;;  %vm7274_vm10 = vweird.f32 %v12924_v6 }
 0x6ea   : > { %v7833_v27 = vmul.f32 %v8968_v28, %v7832_v9  ;;  %8975 = vrcp.f32 %v12938_v2  ;;  %vm7289_vm13 = vweird.f32 %v12938_v2 }
 0x6eb   : > { %8977 = vpow2.f32 %v8413_v21  ;;  %v7281_v45 = vor.u32 1.1754944e-38, %v7280_v23 }
 0x6ec   : > { %v7834_v18 = vadd.f32 %v8968_v28, %v7833_v27  ;;  %8979 = vpow2.f32 %v8414_v32  ;;  %v7278_v27 = vand.u32 2147483647, %v12924_v6 }
 0x6ee   : > { %v7838_v46 = vsel %vm7837_vm5, %v8968_v28, %v7834_v18  ;;  %v13621_v28 = vld [vmem:[#allocation14_spill] sm:$0xff]  ;;  %v7101_v53 = vpop.f32.mrf.mxu1  ;;  %vm7279_vm7 = vcmp.eq.f32.partialorder %v7278_v27, 8.507059e+37  ;;  %v13628_v27 = vld [vmem:[#allocation20_spill] sm:$0xff] }
 0x6ef   : > { %v7843_v50 = vsel %vm7840_vm6, %v7842_v13, %v7838_v46  ;;  %v8974_v37 = vpop.eup %8973  ;;  %v1103_v26 = vadd.f32 %v13621_v28, %v11153_v48  ;;  %v1105_v46 = vadd.f32 %v13623_v1, %v11153_v48 }
 0x6f0   : > { %v7860_v16 = vmul.f32 %v7843_v50, %v12732_v4  ;;  %v7270_v60 = vmul.f32 %v8974_v37, %v12924_v6  ;;  %v12948_v20 = vpop.eup %8975  ;;  %vm7275_vm9 = vweird.f32 %v8974_v37  ;;  %v1193_v50 = vadd.f32 %v13624_v7, %v11207_v8 }
 0x6f1   : > { %v7285_v30 = vmul.f32 %v12948_v20, %v12938_v2  ;;  %v8978_v5 = vpop.eup %8977  ;;  %v7193_v17 = vadd.f32 %v7094_v22, %v1103_v26  ;;  %vm7276_vm11 = vmor %vm7274_vm10, %vm7275_vm9  ;;  %v7194_v61 = vadd.f32 %v7096_v0, %v1105_v46  ;;  %vm7290_vm12 = vweird.f32 %v12948_v20 }
 0x6f2   : > { %v7868_v52 = vpack.c.bf16 %v7860_v16, %v7859_v58  ;;  %v7271_v34 = vsub.f32 1.0, %v7270_v60  ;;  %v12956_v55 = vadd.f32 1.0, %v8978_v5  ;;  %v8980_v13 = vpop.eup %8979  ;;  %v7293_v60 = vand.u32 2147483647, %v12938_v2  ;;  %vm12981_vm14 = vmor %vm7289_vm13, %vm7290_vm12 }
 0x6f3   : > { %v7286_v56 = vsub.f32 1.0, %v7285_v30  ;;  %v8415_v54 = vmul.f32 -1.442695, %v7193_v17  ;;  %v12971_v42 = vadd.f32 1.0, %v8980_v13  ;;  %v8416_v44 = vmul.f32 -1.442695, %v7194_v61 }
 0x6f4   : > { %7928 = vmatmul.bf16.gmra.mxu3 %v7868_v52  ;;  %v7272_v12 = vmul.f32 %v8974_v37, %v7271_v34  ;;  %8981 = vrcp.f32 %v12956_v55  ;;  %vm7294_vm15 = vcmp.eq.f32.partialorder %v7293_v60, 8.507059e+37  ;;  %vm7304_vm1 = vweird.f32 %v12956_v55 }
 0x6f5   : > { %v7287_v18 = vmul.f32 %v12948_v20, %v7286_v56  ;;  %8983 = vpow2.f32 %v8415_v54  ;;  %vm7319_vm5 = vweird.f32 %v12971_v42 }
 0x6f6   : > { %v7273_v9 = vadd.f32 %v8974_v37, %v7272_v12  ;;  %8985 = vrcp.f32 %v12971_v42  ;;  %v7104_v12 = vpop.f32.mrf.mxu1 }
 0x6f7   : > { %v7288_v16 = vadd.f32 %v12948_v20, %v7287_v18  ;;  %8987 = vpow2.f32 %v8416_v44 }
 0x6f8   : > { %v7277_v22 = vsel %vm7276_vm11, %v8974_v37, %v7273_v9  ;;  %v7295_v37 = vand.u32 2147483648, %v12938_v2  ;;  %v13627_v2 = vld [vmem:[#allocation18_spill] sm:$0xff] }
 0x6f9   : > { %v7282_v38 = vsel %vm7279_vm7, %v7281_v45, %v7277_v22  ;;  %v1108_v32 = vadd.f32 %v13627_v2, %v11153_v48 }
 0x6fa   : > { %v12976_v21 = vpop.eup %8981  ;;  %v7296_v5 = vor.u32 1.1754944e-38, %v7295_v37 }
 0x6fb   : > { %v8984_v34 = vpop.eup %8983  ;;  %v7300_v30 = vmul.f32 %v12976_v21, %v12956_v55  ;;  %v7195_v26 = vadd.f32 %v7099_v59, %v1108_v32  ;;  %vm7305_vm0 = vweird.f32 %v12976_v21 }
 0x6fc   : > { %v12999_v56 = vpop.eup %8985  ;;  %vm7306_vm2 = vmor %vm7304_vm1, %vm7305_vm0 }
 0x6fd   : > { %v7301_v17 = vsub.f32 1.0, %v7300_v30  ;;  %v8417_v23 = vmul.f32 -1.442695, %v7195_v26  ;;  %v7315_v59 = vmul.f32 %v12999_v56, %v12971_v42  ;;  %vm7320_vm4 = vweird.f32 %v12999_v56 }
 0x6fe   : > { %vm7321_vm6 = vmor %vm7319_vm5, %vm7320_vm4 }
 0x6ff   : > { %v7302_v54 = vmul.f32 %v12976_v21, %v7301_v17  ;;  %v7316_v1 = vsub.f32 1.0, %v7315_v59 }
 0x701   : > { %v7303_v46 = vadd.f32 %v12976_v21, %v7302_v54  ;;  %v7317_v60 = vmul.f32 %v12999_v56, %v7316_v1 }
 0x707   : > { %v7894_v29 = vpop.f32.mrf.mxu3 }
 0x708   : > { %v7895_v49 = vadd.f32 %v7894_v29, %v1191_v19  ;;  %v12997_v19 = vadd.f32 1.0, %v8984_v34  ;;  %v8988_v29 = vpop.eup %8987 }
 0x709   : > { %v13009_v18 = vadd.f32 1.0, %v8988_v29 }
 0x70a   : > { %v7934_v51 = vmax.f32 %v7895_v49, 0.0  ;;  %8989 = vrcp.f32 %v12997_v19  ;;  %v1110_v49 = vadd.f32 %v13628_v27, %v11153_v48  ;;  %vm7334_vm10 = vweird.f32 %v12997_v19 }
 0x70b   : > { %8991 = vpow2.f32 %v8417_v23  ;;  %vm7349_vm13 = vweird.f32 %v13009_v18 }
 0x70c   : > { %v7950_v6 = vsub.f32 %v7934_v51, %v12436_v63  ;;  %v7196_v22 = vadd.f32 %v7101_v53, %v1110_v49  ;;  %v7106_v51 = vpop.f32.mrf.mxu1  ;;  %v7308_v53 = vand.u32 2147483647, %v12956_v55  ;;  %8993 = vrcp.f32 %v13009_v18 }
 0x70e   : > { %v7966_v15 = vmul.f32 %v7950_v6, %v7282_v38  ;;  %v7310_v6 = vand.u32 2147483648, %v12956_v55  ;;  %v13630_v38 = vld [vmem:[#allocation22_spill] sm:$0xff]  ;;  %vm7309_vm3 = vcmp.eq.f32.partialorder %v7308_v53, 8.507059e+37  ;;  %v7340_v53 = vand.u32 2147483648, %v12997_v19 }
 0x70f   : > { %v7896_v58 = vpop.f32.mrf.mxu3 }
 0x710   : > { %v7982_v52 = vadd.f32 %v7966_v15, %v12436_v63  ;;  %v7897_v0 = vadd.f32 %v7896_v58, %v1193_v50  ;;  %v7292_v63 = vsel %vm12981_vm14, %v12948_v20, %v7288_v16  ;;  %v13015_v45 = vpop.eup %8989  ;;  %v8418_v50 = vmul.f32 -1.442695, %v7196_v22 }
 0x711   : > { %v7297_v25 = vsel %vm7294_vm15, %v7296_v5, %v7292_v63  ;;  %v1113_v15 = vadd.f32 %v13630_v38, %v11153_v48  ;;  %v8992_v16 = vpop.eup %8991  ;;  %v7330_v37 = vmul.f32 %v13015_v45, %v12997_v19  ;;  %v7307_v58 = vsel %vm7306_vm2, %v12976_v21, %v7303_v46 }
 0x712   : > { %7998 = vst [vmem:[%s12986_s10] sm:$0xff] %v7982_v52  ;;  %v7935_v24 = vmax.f32 %v7897_v0, 0.0  ;;  %v7311_v44 = vor.u32 1.1754944e-38, %v7310_v6  ;;  %8995 = vpow2.f32 %v8418_v50  ;;  %v1198_v63 = vadd.f32 %v13631_v62, %v11207_v8 }
 0x713   : > { %v7197_v0 = vadd.f32 %v7104_v12, %v1113_v15  ;;  %v7331_v2 = vsub.f32 1.0, %v7330_v37  ;;  %v7318_v21 = vadd.f32 %v12999_v56, %v7317_v60  ;;  %v13034_v12 = vpop.eup %8993  ;;  %vm7335_vm9 = vweird.f32 %v13015_v45 }
 0x714   : > { %v7951_v28 = vsub.f32 %v7935_v24, %v12439_v39  ;;  %v13030_v24 = vadd.f32 1.0, %v8992_v16  ;;  %v7312_v34 = vsel %vm7309_vm3, %v7311_v44, %v7307_v58  ;;  %v7109_v32 = vpop.f32.mrf.mxu1  ;;  %v7345_v27 = vmul.f32 %v13034_v12, %v13009_v18  ;;  %v13634_v58 = vld [vmem:[#allocation26_spill] sm:$0xff]  ;;  %vm7336_vm11 = vmor %vm7334_vm10, %vm7335_vm9 }
 0x715   : > { %v8419_v5 = vmul.f32 -1.442695, %v7197_v0  ;;  %v7322_v49 = vsel %vm7321_vm6, %v12999_v56, %v7318_v21  ;;  %v7338_v16 = vand.u32 2147483647, %v12997_v19  ;;  %vm7350_vm12 = vweird.f32 %v13034_v12 }
 0x716   : > { %v7967_v20 = vmul.f32 %v7951_v28, %v7297_v25  ;;  %v7325_v28 = vand.u32 2147483648, %v12971_v42  ;;  %8997 = vrcp.f32 %v13030_v24  ;;  %v7346_v6 = vsub.f32 1.0, %v7345_v27  ;;  %vm13085_vm14 = vmor %vm7349_vm13, %vm7350_vm12 }
 0x717   : > { %v7899_v7 = vpop.f32.mrf.mxu3  ;;  %8999 = vpow2.f32 %v8419_v5  ;;  %vm7339_vm7 = vcmp.eq.f32.partialorder %v7338_v16, 8.507059e+37  ;;  %vm7364_vm1 = vweird.f32 %v13030_v24 }
 0x718   : > { %v7983_v9 = vadd.f32 %v7967_v20, %v12439_v39  ;;  %v13629_v39 = vld [vmem:[#allocation40_spill] sm:$0xff]  ;;  %v7323_v20 = vand.u32 2147483647, %v12971_v42  ;;  %v8996_v29 = vpop.eup %8995  ;;  %v7326_v22 = vor.u32 1.1754944e-38, %v7325_v28 }
 0x719   : > { %v1196_v13 = vadd.f32 %v13629_v39, %v11207_v8  ;;  %v13633_v39 = vld [vmem:[#allocation45_spill] sm:$0xff]  ;;  %v13051_v1 = vadd.f32 1.0, %v8996_v29  ;;  %v13636_v29 = vld [vmem:[#allocation28_spill] sm:$0xff] }
 0x71a   : > { %7999 = vst [vmem:[%s12986_s10 + $0x8] sm:$0xff] %v7983_v9  ;;  %v13632_v9 = vld [vmem:[#allocation24_spill] sm:$0xff]  ;;  %vm7324_vm8 = vcmp.eq.f32.partialorder %v7323_v20, 8.507059e+37  ;;  %v1120_v27 = vadd.f32 %v13636_v29, %v11153_v48 }
 0x71b   : > { %v7900_v61 = vadd.f32 %v7899_v7, %v1196_v13  ;;  %v1115_v23 = vadd.f32 %v13632_v9, %v11153_v48  ;;  %v1201_v13 = vadd.f32 %v13633_v39, %v11207_v8  ;;  %v7327_v46 = vsel %vm7324_vm8, %v7326_v22, %v7322_v49 }
 0x71c   : > { %v13055_v56 = vpop.eup %8997  ;;  %v7111_v38 = vpop.f32.mrf.mxu1  ;;  %9001 = vrcp.f32 %v13051_v1  ;;  %v7353_v9 = vand.u32 2147483647, %v13009_v18  ;;  %vm7379_vm5 = vweird.f32 %v13051_v1 }
 0x71d   : > { %v7936_v52 = vmax.f32 %v7900_v61, 0.0  ;;  %v7198_v54 = vadd.f32 %v7106_v51, %v1115_v23  ;;  %v9000_v60 = vpop.eup %8999  ;;  %v7360_v0 = vmul.f32 %v13055_v56, %v13030_v24  ;;  %vm7365_vm0 = vweird.f32 %v13055_v56 }
 0x71e   : > { %vm7354_vm15 = vcmp.eq.f32.partialorder %v7353_v9, 8.507059e+37  ;;  %vm13112_vm2 = vmor %vm7364_vm1, %vm7365_vm0  ;;  %v7385_v9 = vand.u32 2147483648, %v13051_v1 }
 0x71f   : > { %v7952_v55 = vsub.f32 %v7936_v52, %v12492_v14  ;;  %v7901_v26 = vpop.f32.mrf.mxu3  ;;  %v8420_v51 = vmul.f32 -1.442695, %v7198_v54  ;;  %v1118_v52 = vadd.f32 %v13634_v58, %v11153_v48  ;;  %v7361_v5 = vsub.f32 1.0, %v7360_v0 }
 0x720   : > { %v7902_v17 = vadd.f32 %v7901_v26, %v1198_v63  ;;  %v7341_v63 = vor.u32 1.1754944e-38, %v7340_v53  ;;  %v7368_v58 = vand.u32 2147483647, %v13030_v24 }
 0x721   : > { %v7968_v30 = vmul.f32 %v7952_v55, %v7312_v34  ;;  %v7199_v62 = vadd.f32 %v7109_v32, %v1118_v52  ;;  %9003 = vpow2.f32 %v8420_v51  ;;  %v13635_v34 = vld [vmem:[#allocation48_spill] sm:$0xff]  ;;  %v7362_v22 = vmul.f32 %v13055_v56, %v7361_v5 }
 0x722   : > { %v7937_v59 = vmax.f32 %v7902_v17, 0.0  ;;  %vm7369_vm3 = vcmp.eq.f32.partialorder %v7368_v58, 8.507059e+37 }
 0x723   : > { %v7984_v25 = vadd.f32 %v7968_v30, %v12492_v14  ;;  %v7332_v14 = vmul.f32 %v13015_v45, %v7331_v2  ;;  %v1203_v2 = vadd.f32 %v13635_v34, %v11207_v8  ;;  %v13072_v30 = vadd.f32 1.0, %v9000_v60  ;;  %v13640_v60 = vld [vmem:[#allocation31_spill] sm:$0xff] }
 0x724   : > { %v7953_v42 = vsub.f32 %v7937_v59, %v12495_v43  ;;  %v8421_v32 = vmul.f32 -1.442695, %v7199_v62  ;;  %v7114_v54 = vpop.f32.mrf.mxu1  ;;  %v1123_v0 = vadd.f32 %v13640_v60, %v11153_v48 }
 0x725   : > { %8000 = vst [vmem:[%s12986_s10 + $0x10] sm:$0xff] %v7984_v25  ;;  %v7333_v50 = vadd.f32 %v13015_v45, %v7332_v14  ;;  %v7355_v25 = vand.u32 2147483648, %v13009_v18  ;;  %9005 = vrcp.f32 %v13072_v30  ;;  %vm7394_vm10 = vweird.f32 %v13072_v30 }
 0x726   : > { %v7969_v7 = vmul.f32 %v7953_v42, %v7327_v46  ;;  %v7200_v42 = vadd.f32 %v7111_v38, %v1120_v27  ;;  %9007 = vpow2.f32 %v8421_v32  ;;  %v13639_v46 = vld [vmem:[#allocation51_spill] sm:$0xff]  ;;  %v7383_v27 = vand.u32 2147483647, %v13051_v1 }
 0x727   : > { %v7904_v61 = vpop.f32.mrf.mxu3  ;;  %v7337_v44 = vsel %vm7336_vm11, %v13015_v45, %v7333_v50  ;;  %v13076_v45 = vpop.eup %9001  ;;  %v7356_v39 = vor.u32 1.1754944e-38, %v7355_v25 }
 0x728   : > { %v7985_v15 = vadd.f32 %v7969_v7, %v12495_v43  ;;  %v7905_v37 = vadd.f32 %v7904_v61, %v1201_v13  ;;  %v7347_v43 = vmul.f32 %v13034_v12, %v7346_v6  ;;  %v7342_v21 = vsel %vm7339_vm7, %v7341_v63, %v7337_v44  ;;  %v9004_v59 = vpop.eup %9003 }
 0x729   : > { %v7375_v14 = vmul.f32 %v13076_v45, %v13051_v1  ;;  %v1206_v6 = vadd.f32 %v13639_v46, %v11207_v8  ;;  %v13099_v7 = vadd.f32 1.0, %v9004_v59  ;;  %v8422_v38 = vmul.f32 -1.442695, %v7200_v42  ;;  %v13644_v59 = vld [vmem:[#allocation33_spill] sm:$0xff] }
 0x72a   : > { %8001 = vst [vmem:[%s12986_s10 + $0x18] sm:$0xff] %v7985_v15  ;;  %v7938_v55 = vmax.f32 %v7905_v37, 0.0  ;;  %v7348_v26 = vadd.f32 %v13034_v12, %v7347_v43  ;;  %v7370_v15 = vand.u32 2147483648, %v13030_v24  ;;  %v7201_v63 = vadd.f32 %v7114_v54, %v1123_v0  ;;  %v13646_v0 = vld [vmem:[#allocation39_spill] sm:$0xff] }
 0x72b   : > { %v7376_v51 = vsub.f32 1.0, %v7375_v14  ;;  %v13103_v61 = vpop.eup %9005  ;;  %9009 = vrcp.f32 %v13099_v7  ;;  %vm7380_vm4 = vweird.f32 %v13076_v45  ;;  %v1125_v14 = vadd.f32 %v13644_v59, %v11153_v48 }
 0x72c   : > { %v7954_v19 = vsub.f32 %v7938_v55, %v12540_v47  ;;  %v9008_v55 = vpop.eup %9007  ;;  %v7390_v43 = vmul.f32 %v13103_v61, %v13072_v30  ;;  %9011 = vpow2.f32 %v8422_v38  ;;  %v7116_v34 = vpop.f32.mrf.mxu1  ;;  %vm7381_vm6 = vmor %vm7379_vm5, %vm7380_vm4  ;;  %vm7384_vm8 = vcmp.eq.f32.partialorder %v7383_v27, 8.507059e+37 }
 0x72d   : > { %v7377_v62 = vmul.f32 %v13076_v45, %v7376_v51  ;;  %v7202_v42 = vadd.f32 %v7116_v34, %v1125_v14  ;;  %vm7395_vm9 = vweird.f32 %v13103_v61  ;;  %v1128_v44 = vadd.f32 %v13646_v0, %v11153_v48 }
 0x72e   : > { %v7970_v28 = vmul.f32 %v7954_v19, %v7342_v21  ;;  %v7371_v19 = vor.u32 1.1754944e-38, %v7370_v15  ;;  %v13643_v21 = vld [vmem:[#allocation53_spill] sm:$0xff]  ;;  %v7391_v32 = vsub.f32 1.0, %v7390_v43  ;;  %vm7396_vm11 = vmor %vm7394_vm10, %vm7395_vm9  ;;  %vm7409_vm13 = vweird.f32 %v13099_v7 }
 0x72f   : > { %v7906_v20 = vpop.f32.mrf.mxu3  ;;  %v1208_v5 = vadd.f32 %v13643_v21, %v11207_v8  ;;  %v8424_v15 = vmul.f32 -1.442695, %v7202_v42 }
 0x730   : > { %v7986_v17 = vadd.f32 %v7970_v28, %v12540_v47  ;;  %v7907_v23 = vadd.f32 %v7906_v20, %v1203_v2  ;;  %v7352_v47 = vsel %vm13085_vm14, %v13034_v12, %v7348_v26  ;;  %v7363_v12 = vadd.f32 %v13055_v56, %v7362_v22 }
 0x731   : > { %v7357_v50 = vsel %vm7354_vm15, %v7356_v39, %v7352_v47  ;;  %v13126_v28 = vadd.f32 1.0, %v9008_v55  ;;  %v13130_v20 = vpop.eup %9009  ;;  %v7386_v39 = vor.u32 1.1754944e-38, %v7385_v9 }
 0x732   : > { %8002 = vst [vmem:[%s12986_s10 + $0x20] sm:$0xff] %v7986_v17  ;;  %v7939_v18 = vmax.f32 %v7907_v23, 0.0  ;;  %v8423_v17 = vmul.f32 -1.442695, %v7201_v63  ;;  %v9012_v54 = vpop.eup %9011  ;;  %v7405_v47 = vmul.f32 %v13130_v20, %v13099_v7  ;;  %vm7410_vm12 = vweird.f32 %v13130_v20 }
 0x733   : > { %9013 = vrcp.f32 %v13126_v28  ;;  %vm7411_vm14 = vmor %vm7409_vm13, %vm7410_vm12  ;;  %vm7424_vm1 = vweird.f32 %v13126_v28 }
 0x734   : > { %v7955_v13 = vsub.f32 %v7939_v18, %v12543_v11  ;;  %9015 = vpow2.f32 %v8423_v17  ;;  %v7406_v51 = vsub.f32 1.0, %v7405_v47 }
 0x736   : > { %v7971_v53 = vmul.f32 %v7955_v13, %v7357_v50  ;;  %v13645_v13 = vld [vmem:[#allocation55_spill] sm:$0xff] }
 0x737   : > { %v7909_v16 = vpop.f32.mrf.mxu3  ;;  %v1211_v46 = vadd.f32 %v13645_v13, %v11207_v8 }
 0x738   : > { %v7987_v37 = vadd.f32 %v7971_v53, %v12543_v11  ;;  %v7910_v52 = vadd.f32 %v7909_v16, %v1206_v6  ;;  %v7367_v11 = vsel %vm13112_vm2, %v13055_v56, %v7363_v12  ;;  %v7378_v56 = vadd.f32 %v13076_v45, %v7377_v62  ;;  %v7119_v53 = vpop.f32.mrf.mxu1 }
 0x739   : > { %v7372_v26 = vsel %vm7369_vm3, %v7371_v19, %v7367_v11  ;;  %v13147_v6 = vadd.f32 1.0, %v9012_v54  ;;  %v13151_v38 = vpop.eup %9013  ;;  %v7400_v16 = vand.u32 2147483648, %v13072_v30  ;;  %v7203_v62 = vadd.f32 %v7119_v53, %v1128_v44  ;;  %v13647_v19 = vld [vmem:[#allocation58_spill] sm:$0xff] }
 0x73a   : > { %8003 = vst [vmem:[%s12986_s10 + $0x28] sm:$0xff] %v7987_v37  ;;  %v7940_v24 = vmax.f32 %v7910_v52, 0.0  ;;  %v7382_v18 = vsel %vm7381_vm6, %v13076_v45, %v7378_v56  ;;  %v7398_v52 = vand.u32 2147483647, %v13072_v30  ;;  %v9016_v55 = vpop.eup %9015  ;;  %v7420_v43 = vmul.f32 %v13151_v38, %v13126_v28 }
 0x73b   : > { %v7387_v50 = vsel %vm7384_vm8, %v7386_v39, %v7382_v18  ;;  %9017 = vrcp.f32 %v13147_v6  ;;  %v7401_v63 = vor.u32 1.1754944e-38, %v7400_v16  ;;  %v1213_v34 = vadd.f32 %v13647_v19, %v11207_v8 }
 0x73c   : > { %v7956_v2 = vsub.f32 %v7940_v24, %v12592_v10  ;;  %9019 = vpow2.f32 %v8424_v15  ;;  %vm7399_vm7 = vcmp.eq.f32.partialorder %v7398_v52, 8.507059e+37  ;;  %v7415_v56 = vand.u32 2147483648, %v13099_v7 }
 0x73d   : > { %vm7425_vm0 = vweird.f32 %v13151_v38  ;;  %v7430_v53 = vand.u32 2147483648, %v13126_v28  ;;  %v7428_v15 = vand.u32 2147483647, %v13126_v28  ;;  %v13650_v28 = vld [vmem:[#allocation63_spill] sm:$0xff]  ;;  %vm7439_vm5 = vweird.f32 %v13147_v6 }
 0x73e   : > { %v7972_v25 = vmul.f32 %v7956_v2, %v7372_v26  ;;  %v13168_v2 = vadd.f32 1.0, %v9016_v55  ;;  %vm7426_vm2 = vmor %vm7424_vm1, %vm7425_vm0  ;;  %v1218_v55 = vadd.f32 %v13650_v28, %v11207_v8 }
 0x73f   : > { %v7911_v23 = vpop.f32.mrf.mxu3  ;;  %v7431_v44 = vor.u32 1.1754944e-38, %v7430_v53  ;;  %vm7429_vm3 = vcmp.eq.f32.partialorder %v7428_v15, 8.507059e+37 }
 0x740   : > { %v7988_v29 = vadd.f32 %v7972_v25, %v12592_v10  ;;  %v7912_v49 = vadd.f32 %v7911_v23, %v1208_v5  ;;  %v7392_v10 = vmul.f32 %v13103_v61, %v7391_v32  ;;  %v7421_v5 = vsub.f32 1.0, %v7420_v43  ;;  %v7121_v9 = vpop.f32.mrf.mxu1 }
 0x741   : > { %v8425_v25 = vmul.f32 -1.442695, %v7203_v62  ;;  %9021 = vrcp.f32 %v13168_v2  ;;  %vm7454_vm10 = vweird.f32 %v13168_v2 }
 0x742   : > { %8004 = vst [vmem:[%s12986_s10 + $0x30] sm:$0xff] %v7988_v29  ;;  %v7941_v22 = vmax.f32 %v7912_v49, 0.0  ;;  %v7393_v45 = vadd.f32 %v13103_v61, %v7392_v10  ;;  %v7413_v29 = vand.u32 2147483647, %v13099_v7  ;;  %v13648_v49 = vld [vmem:[#allocation42_spill] sm:$0xff]  ;;  %v7416_v10 = vor.u32 1.1754944e-38, %v7415_v56 }
 0x743   : > { %v1130_v59 = vadd.f32 %v13648_v49, %v11153_v48  ;;  %9023 = vpow2.f32 %v8425_v25  ;;  %v13649_v48 = vld [vmem:[#allocation61_spill] sm:$0xff] }
 0x744   : > { %v7957_v1 = vsub.f32 %v7941_v22, %v12595_v40  ;;  %v7397_v11 = vsel %vm7396_vm11, %v13103_v61, %v7393_v45  ;;  %v13172_v61 = vpop.eup %9017  ;;  %vm7414_vm15 = vcmp.eq.f32.partialorder %v7413_v29, 8.507059e+37  ;;  %v1216_v42 = vadd.f32 %v13649_v48, %v11207_v8 }
 0x745   : > { %v7402_v21 = vsel %vm7399_vm7, %v7401_v63, %v7397_v11  ;;  %v9020_v14 = vpop.eup %9019  ;;  %v7435_v54 = vmul.f32 %v13172_v61, %v13147_v6  ;;  %v7204_v22 = vadd.f32 %v7121_v9, %v1130_v59  ;;  %vm7440_vm4 = vweird.f32 %v13172_v61 }
 0x746   : > { %v7973_v12 = vmul.f32 %v7957_v1, %v7387_v50  ;;  %v13189_v39 = vadd.f32 1.0, %v9020_v14  ;;  %v7445_v63 = vand.u32 2147483648, %v13147_v6  ;;  %vm7441_vm6 = vmor %vm7439_vm5, %vm7440_vm4  ;;  %v7460_v14 = vand.u32 2147483648, %v13168_v2 }
 0x747   : > { %v7914_v37 = vpop.f32.mrf.mxu3  ;;  %v7436_v13 = vsub.f32 1.0, %v7435_v54  ;;  %v13193_v50 = vpop.eup %9021 }
 0x748   : > { %v7989_v58 = vadd.f32 %v7973_v12, %v12595_v40  ;;  %v7915_v60 = vadd.f32 %v7914_v37, %v1211_v46  ;;  %v7407_v40 = vmul.f32 %v13130_v20, %v7406_v51  ;;  %v8426_v51 = vmul.f32 -1.442695, %v7204_v22 }
 0x749   : > { %9025 = vrcp.f32 %v13189_v39  ;;  %v9024_v37 = vpop.eup %9023  ;;  %v7437_v0 = vmul.f32 %v13172_v61, %v7436_v13  ;;  %vm7455_vm9 = vweird.f32 %v13193_v50  ;;  %vm7469_vm13 = vweird.f32 %v13189_v39 }
 0x74a   : > { %8005 = vst [vmem:[%s12986_s10 + $0x38] sm:$0xff] %v7989_v58  ;;  %v7942_v24 = vmax.f32 %v7915_v60, 0.0  ;;  %v7408_v32 = vadd.f32 %v13130_v20, %v7407_v40  ;;  %v7450_v58 = vmul.f32 %v13193_v50, %v13168_v2  ;;  %9027 = vpow2.f32 %v8426_v51  ;;  %vm7456_vm11 = vmor %vm7454_vm10, %vm7455_vm9 }
 0x74b   : > { %v13208_v43 = vadd.f32 1.0, %v9024_v37  ;;  %v7438_v62 = vadd.f32 %v13172_v61, %v7437_v0  ;;  %v7473_v15 = vand.u32 2147483647, %v13189_v39 }
 0x74c   : > { %v7958_v30 = vsub.f32 %v7942_v24, %v12638_v3  ;;  %v7412_v47 = vsel %vm7411_vm14, %v13130_v20, %v7408_v32  ;;  %v7451_v24 = vsub.f32 1.0, %v7450_v58 }
 0x74d   : > { %v7417_v1 = vsel %vm7414_vm15, %v7416_v10, %v7412_v47  ;;  %9029 = vrcp.f32 %v13208_v43  ;;  %v7442_v32 = vsel %vm7441_vm6, %v13172_v61, %v7438_v62  ;;  %vm7474_vm15 = vcmp.eq.f32.partialorder %v7473_v15, 8.507059e+37 }
 0x74e   : > { %v7974_v26 = vmul.f32 %v7958_v30, %v7402_v21  ;;  %v7452_v56 = vmul.f32 %v13193_v50, %v7451_v24  ;;  %v7490_v24 = vand.u32 2147483648, %v13208_v43  ;;  %vm7484_vm1 = vweird.f32 %v13208_v43 }
 0x74f   : > { %v7916_v17 = vpop.f32.mrf.mxu3 }
 0x750   : > { %v7990_v23 = vadd.f32 %v7974_v26, %v12638_v3  ;;  %v7917_v27 = vadd.f32 %v7916_v17, %v1213_v34  ;;  %v7422_v3 = vmul.f32 %v13151_v38, %v7421_v5  ;;  %v7443_v34 = vand.u32 2147483647, %v13147_v6  ;;  %v13651_v6 = vld [vmem:[#allocation66_spill] sm:$0xff] }
 0x751   : > { %v7446_v17 = vor.u32 1.1754944e-38, %v7445_v63  ;;  %v1221_v9 = vadd.f32 %v13651_v6, %v11207_v8  ;;  %v7453_v59 = vadd.f32 %v13193_v50, %v7452_v56 }
 0x752   : > { %8006 = vst [vmem:[%s12986_s10 + $0x40] sm:$0xff] %v7990_v23  ;;  %v7943_v18 = vmax.f32 %v7917_v27, 0.0  ;;  %v7423_v20 = vadd.f32 %v13151_v38, %v7422_v3  ;;  %vm7444_vm8 = vcmp.eq.f32.partialorder %v7443_v34, 8.507059e+37 }
 0x753   : > { %v7447_v29 = vsel %vm7444_vm8, %v7446_v17, %v7442_v32  ;;  %v7457_v10 = vsel %vm7456_vm11, %v13193_v50, %v7453_v59  ;;  %v7475_v50 = vand.u32 2147483648, %v13189_v39  ;;  %v13654_v32 = vld [vmem:[#allocation74_spill] sm:$0xff] }
 0x754   : > { %v7959_v7 = vsub.f32 %v7943_v18, %v12641_v36  ;;  %v7427_v52 = vsel %vm7426_vm2, %v13151_v38, %v7423_v20  ;;  %v13212_v38 = vpop.eup %9025  ;;  %v7458_v18 = vand.u32 2147483647, %v13168_v2 }
 0x755   : > { %v7432_v11 = vsel %vm7429_vm3, %v7431_v44, %v7427_v52  ;;  %v9028_v5 = vpop.eup %9027  ;;  %v7465_v26 = vmul.f32 %v13212_v38, %v13189_v39  ;;  %vm7470_vm12 = vweird.f32 %v13212_v38  ;;  %v7476_v0 = vor.u32 1.1754944e-38, %v7475_v50 }
 0x756   : > { %v7975_v46 = vmul.f32 %v7959_v7, %v7417_v1  ;;  %v13227_v23 = vadd.f32 1.0, %v9028_v5  ;;  %v9030_v61 = vpop.eup %9029  ;;  %vm7459_vm7 = vcmp.eq.f32.partialorder %v7458_v18, 8.507059e+37  ;;  %v13652_v1 = vld [vmem:[#allocation69_spill] sm:$0xff]  ;;  %vm7471_vm14 = vmor %vm7469_vm13, %vm7470_vm12 }
 0x757   : > { %v7919_v12 = vpop.f32.mrf.mxu3  ;;  %v7466_v27 = vsub.f32 1.0, %v7465_v26  ;;  %v7480_v22 = vmul.f32 %v9030_v61, %v13208_v43  ;;  %v1223_v2 = vadd.f32 %v13652_v1, %v11207_v8  ;;  %vm7485_vm0 = vweird.f32 %v9030_v61 }
 0x758   : > { %v7991_v45 = vadd.f32 %v7975_v46, %v12641_v36  ;;  %v7920_v16 = vadd.f32 %v7919_v12, %v1216_v42  ;;  %9031 = vrcp.f32 %v13227_v23  ;;  %v7461_v42 = vor.u32 1.1754944e-38, %v7460_v14  ;;  %vm7486_vm2 = vmor %vm7484_vm1, %vm7485_vm0 }
 0x759   : > { %v7467_v48 = vmul.f32 %v13212_v38, %v7466_v27  ;;  %v7481_v46 = vsub.f32 1.0, %v7480_v22  ;;  %vm7499_vm5 = vweird.f32 %v13227_v23  ;;  %v7503_v6 = vand.u32 2147483647, %v13227_v23 }
 0x75a   : > { %8007 = vst [vmem:[%s12986_s10 + $0x48] sm:$0xff] %v7991_v45  ;;  %v7944_v60 = vmax.f32 %v7920_v16, 0.0  ;;  %v7462_v13 = vsel %vm7459_vm7, %v7461_v42, %v7457_v10 }
 0x75b   : > { %v7468_v51 = vadd.f32 %v13212_v38, %v7467_v48  ;;  %vm7504_vm8 = vcmp.eq.f32.partialorder %v7503_v6, 8.507059e+37 }
 0x75c   : > { %v7960_v36 = vsub.f32 %v7944_v60, %v12680_v57  ;;  %v7482_v60 = vmul.f32 %v9030_v61, %v7481_v46 }
 0x75d   : > { %v7472_v58 = vsel %vm7471_vm14, %v13212_v38, %v7468_v51  ;;  %v7488_v38 = vand.u32 2147483647, %v13208_v43  ;;  %v7505_v43 = vand.u32 2147483648, %v13227_v23 }
 0x75e   : > { %v7976_v40 = vmul.f32 %v7960_v36, %v7432_v11  ;;  %v9032_v53 = vpop.eup %9031  ;;  %v7477_v28 = vsel %vm7474_vm15, %v7476_v0, %v7472_v58  ;;  %v7483_v11 = vadd.f32 %v9030_v61, %v7482_v60 }
 0x75f   : > { %v7921_v30 = vpop.f32.mrf.mxu3  ;;  %v7495_v37 = vmul.f32 %v9032_v53, %v13227_v23  ;;  %vm7489_vm3 = vcmp.eq.f32.partialorder %v7488_v38, 8.507059e+37  ;;  %vm7500_vm4 = vweird.f32 %v9032_v53  ;;  %v7506_v27 = vor.u32 1.1754944e-38, %v7505_v43 }
 0x760   : > { %v7992_v19 = vadd.f32 %v7976_v40, %v12680_v57  ;;  %v7922_v21 = vadd.f32 %v7921_v30, %v1218_v55  ;;  %v7487_v30 = vsel %vm7486_vm2, %v9030_v61, %v7483_v11  ;;  %vm7501_vm6 = vmor %vm7499_vm5, %vm7500_vm4 }
 0x761   : > { %v7496_v55 = vsub.f32 1.0, %v7495_v37 }
 0x762   : > { %8008 = vst [vmem:[%s12986_s10 + $0x50] sm:$0xff] %v7992_v19  ;;  %v7945_v25 = vmax.f32 %v7922_v21, 0.0  ;;  %v7491_v21 = vor.u32 1.1754944e-38, %v7490_v24 }
 0x763   : > { %v7497_v34 = vmul.f32 %v9032_v53, %v7496_v55 }
 0x764   : > { %v7961_v57 = vsub.f32 %v7945_v25, %v12683_v41  ;;  %v7492_v26 = vsel %vm7489_vm3, %v7491_v21, %v7487_v30 }
 0x765   : > { %v7498_v56 = vadd.f32 %v9032_v53, %v7497_v34 }
 0x766   : > { %v7977_v49 = vmul.f32 %v7961_v57, %v7447_v29 }
 0x767   : > { %v7924_v54 = vpop.f32.mrf.mxu3 }
 0x768   : > { %v7993_v47 = vadd.f32 %v7977_v49, %v12683_v41  ;;  %v7925_v3 = vadd.f32 %v7924_v54, %v1221_v9 }
 0x76a   : > { %8009 = vst [vmem:[%s12986_s10 + $0x58] sm:$0xff] %v7993_v47  ;;  %v7946_v7 = vmax.f32 %v7925_v3, 0.0 }
 0x76c   : > { %v7962_v41 = vsub.f32 %v7946_v7, %v12712_v35 }
 0x76e   : > { %v7978_v20 = vmul.f32 %v7962_v41, %v7462_v13 }
 0x76f   : > { %v7926_v12 = vpop.f32.mrf.mxu3 }
 0x770   : > { %v7994_v45 = vadd.f32 %v7978_v20, %v12712_v35  ;;  %v7927_v16 = vadd.f32 %v7926_v12, %v1223_v2  ;;  %v13653_v35 = vld [vmem:[#allocation71_spill] sm:$0xff] }
 0x771   : > { %v1226_v36 = vadd.f32 %v13653_v35, %v11207_v8 }
 0x772   : > { %8010 = vst [vmem:[%s12986_s10 + $0x60] sm:$0xff] %v7994_v45  ;;  %v7947_v52 = vmax.f32 %v7927_v16, 0.0 }
 0x774   : > { %v7963_v44 = vsub.f32 %v7947_v52, %v12715_v33 }
 0x776   : > { %v7979_v39 = vmul.f32 %v7963_v44, %v7477_v28 }
 0x777   : > { %v7929_v40 = vpop.f32.mrf.mxu3 }
 0x778   : > { %v7995_v62 = vadd.f32 %v7979_v39, %v12715_v33  ;;  %v7930_v63 = vadd.f32 %v7929_v40, %v1226_v36  ;;  %v1228_v33 = vadd.f32 %v13654_v32, %v11207_v8  ;;  %v7502_v8 = vsel %vm7501_vm6, %v9032_v53, %v7498_v56 }
 0x779   : > { %v7507_v49 = vsel %vm7504_vm8, %v7506_v27, %v7502_v8 }
 0x77a   : > { %8011 = vst [vmem:[%s12986_s10 + $0x68] sm:$0xff] %v7995_v62  ;;  %v7948_v19 = vmax.f32 %v7930_v63, 0.0 }
 0x77c   : > { %v7964_v5 = vsub.f32 %v7948_v19, %v12729_v31 }
 0x77e   : > { %v7980_v25 = vmul.f32 %v7964_v5, %v7492_v26 }
 0x77f   : > { %v7931_v17 = vpop.f32.mrf.mxu3 }
 0x780   : > { %v7996_v57 = vadd.f32 %v7980_v25, %v12729_v31  ;;  %v7932_v9 = vadd.f32 %v7931_v17, %v1228_v33 }
 0x782   : > { %8012 = vst [vmem:[%s12986_s10 + $0x70] sm:$0xff] %v7996_v57  ;;  %v7949_v29 = vmax.f32 %v7932_v9, 0.0 }
 0x784   : > { %v7965_v31 = vsub.f32 %v7949_v29, %v12732_v4 }
 0x786   : > { %v7981_v23 = vmul.f32 %v7965_v31, %v7507_v49 }
 0x788   : > { %v7997_v59 = vadd.f32 %v7981_v23, %v12732_v4 }
 0x78a   : > { %8013 = vst [vmem:[%s12986_s10 + $0x78] sm:$0xff] %v7997_v59 }
 0x78b   : > { %9069 = shalt.err (!%p9066_p3)
}
 0x78c   : > { %s9107_s8 = smov 128   ;;  %s9108_s22 = smov 8  }
 0x78d   : > { %8479 = dma.vmem_to_hbm [thread:$0]  (%p9174_p5), %s8028_s15, 2048, %s8030_s16, %s8015_s13, %s9107_s8, %s9107_s8, %s9108_s22  }
 0x78e PF: > { %p8485_p4 = scmp.ge.s32.totalorder %s9104_s21, 2  ;;  %s8044_s9 = sand.u32 1, %s9092_s18  }
 0x78f   : > { %s8045_s10 = scalar_lea.sflag [#allocation4], %s8044_s9 }
 0x790   : > { %p8482_p7 = pnand %p8485_p4, %p9178_p6 }
 0x792   : > { %p8483_p8 = pneg %p8482_p7 }
 0x794   : > { %9087 = dma.done.wait (%p8483_p8), %s8045_s10, 2048  }
 0x795   : > { %9089 = vsyncadd (%p8483_p8), %s8045_s10, 4294965248  ;;  %p15_p9 = scmp.ge.s32.totalorder %s9162_s24, 4   ;;  %s13655_s18 = smov %s9096_s19 }
 0x796   : > { %s13656_s19 = smov %s9100_s20  ;;  %s13657_s20 = smov %s9172_s27 }
 0x797   : > { %s13658_s21 = smov %s9162_s24  ;;  %17 = sbr.rel (!%p15_p9) target bundleno = 3 (0x3), region = 78 }
 0x79c   :  { %8051 = vsyncpa [#allocation4], 1 }
 0x79d   :  { %8053 = vsyncpa [#allocation4 + $0x1], 1 }

</bundles_post_ra>
